<compile_context>
chip_gen: v6e
topology: v6e:2x2x1
jax: 0.10.0
libtpu: 0.0.40
codegen_flags: <defaults>
</compile_context>

<pallas_src>
import functools
import numpy as np
import jax
import jax.numpy as jnp
from jax import lax
from jax.experimental import pallas as pl
from jax.experimental.pallas import tpu as pltpu


def _decoder_kernel(tmax_ref,
                    emb_ref, feat_ref, aimg_ref, len_ref,
                    w_ih_ref, w_hh_ref, b_lstm_ref,
                    w_hatt_ref, b_hatt_ref, w_comb_ref, b_comb_ref,
                    w_lin_h_ref, w_lin_c_ref, b_out_ref,
                    out_ref, alpha_ref,
                    h_ref, c_ref,
                    *, hidden_size, num_locs):
    H = hidden_size
    Lp = feat_ref.shape[1]
    b = pl.program_id(0)
    t = pl.program_id(1)

    # Reset the recurrent state at the start of every batch tile.
    @pl.when(t == 0)
    def _():
        h_ref[...] = jnp.zeros_like(h_ref)
        c_ref[...] = jnp.zeros_like(c_ref)

    tmax = tmax_ref[b]   # longest caption in this batch tile (SMEM scalar)

    @pl.when(t < tmax)
    def _():
        h_prev = h_ref[...]                                # (Bt, H) f32
        c_prev = c_ref[...]
        x_t = emb_ref[0]                                   # (Bt, E) bf16

        # ---- LSTMCell: two accumulating bf16 matmuls, f32 accumulation ----
        gates = (jnp.dot(x_t, w_ih_ref[...], preferred_element_type=jnp.float32)
                 + jnp.dot(h_prev.astype(w_hh_ref.dtype), w_hh_ref[...],
                           preferred_element_type=jnp.float32)
                 + b_lstm_ref[...])
        i_g = jax.nn.sigmoid(gates[:, 0:H])
        f_g = jax.nn.sigmoid(gates[:, H:2 * H])
        g_g = jnp.tanh(gates[:, 2 * H:3 * H])
        o_g = jax.nn.sigmoid(gates[:, 3 * H:4 * H])
        c_new = f_g * c_prev + i_g * g_g
        h_new = o_g * jnp.tanh(c_new)
        h_ref[...] = h_new
        c_ref[...] = c_new

        # ---- SpatialAttention (feat @ W_img + b_img precomputed outside) ----
        att_h = jnp.dot(h_new.astype(w_hatt_ref.dtype), w_hatt_ref[...],
                        preferred_element_type=jnp.float32) + b_hatt_ref[...]
        e = jnp.maximum(aimg_ref[...] + att_h[:, None, :], 0.0)   # f32 (Bt,Lp,H)
        logits = (jnp.sum(e * w_comb_ref[...].reshape(1, 1, H), axis=2)
                  + b_comb_ref[...])                               # (Bt, Lp)
        loc_ok = lax.broadcasted_iota(jnp.int32, (1, Lp), 1) < num_locs
        logits = jnp.where(loc_ok, logits, -1e30)
        m = jnp.max(logits, axis=1, keepdims=True)
        p = jnp.exp(logits - m)
        # NOTE: approx reciprocal => alphas sum to 1 only to ~1e-3 relative.
        alphas = p * pl.reciprocal(jnp.sum(p, axis=1, keepdims=True), approx=True)
        ctx = jnp.sum(feat_ref[...].astype(jnp.float32) * alphas[:, :, None],
                      axis=1)                                      # (Bt, C)

        # ---- vocab projection: two accumulating matmuls, no concatenate ----
        out_t = (jnp.dot(h_new.astype(w_lin_h_ref.dtype), w_lin_h_ref[...],
                         preferred_element_type=jnp.float32)
                 + jnp.dot(ctx.astype(w_lin_c_ref.dtype), w_lin_c_ref[...],
                           preferred_element_type=jnp.float32)
                 + b_out_ref[...])

        # shrinking-batch semantics: rows whose caption has ended emit zeros.
        live = len_ref[...] > t                            # (Bt, 1)
        out_ref[0] = jnp.where(live, out_t, 0.0)           # lane-dense (Bt, Vp)
        alpha_ref[0] = jnp.where(live, alphas, 0.0)        # lane-dense (Bt, Lp)

    # Steps past the tile's longest caption: skip all compute, emit zeros.
    @pl.when(t >= tmax)
    def _():
        out_ref[...] = jnp.zeros_like(out_ref)
        alpha_ref[...] = jnp.zeros_like(alpha_ref)


def _round_up(x, m):
    return ((x + m - 1) // m) * m


def _vmem_limit_bytes():
    cap = 128 * 1024 * 1024
    try:
        cap = int(pltpu.get_tpu_info().vmem_capacity_bytes)
    except Exception:
        pass
    # ~3/4 of physical VMEM: ~96 MiB on v5e/v6e (128 MiB), ~48 MiB on v7x (64 MiB).
    return int(min((cap * 3) // 4, 100 * 1024 * 1024))


def _pack_padded(outputs, lengths):
    """Glue: torch.nn.utils.rnn.pack_padded_sequence(..., batch_first=True)[0]."""
    B = outputs.shape[0]
    b_idx, t_idx = [], []
    for t in range(max(lengths)):
        for b in range(B):
            if lengths[b] > t:
                b_idx.append(b)
                t_idx.append(t)
    return outputs[jnp.asarray(b_idx), jnp.asarray(t_idx)]


def spatial_attention_decoder_forward(params, encoder_features, captions,
                                      lengths, external_features, images=None):
    V, E = params["embed"].shape
    H = params["w_hatt"].shape[0]
    C = params["w_img"].shape[0]

    # ---- glue: embedding lookup + prepend encoder features ----
    emb = params["embed"][captions]                                     # (B, Tcap, E)
    emb = jnp.concatenate([encoder_features[:, None, :], emb], axis=1)  # (B, S, E)
    B, S, _ = emb.shape
    T = S - 1
    feat = external_features.reshape(B, -1, C).astype(jnp.float32)      # (B, L, C)
    L = feat.shape[1]

    # ---- hoisted, time-invariant attention image projection (done once) ----
    att_img = (jnp.einsum("blc,ch->blh", feat, params["w_img"])
               + params["b_img"]).astype(jnp.float32)                   # (B, L, H)

    # ---- padding / tiling (sublane batch, lane-dense Lp/Vp) ----
    B_TILE = min(128, _round_up(B, 8))
    B_pad = _round_up(B, B_TILE)
    nb = B_pad // B_TILE
    Lp = _round_up(L, 128)
    Vp = _round_up(V, 128)

    bf16 = jnp.bfloat16
    emb_tm = jnp.transpose(emb[:, :T, :], (1, 0, 2))                    # (T, B, E)
    emb_tm = jnp.pad(emb_tm, ((0, 0), (0, B_pad - B), (0, 0))).astype(bf16)
    feat_p = jnp.pad(feat, ((0, B_pad - B), (0, Lp - L), (0, 0))).astype(bf16)
    aimg_p = jnp.pad(att_img, ((0, B_pad - B), (0, Lp - L), (0, 0))).astype(bf16)

    lens_np = np.zeros((B_pad,), np.int32)
    lens_np[:B] = np.asarray(lengths, dtype=np.int32)
    lens_p = jnp.asarray(lens_np).reshape(B_pad, 1)
    tile_max = jnp.asarray(lens_np.reshape(nb, B_TILE).max(axis=1).astype(np.int32))

    weights = (params["w_ih"].astype(bf16),                 # (E, 4H)
               params["w_hh"].astype(bf16),                 # (H, 4H)
               params["b_lstm"],                            # (1, 4H)  f32
               params["w_hatt"].astype(bf16),               # (H, H)
               params["b_hatt"],                            # (1, H)   f32
               params["w_comb"],                            # (1, H)   f32
               params["b_comb"],                            # (1, 1)   f32
               jnp.pad(params["w_lin_h"], ((0, 0), (0, Vp - V))).astype(bf16),
               jnp.pad(params["w_lin_c"], ((0, 0), (0, Vp - V))).astype(bf16),
               jnp.pad(params["b_lin"], ((0, 0), (0, Vp - V))))         # f32

    kernel = functools.partial(_decoder_kernel, hidden_size=H, num_locs=L)

    def build(single_buffer_consts):
        def const_spec(a):
            nd = a.ndim
            idx = lambda b, t, tm, _nd=nd: (0,) * _nd
            if single_buffer_consts:
                return pl.BlockSpec(a.shape, idx, pipeline_mode=pl.Buffered(1))
            return pl.BlockSpec(a.shape, idx)

        # emb index clamps to the tile's last live step so dead steps issue no
        # new embedding DMA (block index unchanged -> no refetch).
        emb_spec = pl.BlockSpec(
            (1, B_TILE, E),
            lambda b, t, tm: (jnp.minimum(t, jnp.maximum(tm[b] - 1, 0)), b, 0))

        in_specs = ([emb_spec,
                     pl.BlockSpec((B_TILE, Lp, C), lambda b, t, tm: (b, 0, 0)),
                     pl.BlockSpec((B_TILE, Lp, H), lambda b, t, tm: (b, 0, 0)),
                     pl.BlockSpec((B_TILE, 1), lambda b, t, tm: (b, 0))]
                    + [const_spec(w) for w in weights])
        out_specs = [pl.BlockSpec((1, B_TILE, Vp), lambda b, t, tm: (t, b, 0)),
                     pl.BlockSpec((1, B_TILE, Lp), lambda b, t, tm: (t, b, 0))]

        return pl.pallas_call(
            kernel,
            out_shape=(jax.ShapeDtypeStruct((T, B_pad, Vp), jnp.float32),
                       jax.ShapeDtypeStruct((T, B_pad, Lp), jnp.float32)),
            grid_spec=pltpu.PrefetchScalarGridSpec(
                num_scalar_prefetch=1,
                grid=(nb, T),
                in_specs=in_specs,
                out_specs=out_specs,
                scratch_shapes=[pltpu.VMEM((B_TILE, H), jnp.float32),   # h carry
                                pltpu.VMEM((B_TILE, H), jnp.float32)],  # c carry
            ),
            compiler_params=pltpu.CompilerParams(
                dimension_semantics=("parallel", "arbitrary"),
                vmem_limit_bytes=_vmem_limit_bytes()),
        )

    args = (tile_max, emb_tm, feat_p, aimg_p, lens_p) + weights
    try:
        out_p, alpha_p = build(True)(*args)
    except Exception:
        # TODO(synk): pl.Buffered(1) rejected by this jax build -- fall back to
        # default double-buffering of the constant weight blocks.
        out_p, alpha_p = build(False)(*args)

    # ---- strip padding, back to PyTorch batch-major convention ----
    outputs = jnp.transpose(out_p[:, :B, :V], (1, 0, 2))                 # (B, T, V)
    alphas = jnp.transpose(alpha_p[:, :B, :L], (1, 0, 2))                # (B, T, L)
    outputs_full = jnp.concatenate(
        [outputs, jnp.zeros((B, 1, V), jnp.float32)], axis=1)            # (B, S, V)
    alphas_full = jnp.concatenate(
        [alphas, jnp.zeros((B, 1, L), jnp.float32)], axis=1)             # (B, S, L)

    packed = _pack_padded(outputs_full, lengths)
    return packed, alphas_full


def reference_forward(params, encoder_features, captions, lengths, external_features):
    """Pure-JAX reference reproducing the PyTorch forward (eval-mode dropout)."""
    V, E = params["embed"].shape
    H = params["w_hatt"].shape[0]
    C = params["w_img"].shape[0]
    emb = params["embed"][captions]
    emb = jnp.concatenate([encoder_features[:, None, :], emb], axis=1)
    B, S, _ = emb.shape
    feat = external_features.reshape(B, -1, C).astype(jnp.float32)
    L = feat.shape[1]
    h = jnp.zeros((B, H), jnp.float32)
    c = jnp.zeros((B, H), jnp.float32)
    outputs = jnp.zeros((B, S, V), jnp.float32)
    alphas_all = jnp.zeros((B, S, L), jnp.float32)
    lengths_arr = jnp.asarray(lengths)
    for t in range(S - 1):
        x = emb[:, t]
        gates = x @ params["w_ih"] + h @ params["w_hh"] + params["b_lstm"]
        i = jax.nn.sigmoid(gates[:, :H])
        f = jax.nn.sigmoid(gates[:, H:2 * H])
        g = jnp.tanh(gates[:, 2 * H:3 * H])
        o = jax.nn.sigmoid(gates[:, 3 * H:])
        c = f * c + i * g
        h = o * jnp.tanh(c)
        att_img = feat @ params["w_img"] + params["b_img"]
        att_h = h @ params["w_hatt"] + params["b_hatt"]
        e = jnp.maximum(att_img + att_h[:, None, :], 0.0)
        logits = jnp.sum(e * params["w_comb"][None], axis=2) + params["b_comb"]
        a = jax.nn.softmax(logits, axis=1)
        ctx = jnp.sum(feat * a[:, :, None], axis=1)
        out_t = h @ params["w_lin_h"] + ctx @ params["w_lin_c"] + params["b_lin"]
        mask = (lengths_arr > t)[:, None]
        outputs = outputs.at[:, t].set(jnp.where(mask, out_t, 0.0))
        alphas_all = alphas_all.at[:, t].set(jnp.where(mask, a, 0.0))
    packed = _pack_padded(outputs, lengths)
    return packed, alphas_all


if __name__ == "__main__":
    key = jax.random.PRNGKey(0)
    V, E, H = 32, 16, 32          # vocab, embed_size, hidden_size
    C, Hs, Ws = 4, 4, 4           # ext_features_dim -> L = 16 attention locations
    B, Tcap = 2, 7                # batch, caption length (seq_length = Tcap + 1)
    lengths = [7, 5]              # sorted descending (pack_padded requirement)

    keys = jax.random.split(key, 20)

    def rnd(k, shape, scale=0.1):
        return (scale * jax.random.normal(k, shape)).astype(jnp.float32)

    params = {
        "embed":   rnd(keys[0], (V, E)),
        # LSTMCell weights stored pre-transposed: x @ (E,4H), h @ (H,4H)
        "w_ih":    rnd(keys[1], (E, 4 * H)),
        "w_hh":    rnd(keys[2], (H, 4 * H)),
        "b_lstm":  rnd(keys[3], (1, 4 * H)),          # b_ih + b_hh combined
        # SpatialAttention
        "w_img":   rnd(keys[4], (C, H)),
        "b_img":   rnd(keys[5], (1, H)),
        "w_hatt":  rnd(keys[6], (H, H)),
        "b_hatt":  rnd(keys[7], (1, H)),
        "w_comb":  rnd(keys[8], (1, H)),
        "b_comb":  rnd(keys[9], (1, 1)),
        # Final linear(hidden + feature -> vocab), split along the input dim
        "w_lin_h": rnd(keys[10], (H, V)),
        "w_lin_c": rnd(keys[11], (C, V)),
        "b_lin":   rnd(keys[12], (1, V)),
    }

    encoder_features = rnd(keys[13], (B, E), scale=1.0)
    captions = jax.random.randint(keys[14], (B, Tcap), 0, V, dtype=jnp.int32)
    # channels-last spatial features, consistent with view(B, -1, C)
    external_features = rnd(keys[15], (B, Hs, Ws, C), scale=1.0)

    packed, alphas = spatial_attention_decoder_forward(
        params, encoder_features, captions, lengths, external_features)
    packed = jax.block_until_ready(packed)
    alphas = jax.block_until_ready(alphas)

    packed_ref, alphas_ref = reference_forward(
        params, encoder_features, captions, lengths, external_features)
    np.testing.assert_allclose(np.asarray(packed), np.asarray(packed_ref),
                               rtol=1e-2, atol=1e-2)
    np.testing.assert_allclose(np.asarray(alphas), np.asarray(alphas_ref),
                               rtol=1e-2, atol=1e-2)

    print("KERNEL_OK")
</pallas_src>

<mosaic_0001>
module attributes {stable_mosaic.version = 11 : i64} {
  func.func @_decoder_kernel(%arg0: i32, %arg1: i32, %arg2: memref<1xi32, #tpu.memory_space<smem>>, %arg3: memref<1x8x16xbf16, #tpu.memory_space<vmem>>, %arg4: memref<8x128x4xbf16, #tpu.memory_space<vmem>>, %arg5: memref<8x128x32xbf16, #tpu.memory_space<vmem>>, %arg6: memref<8x1xi32, #tpu.memory_space<vmem>>, %arg7: memref<16x128xbf16, #tpu.memory_space<vmem>>, %arg8: memref<32x128xbf16, #tpu.memory_space<vmem>>, %arg9: memref<1x128xf32, #tpu.memory_space<vmem>>, %arg10: memref<32x32xbf16, #tpu.memory_space<vmem>>, %arg11: memref<1x32xf32, #tpu.memory_space<vmem>>, %arg12: memref<1x32xf32, #tpu.memory_space<vmem>>, %arg13: memref<1x1xf32, #tpu.memory_space<vmem>>, %arg14: memref<32x128xbf16, #tpu.memory_space<vmem>>, %arg15: memref<4x128xbf16, #tpu.memory_space<vmem>>, %arg16: memref<1x128xf32, #tpu.memory_space<vmem>>, %arg17: memref<1x8x128xf32, #tpu.memory_space<vmem>>, %arg18: memref<1x8x128xf32, #tpu.memory_space<vmem>>, %arg19: memref<8x32xf32, #tpu.memory_space<vmem>>, %arg20: memref<8x32xf32, #tpu.memory_space<vmem>>) attributes {dimension_semantics = [#tpu.dimension_semantics<parallel>, #tpu.dimension_semantics<arbitrary>], iteration_bounds = array<i64: 1, 7>, scalar_prefetch = 1 : i64, scratch_operands = 2 : i64, tpu.core_type = #tpu.core_type<tc>, window_params = [{transform_indices = @transform_0, window_bounds = array<i64: 1, 8, 16>}, {transform_indices = @transform_1, window_bounds = array<i64: 8, 128, 4>}, {transform_indices = @transform_2, window_bounds = array<i64: 8, 128, 32>}, {transform_indices = @transform_3, window_bounds = array<i64: 8, 1>}, {pipeline_mode = #tpu.pipeline_mode<synchronous>, transform_indices = @transform_4, window_bounds = array<i64: 16, 128>}, {pipeline_mode = #tpu.pipeline_mode<synchronous>, transform_indices = @transform_5, window_bounds = array<i64: 32, 128>}, {pipeline_mode = #tpu.pipeline_mode<synchronous>, transform_indices = @transform_6, window_bounds = array<i64: 1, 128>}, {pipeline_mode = #tpu.pipeline_mode<synchronous>, transform_indices = @transform_7, window_bounds = array<i64: 32, 32>}, {pipeline_mode = #tpu.pipeline_mode<synchronous>, transform_indices = @transform_8, window_bounds = array<i64: 1, 32>}, {pipeline_mode = #tpu.pipeline_mode<synchronous>, transform_indices = @transform_9, window_bounds = array<i64: 1, 32>}, {pipeline_mode = #tpu.pipeline_mode<synchronous>, transform_indices = @transform_10, window_bounds = array<i64: 1, 1>}, {pipeline_mode = #tpu.pipeline_mode<synchronous>, transform_indices = @transform_11, window_bounds = array<i64: 32, 128>}, {pipeline_mode = #tpu.pipeline_mode<synchronous>, transform_indices = @transform_12, window_bounds = array<i64: 4, 128>}, {pipeline_mode = #tpu.pipeline_mode<synchronous>, transform_indices = @transform_13, window_bounds = array<i64: 1, 128>}, {transform_indices = @transform_14, window_bounds = array<i64: 1, 8, 128>}, {transform_indices = @transform_15, window_bounds = array<i64: 1, 8, 128>}]} {
    %c0_i32 = arith.constant 0 : i32
    %0 = arith.cmpi eq, %arg1, %c0_i32 : i32
    %1 = arith.extui %0 : i1 to i32
    %c0_i32_0 = arith.constant 0 : i32
    %2 = arith.cmpi ne, %1, %c0_i32_0 : i32
    scf.if %2 {
      %cst = arith.constant 0.000000e+00 : f32
      %11 = vector.broadcast %cst : f32 to vector<8x32xf32>
      %c0 = arith.constant 0 : index
      %c0_3 = arith.constant 0 : index
      %12 = vector.load %arg19[%c0, %c0_3] : memref<8x32xf32, #tpu.memory_space<vmem>>, vector<8x32xf32>
      tpu.vector_store %arg19[%c0, %c0_3], %11 {strides = array<i32>} : memref<8x32xf32, #tpu.memory_space<vmem>>, vector<8x32xf32>,
      %cst_4 = arith.constant 0.000000e+00 : f32
      %13 = vector.broadcast %cst_4 : f32 to vector<8x32xf32>
      %c0_5 = arith.constant 0 : index
      %c0_6 = arith.constant 0 : index
      %14 = vector.load %arg20[%c0_5, %c0_6] : memref<8x32xf32, #tpu.memory_space<vmem>>, vector<8x32xf32>
      tpu.vector_store %arg20[%c0_5, %c0_6], %13 {strides = array<i32>} : memref<8x32xf32, #tpu.memory_space<vmem>>, vector<8x32xf32>,
    } else {
    }
    %3 = arith.index_cast %arg0 : i32 to index
    %4 = memref.load %arg2[%3] : memref<1xi32, #tpu.memory_space<smem>>
    %5 = arith.cmpi slt, %arg1, %4 : i32
    %6 = arith.extui %5 : i1 to i32
    %c0_i32_1 = arith.constant 0 : i32
    %7 = arith.cmpi ne, %6, %c0_i32_1 : i32
    scf.if %7 {
      %c0 = arith.constant 0 : index
      %c0_3 = arith.constant 0 : index
      %11 = vector.load %arg19[%c0, %c0_3] : memref<8x32xf32, #tpu.memory_space<vmem>>, vector<8x32xf32>
      %c0_4 = arith.constant 0 : index
      %c0_5 = arith.constant 0 : index
      %12 = vector.load %arg20[%c0_4, %c0_5] : memref<8x32xf32, #tpu.memory_space<vmem>>, vector<8x32xf32>
      %c0_6 = arith.constant 0 : index
      %c0_7 = arith.constant 0 : index
      %c0_8 = arith.constant 0 : index
      %13 = vector.load %arg3[%c0_6, %c0_7, %c0_8] : memref<1x8x16xbf16, #tpu.memory_space<vmem>>, vector<1x8x16xbf16>
      %14 = vector.shape_cast %13 : vector<1x8x16xbf16> to vector<8x16xbf16>
      %c0_9 = arith.constant 0 : index
      %c0_10 = arith.constant 0 : index
      %15 = vector.load %arg7[%c0_9, %c0_10] : memref<16x128xbf16, #tpu.memory_space<vmem>>, vector<16x128xbf16>
      %cst = arith.constant dense<0.000000e+00> : vector<8x128xf32>
      %16 = tpu.matmul %14, %15, %cst {dimension_numbers = #tpu.dot_dimension_numbers<[1], [0], [0], [1], [0, 0, 1, 1], [], []>} : vector<8x16xbf16>, vector<16x128xbf16>, vector<8x128xf32> -> vector<8x128xf32>
      %17 = arith.truncf %11 : vector<8x32xf32> to vector<8x32xbf16>
      %c0_11 = arith.constant 0 : index
      %c0_12 = arith.constant 0 : index
      %18 = vector.load %arg8[%c0_11, %c0_12] : memref<32x128xbf16, #tpu.memory_space<vmem>>, vector<32x128xbf16>
      %cst_13 = arith.constant dense<0.000000e+00> : vector<8x128xf32>
      %19 = tpu.matmul %17, %18, %cst_13 {dimension_numbers = #tpu.dot_dimension_numbers<[1], [0], [0], [1], [0, 0, 1, 1], [], []>} : vector<8x32xbf16>, vector<32x128xbf16>, vector<8x128xf32> -> vector<8x128xf32>
      %20 = arith.addf %16, %19 : vector<8x128xf32>
      %c0_14 = arith.constant 0 : index
      %c0_15 = arith.constant 0 : index
      %21 = vector.load %arg9[%c0_14, %c0_15] : memref<1x128xf32, #tpu.memory_space<vmem>>, vector<1x128xf32>
      %22 = vector.broadcast %21 : vector<1x128xf32> to vector<8x128xf32>
      %23 = arith.addf %20, %22 : vector<8x128xf32>
      %24 = vector.extract_strided_slice %23 {offsets = [0, 0], sizes = [8, 32], strides = [1, 1]} : vector<8x128xf32> to vector<8x32xf32>
      %25 = arith.negf %24 : vector<8x32xf32>
      %26 = math.exp %25 : vector<8x32xf32>
      %cst_16 = arith.constant 1.000000e+00 : f32
      %27 = vector.broadcast %cst_16 : f32 to vector<8x32xf32>
      %28 = arith.addf %27, %26 : vector<8x32xf32>
      %29 = arith.divf %27, %28 : vector<8x32xf32>
      %30 = vector.extract_strided_slice %23 {offsets = [0, 32], sizes = [8, 32], strides = [1, 1]} : vector<8x128xf32> to vector<8x32xf32>
      %31 = arith.negf %30 : vector<8x32xf32>
      %32 = math.exp %31 : vector<8x32xf32>
      %cst_17 = arith.constant 1.000000e+00 : f32
      %33 = vector.broadcast %cst_17 : f32 to vector<8x32xf32>
      %34 = arith.addf %33, %32 : vector<8x32xf32>
      %35 = arith.divf %33, %34 : vector<8x32xf32>
      %36 = vector.extract_strided_slice %23 {offsets = [0, 64], sizes = [8, 32], strides = [1, 1]} : vector<8x128xf32> to vector<8x32xf32>
      %37 = math.tanh %36 : vector<8x32xf32>
      %38 = vector.extract_strided_slice %23 {offsets = [0, 96], sizes = [8, 32], strides = [1, 1]} : vector<8x128xf32> to vector<8x32xf32>
      %39 = arith.negf %38 : vector<8x32xf32>
      %40 = math.exp %39 : vector<8x32xf32>
      %cst_18 = arith.constant 1.000000e+00 : f32
      %41 = vector.broadcast %cst_18 : f32 to vector<8x32xf32>
      %42 = arith.addf %41, %40 : vector<8x32xf32>
      %43 = arith.divf %41, %42 : vector<8x32xf32>
      %44 = arith.mulf %35, %12 : vector<8x32xf32>
      %45 = arith.mulf %29, %37 : vector<8x32xf32>
      %46 = arith.addf %44, %45 : vector<8x32xf32>
      %47 = math.tanh %46 : vector<8x32xf32>
      %48 = arith.mulf %43, %47 : vector<8x32xf32>
      %c0_19 = arith.constant 0 : index
      %c0_20 = arith.constant 0 : index
      %49 = vector.load %arg19[%c0_19, %c0_20] : memref<8x32xf32, #tpu.memory_space<vmem>>, vector<8x32xf32>
      tpu.vector_store %arg19[%c0_19, %c0_20], %48 {strides = array<i32>} : memref<8x32xf32, #tpu.memory_space<vmem>>, vector<8x32xf32>,
      %c0_21 = arith.constant 0 : index
      %c0_22 = arith.constant 0 : index
      %50 = vector.load %arg20[%c0_21, %c0_22] : memref<8x32xf32, #tpu.memory_space<vmem>>, vector<8x32xf32>
      tpu.vector_store %arg20[%c0_21, %c0_22], %46 {strides = array<i32>} : memref<8x32xf32, #tpu.memory_space<vmem>>, vector<8x32xf32>,
      %51 = arith.truncf %48 : vector<8x32xf32> to vector<8x32xbf16>
      %c0_23 = arith.constant 0 : index
      %c0_24 = arith.constant 0 : index
      %52 = vector.load %arg10[%c0_23, %c0_24] : memref<32x32xbf16, #tpu.memory_space<vmem>>, vector<32x32xbf16>
      %cst_25 = arith.constant dense<0.000000e+00> : vector<8x32xf32>
      %53 = tpu.matmul %51, %52, %cst_25 {dimension_numbers = #tpu.dot_dimension_numbers<[1], [0], [0], [1], [0, 0, 1, 1], [], []>} : vector<8x32xbf16>, vector<32x32xbf16>, vector<8x32xf32> -> vector<8x32xf32>
      %c0_26 = arith.constant 0 : index
      %c0_27 = arith.constant 0 : index
      %54 = vector.load %arg11[%c0_26, %c0_27] : memref<1x32xf32, #tpu.memory_space<vmem>>, vector<1x32xf32>
      %55 = vector.broadcast %54 : vector<1x32xf32> to vector<8x32xf32>
      %56 = arith.addf %53, %55 : vector<8x32xf32>
      %c0_28 = arith.constant 0 : index
      %c0_29 = arith.constant 0 : index
      %c0_30 = arith.constant 0 : index
      %57 = vector.load %arg5[%c0_28, %c0_29, %c0_30] : memref<8x128x32xbf16, #tpu.memory_space<vmem>>, vector<8x128x32xbf16>
      %58 = vector.shape_cast %56 : vector<8x32xf32> to vector<8x1x32xf32>
      %59 = arith.extf %57 : vector<8x128x32xbf16> to vector<8x128x32xf32>
      %60 = vector.broadcast %58 : vector<8x1x32xf32> to vector<8x128x32xf32>
      %61 = arith.addf %59, %60 : vector<8x128x32xf32>
      %cst_31 = arith.constant 0.000000e+00 : f32
      %62 = vector.broadcast %cst_31 : f32 to vector<8x128x32xf32>
      %63 = arith.maximumf %61, %62 : vector<8x128x32xf32>
      %c0_32 = arith.constant 0 : index
      %c0_33 = arith.constant 0 : index
      %64 = vector.load %arg12[%c0_32, %c0_33] : memref<1x32xf32, #tpu.memory_space<vmem>>, vector<1x32xf32>
      %65 = vector.shape_cast %64 : vector<1x32xf32> to vector<1x1x32xf32>
      %66 = vector.broadcast %65 : vector<1x1x32xf32> to vector<8x128x32xf32>
      %67 = arith.mulf %63, %66 : vector<8x128x32xf32>
      %cst_34 = arith.constant dense<0.000000e+00> : vector<8x128xf32>
      %68 = vector.multi_reduction <add>, %67, %cst_34 [2] : vector<8x128x32xf32> to vector<8x128xf32>
      %c0_35 = arith.constant 0 : index
      %c0_36 = arith.constant 0 : index
      %69 = vector.load %arg13[%c0_35, %c0_36] : memref<1x1xf32, #tpu.memory_space<vmem>>, vector<1x1xf32>
      %70 = vector.broadcast %69 : vector<1x1xf32> to vector<8x128xf32>
      %71 = arith.addf %68, %70 : vector<8x128xf32>
      %72 = tpu.iota {dimensions = array<i32: 1>} : vector<1x128xi32>
      %c16_i32 = arith.constant 16 : i32
      %73 = vector.broadcast %c16_i32 : i32 to vector<1x128xi32>
      %74 = arith.cmpi slt, %72, %73 : vector<1x128xi32>
      %cst_37 = arith.constant -1.000000e+30 : f32
      %75 = vector.shape_cast %74 : vector<1x128xi1> to vector<1x128xi1>
      %76 = vector.broadcast %75 : vector<1x128xi1> to vector<8x128xi1>
      %77 = vector.broadcast %cst_37 : f32 to vector<8x128xf32>
      %78 = arith.select %76, %71, %77 : vector<8x128xi1>, vector<8x128xf32>
      %cst_38 = arith.constant dense<0xFF800000> : vector<8xf32>
      %79 = vector.multi_reduction <maximumf>, %78, %cst_38 [1] : vector<8x128xf32> to vector<8xf32>
      %80 = vector.shape_cast %79 : vector<8xf32> to vector<8x1xf32>
      %81 = vector.broadcast %80 : vector<8x1xf32> to vector<8x128xf32>
      %82 = arith.subf %78, %81 : vector<8x128xf32>
      %83 = math.exp %82 : vector<8x128xf32>
      %cst_39 = arith.constant dense<0.000000e+00> : vector<8xf32>
      %84 = vector.multi_reduction <add>, %83, %cst_39 [1] : vector<8x128xf32> to vector<8xf32>
      %85 = vector.shape_cast %84 : vector<8xf32> to vector<8x1xf32>
      %86 = tpu.reciprocal %85 {approx = true} : vector<8x1xf32> -> vector<8x1xf32>
      %87 = vector.broadcast %86 : vector<8x1xf32> to vector<8x128xf32>
      %88 = arith.mulf %83, %87 : vector<8x128xf32>
      %c0_40 = arith.constant 0 : index
      %c0_41 = arith.constant 0 : index
      %c0_42 = arith.constant 0 : index
      %89 = vector.load %arg4[%c0_40, %c0_41, %c0_42] : memref<8x128x4xbf16, #tpu.memory_space<vmem>>, vector<8x128x4xbf16>
      %90 = arith.extf %89 : vector<8x128x4xbf16> to vector<8x128x4xf32>
      %91 = vector.shape_cast %88 : vector<8x128xf32> to vector<8x128x1xf32>
      %92 = vector.broadcast %91 : vector<8x128x1xf32> to vector<8x128x4xf32>
      %93 = arith.mulf %90, %92 : vector<8x128x4xf32>
      %cst_43 = arith.constant dense<0.000000e+00> : vector<8x4xf32>
      %94 = vector.multi_reduction <add>, %93, %cst_43 [1] : vector<8x128x4xf32> to vector<8x4xf32>
      %95 = arith.truncf %48 : vector<8x32xf32> to vector<8x32xbf16>
      %c0_44 = arith.constant 0 : index
      %c0_45 = arith.constant 0 : index
      %96 = vector.load %arg14[%c0_44, %c0_45] : memref<32x128xbf16, #tpu.memory_space<vmem>>, vector<32x128xbf16>
      %cst_46 = arith.constant dense<0.000000e+00> : vector<8x128xf32>
      %97 = tpu.matmul %95, %96, %cst_46 {dimension_numbers = #tpu.dot_dimension_numbers<[1], [0], [0], [1], [0, 0, 1, 1], [], []>} : vector<8x32xbf16>, vector<32x128xbf16>, vector<8x128xf32> -> vector<8x128xf32>
      %98 = arith.truncf %94 : vector<8x4xf32> to vector<8x4xbf16>
      %c0_47 = arith.constant 0 : index
      %c0_48 = arith.constant 0 : index
      %99 = vector.load %arg15[%c0_47, %c0_48] : memref<4x128xbf16, #tpu.memory_space<vmem>>, vector<4x128xbf16>
      %cst_49 = arith.constant dense<0.000000e+00> : vector<8x128xf32>
      %100 = tpu.matmul %98, %99, %cst_49 {dimension_numbers = #tpu.dot_dimension_numbers<[1], [0], [0], [1], [0, 0, 1, 1], [], []>} : vector<8x4xbf16>, vector<4x128xbf16>, vector<8x128xf32> -> vector<8x128xf32>
      %101 = arith.addf %97, %100 : vector<8x128xf32>
      %c0_50 = arith.constant 0 : index
      %c0_51 = arith.constant 0 : index
      %102 = vector.load %arg16[%c0_50, %c0_51] : memref<1x128xf32, #tpu.memory_space<vmem>>, vector<1x128xf32>
      %103 = vector.broadcast %102 : vector<1x128xf32> to vector<8x128xf32>
      %104 = arith.addf %101, %103 : vector<8x128xf32>
      %c0_52 = arith.constant 0 : index
      %c0_53 = arith.constant 0 : index
      %105 = vector.load %arg6[%c0_52, %c0_53] : memref<8x1xi32, #tpu.memory_space<vmem>>, vector<8x1xi32>
      %106 = vector.broadcast %arg1 : i32 to vector<8x1xi32>
      %107 = arith.cmpi sgt, %105, %106 : vector<8x1xi32>
      %cst_54 = arith.constant 0.000000e+00 : f32
      %108 = vector.shape_cast %107 : vector<8x1xi1> to vector<8x1xi1>
      %109 = vector.broadcast %108 : vector<8x1xi1> to vector<8x128xi1>
      %110 = vector.broadcast %cst_54 : f32 to vector<8x128xf32>
      %111 = arith.select %109, %104, %110 : vector<8x128xi1>, vector<8x128xf32>
      %c0_55 = arith.constant 0 : index
      %c0_56 = arith.constant 0 : index
      %c0_57 = arith.constant 0 : index
      %112 = vector.load %arg17[%c0_55, %c0_56, %c0_57] : memref<1x8x128xf32, #tpu.memory_space<vmem>>, vector<1x8x128xf32>
      %113 = vector.shape_cast %112 : vector<1x8x128xf32> to vector<8x128xf32>
      %114 = vector.shape_cast %111 : vector<8x128xf32> to vector<1x8x128xf32>
      tpu.vector_store %arg17[%c0_55, %c0_56, %c0_57], %114 {strides = array<i32>} : memref<1x8x128xf32, #tpu.memory_space<vmem>>, vector<1x8x128xf32>,
      %cst_58 = arith.constant 0.000000e+00 : f32
      %115 = vector.shape_cast %107 : vector<8x1xi1> to vector<8x1xi1>
      %116 = vector.broadcast %115 : vector<8x1xi1> to vector<8x128xi1>
      %117 = vector.broadcast %cst_58 : f32 to vector<8x128xf32>
      %118 = arith.select %116, %88, %117 : vector<8x128xi1>, vector<8x128xf32>
      %c0_59 = arith.constant 0 : index
      %c0_60 = arith.constant 0 : index
      %c0_61 = arith.constant 0 : index
      %119 = vector.load %arg18[%c0_59, %c0_60, %c0_61] : memref<1x8x128xf32, #tpu.memory_space<vmem>>, vector<1x8x128xf32>
      %120 = vector.shape_cast %119 : vector<1x8x128xf32> to vector<8x128xf32>
      %121 = vector.shape_cast %118 : vector<8x128xf32> to vector<1x8x128xf32>
      tpu.vector_store %arg18[%c0_59, %c0_60, %c0_61], %121 {strides = array<i32>} : memref<1x8x128xf32, #tpu.memory_space<vmem>>, vector<1x8x128xf32>,
    } else {
    }
    %8 = arith.cmpi sge, %arg1, %4 : i32
    %9 = arith.extui %8 : i1 to i32
    %c0_i32_2 = arith.constant 0 : i32
    %10 = arith.cmpi ne, %9, %c0_i32_2 : i32
    scf.if %10 {
      %cst = arith.constant 0.000000e+00 : f32
      %11 = vector.broadcast %cst : f32 to vector<1x8x128xf32>
      %c0 = arith.constant 0 : index
      %c0_3 = arith.constant 0 : index
      %c0_4 = arith.constant 0 : index
      %12 = vector.load %arg17[%c0, %c0_3, %c0_4] : memref<1x8x128xf32, #tpu.memory_space<vmem>>, vector<1x8x128xf32>
      tpu.vector_store %arg17[%c0, %c0_3, %c0_4], %11 {strides = array<i32>} : memref<1x8x128xf32, #tpu.memory_space<vmem>>, vector<1x8x128xf32>,
      %cst_5 = arith.constant 0.000000e+00 : f32
      %13 = vector.broadcast %cst_5 : f32 to vector<1x8x128xf32>
      %c0_6 = arith.constant 0 : index
      %c0_7 = arith.constant 0 : index
      %c0_8 = arith.constant 0 : index
      %14 = vector.load %arg18[%c0_6, %c0_7, %c0_8] : memref<1x8x128xf32, #tpu.memory_space<vmem>>, vector<1x8x128xf32>
      tpu.vector_store %arg18[%c0_6, %c0_7, %c0_8], %13 {strides = array<i32>} : memref<1x8x128xf32, #tpu.memory_space<vmem>>, vector<1x8x128xf32>,
    } else {
    }
    return
  }
  func.func @transform_0(%arg0: i32, %arg1: i32, %arg2: memref<1xi32, #tpu.memory_space<smem>>) -> (i32, i32, i32) {
    %0 = arith.index_cast %arg0 : i32 to index
    %1 = memref.load %arg2[%0] : memref<1xi32, #tpu.memory_space<smem>>
    %c1_i32 = arith.constant 1 : i32
    %2 = arith.subi %1, %c1_i32 : i32
    %c0_i32 = arith.constant 0 : i32
    %3 = arith.maxsi %2, %c0_i32 : i32
    %4 = arith.minsi %arg1, %3 : i32
    %c0_i32_0 = arith.constant 0 : i32
    %c0_i32_1 = arith.constant 0 : i32
    return %4, %arg0, %c0_i32_0 : i32, i32, i32
  }
  func.func @transform_1(%arg0: i32, %arg1: i32, %arg2: memref<1xi32, #tpu.memory_space<smem>>) -> (i32, i32, i32) {
    %c0_i32 = arith.constant 0 : i32
    %c0_i32_0 = arith.constant 0 : i32
    %c0_i32_1 = arith.constant 0 : i32
    return %arg0, %c0_i32, %c0_i32_0 : i32, i32, i32
  }
  func.func @transform_2(%arg0: i32, %arg1: i32, %arg2: memref<1xi32, #tpu.memory_space<smem>>) -> (i32, i32, i32) {
    %c0_i32 = arith.constant 0 : i32
    %c0_i32_0 = arith.constant 0 : i32
    %c0_i32_1 = arith.constant 0 : i32
    return %arg0, %c0_i32, %c0_i32_0 : i32, i32, i32
  }
  func.func @transform_3(%arg0: i32, %arg1: i32, %arg2: memref<1xi32, #tpu.memory_space<smem>>) -> (i32, i32) {
    %c0_i32 = arith.constant 0 : i32
    %c0_i32_0 = arith.constant 0 : i32
    return %arg0, %c0_i32 : i32, i32
  }
  func.func @transform_4(%arg0: i32, %arg1: i32, %arg2: memref<1xi32, #tpu.memory_space<smem>>) -> (i32, i32) {
    %c0_i32 = arith.constant 0 : i32
    %c0_i32_0 = arith.constant 0 : i32
    %c0_i32_1 = arith.constant 0 : i32
    return %c0_i32, %c0_i32_0 : i32, i32
  }
  func.func @transform_5(%arg0: i32, %arg1: i32, %arg2: memref<1xi32, #tpu.memory_space<smem>>) -> (i32, i32) {
    %c0_i32 = arith.constant 0 : i32
    %c0_i32_0 = arith.constant 0 : i32
    %c0_i32_1 = arith.constant 0 : i32
    return %c0_i32, %c0_i32_0 : i32, i32
  }
  func.func @transform_6(%arg0: i32, %arg1: i32, %arg2: memref<1xi32, #tpu.memory_space<smem>>) -> (i32, i32) {
    %c0_i32 = arith.constant 0 : i32
    %c0_i32_0 = arith.constant 0 : i32
    %c0_i32_1 = arith.constant 0 : i32
    return %c0_i32, %c0_i32_0 : i32, i32
  }
  func.func @transform_7(%arg0: i32, %arg1: i32, %arg2: memref<1xi32, #tpu.memory_space<smem>>) -> (i32, i32) {
    %c0_i32 = arith.constant 0 : i32
    %c0_i32_0 = arith.constant 0 : i32
    %c0_i32_1 = arith.constant 0 : i32
    return %c0_i32, %c0_i32_0 : i32, i32
  }
  func.func @transform_8(%arg0: i32, %arg1: i32, %arg2: memref<1xi32, #tpu.memory_space<smem>>) -> (i32, i32) {
    %c0_i32 = arith.constant 0 : i32
    %c0_i32_0 = arith.constant 0 : i32
    %c0_i32_1 = arith.constant 0 : i32
    return %c0_i32, %c0_i32_0 : i32, i32
  }
  func.func @transform_9(%arg0: i32, %arg1: i32, %arg2: memref<1xi32, #tpu.memory_space<smem>>) -> (i32, i32) {
    %c0_i32 = arith.constant 0 : i32
    %c0_i32_0 = arith.constant 0 : i32
    %c0_i32_1 = arith.constant 0 : i32
    return %c0_i32, %c0_i32_0 : i32, i32
  }
  func.func @transform_10(%arg0: i32, %arg1: i32, %arg2: memref<1xi32, #tpu.memory_space<smem>>) -> (i32, i32) {
    %c0_i32 = arith.constant 0 : i32
    %c0_i32_0 = arith.constant 0 : i32
    %c0_i32_1 = arith.constant 0 : i32
    return %c0_i32, %c0_i32_0 : i32, i32
  }
  func.func @transform_11(%arg0: i32, %arg1: i32, %arg2: memref<1xi32, #tpu.memory_space<smem>>) -> (i32, i32) {
    %c0_i32 = arith.constant 0 : i32
    %c0_i32_0 = arith.constant 0 : i32
    %c0_i32_1 = arith.constant 0 : i32
    return %c0_i32, %c0_i32_0 : i32, i32
  }
  func.func @transform_12(%arg0: i32, %arg1: i32, %arg2: memref<1xi32, #tpu.memory_space<smem>>) -> (i32, i32) {
    %c0_i32 = arith.constant 0 : i32
    %c0_i32_0 = arith.constant 0 : i32
    %c0_i32_1 = arith.constant 0 : i32
    return %c0_i32, %c0_i32_0 : i32, i32
  }
  func.func @transform_13(%arg0: i32, %arg1: i32, %arg2: memref<1xi32, #tpu.memory_space<smem>>) -> (i32, i32) {
    %c0_i32 = arith.constant 0 : i32
    %c0_i32_0 = arith.constant 0 : i32
    %c0_i32_1 = arith.constant 0 : i32
    return %c0_i32, %c0_i32_0 : i32, i32
  }
  func.func @transform_14(%arg0: i32, %arg1: i32, %arg2: memref<1xi32, #tpu.memory_space<smem>>) -> (i32, i32, i32) {
    %c0_i32 = arith.constant 0 : i32
    %c0_i32_0 = arith.constant 0 : i32
    return %arg1, %arg0, %c0_i32 : i32, i32, i32
  }
  func.func @transform_15(%arg0: i32, %arg1: i32, %arg2: memref<1xi32, #tpu.memory_space<smem>>) -> (i32, i32, i32) {
    %c0_i32 = arith.constant 0 : i32
    %c0_i32_0 = arith.constant 0 : i32
    return %arg1, %arg0, %c0_i32 : i32, i32, i32
  }
}

module attributes {stable_mosaic.version = 11 : i64} {
  func.func @_decoder_kernel(%arg0: i32, %arg1: i32, %arg2: memref<1xi32, #tpu.memory_space<smem>>, %arg3: memref<1x8x16xbf16, #tpu.memory_space<vmem>>, %arg4: memref<8x128x4xbf16, #tpu.memory_space<vmem>>, %arg5: memref<8x128x32xbf16, #tpu.memory_space<vmem>>, %arg6: memref<8x1xi32, #tpu.memory_space<vmem>>, %arg7: memref<16x128xbf16, #tpu.memory_space<vmem>>, %arg8: memref<32x128xbf16, #tpu.memory_space<vmem>>, %arg9: memref<1x128xf32, #tpu.memory_space<vmem>>, %arg10: memref<32x32xbf16, #tpu.memory_space<vmem>>, %arg11: memref<1x32xf32, #tpu.memory_space<vmem>>, %arg12: memref<1x32xf32, #tpu.memory_space<vmem>>, %arg13: memref<1x1xf32, #tpu.memory_space<vmem>>, %arg14: memref<32x128xbf16, #tpu.memory_space<vmem>>, %arg15: memref<4x128xbf16, #tpu.memory_space<vmem>>, %arg16: memref<1x128xf32, #tpu.memory_space<vmem>>, %arg17: memref<1x8x128xf32, #tpu.memory_space<vmem>>, %arg18: memref<1x8x128xf32, #tpu.memory_space<vmem>>, %arg19: memref<8x32xf32, #tpu.memory_space<vmem>>, %arg20: memref<8x32xf32, #tpu.memory_space<vmem>>) attributes {dimension_semantics = [#tpu.dimension_semantics<parallel>, #tpu.dimension_semantics<arbitrary>], iteration_bounds = array<i64: 1, 7>, scalar_prefetch = 1 : i64, scratch_operands = 2 : i64, tpu.core_type = #tpu.core_type<tc>, window_params = [{transform_indices = @transform_0, window_bounds = array<i64: 1, 8, 16>}, {transform_indices = @transform_1, window_bounds = array<i64: 8, 128, 4>}, {transform_indices = @transform_2, window_bounds = array<i64: 8, 128, 32>}, {transform_indices = @transform_3, window_bounds = array<i64: 8, 1>}, {pipeline_mode = #tpu.pipeline_mode<synchronous>, transform_indices = @transform_4, window_bounds = array<i64: 16, 128>}, {pipeline_mode = #tpu.pipeline_mode<synchronous>, transform_indices = @transform_5, window_bounds = array<i64: 32, 128>}, {pipeline_mode = #tpu.pipeline_mode<synchronous>, transform_indices = @transform_6, window_bounds = array<i64: 1, 128>}, {pipeline_mode = #tpu.pipeline_mode<synchronous>, transform_indices = @transform_7, window_bounds = array<i64: 32, 32>}, {pipeline_mode = #tpu.pipeline_mode<synchronous>, transform_indices = @transform_8, window_bounds = array<i64: 1, 32>}, {pipeline_mode = #tpu.pipeline_mode<synchronous>, transform_indices = @transform_9, window_bounds = array<i64: 1, 32>}, {pipeline_mode = #tpu.pipeline_mode<synchronous>, transform_indices = @transform_10, window_bounds = array<i64: 1, 1>}, {pipeline_mode = #tpu.pipeline_mode<synchronous>, transform_indices = @transform_11, window_bounds = array<i64: 32, 128>}, {pipeline_mode = #tpu.pipeline_mode<synchronous>, transform_indices = @transform_12, window_bounds = array<i64: 4, 128>}, {pipeline_mode = #tpu.pipeline_mode<synchronous>, transform_indices = @transform_13, window_bounds = array<i64: 1, 128>}, {transform_indices = @transform_14, window_bounds = array<i64: 1, 8, 128>}, {transform_indices = @transform_15, window_bounds = array<i64: 1, 8, 128>}]} {
    %c0_i32 = arith.constant 0 : i32
    %0 = arith.cmpi eq, %arg1, %c0_i32 : i32
    %1 = arith.extui %0 : i1 to i32
    %c0_i32_0 = arith.constant 0 : i32
    %2 = arith.cmpi ne, %1, %c0_i32_0 : i32
    scf.if %2 {
      %cst = arith.constant 0.000000e+00 : f32
      %11 = vector.broadcast %cst : f32 to vector<8x32xf32>
      %c0 = arith.constant 0 : index
      %c0_3 = arith.constant 0 : index
      %12 = vector.load %arg19[%c0, %c0_3] : memref<8x32xf32, #tpu.memory_space<vmem>>, vector<8x32xf32>
      tpu.vector_store %arg19[%c0, %c0_3], %11 {strides = array<i32>} : memref<8x32xf32, #tpu.memory_space<vmem>>, vector<8x32xf32>,
      %cst_4 = arith.constant 0.000000e+00 : f32
      %13 = vector.broadcast %cst_4 : f32 to vector<8x32xf32>
      %c0_5 = arith.constant 0 : index
      %c0_6 = arith.constant 0 : index
      %14 = vector.load %arg20[%c0_5, %c0_6] : memref<8x32xf32, #tpu.memory_space<vmem>>, vector<8x32xf32>
      tpu.vector_store %arg20[%c0_5, %c0_6], %13 {strides = array<i32>} : memref<8x32xf32, #tpu.memory_space<vmem>>, vector<8x32xf32>,
    } else {
    }
    %3 = arith.index_cast %arg0 : i32 to index
    %4 = memref.load %arg2[%3] : memref<1xi32, #tpu.memory_space<smem>>
    %5 = arith.cmpi slt, %arg1, %4 : i32
    %6 = arith.extui %5 : i1 to i32
    %c0_i32_1 = arith.constant 0 : i32
    %7 = arith.cmpi ne, %6, %c0_i32_1 : i32
    scf.if %7 {
      %c0 = arith.constant 0 : index
      %c0_3 = arith.constant 0 : index
      %11 = vector.load %arg19[%c0, %c0_3] : memref<8x32xf32, #tpu.memory_space<vmem>>, vector<8x32xf32>
      %c0_4 = arith.constant 0 : index
      %c0_5 = arith.constant 0 : index
      %12 = vector.load %arg20[%c0_4, %c0_5] : memref<8x32xf32, #tpu.memory_space<vmem>>, vector<8x32xf32>
      %c0_6 = arith.constant 0 : index
      %c0_7 = arith.constant 0 : index
      %c0_8 = arith.constant 0 : index
      %13 = vector.load %arg3[%c0_6, %c0_7, %c0_8] : memref<1x8x16xbf16, #tpu.memory_space<vmem>>, vector<1x8x16xbf16>
      %14 = vector.shape_cast %13 : vector<1x8x16xbf16> to vector<8x16xbf16>
      %c0_9 = arith.constant 0 : index
      %c0_10 = arith.constant 0 : index
      %15 = vector.load %arg7[%c0_9, %c0_10] : memref<16x128xbf16, #tpu.memory_space<vmem>>, vector<16x128xbf16>
      %cst = arith.constant dense<0.000000e+00> : vector<8x128xf32>
      %16 = tpu.matmul %14, %15, %cst {dimension_numbers = #tpu.dot_dimension_numbers<[1], [0], [0], [1], [0, 0, 1, 1], [], []>} : vector<8x16xbf16>, vector<16x128xbf16>, vector<8x128xf32> -> vector<8x128xf32>
      %17 = arith.truncf %11 : vector<8x32xf32> to vector<8x32xbf16>
      %c0_11 = arith.constant 0 : index
      %c0_12 = arith.constant 0 : index
      %18 = vector.load %arg8[%c0_11, %c0_12] : memref<32x128xbf16, #tpu.memory_space<vmem>>, vector<32x128xbf16>
      %cst_13 = arith.constant dense<0.000000e+00> : vector<8x128xf32>
      %19 = tpu.matmul %17, %18, %cst_13 {dimension_numbers = #tpu.dot_dimension_numbers<[1], [0], [0], [1], [0, 0, 1, 1], [], []>} : vector<8x32xbf16>, vector<32x128xbf16>, vector<8x128xf32> -> vector<8x128xf32>
      %20 = arith.addf %16, %19 : vector<8x128xf32>
      %c0_14 = arith.constant 0 : index
      %c0_15 = arith.constant 0 : index
      %21 = vector.load %arg9[%c0_14, %c0_15] : memref<1x128xf32, #tpu.memory_space<vmem>>, vector<1x128xf32>
      %22 = vector.broadcast %21 : vector<1x128xf32> to vector<8x128xf32>
      %23 = arith.addf %20, %22 : vector<8x128xf32>
      %24 = vector.extract_strided_slice %23 {offsets = [0, 0], sizes = [8, 32], strides = [1, 1]} : vector<8x128xf32> to vector<8x32xf32>
      %25 = arith.negf %24 : vector<8x32xf32>
      %26 = math.exp %25 : vector<8x32xf32>
      %cst_16 = arith.constant 1.000000e+00 : f32
      %27 = vector.broadcast %cst_16 : f32 to vector<8x32xf32>
      %28 = arith.addf %27, %26 : vector<8x32xf32>
      %29 = arith.divf %27, %28 : vector<8x32xf32>
      %30 = vector.extract_strided_slice %23 {offsets = [0, 32], sizes = [8, 32], strides = [1, 1]} : vector<8x128xf32> to vector<8x32xf32>
      %31 = arith.negf %30 : vector<8x32xf32>
      %32 = math.exp %31 : vector<8x32xf32>
      %cst_17 = arith.constant 1.000000e+00 : f32
      %33 = vector.broadcast %cst_17 : f32 to vector<8x32xf32>
      %34 = arith.addf %33, %32 : vector<8x32xf32>
      %35 = arith.divf %33, %34 : vector<8x32xf32>
      %36 = vector.extract_strided_slice %23 {offsets = [0, 64], sizes = [8, 32], strides = [1, 1]} : vector<8x128xf32> to vector<8x32xf32>
      %37 = math.tanh %36 : vector<8x32xf32>
      %38 = vector.extract_strided_slice %23 {offsets = [0, 96], sizes = [8, 32], strides = [1, 1]} : vector<8x128xf32> to vector<8x32xf32>
      %39 = arith.negf %38 : vector<8x32xf32>
      %40 = math.exp %39 : vector<8x32xf32>
      %cst_18 = arith.constant 1.000000e+00 : f32
      %41 = vector.broadcast %cst_18 : f32 to vector<8x32xf32>
      %42 = arith.addf %41, %40 : vector<8x32xf32>
      %43 = arith.divf %41, %42 : vector<8x32xf32>
      %44 = arith.mulf %35, %12 : vector<8x32xf32>
      %45 = arith.mulf %29, %37 : vector<8x32xf32>
      %46 = arith.addf %44, %45 : vector<8x32xf32>
      %47 = math.tanh %46 : vector<8x32xf32>
      %48 = arith.mulf %43, %47 : vector<8x32xf32>
      %c0_19 = arith.constant 0 : index
      %c0_20 = arith.constant 0 : index
      %49 = vector.load %arg19[%c0_19, %c0_20] : memref<8x32xf32, #tpu.memory_space<vmem>>, vector<8x32xf32>
      tpu.vector_store %arg19[%c0_19, %c0_20], %48 {strides = array<i32>} : memref<8x32xf32, #tpu.memory_space<vmem>>, vector<8x32xf32>,
      %c0_21 = arith.constant 0 : index
      %c0_22 = arith.constant 0 : index
      %50 = vector.load %arg20[%c0_21, %c0_22] : memref<8x32xf32, #tpu.memory_space<vmem>>, vector<8x32xf32>
      tpu.vector_store %arg20[%c0_21, %c0_22], %46 {strides = array<i32>} : memref<8x32xf32, #tpu.memory_space<vmem>>, vector<8x32xf32>,
      %51 = arith.truncf %48 : vector<8x32xf32> to vector<8x32xbf16>
      %c0_23 = arith.constant 0 : index
      %c0_24 = arith.constant 0 : index
      %52 = vector.load %arg10[%c0_23, %c0_24] : memref<32x32xbf16, #tpu.memory_space<vmem>>, vector<32x32xbf16>
      %cst_25 = arith.constant dense<0.000000e+00> : vector<8x32xf32>
      %53 = tpu.matmul %51, %52, %cst_25 {dimension_numbers = #tpu.dot_dimension_numbers<[1], [0], [0], [1], [0, 0, 1, 1], [], []>} : vector<8x32xbf16>, vector<32x32xbf16>, vector<8x32xf32> -> vector<8x32xf32>
      %c0_26 = arith.constant 0 : index
      %c0_27 = arith.constant 0 : index
      %54 = vector.load %arg11[%c0_26, %c0_27] : memref<1x32xf32, #tpu.memory_space<vmem>>, vector<1x32xf32>
      %55 = vector.broadcast %54 : vector<1x32xf32> to vector<8x32xf32>
      %56 = arith.addf %53, %55 : vector<8x32xf32>
      %c0_28 = arith.constant 0 : index
      %c0_29 = arith.constant 0 : index
      %c0_30 = arith.constant 0 : index
      %57 = vector.load %arg5[%c0_28, %c0_29, %c0_30] : memref<8x128x32xbf16, #tpu.memory_space<vmem>>, vector<8x128x32xbf16>
      %58 = vector.shape_cast %56 : vector<8x32xf32> to vector<8x1x32xf32>
      %59 = arith.extf %57 : vector<8x128x32xbf16> to vector<8x128x32xf32>
      %60 = vector.broadcast %58 : vector<8x1x32xf32> to vector<8x128x32xf32>
      %61 = arith.addf %59, %60 : vector<8x128x32xf32>
      %cst_31 = arith.constant 0.000000e+00 : f32
      %62 = vector.broadcast %cst_31 : f32 to vector<8x128x32xf32>
      %63 = arith.maximumf %61, %62 : vector<8x128x32xf32>
      %c0_32 = arith.constant 0 : index
      %c0_33 = arith.constant 0 : index
      %64 = vector.load %arg12[%c0_32, %c0_33] : memref<1x32xf32, #tpu.memory_space<vmem>>, vector<1x32xf32>
      %65 = vector.shape_cast %64 : vector<1x32xf32> to vector<1x1x32xf32>
      %66 = vector.broadcast %65 : vector<1x1x32xf32> to vector<8x128x32xf32>
      %67 = arith.mulf %63, %66 : vector<8x128x32xf32>
      %cst_34 = arith.constant dense<0.000000e+00> : vector<8x128xf32>
      %68 = vector.multi_reduction <add>, %67, %cst_34 [2] : vector<8x128x32xf32> to vector<8x128xf32>
      %c0_35 = arith.constant 0 : index
      %c0_36 = arith.constant 0 : index
      %69 = vector.load %arg13[%c0_35, %c0_36] : memref<1x1xf32, #tpu.memory_space<vmem>>, vector<1x1xf32>
      %70 = vector.broadcast %69 : vector<1x1xf32> to vector<8x128xf32>
      %71 = arith.addf %68, %70 : vector<8x128xf32>
      %72 = tpu.iota {dimensions = array<i32: 1>} : vector<1x128xi32>
      %c16_i32 = arith.constant 16 : i32
      %73 = vector.broadcast %c16_i32 : i32 to vector<1x128xi32>
      %74 = arith.cmpi slt, %72, %73 : vector<1x128xi32>
      %cst_37 = arith.constant -1.000000e+30 : f32
      %75 = vector.shape_cast %74 : vector<1x128xi1> to vector<1x128xi1>
      %76 = vector.broadcast %75 : vector<1x128xi1> to vector<8x128xi1>
      %77 = vector.broadcast %cst_37 : f32 to vector<8x128xf32>
      %78 = arith.select %76, %71, %77 : vector<8x128xi1>, vector<8x128xf32>
      %cst_38 = arith.constant dense<0xFF800000> : vector<8xf32>
      %79 = vector.multi_reduction <maximumf>, %78, %cst_38 [1] : vector<8x128xf32> to vector<8xf32>
      %80 = vector.shape_cast %79 : vector<8xf32> to vector<8x1xf32>
      %81 = vector.broadcast %80 : vector<8x1xf32> to vector<8x128xf32>
      %82 = arith.subf %78, %81 : vector<8x128xf32>
      %83 = math.exp %82 : vector<8x128xf32>
      %cst_39 = arith.constant dense<0.000000e+00> : vector<8xf32>
      %84 = vector.multi_reduction <add>, %83, %cst_39 [1] : vector<8x128xf32> to vector<8xf32>
      %85 = vector.shape_cast %84 : vector<8xf32> to vector<8x1xf32>
      %86 = tpu.reciprocal %85 {approx = true} : vector<8x1xf32> -> vector<8x1xf32>
      %87 = vector.broadcast %86 : vector<8x1xf32> to vector<8x128xf32>
      %88 = arith.mulf %83, %87 : vector<8x128xf32>
      %c0_40 = arith.constant 0 : index
      %c0_41 = arith.constant 0 : index
      %c0_42 = arith.constant 0 : index
      %89 = vector.load %arg4[%c0_40, %c0_41, %c0_42] : memref<8x128x4xbf16, #tpu.memory_space<vmem>>, vector<8x128x4xbf16>
      %90 = arith.extf %89 : vector<8x128x4xbf16> to vector<8x128x4xf32>
      %91 = vector.shape_cast %88 : vector<8x128xf32> to vector<8x128x1xf32>
      %92 = vector.broadcast %91 : vector<8x128x1xf32> to vector<8x128x4xf32>
      %93 = arith.mulf %90, %92 : vector<8x128x4xf32>
      %cst_43 = arith.constant dense<0.000000e+00> : vector<8x4xf32>
      %94 = vector.multi_reduction <add>, %93, %cst_43 [1] : vector<8x128x4xf32> to vector<8x4xf32>
      %95 = arith.truncf %48 : vector<8x32xf32> to vector<8x32xbf16>
      %c0_44 = arith.constant 0 : index
      %c0_45 = arith.constant 0 : index
      %96 = vector.load %arg14[%c0_44, %c0_45] : memref<32x128xbf16, #tpu.memory_space<vmem>>, vector<32x128xbf16>
      %cst_46 = arith.constant dense<0.000000e+00> : vector<8x128xf32>
      %97 = tpu.matmul %95, %96, %cst_46 {dimension_numbers = #tpu.dot_dimension_numbers<[1], [0], [0], [1], [0, 0, 1, 1], [], []>} : vector<8x32xbf16>, vector<32x128xbf16>, vector<8x128xf32> -> vector<8x128xf32>
      %98 = arith.truncf %94 : vector<8x4xf32> to vector<8x4xbf16>
      %c0_47 = arith.constant 0 : index
      %c0_48 = arith.constant 0 : index
      %99 = vector.load %arg15[%c0_47, %c0_48] : memref<4x128xbf16, #tpu.memory_space<vmem>>, vector<4x128xbf16>
      %cst_49 = arith.constant dense<0.000000e+00> : vector<8x128xf32>
      %100 = tpu.matmul %98, %99, %cst_49 {dimension_numbers = #tpu.dot_dimension_numbers<[1], [0], [0], [1], [0, 0, 1, 1], [], []>} : vector<8x4xbf16>, vector<4x128xbf16>, vector<8x128xf32> -> vector<8x128xf32>
      %101 = arith.addf %97, %100 : vector<8x128xf32>
      %c0_50 = arith.constant 0 : index
      %c0_51 = arith.constant 0 : index
      %102 = vector.load %arg16[%c0_50, %c0_51] : memref<1x128xf32, #tpu.memory_space<vmem>>, vector<1x128xf32>
      %103 = vector.broadcast %102 : vector<1x128xf32> to vector<8x128xf32>
      %104 = arith.addf %101, %103 : vector<8x128xf32>
      %c0_52 = arith.constant 0 : index
      %c0_53 = arith.constant 0 : index
      %105 = vector.load %arg6[%c0_52, %c0_53] : memref<8x1xi32, #tpu.memory_space<vmem>>, vector<8x1xi32>
      %106 = vector.broadcast %arg1 : i32 to vector<8x1xi32>
      %107 = arith.cmpi sgt, %105, %106 : vector<8x1xi32>
      %cst_54 = arith.constant 0.000000e+00 : f32
      %108 = vector.shape_cast %107 : vector<8x1xi1> to vector<8x1xi1>
      %109 = vector.broadcast %108 : vector<8x1xi1> to vector<8x128xi1>
      %110 = vector.broadcast %cst_54 : f32 to vector<8x128xf32>
      %111 = arith.select %109, %104, %110 : vector<8x128xi1>, vector<8x128xf32>
      %c0_55 = arith.constant 0 : index
      %c0_56 = arith.constant 0 : index
      %c0_57 = arith.constant 0 : index
      %112 = vector.load %arg17[%c0_55, %c0_56, %c0_57] : memref<1x8x128xf32, #tpu.memory_space<vmem>>, vector<1x8x128xf32>
      %113 = vector.shape_cast %112 : vector<1x8x128xf32> to vector<8x128xf32>
      %114 = vector.shape_cast %111 : vector<8x128xf32> to vector<1x8x128xf32>
      tpu.vector_store %arg17[%c0_55, %c0_56, %c0_57], %114 {strides = array<i32>} : memref<1x8x128xf32, #tpu.memory_space<vmem>>, vector<1x8x128xf32>,
      %cst_58 = arith.constant 0.000000e+00 : f32
      %115 = vector.shape_cast %107 : vector<8x1xi1> to vector<8x1xi1>
      %116 = vector.broadcast %115 : vector<8x1xi1> to vector<8x128xi1>
      %117 = vector.broadcast %cst_58 : f32 to vector<8x128xf32>
      %118 = arith.select %116, %88, %117 : vector<8x128xi1>, vector<8x128xf32>
      %c0_59 = arith.constant 0 : index
      %c0_60 = arith.constant 0 : index
      %c0_61 = arith.constant 0 : index
      %119 = vector.load %arg18[%c0_59, %c0_60, %c0_61] : memref<1x8x128xf32, #tpu.memory_space<vmem>>, vector<1x8x128xf32>
      %120 = vector.shape_cast %119 : vector<1x8x128xf32> to vector<8x128xf32>
      %121 = vector.shape_cast %118 : vector<8x128xf32> to vector<1x8x128xf32>
      tpu.vector_store %arg18[%c0_59, %c0_60, %c0_61], %121 {strides = array<i32>} : memref<1x8x128xf32, #tpu.memory_space<vmem>>, vector<1x8x128xf32>,
    } else {
    }
    %8 = arith.cmpi sge, %arg1, %4 : i32
    %9 = arith.extui %8 : i1 to i32
    %c0_i32_2 = arith.constant 0 : i32
    %10 = arith.cmpi ne, %9, %c0_i32_2 : i32
    scf.if %10 {
      %cst = arith.constant 0.000000e+00 : f32
      %11 = vector.broadcast %cst : f32 to vector<1x8x128xf32>
      %c0 = arith.constant 0 : index
      %c0_3 = arith.constant 0 : index
      %c0_4 = arith.constant 0 : index
      %12 = vector.load %arg17[%c0, %c0_3, %c0_4] : memref<1x8x128xf32, #tpu.memory_space<vmem>>, vector<1x8x128xf32>
      tpu.vector_store %arg17[%c0, %c0_3, %c0_4], %11 {strides = array<i32>} : memref<1x8x128xf32, #tpu.memory_space<vmem>>, vector<1x8x128xf32>,
      %cst_5 = arith.constant 0.000000e+00 : f32
      %13 = vector.broadcast %cst_5 : f32 to vector<1x8x128xf32>
      %c0_6 = arith.constant 0 : index
      %c0_7 = arith.constant 0 : index
      %c0_8 = arith.constant 0 : index
      %14 = vector.load %arg18[%c0_6, %c0_7, %c0_8] : memref<1x8x128xf32, #tpu.memory_space<vmem>>, vector<1x8x128xf32>
      tpu.vector_store %arg18[%c0_6, %c0_7, %c0_8], %13 {strides = array<i32>} : memref<1x8x128xf32, #tpu.memory_space<vmem>>, vector<1x8x128xf32>,
    } else {
    }
    return
  }
  func.func @transform_0(%arg0: i32, %arg1: i32, %arg2: memref<1xi32, #tpu.memory_space<smem>>) -> (i32, i32, i32) {
    %0 = arith.index_cast %arg0 : i32 to index
    %1 = memref.load %arg2[%0] : memref<1xi32, #tpu.memory_space<smem>>
    %c1_i32 = arith.constant 1 : i32
    %2 = arith.subi %1, %c1_i32 : i32
    %c0_i32 = arith.constant 0 : i32
    %3 = arith.maxsi %2, %c0_i32 : i32
    %4 = arith.minsi %arg1, %3 : i32
    %c0_i32_0 = arith.constant 0 : i32
    %c0_i32_1 = arith.constant 0 : i32
    return %4, %arg0, %c0_i32_0 : i32, i32, i32
  }
  func.func @transform_1(%arg0: i32, %arg1: i32, %arg2: memref<1xi32, #tpu.memory_space<smem>>) -> (i32, i32, i32) {
    %c0_i32 = arith.constant 0 : i32
    %c0_i32_0 = arith.constant 0 : i32
    %c0_i32_1 = arith.constant 0 : i32
    return %arg0, %c0_i32, %c0_i32_0 : i32, i32, i32
  }
  func.func @transform_2(%arg0: i32, %arg1: i32, %arg2: memref<1xi32, #tpu.memory_space<smem>>) -> (i32, i32, i32) {
    %c0_i32 = arith.constant 0 : i32
    %c0_i32_0 = arith.constant 0 : i32
    %c0_i32_1 = arith.constant 0 : i32
    return %arg0, %c0_i32, %c0_i32_0 : i32, i32, i32
  }
  func.func @transform_3(%arg0: i32, %arg1: i32, %arg2: memref<1xi32, #tpu.memory_space<smem>>) -> (i32, i32) {
    %c0_i32 = arith.constant 0 : i32
    %c0_i32_0 = arith.constant 0 : i32
    return %arg0, %c0_i32 : i32, i32
  }
  func.func @transform_4(%arg0: i32, %arg1: i32, %arg2: memref<1xi32, #tpu.memory_space<smem>>) -> (i32, i32) {
    %c0_i32 = arith.constant 0 : i32
    %c0_i32_0 = arith.constant 0 : i32
    %c0_i32_1 = arith.constant 0 : i32
    return %c0_i32, %c0_i32_0 : i32, i32
  }
  func.func @transform_5(%arg0: i32, %arg1: i32, %arg2: memref<1xi32, #tpu.memory_space<smem>>) -> (i32, i32) {
    %c0_i32 = arith.constant 0 : i32
    %c0_i32_0 = arith.constant 0 : i32
    %c0_i32_1 = arith.constant 0 : i32
    return %c0_i32, %c0_i32_0 : i32, i32
  }
  func.func @transform_6(%arg0: i32, %arg1: i32, %arg2: memref<1xi32, #tpu.memory_space<smem>>) -> (i32, i32) {
    %c0_i32 = arith.constant 0 : i32
    %c0_i32_0 = arith.constant 0 : i32
    %c0_i32_1 = arith.constant 0 : i32
    return %c0_i32, %c0_i32_0 : i32, i32
  }
  func.func @transform_7(%arg0: i32, %arg1: i32, %arg2: memref<1xi32, #tpu.memory_space<smem>>) -> (i32, i32) {
    %c0_i32 = arith.constant 0 : i32
    %c0_i32_0 = arith.constant 0 : i32
    %c0_i32_1 = arith.constant 0 : i32
    return %c0_i32, %c0_i32_0 : i32, i32
  }
  func.func @transform_8(%arg0: i32, %arg1: i32, %arg2: memref<1xi32, #tpu.memory_space<smem>>) -> (i32, i32) {
    %c0_i32 = arith.constant 0 : i32
    %c0_i32_0 = arith.constant 0 : i32
    %c0_i32_1 = arith.constant 0 : i32
    return %c0_i32, %c0_i32_0 : i32, i32
  }
  func.func @transform_9(%arg0: i32, %arg1: i32, %arg2: memref<1xi32, #tpu.memory_space<smem>>) -> (i32, i32) {
    %c0_i32 = arith.constant 0 : i32
    %c0_i32_0 = arith.constant 0 : i32
    %c0_i32_1 = arith.constant 0 : i32
    return %c0_i32, %c0_i32_0 : i32, i32
  }
  func.func @transform_10(%arg0: i32, %arg1: i32, %arg2: memref<1xi32, #tpu.memory_space<smem>>) -> (i32, i32) {
    %c0_i32 = arith.constant 0 : i32
    %c0_i32_0 = arith.constant 0 : i32
    %c0_i32_1 = arith.constant 0 : i32
    return %c0_i32, %c0_i32_0 : i32, i32
  }
  func.func @transform_11(%arg0: i32, %arg1: i32, %arg2: memref<1xi32, #tpu.memory_space<smem>>) -> (i32, i32) {
    %c0_i32 = arith.constant 0 : i32
    %c0_i32_0 = arith.constant 0 : i32
    %c0_i32_1 = arith.constant 0 : i32
    return %c0_i32, %c0_i32_0 : i32, i32
  }
  func.func @transform_12(%arg0: i32, %arg1: i32, %arg2: memref<1xi32, #tpu.memory_space<smem>>) -> (i32, i32) {
    %c0_i32 = arith.constant 0 : i32
    %c0_i32_0 = arith.constant 0 : i32
    %c0_i32_1 = arith.constant 0 : i32
    return %c0_i32, %c0_i32_0 : i32, i32
  }
  func.func @transform_13(%arg0: i32, %arg1: i32, %arg2: memref<1xi32, #tpu.memory_space<smem>>) -> (i32, i32) {
    %c0_i32 = arith.constant 0 : i32
    %c0_i32_0 = arith.constant 0 : i32
    %c0_i32_1 = arith.constant 0 : i32
    return %c0_i32, %c0_i32_0 : i32, i32
  }
  func.func @transform_14(%arg0: i32, %arg1: i32, %arg2: memref<1xi32, #tpu.memory_space<smem>>) -> (i32, i32, i32) {
    %c0_i32 = arith.constant 0 : i32
    %c0_i32_0 = arith.constant 0 : i32
    return %arg1, %arg0, %c0_i32 : i32, i32, i32
  }
  func.func @transform_15(%arg0: i32, %arg1: i32, %arg2: memref<1xi32, #tpu.memory_space<smem>>) -> (i32, i32, i32) {
    %c0_i32 = arith.constant 0 : i32
    %c0_i32_0 = arith.constant 0 : i32
    return %arg1, %arg0, %c0_i32 : i32, i32, i32
  }
}

</mosaic_0001>

<bundles_post_ra>
// kernel: tpu_custom_call.1
= control target key start
LH: loop header
LB: loop body
LE: loop exit
PB: predicated region body
PF: predicated region fallthrough
CT: control target
= control target key end

     0   :  { %s8347_s0 = inlined_call_operand.<no memory space> [shape: s32[1], index: 0, kind: input, shape index: {}]   ;;  %s8348_s1 = inlined_call_operand.vmem [shape: bf16[7,8,16], index: 1, kind: input, shape index: {}]   ;;  %s8349_s2 = inlined_call_operand.vmem [shape: bf16[8,128,4], index: 2, kind: input, shape index: {}]   ;;  %s8350_s3 = inlined_call_operand.vmem [shape: bf16[8,128,32], index: 3, kind: input, shape index: {}]   ;;  %s8351_s4 = inlined_call_operand.vmem [shape: s32[8,1], index: 4, kind: input, shape index: {}]   ;;  %s8352_s5 = inlined_call_operand.vmem [shape: bf16[16,128], index: 5, kind: input, shape index: {}]   ;;  %s8353_s6 = inlined_call_operand.vmem [shape: bf16[32,128], index: 6, kind: input, shape index: {}]   ;;  %s8354_s7 = inlined_call_operand.vmem [shape: f32[1,128], index: 7, kind: input, shape index: {}]   ;;  %s8355_s8 = inlined_call_operand.vmem [shape: bf16[32,32], index: 8, kind: input, shape index: {}]   ;;  %s8356_s9 = inlined_call_operand.vmem [shape: f32[1,32], index: 9, kind: input, shape index: {}]   ;;  %s8357_s10 = inlined_call_operand.vmem [shape: f32[1,32], index: 10, kind: input, shape index: {}]   ;;  %s8358_s11 = inlined_call_operand.<no memory space> [shape: f32[1,1], index: 11, kind: input, shape index: {}]   ;;  %s8359_s12 = inlined_call_operand.vmem [shape: bf16[32,128], index: 12, kind: input, shape index: {}]   ;;  %s8360_s13 = inlined_call_operand.vmem [shape: bf16[4,128], index: 13, kind: input, shape index: {}]   ;;  %s8361_s14 = inlined_call_operand.vmem [shape: f32[1,128], index: 14, kind: input, shape index: {}]   ;;  %s8362_s15 = inlined_call_operand.hbm [shape: f32[7,8,128], index: 15, kind: output, shape index: {0}]   ;;  %s8363_s16 = inlined_call_operand.hbm [shape: f32[7,8,128], index: 16, kind: output, shape index: {1}]  }
   0x1   :  { %8396 = sst [smem:[#allocation33_spill]] %s8347_s0  ;;  %v23_v0 = vstv %s8358_s11 }
   0x2   :  { %8397 = sst [smem:[#allocation34_spill]] %s8348_s1  ;;  %24 = vst [vmem:[#allocation6] sm:$0x1] %v23_v0 }
   0x3   :  { %8398 = sst [smem:[#allocation35_spill]] %s8349_s2 }
   0x4   :  { %8399 = sst [smem:[#allocation36_spill]] %s8350_s3 }
   0x5   :  { %8400 = sst [smem:[#allocation37_spill]] %s8352_s5 }
   0x6   :  { %s8401_s23 = sld [smem:[#allocation33_spill]] }
   0xc   :  { %22 = sst [smem:[#allocation5]] %s8401_s23 }
   0xd   :  { %25 = vsyncpa [#allocation8], 0 }
   0xe   :  { %27 = vsyncpa [#allocation8 + $0x1], 0 }
   0xf   :  { %28 = vsyncpa [#allocation10], 0 }
  0x10   :  { %30 = vsyncpa [#allocation10 + $0x1], 0  ;;  %s5557_s26 = smov 0   ;;  %s5559_s27 = smov 0  }
  0x11   :  { %s5561_s28 = smov 0   ;;  %s5563_s29 = smov 0  }
  0x12   :  { %s5565_s30 = smov 0   ;;  %s5567_s0 = smov 0  }
  0x13 LB: > { %8402 = sst [smem:[#allocation13_spill]] %s5441_s28  ;;  %s4527_s11 = sadd.s32 4294967295, %s5453_s0   ;;  %s5453_s0 = sphi %s5567_s0, %s36_s0   ;;  %s5449_s30 = sphi %s5565_s30, %s8563_s30   ;;  %s5445_s29 = sphi %s5563_s29, %s8562_s29   ;;  %s5441_s28 = sphi %s5561_s28, %s8561_s28   ;;  %s5437_s27 = sphi %s5559_s27, %s8565_s27   ;;  %s5433_s26 = sphi %s5557_s26, %s8564_s26  }
  0x14   : > { %8403 = sst [smem:[#allocation14_spill]] %s5449_s30  ;;  %s4528_s17 = sadd.s32 4294967294, %s5453_s0  }
  0x15   : > { %s45_s18 = sadd.s32 1, %s5449_s30  ;;  %s385_s19 = sadd.s32 1, %s5441_s28 }
  0x16   : > { %p46_p0 = scmp.ge.s32.totalorder %s45_s18, 7  ;;  %p395_p1 = scmp.ne.s32.totalorder %s5441_s28, %s5437_s27 }
  0x17   : > { %p396_p2 = scmp.eq.s32.totalorder %s4527_s11, 6  ;;  %p401_p3 = scmp.ne.s32.totalorder %s5437_s27, %s5433_s26 }
  0x18   : > { %s8567_s18 = smov (%p46_p0, %s45_s18), 0  ;;  %p402_p5 = scmp.eq.s32.totalorder %s4528_s17, 6 }
  0x19   : > { %8404 = sst [smem:[#allocation15_spill]] %s8567_s18  ;;  %p5597_p4 = por %p396_p2, %p395_p1 }
  0x1a   : > { %s380_s21 = ssub.s32 %s5449_s30, %s8567_s18  ;;  %p4536_p6 = scmp.ge.s32.totalorder %s5453_s0, 1 }
  0x1b   : > { %p383_p7 = scmp.eq.s32.totalorder %s380_s21, 0  ;;  %p5604_p8 = por %p402_p5, %p401_p3 }
  0x1c   : > { %p527_p9 = scmp.lt.s32.totalorder %s5453_s0, 8 }
  0x1d   : > { %s8406_s22 = scalar_select %p5604_p8, 1, 0 }
  0x1e   : > { %s5610_s23 = scalar_select %p383_p7, %s5441_s28, %s385_s19  }
  0x1f   : > { %8407 = sst [smem:[#allocation16_spill]] %s8406_s22  ;;  %p528_p10 = pnand %p4536_p6, %p527_p9 }
  0x20   : > { %8408 = sst [smem:[#allocation17_spill]] %s5610_s23  ;;  %s5613_s24 = sand.u32 (!%p528_p10), 1, %s5437_s27  }
  0x21   : > { %531 = sbr.rel (%p528_p10) target bundleno = 2363 (0x93b), region = 76  ;;  %s604_s25 = sld [smem:[#allocation5]] (!%p528_p10) }
  0x22   : > { %s4537_s11 = sshll.u32 (!%p528_p10), %s5613_s24, 3  ;;  %s8409_s1 = sld [smem:[#allocation34_spill]] (!%p528_p10) }
  0x23   : > { %s5621_s28 = scalar_lea.vmem (!%p528_p10), [#allocation7], %s4537_s11  ;;  %s5623_s22 = scalar_lea.vmem (!%p528_p10), [#allocation9], %s4537_s11 }
  0x24   : > { %p4541_p0 = scmp.ne.s32.totalorder (!%p528_p10), %s5445_s29, 0 }
  0x27   : > { %s4539_s17 = sadd.s32 4294967295, %s604_s25 }
  0x28   : > { %p606_p11 = scmp.gt.s32.totalorder %s4539_s17, 0 }
  0x2a   : > { %s8569_s17 = smov (!%p606_p11, %s4539_s17), 0 }
  0x2b   : > { %p608_p12 = scmp.lt.s32.totalorder %s5445_s29, %s8569_s17 }
  0x2d   : > { %s609_s21 = scalar_select %p608_p12, %s5445_s29, %s8569_s17 }
  0x2f   : > { %p610_p13 = scmp.lt.s32.totalorder %s609_s21, 6  ;;  %645 = sbr.rel (%p4541_p0) target bundleno = 54 (0x36), region = 80 }
  0x31   : > { %s8571_s21 = smov (!%p610_p13, %s609_s21), 6 }
  0x32   : > { %s4540_s18 = sshll.u32 %s8571_s21, 2 }
  0x33   : > { %s616_s23 = scalar_lea.vmem %s8409_s1, %s4540_s18 }
  0x34   : > { %vm646_vm0 = vcmask 261120   ;;  %v5455_v1 = vmov 0.0  }
  0x35   : > { %647 = vst.msk [vmem:[#allocation2] sm:$0xff] %vm646_vm0, %v5455_v1  ;;  %648 = vst.msk [vmem:[#allocation3] sm:$0xff] %vm646_vm0, %v5455_v1 }
  0x36 PF: > { %s5626_s25 = sld [smem:[#allocation5]] }
  0x3c   : > { %p4542_p1 = scmp.ge.s32.totalorder %s5445_s29, %s5626_s25 }
  0x3e   : > { %653 = sbr.rel (%p4542_p1) target bundleno = 2308 (0x904), region = 84 }
  0x43   : > { %v5326_v2 = vld [vmem:[%s8353_s6 + $0x8] sm:$0xff]   ;;  %v5456_v3 = vmov 0.0   ;;  %s8410_s5 = sld [smem:[#allocation37_spill]]  ;;  %vm5457_vm1 = vmmov 0   ;;  %v656_v5 = vld [vmem:[%s616_s23] sm:$0xf]  ;;  %v1019_v45 = vlaneseq }
  0x44   : > { %5219 = vmatprep.subr.bf16.mxu0 %v5456_v3  ;;  %5227 = vmatprep.subr.bf16.mxu1 %v5456_v3  ;;  %v5328_v6 = vld [vmem:[%s8353_s6] sm:$0xff]   ;;  %vm726_vm2 = vcmask 130048   ;;  %vm8378_vm3 = vcmask 261120   ;;  %s5458_s18 = smov 64   ;;  %v655_v21 = vld [vmem:[#allocation3] sm:$0xff]  ;;  %s8368_s11 = smov 32  }
  0x45   : > { %5220 = vmatpush3.bf16.msra.mxu0 %v5326_v2  ;;  %5229 = vmatprep.mubr.msk.bf16.mxu1 %vm5457_vm1, %v5456_v3  ;;  %v654_v7 = vld [vmem:[#allocation2] sm:$0xff]  ;;  %v5329_v32 = vld [vmem:[%s8355_s8 + $0x8] sm:$0xff]   ;;  %v4555_v36 = vld [vmem:[#allocation6] ss:$0 sm:$0xff]  ;;  %v8369_v38 = vmov 0   ;;  %v5688_v47 = vshrl.u32 %v1019_v45, 7 }
  0x46   : > { %5221 = vmatprep.subr.bf16.mxu0 %v5456_v3  ;;  %5223 = vmatprep.mubr.msk.bf16.mxu0 %vm5457_vm1, %v5456_v3  ;;  %v659_v8 = vpack.c.bf16 %v654_v7, %v654_v7  ;;  %v4548_v12 = vld [vmem:[%s8354_s7] ss:$0 sm:$0xff]  ;;  %v5331_v40 = vld [vmem:[%s8359_s12 + $0x8] sm:$0xff]   ;;  %v5461_v43 = vmov 1966171168   ;;  %s8414_s3 = sld [smem:[#allocation36_spill]] }
  0x47   : > { %v5330_v33 = vld [vmem:[%s8355_s8] sm:$0xff]   ;;  %5324 = vset.pattern.permute.xlu1 %v8369_v38  ;;  %5325 = vset.pattern.permute.xlu0 %v8369_v38  ;;  %v1017_v44 = vunpack.c.l.s4 %v5461_v43  ;;  %8413 = vst [vmem:[#allocation20_spill] sm:$0xff] %v5688_v47  ;;  %v5703_v56 = vsub.s32 0, %v5688_v47  ;;  %vm2287_vm4 = vcmask 130112   ;;  %vm2294_vm5 = vcmask 195712   ;;  %s8459_s2 = sld [smem:[#allocation35_spill]] }
  0x48   : > { %v5332_v42 = vld [vmem:[%s8359_s12] sm:$0xff]   ;;  %vm2301_vm6 = vcmask 261312   ;;  %vm2308_vm7 = vcmask 326912   ;;  %vm2315_vm8 = vcmask 392512   ;;  %vm2322_vm9 = vcmask 458112   ;;  %s8526_s17 = smov 32  }
  0x49   : > { %v5327_v4 = vld [vmem:[%s8410_s5] sm:$0xff]   ;;  %5222 = vmatpush3.bf16.msra.mxu0 %v5328_v6  ;;  %v1018_v46 = vunpack.c.0.s8 %v1017_v44  ;;  %8415 = vst [vmem:[#allocation21_spill] sm:$0xff] %v5703_v56  ;;  %vm2329_vm10 = vcmask 523712   ;;  %vm8370_vm11 = vcmask 589312   ;;  %vm2343_vm12 = vcmask 654912   ;;  %s5462_s21 = smov 96  }
  0x4a   : > { %5228 = vmatpush3.bf16.msra.mxu1 %v5327_v4  ;;  %5241 = vmatprep.subr.bf16.mxu0 %v5456_v3  ;;  %v4550_v48 = vld [vmem:[%s8356_s9] ss:$0 sm:$0xff]  ;;  %vm2350_vm13 = vcmask 720512   ;;  %vm2357_vm14 = vcmask 786112   ;;  %vm2364_vm15 = vcmask 851712   ;;  %vm2371_vm0 = vcmask 917312  }
  0x4b   : > { %5233 = vmatprep.subr.bf16.mxu1 %v5456_v3  ;;  %v5694_v49 = vsub.s32 %v1018_v46, %v5688_v47 }
  0x4c   : > { %5224 = vmatmul.mubr.msk.bf16.vlgmr.msra.gmra.mxu0 %vm8378_vm3, %v659_v8  ;;  %v4569_v55 = vld [vmem:[%s8414_s3] sm:$0xff]   ;;  %v5080_v60 = vld [vmem:[%s8414_s3 + $0x8] sm:$0xff]   ;;  %v5081_v61 = vld [vmem:[%s8414_s3 + $0x10] sm:$0xff]  }
  0x4d   : > { %5230 = vmatmul.mubr.msk.bf16.vlgmr.msra.gmra.mxu1 %vm726_vm2, %v656_v5  ;;  %5243 = vmatprep.mubr.msk.bf16.mxu0 %vm5457_vm1, %v5456_v3  ;;  %v4571_v63 = vunpack.c.h.bf16 %v4569_v55  ;;  %v4570_v0 = vunpack.c.l.bf16 %v4569_v55  ;;  %v4574_v4 = vunpack.c.l.bf16 %v5080_v60  ;;  %v4578_v5 = vunpack.c.l.bf16 %v5081_v61  ;;  %v5082_v6 = vld [vmem:[%s8414_s3 + $0x18] sm:$0xff]   ;;  %v5083_v7 = vld [vmem:[%s8414_s3 + $0x20] sm:$0xff]  }
  0x4e   : > { %5237 = vmatprep.mubr.msk.bf16.mxu1 %vm5457_vm1, %v5456_v3  ;;  %5234 = vmatpush3.bf16.msra.mxu1 %v5329_v32  ;;  %v4587_v46 = vunpack.c.h.bf16 %v5083_v7  ;;  %vm2385_vm2 = vcmask 1048512  }
  0x4f   : > { %5235 = vmatprep.subr.bf16.mxu1 %v5456_v3 }
  0x52   : > { %5236 = vmatpush3.bf16.msra.mxu1 %v5330_v33 }
  0x53   : > { %5247 = vmatprep.subr.bf16.mxu1 %v5456_v3 }
 0x10c   : > { %v714_v11 = vpop.f32.mrf.mxu0 }
 0x10d   : > { %v764_v9 = vpop.f32.mrf.mxu1 }
 0x10e   : > { %v765_v13 = vadd.f32 %v764_v9, %v714_v11  ;;  %v5225_v15 = vpop.f32.mrf.mxu0  ;;  %v4575_v9 = vunpack.c.h.bf16 %v5080_v60 }
 0x10f   : > { %v5231_v10 = vpop.f32.mrf.mxu1  ;;  %v5745_v15 = vld [vmem:[%s8357_s10] ss:$0 sm:$0xff] }
 0x110   : > { %v777_v16 = vadd.f32 %v4548_v12, %v765_v13  ;;  %v717_v18 = vpop.f32.mrf.mxu0  ;;  %v4579_v10 = vunpack.c.h.bf16 %v5081_v61 }
 0x111   : > { %v767_v14 = vpop.f32.mrf.mxu1 }
 0x112   : > { %5333 = vtanh.f32 %v777_v16  ;;  %v5226_v19 = vpop.f32.mrf.mxu0  ;;  %v4549_v22 = vmul.f32 -1.442695, %v777_v16  ;;  %v5740_v14 = vld [vmem:[%s8414_s3 + $0x28] sm:$0xff]   ;;  %v4582_v16 = vunpack.c.l.bf16 %v5082_v6 }
 0x113   : > { %v5232_v17 = vpop.f32.mrf.mxu1 }
 0x114   : > { %5335 = vpow2.f32 %v4549_v22  ;;  %v4586_v17 = vunpack.c.l.bf16 %v5083_v7  ;;  %v5087_v7 = vld [vmem:[%s8414_s3 + $0x40] sm:$0xff]  }
 0x11f   : > { %v5334_v20 = vpop.eup %5333 }
 0x120   : > { %791 = vrot.lane.b32.xlu0 %v5334_v20, %s5458_s18 }
 0x121   : > { %v5336_v23 = vpop.eup %5335 }
 0x122   : > { %v781_v24 = vadd.f32 1.0, %v5336_v23 }
 0x124   : > { %786 = vrot.lane.b32.xlu0 %v655_v21, %s8368_s11  ;;  %5337 = vrcp.f32 %v781_v24 }
 0x131   : > { %v5338_v25 = vpop.eup %5337 }
 0x192   : > { %v792_v26 = vpop.permute.xlu0 %791 }
 0x193   : > { %v794_v27 = vmul.f32 %v5338_v25, %v792_v26  ;;  %v4591_v26 = vunpack.c.h.bf16 %v5740_v14 }
 0x195   : > { %796 = vrot.lane.b32.xlu1 %v794_v27, %s8368_s11 }
 0x196   : > { %v787_v28 = vpop.permute.xlu0 %786 }
 0x197   : > { %v789_v29 = vmul.f32 %v5338_v25, %v787_v28 }
 0x207   : > { %v797_v30 = vpop.permute.xlu1 %796 }
 0x208   : > { %v5658_v31 = vadd.f32 %v797_v30, %v789_v29 }
 0x20a   : > { %8411 = vst [vmem:[#allocation18_spill] sm:$0xff] %v5658_v31  ;;  %5339 = vtanh.f32 %v5658_v31 }
 0x217   : > { %v5340_v34 = vpop.eup %5339 }
 0x218   : > { %802 = vrot.lane.b32.xlu1 %v5340_v34, %s5458_s18 }
 0x21c   : > { %2014 = vperm.xlu1 %5324, %v4555_v36  }
 0x28a   : > { %v803_v35 = vpop.permute.xlu1 %802 }
 0x28b   : > { %v5669_v37 = vmul.f32 %v5338_v25, %v803_v35  ;;  %v4583_v25 = vunpack.c.h.bf16 %v5082_v6  ;;  %v5086_v6 = vld [vmem:[%s8414_s3 + $0x38] sm:$0xff]  }
 0x28d   : > { %8412 = vst [vmem:[#allocation19_spill] sm:$0xff] %v5669_v37  ;;  %v816_v39 = vpack.c.bf16 %v5669_v37, %v5669_v37 }
 0x28f   : > { %829 = vrot.lane.b32.xlu0 %v816_v39, %s8368_s11  ;;  %v5085_v39 = vld [vmem:[%s8414_s3 + $0x30] sm:$0xff]  }
 0x301   : > { %v830_v41 = vpop.permute.xlu0 %829 }
 0x302   : > { %5238 = vmatmul.mubr.msk.bf16.vlgmr.msra.gmra.mxu1 %vm8378_vm3, %v830_v41 }
 0x303   : > { %5248 = vmatpush3.bf16.msra.mxu1 %v5331_v40  ;;  %5251 = vmatprep.mubr.msk.bf16.mxu1 %vm5457_vm1, %v5456_v3  ;;  %vm2378_vm1 = vcmask 982912  }
 0x304   : > { %5249 = vmatprep.subr.bf16.mxu1 %v5456_v3 }
 0x307   : > { %5250 = vmatpush3.bf16.msra.mxu1 %v5332_v42 }
 0x30a   : > { %5252 = vmatmul.mubr.msk.bf16.vlgmr.msra.gmra.mxu1 %vm8378_vm3, %v830_v41 }
 0x3c2   : > { %v880_v50 = vpop.f32.mrf.mxu1 }
 0x3c3   : > { %v881_v51 = vadd.f32 %v4550_v48, %v880_v50  ;;  %v4594_v48 = vunpack.c.l.bf16 %v5085_v39 }
 0x3c4   : > { %v5239_v52 = vpop.f32.mrf.mxu1 }
 0x3c5   : > { %v1015_v53 = vcombine.high %v881_v51, %v881_v51  ;;  %v5697_v54 = vrot.slane %v881_v51, %v5694_v49 }
 0x3c6   : > { %v883_v57 = vpop.f32.mrf.mxu1 }
 0x3c7   : > { %v5706_v58 = vrot.slane %v1015_v53, %v5694_v49  ;;  %v5710_v59 = vrot.slane %v5697_v54, %v5694_v49  ;;  %v1030_v44 = vcombine.high %v5697_v54, %v5697_v54 }
 0x3c8   : > { %v5240_v62 = vpop.f32.mrf.mxu1 }
 0x3c9   : > { %v1031_v1 = vcombine.high %v5706_v58, %v5706_v58  ;;  %v5722_v2 = vrot.slane %v5710_v59, %v5703_v56  ;;  %v5772_v54 = vrot.slane %v1030_v44, %v5694_v49  ;;  %v4590_v62 = vunpack.c.l.bf16 %v5740_v14 }
 0x3ca   : > { %v5724_v3 = vpop.f32.mrf.mxu1 }
 0x3cb   : > { %8416 = vst [vmem:[#allocation22_spill] sm:$0xff] %v5724_v3  ;;  %v5733_v8 = vrot.slane %v1031_v1, %v5694_v49  ;;  %v1233_v12 = vadd.f32 %v4571_v63, %v5722_v2  ;;  %v1232_v13 = vadd.f32 %v4570_v0, %v5722_v2  ;;  %v1234_v21 = vadd.f32 %v4574_v4, %v5722_v2 }
 0x3cc   : > { %v5253_v11 = vpop.f32.mrf.mxu1  ;;  %v1236_v22 = vadd.f32 %v4578_v5, %v5722_v2  ;;  %v1235_v23 = vadd.f32 %v4575_v9, %v5722_v2  ;;  %v1237_v24 = vadd.f32 %v4579_v10, %v5722_v2  ;;  %v1238_v35 = vadd.f32 %v4582_v16, %v5722_v2 }
 0x3cd   : > { %v1361_v19 = vmax.f32 %v1233_v12, 0.0  ;;  %v1360_v20 = vmax.f32 %v1232_v13, 0.0  ;;  %v1362_v30 = vmax.f32 %v1234_v21, 0.0  ;;  %v1240_v36 = vadd.f32 %v4586_v17, %v5722_v2 }
 0x3ce   : > { %v4315_v18 = vpop.f32.mrf.mxu1  ;;  %v1364_v32 = vmax.f32 %v1236_v22, 0.0  ;;  %v1363_v33 = vmax.f32 %v1235_v23, 0.0  ;;  %v1365_v34 = vmax.f32 %v1237_v24, 0.0  ;;  %v1366_v52 = vmax.f32 %v1238_v35, 0.0  ;;  %v5800_v22 = vld [vmem:[%s8414_s3 + $0x80] sm:$0xff]  }
 0x3cf   : > { %v1496_v28 = vmul.f32 %v5745_v15, %v1361_v19  ;;  %v1495_v29 = vmul.f32 %v5745_v15, %v1360_v20  ;;  %v1497_v42 = vmul.f32 %v5745_v15, %v1362_v30  ;;  %v1368_v53 = vmax.f32 %v1240_v36, 0.0 }
 0x3d0   : > { %v5254_v27 = vpop.f32.mrf.mxu1  ;;  %v1499_v43 = vmul.f32 %v5745_v15, %v1364_v32  ;;  %v1498_v50 = vmul.f32 %v5745_v15, %v1363_v33  ;;  %v1500_v51 = vmul.f32 %v5745_v15, %v1365_v34  ;;  %v1239_v60 = vadd.f32 %v4583_v25, %v5722_v2  ;;  %v5813_v34 = vld [vmem:[%s8414_s3 + $0x88] sm:$0xff]  }
 0x3d1   : > { %v1626_v40 = vsel %vm8378_vm3, %v1496_v28, 0.0  ;;  %v1623_v41 = vsel %vm8378_vm3, %v1495_v29, 0.0  ;;  %v1629_v55 = vsel %vm8378_vm3, %v1497_v42, 0.0  ;;  %v1243_v61 = vadd.f32 %v4591_v26, %v5722_v2 }
 0x3d2   : > { %1627 = vadd.xlane.f32.xlu0 %v1626_v40  ;;  %1624 = vadd.xlane.f32.xlu1 %v1623_v41  ;;  %v1635_v57 = vsel %vm8378_vm3, %v1499_v43, 0.0  ;;  %v4595_v63 = vunpack.c.h.bf16 %v5085_v39  ;;  %v1632_v0 = vsel %vm8378_vm3, %v1498_v50, 0.0  ;;  %v1638_v1 = vsel %vm8378_vm3, %v1500_v51, 0.0  ;;  %v5088_v50 = vld [vmem:[%s8414_s3 + $0x48] sm:$0xff]   ;;  %v5089_v51 = vld [vmem:[%s8414_s3 + $0x50] sm:$0xff]  }
 0x3d3   : > { %v1501_v4 = vmul.f32 %v5745_v15, %v1366_v52  ;;  %v1503_v5 = vmul.f32 %v5745_v15, %v1368_v53  ;;  %v1367_v9 = vmax.f32 %v1239_v60, 0.0  ;;  %v1371_v10 = vmax.f32 %v1243_v61, 0.0 }
 0x3d4   : > { %v1241_v11 = vadd.f32 %v4587_v46, %v5722_v2  ;;  %v1244_v12 = vadd.f32 %v4594_v48, %v5722_v2  ;;  %v1060_v13 = vcombine.high %v5710_v59, %v5710_v59  ;;  %v5791_v14 = vrot.slane %v5772_v54, %v5703_v56 }
 0x3d5   : > { %v4598_v16 = vunpack.c.l.bf16 %v5086_v6  ;;  %v4602_v17 = vunpack.c.l.bf16 %v5087_v7  ;;  %v1641_v18 = vsel %vm8378_vm3, %v1501_v4, 0.0  ;;  %v1647_v19 = vsel %vm8378_vm3, %v1503_v5, 0.0 }
 0x3d6   : > { %1630 = vadd.xlane.f32.xlu0 %v1629_v55  ;;  %1636 = vadd.xlane.f32.xlu1 %v1635_v57  ;;  %v1242_v20 = vadd.f32 %v4590_v62, %v5722_v2  ;;  %v1245_v21 = vadd.f32 %v4595_v63, %v5722_v2  ;;  %v1502_v59 = vmul.f32 %v5745_v15, %v1367_v9  ;;  %v1369_v24 = vmax.f32 %v1241_v11, 0.0 }
 0x3d7   : > { %v1506_v23 = vmul.f32 %v5745_v15, %v1371_v10  ;;  %v1372_v25 = vmax.f32 %v1244_v12, 0.0  ;;  %v5805_v26 = vrot.slane %v1060_v13, %v5703_v56  ;;  %v4599_v27 = vunpack.c.h.bf16 %v5086_v6 }
 0x3d8   : > { %v4634_v28 = vunpack.c.l.bf16 %v5800_v22  ;;  %v1370_v29 = vmax.f32 %v1242_v20, 0.0  ;;  %v1373_v30 = vmax.f32 %v1245_v21, 0.0  ;;  %v1246_v32 = vadd.f32 %v4598_v16, %v5722_v2 }
 0x3d9   : > { %v1248_v33 = vadd.f32 %v4602_v17, %v5791_v14  ;;  %v1644_v35 = vsel %vm8378_vm3, %v1502_v59, 0.0  ;;  %v1656_v36 = vsel %vm8378_vm3, %v1506_v23, 0.0  ;;  %v1504_v39 = vmul.f32 %v5745_v15, %v1369_v24 }
 0x3da   : > { %1633 = vadd.xlane.f32.xlu0 %v1632_v0  ;;  %1639 = vadd.xlane.f32.xlu1 %v1638_v1  ;;  %v1507_v40 = vmul.f32 %v5745_v15, %v1372_v25  ;;  %v4603_v41 = vunpack.c.h.bf16 %v5087_v7  ;;  %v4638_v42 = vunpack.c.l.bf16 %v5813_v34  ;;  %v1505_v43 = vmul.f32 %v5745_v15, %v1370_v29 }
 0x3db   : > { %v1508_v44 = vmul.f32 %v5745_v15, %v1373_v30  ;;  %v1374_v46 = vmax.f32 %v1246_v32, 0.0  ;;  %v1376_v48 = vmax.f32 %v1248_v33, 0.0  ;;  %v1650_v52 = vsel %vm8378_vm3, %v1504_v39, 0.0 }
 0x3dc   : > { %v1659_v53 = vsel %vm8378_vm3, %v1507_v40, 0.0  ;;  %v1247_v55 = vadd.f32 %v4599_v27, %v5722_v2  ;;  %v1264_v57 = vadd.f32 %v4634_v28, %v5805_v26  ;;  %v5834_v60 = vrot.slane %v5706_v58, %v5694_v49  ;;  %v5843_v2 = vld [vmem:[%s8414_s3 + $0x100] sm:$0xff]   ;;  %v5097_v27 = vld [vmem:[%s8414_s3 + $0x90] sm:$0xff]  }
 0x3dd   : > { %v4606_v61 = vunpack.c.l.bf16 %v5088_v50  ;;  %v4610_v62 = vunpack.c.l.bf16 %v5089_v51  ;;  %v1653_v63 = vsel %vm8378_vm3, %v1505_v43, 0.0  ;;  %v1662_v0 = vsel %vm8378_vm3, %v1508_v44, 0.0 }
 0x3de   : > { %1642 = vadd.xlane.f32.xlu0 %v1641_v18  ;;  %1648 = vadd.xlane.f32.xlu1 %v1647_v19  ;;  %v1509_v1 = vmul.f32 %v5745_v15, %v1374_v46  ;;  %v1511_v4 = vmul.f32 %v5745_v15, %v1376_v48  ;;  %v1375_v5 = vmax.f32 %v1247_v55, 0.0  ;;  %v1392_v6 = vmax.f32 %v1264_v57, 0.0  ;;  %v5886_v57 = vld [vmem:[%s8414_s3 + $0x98] sm:$0xff]  }
 0x3df   : > { %v1249_v49 = vadd.f32 %v4603_v41, %v5791_v14  ;;  %v1266_v58 = vadd.f32 %v4638_v42, %v5805_v26  ;;  %v5849_v7 = vrot.slane %v5834_v60, %v5703_v56  ;;  %v4635_v9 = vunpack.c.h.bf16 %v5800_v22  ;;  %v5112_v42 = vld [vmem:[%s8414_s3 + $0x108] sm:$0xff]  }
 0x3e0   : > { %v4699_v10 = vunpack.c.h.bf16 %v5843_v2  ;;  %v1665_v11 = vsel %vm8378_vm3, %v1509_v1, 0.0  ;;  %v1671_v12 = vsel %vm8378_vm3, %v1511_v4, 0.0  ;;  %v1250_v13 = vadd.f32 %v4606_v61, %v5791_v14 }
 0x3e1   : > { %v1252_v16 = vadd.f32 %v4610_v62, %v5791_v14  ;;  %v1510_v17 = vmul.f32 %v5745_v15, %v1375_v5  ;;  %v1527_v18 = vmul.f32 %v5745_v15, %v1392_v6  ;;  %v1377_v19 = vmax.f32 %v1249_v49, 0.0 }
 0x3e2   : > { %1645 = vadd.xlane.f32.xlu0 %v1644_v35  ;;  %1657 = vadd.xlane.f32.xlu1 %v1656_v36  ;;  %v1394_v20 = vmax.f32 %v1266_v58, 0.0  ;;  %v4607_v21 = vunpack.c.h.bf16 %v5088_v50  ;;  %v4611_v22 = vunpack.c.h.bf16 %v5089_v51  ;;  %v1378_v59 = vmax.f32 %v1250_v13, 0.0  ;;  %v5898_v58 = vld [vmem:[%s8414_s3 + $0x110] sm:$0xff]  }
 0x3e3   : > { %v1380_v23 = vmax.f32 %v1252_v16, 0.0  ;;  %v1265_v24 = vadd.f32 %v4635_v9, %v5805_v26  ;;  %v1297_v25 = vadd.f32 %v4699_v10, %v5849_v7  ;;  %v1668_v28 = vsel %vm8378_vm3, %v1510_v17, 0.0 }
 0x3e4   : > { %v1719_v29 = vsel %vm8378_vm3, %v1527_v18, 0.0  ;;  %v1512_v30 = vmul.f32 %v5745_v15, %v1377_v19  ;;  %v1529_v32 = vmul.f32 %v5745_v15, %v1394_v20  ;;  %v4639_v33 = vunpack.c.h.bf16 %v5813_v34 }
 0x3e5   : > { %v4643_v35 = vunpack.c.h.bf16 %v5097_v27  ;;  %v1513_v36 = vmul.f32 %v5745_v15, %v1378_v59  ;;  %v1515_v39 = vmul.f32 %v5745_v15, %v1380_v23  ;;  %v1393_v40 = vmax.f32 %v1265_v24, 0.0 }
 0x3e6   : > { %1651 = vadd.xlane.f32.xlu0 %v1650_v52  ;;  %1660 = vadd.xlane.f32.xlu1 %v1659_v53  ;;  %v1425_v41 = vmax.f32 %v1297_v25, 0.0  ;;  %v1674_v43 = vsel %vm8378_vm3, %v1512_v30, 0.0  ;;  %v1725_v44 = vsel %vm8378_vm3, %v1529_v32, 0.0  ;;  %v1251_v46 = vadd.f32 %v4607_v21, %v5791_v14  ;;  %v5091_v21 = vld [vmem:[%s8414_s3 + $0x60] sm:$0xff]  }
 0x3e7   : > { %v1253_v48 = vadd.f32 %v4611_v22, %v5791_v14  ;;  %v4703_v34 = vunpack.c.h.bf16 %v5112_v42  ;;  %v4698_v50 = vunpack.c.l.bf16 %v5843_v2  ;;  %v1677_v51 = vsel %vm8378_vm3, %v1513_v36, 0.0  ;;  %v5090_v22 = vld [vmem:[%s8414_s3 + $0x58] sm:$0xff]  }
 0x3e8   : > { %v1683_v52 = vsel %vm8378_vm3, %v1515_v39, 0.0  ;;  %v1528_v53 = vmul.f32 %v5745_v15, %v1393_v40  ;;  %v1560_v55 = vmul.f32 %v5745_v15, %v1425_v41  ;;  %v1379_v61 = vmax.f32 %v1251_v46, 0.0 }
 0x3e9   : > { %v1381_v62 = vmax.f32 %v1253_v48, 0.0  ;;  %v4646_v1 = vunpack.c.l.bf16 %v5886_v57  ;;  %v4642_v4 = vunpack.c.l.bf16 %v5097_v27  ;;  %v1299_v6 = vadd.f32 %v4703_v34, %v5849_v7  ;;  %v5099_v34 = vld [vmem:[%s8414_s3 + $0xa0] sm:$0xff]  }
 0x3ea   : > { %1654 = vadd.xlane.f32.xlu0 %v1653_v63  ;;  %1663 = vadd.xlane.f32.xlu1 %v1662_v0  ;;  %v1267_v63 = vadd.f32 %v4639_v33, %v5805_v26  ;;  %v1269_v0 = vadd.f32 %v4643_v35, %v5805_v26  ;;  %v1722_v2 = vsel %vm8378_vm3, %v1528_v53, 0.0  ;;  %v1818_v5 = vsel %vm8378_vm3, %v1560_v55, 0.0 }
 0x3eb   : > { %v1296_v49 = vadd.f32 %v4698_v50, %v5849_v7  ;;  %v1514_v9 = vmul.f32 %v5745_v15, %v1379_v61  ;;  %v1516_v10 = vmul.f32 %v5745_v15, %v1381_v62  ;;  %v4706_v13 = vunpack.c.l.bf16 %v5898_v58 }
 0x3ec   : > { %v4702_v16 = vunpack.c.l.bf16 %v5112_v42  ;;  %v1427_v17 = vmax.f32 %v1299_v6, 0.0  ;;  %v1270_v19 = vadd.f32 %v4646_v1, %v5805_v26  ;;  %v1268_v20 = vadd.f32 %v4642_v4, %v5805_v26  ;;  %v5938_v4 = vld [vmem:[%s8414_s3 + $0x68] sm:$0xff]  }
 0x3ed   : > { %v1424_v18 = vmax.f32 %v1296_v49, 0.0  ;;  %v1680_v59 = vsel %vm8378_vm3, %v1514_v9, 0.0  ;;  %v1686_v23 = vsel %vm8378_vm3, %v1516_v10, 0.0  ;;  %v4618_v27 = vunpack.c.l.bf16 %v5091_v21 }
 0x3ee   : > { %1666 = vadd.xlane.f32.xlu1 %v1665_v11  ;;  %1672 = vadd.xlane.f32.xlu0 %v1671_v12  ;;  %v1395_v11 = vmax.f32 %v1267_v63, 0.0  ;;  %v1397_v12 = vmax.f32 %v1269_v0, 0.0  ;;  %v1398_v32 = vmax.f32 %v1270_v19, 0.0  ;;  %v1396_v33 = vmax.f32 %v1268_v20, 0.0 }
 0x3ef   : > { %v1559_v30 = vmul.f32 %v5745_v15, %v1424_v18  ;;  %v1300_v39 = vadd.f32 %v4706_v13, %v5849_v7  ;;  %v1298_v40 = vadd.f32 %v4702_v16, %v5849_v7  ;;  %v4619_v41 = vunpack.c.h.bf16 %v5091_v21  ;;  %v5114_v16 = vld [vmem:[%s8414_s3 + $0x118] sm:$0xff]  }
 0x3f0   : > { %v1530_v24 = vmul.f32 %v5745_v15, %v1395_v11  ;;  %v1532_v25 = vmul.f32 %v5745_v15, %v1397_v12  ;;  %v4615_v42 = vunpack.c.h.bf16 %v5090_v22  ;;  %v1533_v46 = vmul.f32 %v5745_v15, %v1398_v32 }
 0x3f1   : > { %v1531_v48 = vmul.f32 %v5745_v15, %v1396_v33  ;;  %v1428_v50 = vmax.f32 %v1300_v39, 0.0  ;;  %v4650_v55 = vunpack.c.l.bf16 %v5099_v34  ;;  %v4647_v61 = vunpack.c.h.bf16 %v5886_v57 }
 0x3f2   : > { %1669 = vadd.xlane.f32.xlu1 %v1668_v28  ;;  %1720 = vadd.xlane.f32.xlu0 %v1719_v29  ;;  %v4614_v28 = vunpack.c.l.bf16 %v5090_v22  ;;  %v1562_v29 = vmul.f32 %v5745_v15, %v1427_v17  ;;  %v1728_v35 = vsel %vm8378_vm3, %v1530_v24, 0.0  ;;  %v1734_v36 = vsel %vm8378_vm3, %v1532_v25, 0.0  ;;  %v5100_v25 = vld [vmem:[%s8414_s3 + $0xa8] sm:$0xff]  }
 0x3f3   : > { %v1737_v62 = vsel %vm8378_vm3, %v1533_v46, 0.0  ;;  %v1731_v63 = vsel %vm8378_vm3, %v1531_v48, 0.0  ;;  %v1257_v0 = vadd.f32 %v4619_v41, %v5791_v14  ;;  %v1255_v1 = vadd.f32 %v4615_v42, %v5791_v14  ;;  %v5115_v41 = vld [vmem:[%s8414_s3 + $0x120] sm:$0xff]  }
 0x3f4   : > { %v1254_v53 = vadd.f32 %v4614_v28, %v5791_v14  ;;  %v4622_v57 = vunpack.c.l.bf16 %v5938_v4  ;;  %v4707_v9 = vunpack.c.h.bf16 %v5898_v58  ;;  %v1272_v12 = vadd.f32 %v4650_v55, %v5805_v26  ;;  %v5093_v55 = vld [vmem:[%s8414_s3 + $0x70] sm:$0xff]  }
 0x3f5   : > { %v1385_v10 = vmax.f32 %v1257_v0, 0.0  ;;  %v1383_v11 = vmax.f32 %v1255_v1, 0.0  ;;  %v1271_v13 = vadd.f32 %v4647_v61, %v5805_v26  ;;  %v4651_v58 = vunpack.c.h.bf16 %v5099_v34 }
 0x3f6   : > { %1675 = vadd.xlane.f32.xlu1 %v1674_v43  ;;  %1726 = vadd.xlane.f32.xlu0 %v1725_v44  ;;  %v1824_v43 = vsel %vm8378_vm3, %v1562_v29, 0.0  ;;  %v1815_v44 = vsel %vm8378_vm3, %v1559_v30, 0.0  ;;  %v1382_v49 = vmax.f32 %v1254_v53, 0.0  ;;  %v4710_v21 = vunpack.c.l.bf16 %v5114_v16 }
 0x3f7   : > { %v1520_v22 = vmul.f32 %v5745_v15, %v1385_v10  ;;  %v1399_v24 = vmax.f32 %v1271_v13, 0.0  ;;  %v1258_v29 = vadd.f32 %v4622_v57, %v5791_v14  ;;  %v1301_v30 = vadd.f32 %v4707_v9, %v5849_v7 }
 0x3f8   : > { %v1517_v20 = vmul.f32 %v5745_v15, %v1382_v49  ;;  %v4711_v32 = vunpack.c.h.bf16 %v5114_v16  ;;  %v4654_v33 = vunpack.c.l.bf16 %v5100_v25  ;;  %v1302_v46 = vadd.f32 %v4710_v21, %v5849_v7 }
 0x3f9   : > { %v1386_v42 = vmax.f32 %v1258_v29, 0.0  ;;  %v4623_v48 = vunpack.c.h.bf16 %v5938_v4  ;;  %v4714_v34 = vunpack.c.l.bf16 %v5115_v41  ;;  %v4626_v1 = vunpack.c.l.bf16 %v5093_v55 }
 0x3fa   : > { %1678 = vadd.xlane.f32.xlu1 %v1677_v51  ;;  %1684 = vadd.xlane.f32.xlu0 %v1683_v52  ;;  %v1426_v51 = vmax.f32 %v1298_v40, 0.0  ;;  %v1256_v52 = vadd.f32 %v4618_v27, %v5791_v14  ;;  %v1689_v28 = vsel %vm8378_vm3, %v1517_v20, 0.0  ;;  %v1534_v40 = vmul.f32 %v5745_v15, %v1399_v24  ;;  %v5094_v20 = vld [vmem:[%s8414_s3 + $0x78] sm:$0xff]  }
 0x3fb   : > { %v1274_v53 = vadd.f32 %v4654_v33, %v5805_v26  ;;  %v1521_v61 = vmul.f32 %v5745_v15, %v1386_v42  ;;  %v1430_v0 = vmax.f32 %v1302_v46, 0.0  ;;  %v4655_v4 = vunpack.c.h.bf16 %v5100_v25 }
 0x3fc   : > { %v1384_v6 = vmax.f32 %v1256_v52, 0.0  ;;  %v1303_v52 = vadd.f32 %v4711_v32, %v5849_v7  ;;  %v1304_v49 = vadd.f32 %v4714_v34, %v5849_v7  ;;  %v4715_v13 = vunpack.c.h.bf16 %v5115_v41  ;;  %v5116_v32 = vld [vmem:[%s8414_s3 + $0x128] sm:$0xff]  }
 0x3fd   : > { %v1701_v57 = vsel %vm8378_vm3, %v1521_v61, 0.0  ;;  %v4630_v24 = vunpack.c.l.bf16 %v5094_v20  ;;  %v4718_v41 = vunpack.c.l.bf16 %v5116_v32 }
 0x3fe   : > { %1723 = vadd.xlane.f32.xlu1 %v1722_v2  ;;  %1819 = vadd.xlane.f32.xlu0 %v1818_v5  ;;  %v1563_v2 = vmul.f32 %v5745_v15, %v1428_v50  ;;  %v1561_v5 = vmul.f32 %v5745_v15, %v1426_v51  ;;  %v1519_v19 = vmul.f32 %v5745_v15, %v1384_v6  ;;  %v1740_v51 = vsel %vm8378_vm3, %v1534_v40, 0.0 }
 0x3ff   : > { %v1259_v6 = vadd.f32 %v4623_v48, %v5791_v14  ;;  %v4631_v40 = vunpack.c.h.bf16 %v5094_v20  ;;  %v5118_v48 = vld [vmem:[%s8414_s3 + $0x138] sm:$0xff]  }
 0x400   : > { %v1827_v17 = vsel %vm8378_vm3, %v1563_v2, 0.0  ;;  %v1821_v18 = vsel %vm8378_vm3, %v1561_v5, 0.0  ;;  %v1695_v27 = vsel %vm8378_vm3, %v1519_v19, 0.0  ;;  %v1431_v2 = vmax.f32 %v1303_v52, 0.0 }
 0x401   : > { %v1402_v5 = vmax.f32 %v1274_v53, 0.0  ;;  %v1432_v19 = vmax.f32 %v1304_v49, 0.0  ;;  %v4726_v53 = vunpack.c.l.bf16 %v5118_v48  ;;  %v4727_v49 = vunpack.c.h.bf16 %v5118_v48 }
 0x402   : > { %1681 = vadd.xlane.f32.xlu1 %v1680_v59  ;;  %1687 = vadd.xlane.f32.xlu0 %v1686_v23  ;;  %v1518_v59 = vmul.f32 %v5745_v15, %v1383_v11  ;;  %v1400_v23 = vmax.f32 %v1272_v12, 0.0  ;;  %v1565_v11 = vmul.f32 %v5745_v15, %v1430_v0  ;;  %v4627_v12 = vunpack.c.h.bf16 %v5093_v55 }
 0x403   : > { %v1566_v16 = vmul.f32 %v5745_v15, %v1431_v2  ;;  %v1306_v0 = vadd.f32 %v4718_v41, %v5849_v7 }
 0x404   : > { %v1535_v39 = vmul.f32 %v5745_v15, %v1400_v23  ;;  %v1275_v23 = vadd.f32 %v4655_v4, %v5805_v26 }
 0x406   : > { %1729 = vadd.xlane.f32.xlu1 %v1728_v35  ;;  %1735 = vadd.xlane.f32.xlu0 %v1734_v36  ;;  %v1698_v35 = vsel %vm8378_vm3, %v1520_v22, 0.0  ;;  %v1692_v36 = vsel %vm8378_vm3, %v1518_v59, 0.0  ;;  %v1743_v50 = vsel %vm8378_vm3, %v1535_v39, 0.0  ;;  %v1833_v22 = vsel %vm8378_vm3, %v1565_v11, 0.0 }
 0x407   : > { %v1260_v59 = vadd.f32 %v4626_v1, %v5791_v14  ;;  %v1305_v39 = vadd.f32 %v4715_v13, %v5849_v7  ;;  %v1434_v11 = vmax.f32 %v1306_v0, 0.0  ;;  %v6035_v13 = vld [vmem:[%s8414_s3 + $0xb8] sm:$0xff]  }
 0x408   : > { %v4663_v48 = vunpack.c.h.bf16 %v6035_v13 }
 0x409   : > { %v1388_v33 = vmax.f32 %v1260_v59, 0.0  ;;  %v1433_v52 = vmax.f32 %v1305_v39, 0.0 }
 0x40a   : > { %1825 = vadd.xlane.f32.xlu0 %v1824_v43  ;;  %1816 = vadd.xlane.f32.xlu1 %v1815_v44  ;;  %v1429_v43 = vmax.f32 %v1301_v30, 0.0  ;;  %v1273_v44 = vadd.f32 %v4651_v58, %v5805_v26  ;;  %v5101_v58 = vld [vmem:[%s8414_s3 + $0xb0] sm:$0xff]   ;;  %v1567_v30 = vmul.f32 %v5745_v15, %v1432_v19 }
 0x40b   : > { %v4658_v25 = vunpack.c.l.bf16 %v5101_v58  ;;  %v1523_v34 = vmul.f32 %v5745_v15, %v1388_v33  ;;  %v4659_v55 = vunpack.c.h.bf16 %v5101_v58  ;;  %v4662_v58 = vunpack.c.l.bf16 %v6035_v13  ;;  %v6118_v13 = vld [vmem:[%s8414_s3 + $0x150] sm:$0xff]  }
 0x40d   : > { %v1276_v46 = vadd.f32 %v4658_v25, %v5805_v26  ;;  %v1707_v1 = vsel %vm8378_vm3, %v1523_v34, 0.0  ;;  %v6056_v25 = vld [vmem:[%s8414_s3 + $0x130] sm:$0xff]  }
 0x40e   : > { %1738 = vadd.xlane.f32.xlu0 %v1737_v62  ;;  %1732 = vadd.xlane.f32.xlu1 %v1731_v63  ;;  %v1564_v62 = vmul.f32 %v5745_v15, %v1429_v43  ;;  %v1401_v63 = vmax.f32 %v1273_v44, 0.0  ;;  %v1839_v43 = vsel %vm8378_vm3, %v1567_v30, 0.0  ;;  %v1262_v44 = vadd.f32 %v4630_v24, %v5791_v14  ;;  %v5104_v24 = vld [vmem:[%s8414_s3 + $0xc8] sm:$0xff]  }
 0x40f   : > { %v4722_v33 = vunpack.c.l.bf16 %v6056_v25  ;;  %v4723_v0 = vunpack.c.h.bf16 %v6056_v25  ;;  %v4738_v25 = vunpack.c.l.bf16 %v6118_v13 }
 0x410   : > { %v1830_v9 = vsel %vm8378_vm3, %v1564_v62, 0.0  ;;  %v1536_v10 = vmul.f32 %v5745_v15, %v1401_v63  ;;  %v1390_v61 = vmax.f32 %v1262_v44, 0.0  ;;  %v1404_v62 = vmax.f32 %v1276_v46, 0.0 }
 0x411   : > { %v1263_v63 = vadd.f32 %v4631_v40, %v5791_v14  ;;  %v1278_v40 = vadd.f32 %v4662_v58, %v5805_v26  ;;  %v4671_v46 = vunpack.c.h.bf16 %v5104_v24 }
 0x412   : > { %1828 = vadd.xlane.f32.xlu0 %v1827_v17  ;;  %1822 = vadd.xlane.f32.xlu1 %v1821_v18  ;;  %v1537_v17 = vmul.f32 %v5745_v15, %v1402_v5  ;;  %v1387_v18 = vmax.f32 %v1259_v6, 0.0  ;;  %v1746_v21 = vsel %vm8378_vm3, %v1536_v10, 0.0  ;;  %v1568_v5 = vmul.f32 %v5745_v15, %v1433_v52 }
 0x413   : > { %v1062_v6 = vcombine.high %v5772_v54, %v5772_v54  ;;  %v1391_v10 = vmax.f32 %v1263_v63, 0.0  ;;  %v1308_v52 = vadd.f32 %v4722_v33, %v5849_v7 }
 0x414   : > { %v1522_v29 = vmul.f32 %v5745_v15, %v1387_v18  ;;  %v1277_v18 = vadd.f32 %v4659_v55, %v5805_v26 }
 0x415   : > { %v6042_v19 = vrot.slane %v1062_v6, %v5703_v56  ;;  %v1526_v59 = vmul.f32 %v5745_v15, %v1391_v10  ;;  %v6091_v6 = vld [vmem:[%s8414_s3 + $0x180] sm:$0xff]   ;;  %v1436_v10 = vmax.f32 %v1308_v52, 0.0 }
 0x416   : > { %1696 = vadd.xlane.f32.xlu0 %v1695_v27  ;;  %1690 = vadd.xlane.f32.xlu1 %v1689_v28  ;;  %v1836_v27 = vsel %vm8378_vm3, %v1566_v16, 0.0  ;;  %v1749_v28 = vsel %vm8378_vm3, %v1537_v17, 0.0  ;;  %v1704_v42 = vsel %vm8378_vm3, %v1522_v29, 0.0  ;;  %v1842_v16 = vsel %vm8378_vm3, %v1568_v5, 0.0 }
 0x417   : > { %v1310_v17 = vadd.f32 %v4726_v53, %v5849_v7  ;;  %v1311_v29 = vadd.f32 %v4727_v49, %v5849_v7  ;;  %v6073_v53 = vld [vmem:[%s8414_s3 + $0x140] sm:$0xff]   ;;  %v6096_v49 = vld [vmem:[%s8414_s3 + $0x188] sm:$0xff]  }
 0x418   : > { %v4731_v58 = vunpack.c.h.bf16 %v6073_v53 }
 0x41a   : > { %1699 = vadd.xlane.f32.xlu0 %v1698_v35  ;;  %1693 = vadd.xlane.f32.xlu1 %v1692_v36  ;;  %v1403_v35 = vmax.f32 %v1275_v23, 0.0  ;;  %v1261_v36 = vadd.f32 %v4627_v12, %v5791_v14  ;;  %v1539_v14 = vmul.f32 %v5745_v15, %v1404_v62  ;;  %v6030_v12 = vld [vmem:[%s8414_s3 + $0xc0] sm:$0xff]   ;;  %v1569_v23 = vmul.f32 %v5745_v15, %v1434_v11  ;;  %v6108_v11 = vld [vmem:[%s8414_s3 + $0xd8] sm:$0xff]  }
 0x41b   : > { %v4667_v20 = vunpack.c.h.bf16 %v6030_v12  ;;  %v4666_v5 = vunpack.c.l.bf16 %v6030_v12  ;;  %v6113_v12 = vld [vmem:[%s8414_s3 + $0x148] sm:$0xff]  }
 0x41d   : > { %v1281_v39 = vadd.f32 %v4667_v20, %v6042_v19  ;;  %v4762_v20 = vunpack.c.l.bf16 %v6091_v6 }
 0x41e   : > { %1744 = vadd.xlane.f32.xlu0 %v1743_v50  ;;  %1741 = vadd.xlane.f32.xlu1 %v1740_v51  ;;  %v1538_v50 = vmul.f32 %v5745_v15, %v1403_v35  ;;  %v1389_v51 = vmax.f32 %v1261_v36, 0.0  ;;  %v1716_v35 = vsel %vm8378_vm3, %v1526_v59, 0.0  ;;  %v1845_v36 = vsel %vm8378_vm3, %v1569_v23, 0.0 }
 0x41f   : > { %v1409_v34 = vmax.f32 %v1281_v39, 0.0  ;;  %v4678_v23 = vunpack.c.l.bf16 %v6108_v11 }
 0x420   : > { %v1752_v4 = vsel %vm8378_vm3, %v1538_v50, 0.0  ;;  %v1524_v2 = vmul.f32 %v5745_v15, %v1389_v51  ;;  %v1406_v50 = vmax.f32 %v1278_v40, 0.0  ;;  %v4763_v40 = vunpack.c.h.bf16 %v6091_v6 }
 0x422   : > { %1702 = vadd.xlane.f32.xlu0 %v1701_v57  ;;  %1831 = vadd.xlane.f32.xlu1 %v1830_v9  ;;  %v4719_v57 = vunpack.c.h.bf16 %v5116_v32  ;;  %v1525_v9 = vmul.f32 %v5745_v15, %v1390_v61  ;;  %v1710_v54 = vsel %vm8378_vm3, %v1524_v2, 0.0  ;;  %v4670_v32 = vunpack.c.l.bf16 %v5104_v24 }
 0x423   : > { %v4730_v2 = vunpack.c.l.bf16 %v6073_v53  ;;  %v4734_v24 = vunpack.c.l.bf16 %v6113_v12  ;;  %v1280_v53 = vadd.f32 %v4666_v5, %v6042_v19 }
 0x424   : > { %v1307_v30 = vadd.f32 %v4719_v57, %v5849_v7  ;;  %v1282_v51 = vadd.f32 %v4670_v32, %v6042_v19  ;;  %v1544_v57 = vmul.f32 %v5745_v15, %v1409_v34  ;;  %v6146_v32 = vld [vmem:[%s8414_s3 + $0xe0] sm:$0xff]   ;;  %v6161_v34 = vld [vmem:[%s8414_s3 + $0x158] sm:$0xff]  }
 0x426   : > { %1747 = vadd.xlane.f32.xlu0 %v1746_v21  ;;  %1834 = vadd.xlane.f32.xlu1 %v1833_v22  ;;  %v1713_v21 = vsel %vm8378_vm3, %v1525_v9, 0.0  ;;  %v1755_v22 = vsel %vm8378_vm3, %v1539_v14, 0.0  ;;  %v1435_v44 = vmax.f32 %v1307_v30, 0.0  ;;  %v1541_v9 = vmul.f32 %v5745_v15, %v1406_v50  ;;  %v6141_v30 = vld [vmem:[%s8414_s3 + $0x190] sm:$0xff]   ;;  %v6166_v50 = vld [vmem:[%s8414_s3 + $0x198] sm:$0xff]  }
 0x427   : > { %v1410_v14 = vmax.f32 %v1282_v51, 0.0  ;;  %v4771_v5 = vunpack.c.h.bf16 %v6141_v30 }
 0x428   : > { %v1570_v63 = vmul.f32 %v5745_v15, %v1435_v44  ;;  %v4735_v44 = vunpack.c.h.bf16 %v6113_v12 }
 0x42a   : > { %1837 = vadd.xlane.f32.xlu0 %v1836_v27  ;;  %1750 = vadd.xlane.f32.xlu1 %v1749_v28  ;;  %v1438_v27 = vmax.f32 %v1310_v17, 0.0  ;;  %v1405_v28 = vmax.f32 %v1277_v18, 0.0  ;;  %v1283_v17 = vadd.f32 %v4671_v46, %v6042_v19  ;;  %v1279_v18 = vadd.f32 %v4663_v48, %v5805_v26 }
 0x42b   : > { %v1770_v26 = vsel %vm8378_vm3, %v1544_v57, 0.0  ;;  %v4770_v46 = vunpack.c.l.bf16 %v6141_v30  ;;  %v4767_v48 = vunpack.c.h.bf16 %v6096_v49  ;;  %v4742_v57 = vunpack.c.l.bf16 %v6161_v34 }
 0x42c   : > { %v1573_v41 = vmul.f32 %v5745_v15, %v1438_v27  ;;  %v1761_v27 = vsel %vm8378_vm3, %v1541_v9, 0.0  ;;  %v1411_v33 = vmax.f32 %v1283_v17, 0.0  ;;  %v4774_v9 = vunpack.c.l.bf16 %v6166_v50  ;;  %v6192_v17 = vld [vmem:[%s8414_s3 + $0xe8] sm:$0xff]  }
 0x42e   : > { %1705 = vadd.xlane.f32.xlu0 %v1704_v42  ;;  %1840 = vadd.xlane.f32.xlu1 %v1839_v43  ;;  %v1540_v42 = vmul.f32 %v5745_v15, %v1405_v28  ;;  %v1439_v43 = vmax.f32 %v1311_v29, 0.0  ;;  %v1857_v55 = vsel %vm8378_vm3, %v1573_v41, 0.0  ;;  %v1545_v28 = vmul.f32 %v5745_v15, %v1410_v14 }
 0x42f   : > { %v1571_v29 = vmul.f32 %v5745_v15, %v1436_v10  ;;  %v4679_v41 = vunpack.c.h.bf16 %v6108_v11 }
 0x430   : > { %v1758_v61 = vsel %vm8378_vm3, %v1540_v42, 0.0  ;;  %v1574_v62 = vmul.f32 %v5745_v15, %v1439_v43  ;;  %v4739_v43 = vunpack.c.h.bf16 %v6118_v13  ;;  %v1773_v51 = vsel %vm8378_vm3, %v1545_v28, 0.0 }
 0x431   : > { %v1851_v52 = vsel %vm8378_vm3, %v1571_v29, 0.0 }
 0x432   : > { %1708 = vadd.xlane.f32.xlu0 %v1707_v1  ;;  %1753 = vadd.xlane.f32.xlu1 %v1752_v4  ;;  %v1061_v1 = vcombine.high %v5834_v60, %v5834_v60  ;;  %v6084_v4 = vrot.slane %v5733_v8, %v5703_v56  ;;  %v6101_v60 = vld [vmem:[%s8414_s3 + $0xd0] sm:$0xff]  }
 0x433   : > { %v4675_v42 = vunpack.c.h.bf16 %v6101_v60 }
 0x434   : > { %v6129_v59 = vrot.slane %v1061_v1, %v5703_v56  ;;  %v1312_v39 = vadd.f32 %v4730_v2, %v6084_v4  ;;  %v6177_v1 = vld [vmem:[%s8414_s3 + $0x1a0] sm:$0xff]   ;;  %v6180_v2 = vand.u32 127, %v1019_v45  ;;  %v1313_v14 = vadd.f32 %v4731_v58, %v6084_v4 }
 0x435   : > { %v6197_v45 = vld [vmem:[%s8414_s3 + $0x160] sm:$0xff]   ;;  %v4743_v58 = vunpack.c.h.bf16 %v6161_v34 }
 0x436   : > { %1711 = vadd.xlane.f32.xlu0 %v1710_v54  ;;  %1843 = vadd.xlane.f32.xlu1 %v1842_v16  ;;  %v1860_v54 = vsel %vm8378_vm3, %v1574_v62, 0.0  ;;  %v1848_v16 = vsel %vm8378_vm3, %v1570_v63, 0.0  ;;  %8417 = vst [vmem:[#allocation23_spill] sm:$0xff] %v6180_v2  ;;  %v2352_v13 = vadd.s32 4294967208, %v6180_v2  ;;  %v1332_v12 = vadd.f32 %v4770_v46, %v6129_v59 }
 0x43a   : > { %1714 = vadd.xlane.f32.xlu0 %v1713_v21  ;;  %1756 = vadd.xlane.f32.xlu1 %v1755_v22  ;;  %v4766_v21 = vunpack.c.l.bf16 %v6096_v49  ;;  %v4674_v22 = vunpack.c.l.bf16 %v6101_v60  ;;  %v1333_v49 = vadd.f32 %v4771_v5, %v6129_v59 }
 0x43c   : > { %v1330_v10 = vadd.f32 %v4766_v21, %v6129_v59 }
 0x43e   : > { %1717 = vadd.xlane.f32.xlu0 %v1716_v35  ;;  %1846 = vadd.xlane.f32.xlu1 %v1845_v36  ;;  %v1407_v35 = vmax.f32 %v1279_v18, 0.0  ;;  %v1309_v36 = vadd.f32 %v4723_v0, %v5849_v7  ;;  %v4682_v7 = vunpack.c.l.bf16 %v6146_v32  ;;  %v1440_v0 = vmax.f32 %v1312_v39, 0.0 }
 0x43f   : > { %v1408_v18 = vmax.f32 %v1280_v53, 0.0  ;;  %v1458_v53 = vmax.f32 %v1330_v10, 0.0  ;;  %v6226_v10 = vpop.permute.xlu1 %2014  ;;  %v2324_v39 = vadd.s32 4294967240, %v6180_v2 }
 0x440   : > { %v1542_v62 = vmul.f32 %v5745_v15, %v1407_v35  ;;  %v1437_v63 = vmax.f32 %v1309_v36, 0.0  ;;  %v1575_v29 = vmul.f32 %v5745_v15, %v1440_v0  ;;  %v2282_v35 = vadd.s32 4294967288, %v6180_v2 }
 0x442   : > { %1858 = vadd.xlane.f32.xlu0 %v1857_v55  ;;  %1759 = vadd.xlane.f32.xlu1 %v1758_v61  ;;  %v1328_v55 = vadd.f32 %v4762_v20, %v6129_v59  ;;  %v1546_v61 = vmul.f32 %v5745_v15, %v1411_v33  ;;  %v1572_v28 = vmul.f32 %v5745_v15, %v1437_v63  ;;  %v6208_v33 = vld [vmem:[%s8414_s3 + $0x1a8] sm:$0xff]  }
 0x444   : > { %v1456_v20 = vmax.f32 %v1328_v55, 0.0  ;;  %v1284_v55 = vadd.f32 %v4674_v22, %v6042_v19  ;;  %v2289_v22 = vadd.s32 4294967280, %v6180_v2 }
 0x446   : > { %1861 = vadd.xlane.f32.xlu0 %v1860_v54  ;;  %1849 = vadd.xlane.f32.xlu1 %v1848_v16  ;;  %v4683_v54 = vunpack.c.h.bf16 %v6146_v32  ;;  %v4775_v16 = vunpack.c.h.bf16 %v6166_v50  ;;  %v1591_v63 = vmul.f32 %v5745_v15, %v1456_v20  ;;  %v2303_v20 = vadd.s32 4294967264, %v6180_v2 }
 0x447   : > { %v1412_v0 = vmax.f32 %v1284_v55, 0.0  ;;  %v6247_v38 = vsub.s32 %v2289_v22, %v5688_v47 }
 0x44a   : > { %1771 = vadd.xlane.f32.xlu0 %v1770_v26  ;;  %1762 = vadd.xlane.f32.xlu1 %v1761_v27  ;;  %v1776_v26 = vsel %vm8378_vm3, %v1546_v61, 0.0  ;;  %v1764_v27 = vsel %vm8378_vm3, %v1542_v62, 0.0  ;;  %v1286_v61 = vadd.f32 %v4678_v23, %v6042_v19  ;;  %v1543_v62 = vmul.f32 %v5745_v15, %v1408_v18 }
 0x44b   : > { %v6231_v23 = vsub.s32 %v2282_v35, %v5688_v47  ;;  %v6235_v18 = vsub.s32 %v6180_v2, %v5688_v47  ;;  %v1314_v35 = vadd.f32 %v4734_v24, %v6084_v4  ;;  %v2310_v24 = vadd.s32 4294967256, %v6180_v2 }
 0x44d   : > { %v6287_v21 = vsub.s32 %v2310_v24, %v5688_v47 }
 0x44e   : > { %1774 = vadd.xlane.f32.xlu0 %v1773_v51  ;;  %1852 = vadd.xlane.f32.xlu1 %v1851_v52  ;;  %v1441_v52 = vmax.f32 %v1313_v14, 0.0  ;;  %v1863_v14 = vsel %vm8378_vm3, %v1575_v29, 0.0  ;;  %v1414_v51 = vmax.f32 %v1286_v61, 0.0  ;;  %v1287_v61 = vadd.f32 %v4679_v41, %v6042_v19 }
 0x44f   : > { %v1442_v41 = vmax.f32 %v1314_v35, 0.0  ;;  %v1285_v35 = vadd.f32 %v4675_v42, %v6042_v19 }
 0x450   : > { %v1576_v29 = vmul.f32 %v5745_v15, %v1441_v52  ;;  %v1316_v52 = vadd.f32 %v4738_v25, %v6084_v4 }
 0x452   : > { %1777 = vadd.xlane.f32.xlu0 %v1776_v26  ;;  %1765 = vadd.xlane.f32.xlu1 %v1764_v27  ;;  %v1854_v27 = vsel %vm8378_vm3, %v1572_v28, 0.0  ;;  %v2296_v28 = vadd.s32 4294967272, %v6180_v2  ;;  %v1593_v26 = vmul.f32 %v5745_v15, %v1458_v53  ;;  %v1329_v15 = vadd.f32 %v4763_v40, %v6129_v59  ;;  %v6270_v40 = vld [vmem:[%s8357_s10] ss:$0 sm:$0xff] }
 0x453   : > { %v6256_v53 = vsub.s32 %v2303_v20, %v5688_v47  ;;  %v1547_v22 = vmul.f32 %v6270_v40, %v1412_v0  ;;  %v1549_v20 = vmul.f32 %v6270_v40, %v1414_v51  ;;  %v1415_v51 = vmax.f32 %v1287_v61, 0.0 }
 0x454   : > { %v6259_v55 = vsub.s32 %v2296_v28, %v5688_v47  ;;  %v1917_v6 = vsel %vm8378_vm3, %v1593_v26, 0.0  ;;  %v2331_v26 = vadd.s32 4294967232, %v6180_v2  ;;  %v1577_v60 = vmul.f32 %v6270_v40, %v1442_v41 }
 0x456   : > { %1855 = vadd.xlane.f32.xlu1 %v1854_v27  ;;  %1864 = vadd.xlane.f32.xlu0 %v1863_v14  ;;  %v1767_v27 = vsel %vm8378_vm3, %v1543_v62, 0.0  ;;  %v1911_v14 = vsel %vm8378_vm3, %v1591_v63, 0.0  ;;  %v1866_v63 = vsel %vm8378_vm3, %v1576_v29, 0.0  ;;  %v1444_v29 = vmax.f32 %v1316_v52, 0.0 }
 0x457   : > { %v1779_v52 = vsel %vm8378_vm3, %v1547_v22, 0.0  ;;  %v6300_v24 = vsub.s32 %v2331_v26, %v5688_v47 }
 0x458   : > { %v1579_v22 = vmul.f32 %v6270_v40, %v1444_v29 }
 0x45a   : > { %1768 = vadd.xlane.f32.xlu1 %v1767_v27  ;;  %1912 = vadd.xlane.f32.xlu0 %v1911_v14  ;;  %v2317_v27 = vadd.s32 4294967248, %v6180_v2  ;;  %v1457_v14 = vmax.f32 %v1329_v15, 0.0  ;;  %v1785_v15 = vsel %vm8378_vm3, %v1549_v20, 0.0 }
 0x45b   : > { %v1628_v62 = vpop.xlane.xlu0 %1627  ;;  %v1625_v25 = vpop.xlane.xlu1 %1624 }
 0x45c   : > { %v2018_v28 = vadd.f32 %v6226_v10, %v1628_v62  ;;  %v2017_v11 = vadd.f32 %v6226_v10, %v1625_v25  ;;  %v6296_v42 = vsub.s32 %v2317_v27, %v5688_v47  ;;  %v1592_v20 = vmul.f32 %v6270_v40, %v1457_v14 }
 0x45d   : > { %v1315_v14 = vadd.f32 %v4735_v44, %v6084_v4 }
 0x45e   : > { %v2286_v36 = vrot.slane %v2018_v28, %v6231_v23  ;;  %v2281_v0 = vrot.slane %v2017_v11, %v6235_v18  ;;  %1867 = vadd.xlane.f32.xlu1 %v1866_v63  ;;  %1918 = vadd.xlane.f32.xlu0 %v1917_v6  ;;  %v1317_v63 = vadd.f32 %v4739_v43, %v6084_v4  ;;  %v1413_v11 = vmax.f32 %v1285_v35, 0.0 }
 0x45f   : > { %v1631_v62 = vpop.xlane.xlu0 %1630  ;;  %v1637_v25 = vpop.xlane.xlu1 %1636  ;;  %v6307_v28 = vsub.s32 %v2324_v39, %v5688_v47  ;;  %v1869_v39 = vsel %vm8378_vm3, %v1577_v60, 0.0  ;;  %v1875_v35 = vsel %vm8378_vm3, %v1579_v22, 0.0  ;;  %v1443_v46 = vmax.f32 %v1315_v14, 0.0 }
 0x460   : > { %v2288_v61 = vsel %vm2287_vm4, %v2286_v36, %v2281_v0  ;;  %v2019_v6 = vadd.f32 %v6226_v10, %v1631_v62  ;;  %v1550_v36 = vmul.f32 %v6270_v40, %v1415_v51  ;;  %v2021_v41 = vadd.f32 %v6226_v10, %v1637_v25 }
 0x461   : > { %v1445_v26 = vmax.f32 %v1317_v63, 0.0  ;;  %v2338_v0 = vadd.s32 4294967224, %v6180_v2  ;;  %v1914_v25 = vsel %vm8378_vm3, %v1592_v20, 0.0 }
 0x462   : > { %v2293_v43 = vrot.slane %v2019_v6, %v6247_v38  ;;  %1780 = vadd.xlane.f32.xlu1 %v1779_v52  ;;  %1786 = vadd.xlane.f32.xlu0 %v1785_v15  ;;  %v6321_v15 = vsub.s32 %v2352_v13, %v5688_v47  ;;  %v1788_v63 = vsel %vm8378_vm3, %v1550_v36, 0.0  ;;  %v2359_v6 = vadd.s32 4294967200, %v6180_v2 }
 0x463   : > { %v1634_v27 = vpop.xlane.xlu0 %1633  ;;  %v1640_v29 = vpop.xlane.xlu1 %1639  ;;  %v2307_v60 = vrot.slane %v2021_v41, %v6256_v53  ;;  %v1580_v13 = vmul.f32 %v6270_v40, %v1445_v26  ;;  %v2345_v26 = vadd.s32 4294967216, %v6180_v2 }
 0x464   : > { %v2295_v62 = vsel %vm2294_vm5, %v2293_v43, %v2288_v61  ;;  %v2020_v52 = vadd.f32 %v6226_v10, %v1634_v27  ;;  %v2022_v51 = vadd.f32 %v6226_v10, %v1640_v29  ;;  %v1548_v61 = vmul.f32 %v6270_v40, %v1413_v11 }
 0x465   : > { %v6333_v43 = vsub.s32 %v2338_v0, %v5688_v47  ;;  %v1331_v11 = vadd.f32 %v4767_v48, %v6129_v59  ;;  %v1288_v0 = vadd.f32 %v4682_v7, %v6042_v19  ;;  %v6355_v7 = vsub.s32 %v2359_v6, %v5688_v47 }
 0x466   : > { %v2300_v44 = vrot.slane %v2020_v52, %v6259_v55  ;;  %1870 = vadd.xlane.f32.xlu1 %v1869_v39  ;;  %1876 = vadd.xlane.f32.xlu0 %v1875_v35  ;;  %v2314_v29 = vrot.slane %v2022_v51, %v6287_v21  ;;  %v1460_v52 = vmax.f32 %v1332_v12, 0.0  ;;  %v1782_v51 = vsel %vm8378_vm3, %v1548_v61, 0.0 }
 0x467   : > { %v1643_v22 = vpop.xlane.xlu0 %1642  ;;  %v1649_v20 = vpop.xlane.xlu1 %1648  ;;  %v1878_v12 = vsel %vm8378_vm3, %v1580_v13, 0.0  ;;  %v2366_v61 = vadd.s32 4294967192, %v6180_v2  ;;  %v6363_v5 = vsub.s32 %v2345_v26, %v5688_v47  ;;  %v1318_v6 = vadd.f32 %v4742_v57, %v6084_v4 }
 0x468   : > { %v2302_v27 = vsel %vm2301_vm6, %v2300_v44, %v2295_v62  ;;  %v2023_v36 = vadd.f32 %v6226_v10, %v1643_v22  ;;  %v2025_v48 = vadd.f32 %v6226_v10, %v1649_v20  ;;  %v1578_v44 = vmul.f32 %v6270_v40, %v1443_v46 }
 0x469   : > { %v2309_v41 = vsel %vm2308_vm7, %v2307_v60, %v2302_v27  ;;  %v1459_v60 = vmax.f32 %v1331_v11, 0.0  ;;  %v1595_v30 = vmul.f32 %v6270_v40, %v1460_v52  ;;  %v1416_v22 = vmax.f32 %v1288_v0, 0.0 }
 0x46a   : > { %v2316_v14 = vsel %vm2315_vm8, %v2314_v29, %v2309_v41  ;;  %v2321_v62 = vrot.slane %v2023_v36, %v6296_v42  ;;  %1915 = vadd.xlane.f32.xlu1 %v1914_v25  ;;  %1789 = vadd.xlane.f32.xlu0 %v1788_v63  ;;  %v2373_v13 = vadd.s32 4294967184, %v6180_v2  ;;  %v1461_v46 = vmax.f32 %v1333_v49, 0.0 }
 0x46b   : > { %v1646_v39 = vpop.xlane.xlu0 %1645  ;;  %v1658_v35 = vpop.xlane.xlu1 %1657  ;;  %v2335_v27 = vrot.slane %v2025_v48, %v6300_v24  ;;  %v1872_v11 = vsel %vm8378_vm3, %v1578_v44, 0.0  ;;  %v1334_v41 = vadd.f32 %v4774_v9, %v6129_v59  ;;  %v1289_v57 = vadd.f32 %v4683_v54, %v6042_v19 }
 0x46c   : > { %v2323_v25 = vsel %vm2322_vm9, %v2321_v62, %v2316_v14  ;;  %v2024_v63 = vadd.f32 %v6226_v10, %v1646_v39  ;;  %v6381_v0 = vsub.s32 %v2366_v61, %v5688_v47  ;;  %v1594_v14 = vmul.f32 %v6270_v40, %v1459_v60 }
 0x46d   : > { %v1551_v9 = vmul.f32 %v6270_v40, %v1416_v22  ;;  %v1446_v49 = vmax.f32 %v1318_v6, 0.0  ;;  %v1596_v54 = vmul.f32 %v6270_v40, %v1461_v46  ;;  %v2380_v48 = vadd.s32 4294967176, %v6180_v2 }
 0x46e   : > { %v2328_v20 = vrot.slane %v2024_v63, %v6307_v28  ;;  %1783 = vadd.xlane.f32.xlu1 %v1782_v51  ;;  %1879 = vadd.xlane.f32.xlu0 %v1878_v12  ;;  %v1923_v51 = vsel %vm8378_vm3, %v1595_v30, 0.0  ;;  %v1335_v39 = vadd.f32 %v4775_v16, %v6129_v59  ;;  %v2028_v12 = vadd.f32 %v6226_v10, %v1658_v35 }
 0x46f   : > { %v1652_v29 = vpop.xlane.xlu0 %1651  ;;  %v1661_v36 = vpop.xlane.xlu1 %1660  ;;  %v6395_v63 = vsub.s32 %v2373_v13, %v5688_v47  ;;  %v1462_v61 = vmax.f32 %v1334_v41, 0.0  ;;  %v1417_v60 = vmax.f32 %v1289_v57, 0.0  ;;  %v1791_v16 = vsel %vm8378_vm3, %v1551_v9, 0.0 }
 0x470   : > { %v2330_v52 = vsel %vm2329_vm10, %v2328_v20, %v2323_v25  ;;  %v2026_v26 = vadd.f32 %v6226_v10, %v1652_v29  ;;  %v2029_v22 = vadd.f32 %v6226_v10, %v1661_v36  ;;  %v1920_v20 = vsel %vm8378_vm3, %v1594_v14, 0.0 }
 0x471   : > { %v2337_v62 = vsel %vm8370_vm11, %v2335_v27, %v2330_v52  ;;  %v1581_v35 = vmul.f32 %v6270_v40, %v1446_v49  ;;  %v1319_v13 = vadd.f32 %v4743_v58, %v6084_v4  ;;  %v1926_v27 = vsel %vm8378_vm3, %v1596_v54, 0.0 }
 0x472   : > { %v2342_v32 = vrot.slane %v2026_v26, %v6333_v43  ;;  %1873 = vadd.xlane.f32.xlu1 %v1872_v11  ;;  %1924 = vadd.xlane.f32.xlu0 %v1923_v51  ;;  %v6410_v29 = vsub.s32 %v2380_v48, %v5688_v47  ;;  %v1463_v36 = vmax.f32 %v1335_v39, 0.0  ;;  %v2356_v11 = vrot.slane %v2028_v12, %v6321_v15 }
 0x473   : > { %v1655_v44 = vpop.xlane.xlu0 %1654  ;;  %v1664_v25 = vpop.xlane.xlu1 %1663  ;;  %v1597_v52 = vmul.f32 %v6270_v40, %v1462_v61  ;;  %v1552_v34 = vmul.f32 %v6270_v40, %v1417_v60  ;;  %v8418_v58 = vunpack.c.l.bf16 %v6177_v1  ;;  %v2363_v14 = vrot.slane %v2029_v22, %v6355_v7 }
 0x474   : > { %v2344_v30 = vsel %vm2343_vm12, %v2342_v32, %v2337_v62  ;;  %v2027_v6 = vadd.f32 %v6226_v10, %v1655_v44  ;;  %v2030_v50 = vadd.f32 %v6226_v10, %v1664_v25  ;;  %v8419_v9 = vunpack.c.l.bf16 %v6192_v17 }
 0x475   : > { %v1336_v26 = vadd.f32 %v8418_v58, %v6129_v59  ;;  %v1881_v48 = vsel %vm8378_vm3, %v1581_v35, 0.0  ;;  %v1447_v39 = vmax.f32 %v1319_v13, 0.0  ;;  %v1598_v25 = vmul.f32 %v6270_v40, %v1463_v36  ;;  %v6446_v36 = vld [vmem:[%s8414_s3 + $0xf0] sm:$0xff]  }
 0x476   : > { %v2349_v46 = vrot.slane %v2027_v6, %v6363_v5  ;;  %1921 = vadd.xlane.f32.xlu1 %v1920_v20  ;;  %1792 = vadd.xlane.f32.xlu0 %v1791_v16  ;;  %v1290_v49 = vadd.f32 %v8419_v9, %v6042_v19  ;;  %v2370_v54 = vrot.slane %v2030_v50, %v6381_v0  ;;  %v1929_v22 = vsel %vm8378_vm3, %v1597_v52, 0.0 }
 0x477   : > { %v6413_v41 = vpop.xlane.xlu0 %1672  ;;  %v1667_v57 = vpop.xlane.xlu1 %1666  ;;  %v1794_v6 = vsel %vm8378_vm3, %v1552_v34, 0.0  ;;  %v8420_v20 = vunpack.c.h.bf16 %v6177_v1  ;;  %v1464_v13 = vmax.f32 %v1336_v26, 0.0  ;;  %v1582_v1 = vmul.f32 %v6270_v40, %v1447_v39  ;;  %v6473_v39 = vld [vmem:[%s8414_s3 + $0x170] sm:$0xff]  }
 0x478   : > { %v2351_v62 = vsel %vm2350_vm13, %v2349_v46, %v2344_v30  ;;  %v2031_v51 = vadd.f32 %v6226_v10, %v1667_v57  ;;  %v8421_v46 = vunpack.c.l.bf16 %v6197_v45  ;;  %v1418_v57 = vmax.f32 %v1290_v49, 0.0 }
 0x479   : > { %v2358_v32 = vsel %vm2357_vm14, %v2356_v11, %v2351_v62  ;;  %v1337_v50 = vadd.f32 %v8420_v20, %v6129_v59  ;;  %v6451_v11 = vld [vmem:[%s8414_s3 + $0xf8] sm:$0xff]   ;;  %v8422_v52 = vunpack.c.l.bf16 %v6208_v33  ;;  %v8423_v58 = vunpack.c.h.bf16 %v6192_v17  ;;  %v6468_v17 = vld [vmem:[%s8414_s3 + $0x168] sm:$0xff]  }
 0x47a   : > { %v2365_v12 = vsel %vm2364_vm15, %v2363_v14, %v2358_v32  ;;  %v2377_v44 = vrot.slane %v2031_v51, %v6395_v63  ;;  %1927 = vadd.xlane.f32.xlu1 %v1926_v27  ;;  %1882 = vadd.xlane.f32.xlu0 %v1881_v48  ;;  %v1320_v27 = vadd.f32 %v8421_v46, %v6084_v4  ;;  %v4783_v62 = vunpack.c.h.bf16 %v6208_v33  ;;  %v6478_v33 = vld [vmem:[%s8414_s3 + $0x178] sm:$0xff]  }
 0x47b   : > { %v2372_v61 = vsel %vm2371_vm0, %v2370_v54, %v2365_v12  ;;  %v1721_v60 = vpop.xlane.xlu0 %1720  ;;  %v1670_v30 = vpop.xlane.xlu1 %1669  ;;  %v1338_v34 = vadd.f32 %v8422_v52, %v6129_v59  ;;  %v1291_v26 = vadd.f32 %v8423_v58, %v6042_v19  ;;  %v1932_v32 = vsel %vm8378_vm3, %v1598_v25, 0.0 }
 0x47c   : > { %v2379_v16 = vsel %vm2378_vm1, %v2377_v44, %v2372_v61  ;;  %v2032_v35 = vadd.f32 %v6226_v10, %v1670_v30  ;;  %v1465_v54 = vmax.f32 %v1337_v50, 0.0  ;;  %v4690_v49 = vunpack.c.l.bf16 %v6446_v36 }
 0x47d   : > { %v4695_v48 = vunpack.c.h.bf16 %v6451_v11  ;;  %v1599_v44 = vmul.f32 %v6270_v40, %v1464_v13  ;;  %v1448_v25 = vmax.f32 %v1320_v27, 0.0  ;;  %v8424_v61 = vunpack.c.h.bf16 %v6197_v45 }
 0x47e   : > { %v2384_v14 = vrot.slane %v2032_v35, %v6410_v29  ;;  %1930 = vadd.xlane.f32.xlu1 %v1929_v22  ;;  %1795 = vadd.xlane.f32.xlu0 %v1794_v6  ;;  %v6490_v22 = vld [vmem:[%s8414_s3 + $0x1b8] sm:$0xff]   ;;  %v1884_v6 = vsel %vm8378_vm3, %v1582_v1, 0.0  ;;  %v1553_v20 = vmul.f32 %v6270_v40, %v1418_v57  ;;  %v1466_v50 = vmax.f32 %v1338_v34, 0.0 }
 0x47f   : > { %v1727_v51 = vpop.xlane.xlu0 %1726  ;;  %v1676_v9 = vpop.xlane.xlu1 %1675  ;;  %v1321_v30 = vadd.f32 %v8424_v61, %v6084_v4  ;;  %v1419_v35 = vmax.f32 %v1291_v26, 0.0  ;;  %v4755_v13 = vunpack.c.h.bf16 %v6473_v39  ;;  %v4691_v45 = vunpack.c.h.bf16 %v6446_v36 }
 0x480   : > { %v6481_v12 = vsel %vm2385_vm2, %v2384_v14, %v2379_v16  ;;  %v4750_v16 = vunpack.c.l.bf16 %v6468_v17  ;;  %v4758_v46 = vunpack.c.l.bf16 %v6478_v33  ;;  %v1600_v58 = vmul.f32 %v6270_v40, %v1465_v54 }
 0x481   : > { %v1935_v14 = vsel %vm8378_vm3, %v1599_v44, 0.0  ;;  %v1449_v36 = vmax.f32 %v1321_v30, 0.0  ;;  %v1797_v61 = vsel %vm8378_vm3, %v1553_v20, 0.0  ;;  %v1554_v54 = vmul.f32 %v6270_v40, %v1419_v35 }
 0x482   : > { %1933 = vadd.xlane.f32.xlu1 %v1932_v32  ;;  %1885 = vadd.xlane.f32.xlu0 %v1884_v6  ;;  %v1583_v32 = vmul.f32 %v6270_v40, %v1448_v25  ;;  %v1601_v6 = vmul.f32 %v6270_v40, %v1466_v50  ;;  %v1339_v1 = vadd.f32 %v4783_v62, %v6129_v59  ;;  %v1938_v35 = vsel %vm8378_vm3, %v1600_v58, 0.0 }
 0x483   : > { %v1685_v27 = vpop.xlane.xlu0 %1684  ;;  %v1679_v52 = vpop.xlane.xlu1 %1678  ;;  %v2049_v57 = vadd.f32 %v6226_v10, %v1721_v60  ;;  %v2034_v34 = vadd.f32 %v6226_v10, %v1676_v9  ;;  %v1292_v26 = vadd.f32 %v4690_v49, %v6042_v19  ;;  %v2051_v25 = vadd.f32 %v6226_v10, %v1727_v51 }
 0x484   : > { %v2035_v30 = vadd.f32 %v6226_v10, %v1679_v52  ;;  %v1295_v62 = vadd.f32 %v4695_v48, %v6042_v19  ;;  %v2033_v60 = vadd.f32 %v6226_v10, %v6413_v41  ;;  %v1887_v49 = vsel %vm8378_vm3, %v1583_v32, 0.0 }
 0x485   : > { %v1941_v51 = vsel %vm8378_vm3, %v1601_v6, 0.0  ;;  %v1800_v52 = vsel %vm8378_vm3, %v1554_v54, 0.0  ;;  %v1322_v44 = vadd.f32 %v4750_v16, %v6084_v4  ;;  %v2469_v58 = vrot.slane %v2049_v57, %v6235_v18 }
 0x486   : > { %1936 = vadd.xlane.f32.xlu1 %v1935_v14  ;;  %1798 = vadd.xlane.f32.xlu0 %v1797_v61  ;;  %v1584_v14 = vmul.f32 %v6270_v40, %v1449_v36  ;;  %v1467_v61 = vmax.f32 %v1339_v1, 0.0  ;;  %v2394_v48 = vrot.slane %v2034_v34, %v6231_v23  ;;  %v1420_v41 = vmax.f32 %v1292_v26, 0.0 }
 0x487   : > { %v6516_v20 = vpop.xlane.xlu0 %1819  ;;  %v1724_v50 = vpop.xlane.xlu1 %1723  ;;  %v2478_v32 = vrot.slane %v2051_v25, %v6247_v38  ;;  %v2037_v36 = vadd.f32 %v6226_v10, %v1685_v27  ;;  %v2399_v6 = vrot.slane %v2035_v30, %v6247_v38  ;;  %v1325_v1 = vadd.f32 %v4755_v13, %v6084_v4 }
 0x488   : > { %v2050_v9 = vadd.f32 %v6226_v10, %v1724_v50  ;;  %v2390_v16 = vrot.slane %v2033_v60, %v6235_v18  ;;  %v1602_v25 = vmul.f32 %v6270_v40, %v1467_v61  ;;  %v1423_v27 = vmax.f32 %v1295_v62, 0.0 }
 0x489   : > { %v1293_v30 = vadd.f32 %v4691_v45, %v6042_v19  ;;  %v1326_v60 = vadd.f32 %v4758_v46, %v6084_v4  ;;  %v1555_v62 = vmul.f32 %v6270_v40, %v1420_v41  ;;  %v1450_v61 = vmax.f32 %v1322_v44, 0.0  ;;  %v6554_v45 = vld [vmem:[%s8414_s3 + $0x1b0] sm:$0xff]  }
 0x48a   : > { %v2473_v3 = vrot.slane %v2050_v9, %v6231_v23  ;;  %1939 = vadd.xlane.f32.xlu1 %v1938_v35  ;;  %1888 = vadd.xlane.f32.xlu0 %v1887_v49  ;;  %v2395_v9 = vsel %vm2287_vm4, %v2394_v48, %v2390_v16  ;;  %v2409_v49 = vrot.slane %v2037_v36, %v6256_v53  ;;  %v8425_v46 = vunpack.c.h.bf16 %v6468_v17  ;;  %v6564_v36 = vld [vmem:[%s8414_s3 + $0x1c0] sm:$0xff]  }
 0x48b   : > { %v1688_v50 = vpop.xlane.xlu0 %1687  ;;  %v1682_v54 = vpop.xlane.xlu1 %1681  ;;  %v1944_v41 = vsel %vm8378_vm3, %v1602_v25, 0.0  ;;  %v1454_v17 = vmax.f32 %v1326_v60, 0.0 }
 0x48c   : > { %v2474_v57 = vsel %vm2287_vm4, %v2473_v3, %v2469_v58  ;;  %v2038_v34 = vadd.f32 %v6226_v10, %v1688_v50  ;;  %v2036_v35 = vadd.f32 %v6226_v10, %v1682_v54  ;;  %v1890_v3 = vsel %vm8378_vm3, %v1584_v14, 0.0 }
 0x48d   : > { %v6540_v26 = vsel %vm2294_vm5, %v2478_v32, %v2474_v57  ;;  %v2400_v58 = vsel %vm2294_vm5, %v2399_v6, %v2395_v9  ;;  %v1323_v48 = vadd.f32 %v8425_v46, %v6084_v4  ;;  %v1558_v6 = vmul.f32 %v6270_v40, %v1423_v27 }
 0x48e   : > { %v2404_v13 = vrot.slane %v2036_v35, %v6259_v55  ;;  %1942 = vadd.xlane.f32.xlu1 %v1941_v51  ;;  %1801 = vadd.xlane.f32.xlu0 %v1800_v52  ;;  %v2414_v51 = vrot.slane %v2038_v34, %v6287_v21  ;;  %v1453_v52 = vmax.f32 %v1325_v1, 0.0  ;;  %v1421_v54 = vmax.f32 %v1293_v30, 0.0  ;;  %v6572_v1 = vld [vmem:[%s8414_s3 + $0x1e8] sm:$0xff]  }
 0x48f   : > { %v1736_v32 = vpop.xlane.xlu0 %1735  ;;  %v1730_v50 = vpop.xlane.xlu1 %1729  ;;  %v4754_v57 = vunpack.c.l.bf16 %v6473_v39  ;;  %v4786_v34 = vunpack.c.l.bf16 %v6554_v45  ;;  %v1585_v30 = vmul.f32 %v6270_v40, %v1450_v61  ;;  %v4794_v9 = vunpack.c.l.bf16 %v6564_v36 }
 0x490   : > { %v2405_v14 = vsel %vm2301_vm6, %v2404_v13, %v2400_v58  ;;  %v2052_v35 = vadd.f32 %v6226_v10, %v1730_v50  ;;  %v8426_v39 = vcombine.high %v5733_v8, %v5733_v8  ;;  %v1451_v58 = vmax.f32 %v1323_v48, 0.0 }
 0x491   : > { %v2410_v44 = vsel %vm2308_vm7, %v2409_v49, %v2405_v14  ;;  %v1588_v49 = vmul.f32 %v6270_v40, %v1453_v52  ;;  %v4815_v50 = vunpack.c.h.bf16 %v6572_v1  ;;  %v1803_v61 = vsel %vm8378_vm3, %v1555_v62, 0.0 }
 0x492   : > { %1891 = vadd.xlane.f32.xlu0 %v1890_v3  ;;  %1945 = vadd.xlane.f32.xlu1 %v1944_v41  ;;  %v6575_v16 = vsel %vm2315_vm8, %v2414_v51, %v2410_v44  ;;  %v6586_v3 = vld [vmem:[%s8414_s3 + $0x1f0] sm:$0xff]   ;;  %v6592_v60 = vrot.slane %v8426_v39, %v5703_v56  ;;  %v1812_v51 = vsel %vm8378_vm3, %v1558_v6, 0.0  ;;  %v1556_v14 = vmul.f32 %v6270_v40, %v1421_v54 }
 0x493   : > { %v1826_v25 = vpop.xlane.xlu0 %1825  ;;  %v1817_v27 = vpop.xlane.xlu1 %1816  ;;  %v8427_v46 = vunpack.c.l.bf16 %v6490_v22  ;;  %v1589_v8 = vmul.f32 %v6270_v40, %v1454_v17  ;;  %v8428_v52 = vunpack.c.l.bf16 %v6451_v11  ;;  %v8429_v41 = vunpack.c.h.bf16 %v6490_v22 }
 0x494   : > { %v2054_v54 = vadd.f32 %v6226_v10, %v1736_v32  ;;  %v2483_v39 = vrot.slane %v2052_v35, %v6259_v55  ;;  %v1893_v17 = vsel %vm8378_vm3, %v1585_v30, 0.0  ;;  %v1902_v11 = vsel %vm8378_vm3, %v1588_v49, 0.0 }
 0x495   : > { %v1342_v44 = vadd.f32 %v8427_v46, %v6129_v59  ;;  %v1294_v48 = vadd.f32 %v8428_v52, %v6042_v19  ;;  %v1343_v62 = vadd.f32 %v8429_v41, %v6129_v59  ;;  %v2081_v46 = vadd.f32 %v6226_v10, %v1817_v27 }
 0x496   : > { %1804 = vadd.xlane.f32.xlu0 %v1803_v61  ;;  %1813 = vadd.xlane.f32.xlu1 %v1812_v51  ;;  %v1586_v22 = vmul.f32 %v6270_v40, %v1451_v58  ;;  %v2082_v52 = vadd.f32 %v6226_v10, %v6516_v20  ;;  %v1806_v32 = vsel %vm8378_vm3, %v1556_v14, 0.0  ;;  %v1324_v27 = vadd.f32 %v4754_v57, %v6084_v4 }
 0x497   : > { %v1739_v61 = vpop.xlane.xlu0 %1738  ;;  %v1733_v51 = vpop.xlane.xlu1 %1732  ;;  %v1470_v35 = vmax.f32 %v1342_v44, 0.0  ;;  %v1905_v30 = vsel %vm8378_vm3, %v1589_v8, 0.0  ;;  %v2493_v49 = vrot.slane %v2054_v54, %v6287_v21  ;;  %v2484_v58 = vsel %vm2301_vm6, %v2483_v39, %v6540_v26 }
 0x498   : > { %v2055_v13 = vadd.f32 %v6226_v10, %v1739_v61  ;;  %v2053_v19 = vadd.f32 %v6226_v10, %v1733_v51  ;;  %v1422_v61 = vmax.f32 %v1294_v48, 0.0  ;;  %v1471_v51 = vmax.f32 %v1343_v62, 0.0 }
 0x499   : > { %v2084_v20 = vadd.f32 %v6226_v10, %v1826_v25  ;;  %v2627_v14 = vrot.slane %v2081_v46, %v6235_v18  ;;  %v2631_v48 = vrot.slane %v2082_v52, %v6231_v23  ;;  %v1605_v26 = vmul.f32 %v6270_v40, %v1470_v35 }
 0x49a   : > { %v2488_v41 = vrot.slane %v2053_v19, %v6256_v53  ;;  %1894 = vadd.xlane.f32.xlu0 %v1893_v17  ;;  %1903 = vadd.xlane.f32.xlu1 %v1902_v11  ;;  %v2498_v57 = vrot.slane %v2055_v13, %v6296_v42  ;;  %v1344_v25 = vadd.f32 %v4794_v9, %v6592_v60  ;;  %v1452_v39 = vmax.f32 %v1324_v27, 0.0 }
 0x49b   : > { %v1829_v44 = vpop.xlane.xlu0 %1828  ;;  %v1823_v6 = vpop.xlane.xlu1 %1822  ;;  %v1340_v46 = vadd.f32 %v4786_v34, %v6129_v59  ;;  %v2632_v11 = vsel %vm2287_vm4, %v2631_v48, %v2627_v14  ;;  %v1896_v35 = vsel %vm8378_vm3, %v1586_v22, 0.0  ;;  %v1355_v9 = vadd.f32 %v4815_v50, %v6592_v60  ;;  %v6656_v22 = vld [vmem:[%s8414_s3 + $0x1f8] sm:$0xff]  }
 0x49c   : > { %v2489_v17 = vsel %vm2308_vm7, %v2488_v41, %v2484_v58  ;;  %v2085_v19 = vadd.f32 %v6226_v10, %v1829_v44  ;;  %v2083_v8 = vadd.f32 %v6226_v10, %v1823_v6  ;;  %v2641_v6 = vrot.slane %v2084_v20, %v6259_v55 }
 0x49d   : > { %v2494_v62 = vsel %vm2315_vm8, %v2493_v49, %v2489_v17  ;;  %v1557_v27 = vmul.f32 %v6270_v40, %v1422_v61  ;;  %v1953_v58 = vsel %vm8378_vm3, %v1605_v26, 0.0  ;;  %v1606_v20 = vmul.f32 %v6270_v40, %v1471_v51 }
 0x49e   : > { %v2636_v54 = vrot.slane %v2083_v8, %v6247_v38  ;;  %1807 = vadd.xlane.f32.xlu0 %v1806_v32  ;;  %1906 = vadd.xlane.f32.xlu1 %v1905_v30  ;;  %v6639_v13 = vsel %vm2322_vm9, %v2498_v57, %v2494_v62  ;;  %v2646_v49 = vrot.slane %v2085_v19, %v6256_v53  ;;  %v1472_v14 = vmax.f32 %v1344_v25, 0.0 }
 0x49f   : > { %v1697_v52 = vpop.xlane.xlu0 %1696  ;;  %v1691_v41 = vpop.xlane.xlu1 %1690  ;;  %v1587_v50 = vmul.f32 %v6270_v40, %v1452_v39  ;;  %v1468_v61 = vmax.f32 %v1340_v46, 0.0  ;;  %v8430_v57 = vunpack.c.h.bf16 %v6554_v45  ;;  %v1483_v62 = vmax.f32 %v1355_v9, 0.0 }
 0x4a0   : > { %v2637_v32 = vsel %vm2294_vm5, %v2636_v54, %v2632_v11  ;;  %v2039_v30 = vadd.f32 %v6226_v10, %v1691_v41  ;;  %v2041_v51 = vadd.f32 %v6226_v10, %v1697_v52  ;;  %v4759_v26 = vunpack.c.h.bf16 %v6478_v33 }
 0x4a1   : > { %v2642_v34 = vsel %vm2301_vm6, %v2641_v6, %v2637_v32  ;;  %v1341_v17 = vadd.f32 %v8430_v57, %v6129_v59  ;;  %v4823_v39 = vunpack.c.h.bf16 %v6656_v22  ;;  %v4795_v46 = vunpack.c.h.bf16 %v6564_v36 }
 0x4a2   : > { %1897 = vadd.xlane.f32.xlu0 %v1896_v35  ;;  %1954 = vadd.xlane.f32.xlu1 %v1953_v58  ;;  %v6660_v44 = vsel %vm2308_vm7, %v2646_v49, %v2642_v34  ;;  %v2419_v19 = vrot.slane %v2039_v30, %v6296_v42  ;;  %v1809_v45 = vsel %vm8378_vm3, %v1557_v27, 0.0  ;;  %v1956_v59 = vsel %vm8378_vm3, %v1606_v20, 0.0 }
 0x4a3   : > { %v1700_v8 = vpop.xlane.xlu0 %1699  ;;  %v1694_v48 = vpop.xlane.xlu1 %1693  ;;  %v1607_v6 = vmul.f32 %v6270_v40, %v1472_v14  ;;  %v8431_v11 = vunpack.c.l.bf16 %v6586_v3  ;;  %v1899_v41 = vsel %vm8378_vm3, %v1587_v50, 0.0  ;;  %v1603_v35 = vmul.f32 %v6270_v40, %v1468_v61  ;;  %v5136_v61 = vld [vmem:[%s8414_s3 + $0x1c8] sm:$0xff]  }
 0x4a4   : > { %v2042_v25 = vadd.f32 %v6226_v10, %v1700_v8  ;;  %v2040_v54 = vadd.f32 %v6226_v10, %v1694_v48  ;;  %v1469_v9 = vmax.f32 %v1341_v17, 0.0  ;;  %v2429_v36 = vrot.slane %v2041_v51, %v6300_v24 }
 0x4a5   : > { %v1356_v52 = vadd.f32 %v8431_v11, %v6592_v60  ;;  %v2420_v49 = vsel %vm2322_vm9, %v2419_v19, %v6575_v16  ;;  %v1618_v27 = vmul.f32 %v6270_v40, %v1483_v62  ;;  %v1327_v34 = vadd.f32 %v4759_v26, %v6084_v4 }
 0x4a6   : > { %v2424_v33 = vrot.slane %v2040_v54, %v6307_v28  ;;  %1810 = vadd.xlane.f32.xlu0 %v1809_v45  ;;  %1957 = vadd.xlane.f32.xlu1 %v1956_v59  ;;  %v2434_v58 = vrot.slane %v2042_v25, %v6333_v43  ;;  %v1959_v57 = vsel %vm8378_vm3, %v1607_v6, 0.0  ;;  %v1359_v51 = vadd.f32 %v4823_v39, %v6592_v60 }
 0x4a7   : > { %v1745_v32 = vpop.xlane.xlu0 %1744  ;;  %v1742_v30 = vpop.xlane.xlu1 %1741  ;;  %v1484_v17 = vmax.f32 %v1356_v52, 0.0  ;;  %v1604_v26 = vmul.f32 %v6270_v40, %v1469_v9  ;;  %v1345_v25 = vadd.f32 %v4795_v46, %v6592_v60  ;;  %v4798_v54 = vunpack.c.l.bf16 %v5136_v61 }
 0x4a8   : > { %v2425_v20 = vsel %vm2329_vm10, %v2424_v33, %v2420_v49  ;;  %v2057_v14 = vadd.f32 %v6226_v10, %v1745_v32  ;;  %v2056_v50 = vadd.f32 %v6226_v10, %v1742_v30  ;;  %v1947_v59 = vsel %vm8378_vm3, %v1603_v35, 0.0 }
 0x4a9   : > { %v2430_v16 = vsel %vm8370_vm11, %v2429_v36, %v2425_v20  ;;  %v1992_v6 = vsel %vm8378_vm3, %v1618_v27, 0.0  ;;  %v1619_v52 = vmul.f32 %v6270_v40, %v1484_v17  ;;  %v1455_v33 = vmax.f32 %v1327_v34, 0.0  ;;  %v5137_v20 = vld [vmem:[%s8414_s3 + $0x1d0] sm:$0xff]  }
 0x4aa   : > { %v2508_v4 = vrot.slane %v2057_v14, %v6300_v24  ;;  %v2503_v19 = vrot.slane %v2056_v50, %v6307_v28  ;;  %1900 = vadd.xlane.f32.xlu0 %v1899_v41  ;;  %1960 = vadd.xlane.f32.xlu1 %v1959_v57  ;;  %v2435_v8 = vsel %vm2343_vm12, %v2434_v58, %v2430_v16  ;;  %v1487_v41 = vmax.f32 %v1359_v51, 0.0 }
 0x4ab   : > { %v1703_v48 = vpop.xlane.xlu0 %1702  ;;  %v6699_v62 = vpop.xlane.xlu1 %1831  ;;  %v1950_v35 = vsel %vm8378_vm3, %v1604_v26, 0.0  ;;  %v1473_v49 = vmax.f32 %v1345_v25, 0.0  ;;  %v1346_v32 = vadd.f32 %v4798_v54, %v6592_v60  ;;  %v1995_v30 = vsel %vm8378_vm3, %v1619_v52, 0.0 }
 0x4ac   : > { %v2504_v45 = vsel %vm2329_vm10, %v2503_v19, %v6639_v13  ;;  %v2043_v39 = vadd.f32 %v6226_v10, %v1703_v48  ;;  %v1590_v27 = vmul.f32 %v6270_v40, %v1455_v33  ;;  %v1622_v34 = vmul.f32 %v6270_v40, %v1487_v41 }
 0x4ad   : > { %v6709_v11 = vsel %vm8370_vm11, %v2508_v4, %v2504_v45  ;;  %v4799_v58 = vunpack.c.h.bf16 %v5136_v61  ;;  %v1608_v16 = vmul.f32 %v6270_v40, %v1473_v49  ;;  %v4802_v57 = vunpack.c.l.bf16 %v5137_v20 }
 0x4ae   : > { %v2439_v9 = vrot.slane %v2043_v39, %v6363_v5  ;;  %1948 = vadd.xlane.f32.xlu0 %v1947_v59  ;;  %1993 = vadd.xlane.f32.xlu1 %v1992_v6  ;;  %v1908_v17 = vsel %vm8378_vm3, %v1590_v27, 0.0  ;;  %v2004_v51 = vsel %vm8378_vm3, %v1622_v34, 0.0  ;;  %v1474_v4 = vmax.f32 %v1346_v32, 0.0  ;;  %v5138_v39 = vld [vmem:[%s8414_s3 + $0x1d8] sm:$0xff]  }
 0x4af   : > { %v6713_v46 = vpop.xlane.xlu0 %1747  ;;  %v6715_v13 = vpop.xlane.xlu1 %1834  ;;  %v1347_v61 = vadd.f32 %v4799_v58, %v6592_v60  ;;  %v1348_v48 = vadd.f32 %v4802_v57, %v6592_v60  ;;  %v1962_v26 = vsel %vm8378_vm3, %v1608_v16, 0.0  ;;  %v4803_v45 = vunpack.c.h.bf16 %v5137_v20 }
 0x4b0   : > { %v6718_v36 = vsel %vm2350_vm13, %v2439_v9, %v2435_v8  ;;  %v1609_v25 = vmul.f32 %v6270_v40, %v1474_v4  ;;  %v4806_v52 = vunpack.c.l.bf16 %v5138_v39  ;;  %v4807_v34 = vunpack.c.h.bf16 %v5138_v39 }
 0x4b1   : > { %v1475_v54 = vmax.f32 %v1347_v61, 0.0  ;;  %v1476_v9 = vmax.f32 %v1348_v48, 0.0  ;;  %vm8371_vm11 = vcmask 1041409  }
 0x4b2   : > { %1951 = vadd.xlane.f32.xlu0 %v1950_v35  ;;  %1996 = vadd.xlane.f32.xlu1 %v1995_v30  ;;  %v1965_v33 = vsel %vm8378_vm3, %v1609_v25, 0.0  ;;  %v1349_v35 = vadd.f32 %v4803_v45, %v6592_v60  ;;  %v1350_v27 = vadd.f32 %v4806_v52, %v6592_v60 }
 0x4b3   : > { %v6728_v14 = vpop.xlane.xlu0 %1837  ;;  %v6730_v50 = vpop.xlane.xlu1 %1750  ;;  %v1610_v41 = vmul.f32 %v6270_v40, %v1475_v54  ;;  %v1611_v16 = vmul.f32 %v6270_v40, %v1476_v9 }
 0x4b4   : > { %v1477_v57 = vmax.f32 %v1349_v35, 0.0 }
 0x4b5   : > { %v1968_v20 = vsel %vm8378_vm3, %v1610_v41, 0.0  ;;  %v1971_v45 = vsel %vm8378_vm3, %v1611_v16, 0.0 }
 0x4b6   : > { %1909 = vadd.xlane.f32.xlu0 %v1908_v17  ;;  %2005 = vadd.xlane.f32.xlu1 %v2004_v51  ;;  %v5139_v17 = vld [vmem:[%s8414_s3 + $0x1e0] sm:$0xff]   ;;  %v1612_v39 = vmul.f32 %v6270_v40, %v1477_v57 }
 0x4b7   : > { %v1706_v19 = vpop.xlane.xlu0 %1705  ;;  %v6736_v8 = vpop.xlane.xlu1 %1840  ;;  %v4810_v25 = vunpack.c.l.bf16 %v5139_v17 }
 0x4b8   : > { %v2044_v30 = vadd.f32 %v6226_v10, %v1706_v19 }
 0x4ba   : > { %1963 = vadd.xlane.f32.xlu0 %v1962_v26  ;;  %v2444_v19 = vrot.slane %v2044_v30, %v6321_v15  ;;  %v1351_v26 = vadd.f32 %v4807_v34, %v6592_v60  ;;  %v1352_v30 = vadd.f32 %v4810_v25, %v6592_v60  ;;  %v4811_v34 = vunpack.c.h.bf16 %v5139_v17 }
 0x4bb   : > { %v1709_v59 = vpop.xlane.xlu0 %1708  ;;  %v6744_v6 = vpop.xlane.xlu1 %1753  ;;  %v4814_v25 = vunpack.c.l.bf16 %v6572_v1 }
 0x4bc   : > { %v2045_v58 = vadd.f32 %v6226_v10, %v1709_v59  ;;  %v1478_v59 = vmax.f32 %v1350_v27, 0.0  ;;  %v2445_v35 = vsel %vm2357_vm14, %v2444_v19, %v6718_v36  ;;  %v1974_v27 = vsel %vm8378_vm3, %v1612_v39, 0.0 }
 0x4bd   : > { %v1479_v16 = vmax.f32 %v1351_v26, 0.0  ;;  %v1480_v39 = vmax.f32 %v1352_v30, 0.0  ;;  %v2059_v30 = vadd.f32 %v6226_v10, %v6730_v50 }
 0x4be   : > { %1966 = vadd.xlane.f32.xlu0 %v1965_v33  ;;  %v2449_v54 = vrot.slane %v2045_v58, %v6355_v7 }
 0x4bf   : > { %v1712_v49 = vpop.xlane.xlu0 %1711  ;;  %v6749_v32 = vpop.xlane.xlu1 %1843 }
 0x4c0   : > { %v2046_v51 = vadd.f32 %v6226_v10, %v1712_v49  ;;  %v2450_v58 = vsel %vm2364_vm15, %v2449_v54, %v2445_v35  ;;  %v5346_v54 = vld [vmem:[%s8357_s10] ss:$0 sm:$0xff] }
 0x4c2   : > { %1969 = vadd.xlane.f32.xlu0 %v1968_v20  ;;  %v2454_v52 = vrot.slane %v2046_v51, %v6381_v0  ;;  %v1613_v20 = vmul.f32 %v6270_v40, %v1478_v59 }
 0x4c3   : > { %v1715_v4 = vpop.xlane.xlu0 %1714  ;;  %v1757_v61 = vpop.xlane.xlu1 %1756 }
 0x4c4   : > { %v2047_v48 = vadd.f32 %v6226_v10, %v1715_v4  ;;  %v2455_v57 = vsel %vm2371_vm0, %v2454_v52, %v2450_v58  ;;  %v1977_v26 = vsel %vm8378_vm3, %v1613_v20, 0.0 }
 0x4c6   : > { %1972 = vadd.xlane.f32.xlu0 %v1971_v45  ;;  %v2459_v33 = vrot.slane %v2047_v48, %v6395_v63  ;;  %v1353_v48 = vadd.f32 %v4811_v34, %v6592_v60  ;;  %v1614_v45 = vmul.f32 %v5346_v54, %v1479_v16  ;;  %v4822_v16 = vunpack.c.l.bf16 %v6656_v22 }
 0x4c7   : > { %v1718_v41 = vpop.xlane.xlu0 %1717  ;;  %v6768_v9 = vpop.xlane.xlu1 %1846 }
 0x4c8   : > { %v2048_v49 = vadd.f32 %v6226_v10, %v1718_v41  ;;  %v2460_v36 = vsel %vm2378_vm1, %v2459_v33, %v2455_v57  ;;  %v1354_v33 = vadd.f32 %v4814_v25, %v6592_v60  ;;  %v1980_v1 = vsel %vm8378_vm3, %v1614_v45, 0.0 }
 0x4c9   : > { %v1615_v41 = vmul.f32 %v5346_v54, %v1480_v39  ;;  %v1481_v35 = vmax.f32 %v1353_v48, 0.0  ;;  %v2061_v57 = vadd.f32 %v6226_v10, %v1757_v61 }
 0x4ca   : > { %v2464_v51 = vrot.slane %v2048_v49, %v6410_v29  ;;  %1975 = vadd.xlane.f32.xlu0 %v1974_v27  ;;  %v2058_v49 = vadd.f32 %v6226_v10, %v6713_v46  ;;  %v2060_v27 = vadd.f32 %v6226_v10, %v6744_v6  ;;  %v1482_v20 = vmax.f32 %v1354_v33, 0.0 }
 0x4cb   : > { %v6780_v4 = vpop.xlane.xlu0 %1858  ;;  %v1760_v19 = vpop.xlane.xlu1 %1759  ;;  %v1358_v33 = vadd.f32 %v4822_v16, %v6592_v60 }
 0x4cc   : > { %v2465_v17 = vsel %vm2385_vm2, %v2464_v51, %v2460_v36  ;;  %v1616_v51 = vmul.f32 %v5346_v54, %v1481_v35  ;;  %v2513_v36 = vrot.slane %v2058_v49, %v6333_v43  ;;  %v2062_v50 = vadd.f32 %v6226_v10, %v1760_v19 }
 0x4cd   : > { %v2941_v40 = vsel %vm8371_vm11, %v2465_v17, %v6481_v12  ;;  %v4819_v12 = vunpack.c.h.bf16 %v6586_v3  ;;  %v1983_v3 = vsel %vm8378_vm3, %v1615_v41, 0.0  ;;  %v2518_v17 = vrot.slane %v2059_v30, %v6363_v5 }
 0x4ce   : > { %1978 = vadd.xlane.f32.xlu0 %v1977_v26  ;;  %v2523_v22 = vrot.slane %v2060_v27, %v6321_v15  ;;  %v1617_v61 = vmul.f32 %v5346_v54, %v1482_v20  ;;  %v2528_v26 = vrot.slane %v2061_v57, %v6355_v7  ;;  %v1986_v45 = vsel %vm8378_vm3, %v1616_v51, 0.0 }
 0x4cf   : > { %v6791_v59 = vpop.xlane.xlu0 %1861  ;;  %v6793_v52 = vpop.xlane.xlu1 %1849  ;;  %v1357_v46 = vadd.f32 %v4819_v12, %v6592_v60  ;;  %v2514_v19 = vsel %vm2343_vm12, %v2513_v36, %v6709_v11  ;;  %v1486_v16 = vmax.f32 %v1358_v33, 0.0  ;;  %vm8379_vm11 = vcmask 1042434  }
 0x4d0   : > { %v2519_v41 = vsel %vm2350_vm13, %v2518_v17, %v2514_v19  ;;  %v1989_v60 = vsel %vm8378_vm3, %v1617_v61, 0.0 }
 0x4d1   : > { %v1485_v39 = vmax.f32 %v1357_v46, 0.0  ;;  %v2524_v30 = vsel %vm2357_vm14, %v2523_v22, %v2519_v41 }
 0x4d2   : > { %1981 = vadd.xlane.f32.xlu0 %v1980_v1  ;;  %v2533_v1 = vrot.slane %v2062_v50, %v6381_v0  ;;  %v2529_v27 = vsel %vm2364_vm15, %v2528_v26, %v2524_v30 }
 0x4d3   : > { %v6802_v34 = vpop.xlane.xlu0 %1771  ;;  %v1763_v58 = vpop.xlane.xlu1 %1762  ;;  %v1620_v20 = vmul.f32 %v5346_v54, %v1485_v39 }
 0x4d4   : > { %v2063_v48 = vadd.f32 %v6226_v10, %v1763_v58  ;;  %v2534_v11 = vsel %vm2371_vm0, %v2533_v1, %v2529_v27  ;;  %v2066_v56 = vadd.f32 %v6226_v10, %v6802_v34  ;;  %v2088_v34 = vadd.f32 %v6226_v10, %v6728_v14 }
 0x4d5   : > { %v1998_v17 = vsel %vm8378_vm3, %v1620_v20, 0.0 }
 0x4d6   : > { %1984 = vadd.xlane.f32.xlu0 %v1983_v3  ;;  %v2538_v35 = vrot.slane %v2063_v48, %v6395_v63  ;;  %v1621_v48 = vmul.f32 %v5346_v54, %v1486_v16  ;;  %v2661_v14 = vrot.slane %v2088_v34, %v6307_v28 }
 0x4d7   : > { %v6814_v6 = vpop.xlane.xlu0 %1774  ;;  %v6816_v25 = vpop.xlane.xlu1 %1852 }
 0x4d8   : > { %v2539_v3 = vsel %vm2378_vm1, %v2538_v35, %v2534_v11  ;;  %v2001_v26 = vsel %vm8378_vm3, %v1621_v48, 0.0  ;;  %vm8441_vm3 = vcmask 589312  }
 0x4da   : > { %1987 = vadd.xlane.f32.xlu0 %v1986_v45 }
 0x4db   : > { %v1778_v12 = vpop.xlane.xlu0 %1777  ;;  %v1766_v49 = vpop.xlane.xlu1 %1765 }
 0x4dc   : > { %v2064_v58 = vadd.f32 %v6226_v10, %v1766_v49 }
 0x4de   : > { %v2543_v57 = vrot.slane %v2064_v58, %v6410_v29  ;;  %1990 = vadd.xlane.f32.xlu0 %v1989_v60 }
 0x4df   : > { %v6834_v51 = vpop.xlane.xlu0 %1864  ;;  %v6836_v46 = vpop.xlane.xlu1 %1855 }
 0x4e0   : > { %v2544_v36 = vsel %vm2385_vm2, %v2543_v57, %v2539_v3 }
 0x4e1   : > { %v6840_v50 = vsel %vm8379_vm11, %v2544_v36, %v2941_v40  ;;  %vm8380_vm11 = vcmask 1044484  }
 0x4e2   : > { %1999 = vadd.xlane.f32.xlu0 %v1998_v17 }
 0x4e3   : > { %v6843_v22 = vpop.xlane.xlu0 %1912  ;;  %v1769_v61 = vpop.xlane.xlu1 %1768 }
 0x4e4   : > { %v2065_v31 = vadd.f32 %v6226_v10, %v1769_v61  ;;  %v2552_v61 = vrot.slane %v2066_v56, %v6231_v23 }
 0x4e6   : > { %2002 = vadd.xlane.f32.xlu0 %v2001_v26  ;;  %v2548_v2 = vrot.slane %v2065_v31, %v6235_v18  ;;  %v2068_v31 = vadd.f32 %v6226_v10, %v1778_v12 }
 0x4e7   : > { %v6846_v45 = vpop.xlane.xlu0 %1918  ;;  %v6848_v39 = vpop.xlane.xlu1 %1867 }
 0x4eb   : > { %v1787_v33 = vpop.xlane.xlu0 %1786  ;;  %v1781_v19 = vpop.xlane.xlu1 %1780 }
 0x4ef   : > { %v6850_v1 = vpop.xlane.xlu0 %1876  ;;  %v6852_v40 = vpop.xlane.xlu1 %1870 }
 0x4f3   : > { %v1790_v41 = vpop.xlane.xlu0 %1789  ;;  %v6854_v35 = vpop.xlane.xlu1 %1915 }
 0x4f7   : > { %v6856_v54 = vpop.xlane.xlu0 %1879  ;;  %v1784_v49 = vpop.xlane.xlu1 %1783 }
 0x4f8   : > { %8432 = vst [vmem:[#allocation24_spill] sm:$0xff] %v6856_v54 }
 0x4fb   : > { %v6858_v30 = vpop.xlane.xlu0 %1924  ;;  %v6860_v58 = vpop.xlane.xlu1 %1873 }
 0x4fc   : > { %8433 = vst [vmem:[#allocation25_spill] sm:$0xff] %v6858_v30 }
 0x4ff   : > { %v1793_v27 = vpop.xlane.xlu0 %1792  ;;  %v6862_v60 = vpop.xlane.xlu1 %1921 }
 0x503   : > { %v6864_v20 = vpop.xlane.xlu0 %1882  ;;  %v6866_v16 = vpop.xlane.xlu1 %1927 }
 0x507   : > { %v1796_v11 = vpop.xlane.xlu0 %1795  ;;  %v6868_v57 = vpop.xlane.xlu1 %1930 }
 0x508   : > { %8434 = vst [vmem:[#allocation26_spill] sm:$0xff] %v6868_v57 }
 0x50b   : > { %v6870_v3 = vpop.xlane.xlu0 %1885  ;;  %v6872_v36 = vpop.xlane.xlu1 %1933 }
 0x50c   : > { %8435 = vst [vmem:[#allocation27_spill] sm:$0xff] %v6870_v3  ;;  %8436 = vst [vmem:[#allocation28_spill] sm:$0xff] %v6872_v36  ;;  %v2086_v36 = vadd.f32 %v6226_v10, %v6699_v62  ;;  %v2070_v3 = vadd.f32 %v6226_v10, %v1784_v49 }
 0x50e   : > { %v2651_v30 = vrot.slane %v2086_v36, %v6287_v21  ;;  %v2572_v49 = vrot.slane %v2070_v3, %v6287_v21 }
 0x50f   : > { %v1799_v17 = vpop.xlane.xlu0 %1798  ;;  %v6876_v26 = vpop.xlane.xlu1 %1936 }
 0x510   : > { %8438 = vst [vmem:[#allocation30_spill] sm:$0xff] %v6876_v26  ;;  %v2087_v26 = vadd.f32 %v6226_v10, %v6715_v13  ;;  %v2089_v13 = vadd.f32 %v6226_v10, %v6736_v8  ;;  %v2071_v8 = vadd.f32 %v6226_v10, %v1787_v33  ;;  %v2093_v33 = vadd.f32 %v6226_v10, %v6816_v25 }
 0x512   : > { %v2656_v56 = vrot.slane %v2087_v26, %v6296_v42  ;;  %v2090_v26 = vadd.f32 %v6226_v10, %v6749_v32  ;;  %v2073_v32 = vadd.f32 %v6226_v10, %v1793_v27  ;;  %v2075_v27 = vadd.f32 %v6226_v10, %v1799_v17 }
 0x513   : > { %v6874_v48 = vpop.xlane.xlu0 %1888  ;;  %v6881_v47 = vpop.xlane.xlu1 %1939 }
 0x514   : > { %8437 = vst [vmem:[#allocation29_spill] sm:$0xff] %v6874_v48  ;;  %8439 = vst [vmem:[#allocation31_spill] sm:$0xff] %v6881_v47  ;;  %v2067_v48 = vadd.f32 %v6226_v10, %v6814_v6  ;;  %v2069_v47 = vadd.f32 %v6226_v10, %v1781_v19  ;;  %v2562_v19 = vrot.slane %v2068_v31, %v6259_v55 }
 0x515   : > { %v2092_v31 = vadd.f32 %v6226_v10, %v6793_v52  ;;  %v2094_v52 = vadd.f32 %v6226_v10, %v6836_v46  ;;  %v2686_v46 = vrot.slane %v2093_v33, %v6355_v7 }
 0x516   : > { %v2557_v6 = vrot.slane %v2067_v48, %v6247_v38  ;;  %v2652_v48 = vsel %vm2315_vm8, %v2651_v30, %v6660_v44 }
 0x517   : > { %v1802_v37 = vpop.xlane.xlu0 %1801  ;;  %v6901_v54 = vpop.xlane.xlu1 %1942 }
 0x51b   : > { %v6884_v57 = vpop.xlane.xlu0 %1891  ;;  %v6928_v30 = vpop.xlane.xlu1 %1945 }
 0x51c   : > { %8440 = vst [vmem:[#allocation32_spill] sm:$0xff] %v6884_v57  ;;  %v2553_v57 = vsel %vm2287_vm4, %v2552_v61, %v2548_v2  ;;  %v2567_v2 = vrot.slane %v2069_v47, %v6256_v53  ;;  %v2657_v61 = vsel %vm2322_vm9, %v2656_v56, %v2652_v48  ;;  %v2091_v47 = vadd.f32 %v6226_v10, %v6768_v9 }
 0x51d   : > { %v2558_v12 = vsel %vm2294_vm5, %v2557_v6, %v2553_v57  ;;  %v2666_v57 = vrot.slane %v2089_v13, %v6300_v24  ;;  %v2662_v3 = vsel %vm2329_vm10, %v2661_v14, %v2657_v61  ;;  %v2072_v6 = vadd.f32 %v6226_v10, %v1790_v41 }
 0x51e   : > { %v2563_v34 = vsel %vm2301_vm6, %v2562_v19, %v2558_v12  ;;  %v2074_v56 = vadd.f32 %v6226_v10, %v1796_v11  ;;  %v2671_v14 = vrot.slane %v2090_v26, %v6333_v43  ;;  %v2577_v12 = vrot.slane %v2071_v8, %v6296_v42 }
 0x51f   : > { %v1805_v62 = vpop.xlane.xlu0 %1804  ;;  %v2568_v44 = vsel %vm2308_vm7, %v2567_v2, %v2563_v34  ;;  %v2667_v2 = vsel %vm8441_vm3, %v2666_v57, %v2662_v3  ;;  %v2676_v25 = vrot.slane %v2091_v47, %v6363_v5  ;;  %v2076_v41 = vadd.f32 %v6226_v10, %v1802_v37  ;;  %v1814_v34 = vpop.xlane.xlu1 %1813 }
 0x520   : > { %v2573_v9 = vsel %vm2315_vm8, %v2572_v49, %v2568_v44  ;;  %v2681_v19 = vrot.slane %v2092_v31, %v6321_v15  ;;  %v2587_v49 = vrot.slane %v2073_v32, %v6300_v24  ;;  %v2077_v48 = vadd.f32 %v6226_v10, %v1805_v62 }
 0x521   : > { %v2578_v11 = vsel %vm2322_vm9, %v2577_v12, %v2573_v9  ;;  %v2582_v26 = vrot.slane %v2072_v6, %v6307_v28  ;;  %v2592_v17 = vrot.slane %v2074_v56, %v6333_v43  ;;  %v2672_v37 = vsel %vm2343_vm12, %v2671_v14, %v2667_v2 }
 0x522   : > { %v2691_v57 = vrot.slane %v2094_v52, %v6381_v0  ;;  %v2597_v47 = vrot.slane %v2075_v27, %v6363_v5  ;;  %v2677_v3 = vsel %vm2350_vm13, %v2676_v25, %v2672_v37  ;;  %v2095_v62 = vadd.f32 %v6226_v10, %v6780_v4 }
 0x523   : > { %v6911_v36 = vpop.xlane.xlu0 %1894  ;;  %v2583_v31 = vsel %vm2329_vm10, %v2582_v26, %v2578_v11  ;;  %v2602_v44 = vrot.slane %v2076_v41, %v6321_v15  ;;  %v2682_v32 = vsel %vm2357_vm14, %v2681_v19, %v2677_v3  ;;  %v2607_v6 = vrot.slane %v2077_v48, %v6355_v7 }
 0x524   : > { %v2588_v33 = vsel %vm8441_vm3, %v2587_v49, %v2583_v31  ;;  %v2687_v9 = vsel %vm2364_vm15, %v2686_v46, %v2682_v32  ;;  %v2096_v4 = vadd.f32 %v6226_v10, %v6791_v59  ;;  %v2696_v25 = vrot.slane %v2095_v62, %v6395_v63  ;;  %v6997_v31 = vpop.xlane.xlu1 %1903 }
 0x525   : > { %v2593_v56 = vsel %vm2343_vm12, %v2592_v17, %v2588_v33  ;;  %v2692_v12 = vsel %vm2371_vm0, %v2691_v57, %v2687_v9  ;;  %vm8381_vm3 = vcmask 1043459   ;;  %v2098_v33 = vadd.f32 %v6226_v10, %v6848_v39 }
 0x526   : > { %v2598_v27 = vsel %vm2350_vm13, %v2597_v47, %v2593_v56  ;;  %v2697_v49 = vsel %vm2378_vm1, %v2696_v25, %v2692_v12  ;;  %v2701_v26 = vrot.slane %v2096_v4, %v6410_v29  ;;  %v2114_v9 = vadd.f32 %v6226_v10, %v6854_v35 }
 0x527   : > { %v1808_v13 = vpop.xlane.xlu0 %1807  ;;  %v2603_v41 = vsel %vm2357_vm14, %v2602_v44, %v2598_v27  ;;  %v2097_v56 = vadd.f32 %v6226_v10, %v6834_v51  ;;  %v2710_v39 = vrot.slane %v2098_v33, %v6231_v23  ;;  %v2115_v4 = vadd.f32 %v6226_v10, %v6846_v45 }
 0x528   : > { %v2078_v8 = vadd.f32 %v6226_v10, %v1808_v13  ;;  %v2080_v13 = vadd.f32 %v6226_v10, %v1814_v34  ;;  %v2608_v19 = vsel %vm2364_vm15, %v2607_v6, %v2603_v41  ;;  %v2702_v37 = vsel %vm2385_vm2, %v2701_v26, %v2697_v49  ;;  %v7003_v6 = vpop.xlane.xlu1 %1906  ;;  %v8442_v26 = vld [vmem:[#allocation24_spill] sm:$0xff] }
 0x529   : > { %v2789_v12 = vrot.slane %v2114_v9, %v6231_v23  ;;  %v2706_v35 = vrot.slane %v2097_v56, %v6235_v18  ;;  %v2794_v41 = vrot.slane %v2115_v4, %v6247_v38  ;;  %v8445_v9 = vld [vmem:[#allocation27_spill] sm:$0xff]  ;;  %v8447_v4 = vld [vmem:[#allocation30_spill] sm:$0xff] }
 0x52a   : > { %v2612_v14 = vrot.slane %v2078_v8, %v6381_v0  ;;  %v2622_v48 = vrot.slane %v2080_v13, %v6410_v29  ;;  %v2100_v13 = vadd.f32 %v6226_v10, %v6860_v58  ;;  %v2116_v58 = vadd.f32 %v6226_v10, %v6862_v60 }
 0x52b   : > { %v6951_v61 = vpop.xlane.xlu0 %1897  ;;  %v2711_v45 = vsel %vm2287_vm4, %v2710_v39, %v2706_v35  ;;  %v2104_v56 = vadd.f32 %v6226_v10, %v8445_v9 }
 0x52c   : > { %v2613_v59 = vsel %vm2371_vm0, %v2612_v14, %v2608_v19  ;;  %v2113_v14 = vadd.f32 %v6226_v10, %v6843_v22  ;;  %v2720_v51 = vrot.slane %v2100_v13, %v6259_v55  ;;  %v7024_v27 = vpop.xlane.xlu1 %1954  ;;  %v2799_v60 = vrot.slane %v2116_v58, %v6259_v55  ;;  %v8446_v13 = vld [vmem:[#allocation28_spill] sm:$0xff]  ;;  %v8448_v58 = vld [vmem:[#allocation29_spill] sm:$0xff] }
 0x52e   : > { %v2785_v22 = vrot.slane %v2113_v14, %v6235_v18 }
 0x52f   : > { %v1811_v52 = vpop.xlane.xlu0 %1810 }
 0x530   : > { %v2079_v2 = vadd.f32 %v6226_v10, %v1811_v52  ;;  %v7050_v14 = vpop.xlane.xlu1 %1957 }
 0x532   : > { %v2617_v11 = vrot.slane %v2079_v2, %v6395_v63  ;;  %v2101_v2 = vadd.f32 %v6226_v10, %v6850_v1 }
 0x533   : > { %v6980_v46 = vpop.xlane.xlu0 %1900 }
 0x534   : > { %v2618_v17 = vsel %vm2378_vm1, %v2617_v11, %v2613_v59  ;;  %v2790_v11 = vsel %vm2287_vm4, %v2789_v12, %v2785_v22  ;;  %v2118_v59 = vadd.f32 %v6226_v10, %v6866_v16  ;;  %v2725_v1 = vrot.slane %v2101_v2, %v6256_v53 }
 0x535   : > { %v2623_v8 = vsel %vm2385_vm2, %v2622_v48, %v2618_v17  ;;  %v2103_v48 = vadd.f32 %v6226_v10, %v6864_v20  ;;  %v2102_v17 = vadd.f32 %v6226_v10, %v8442_v26  ;;  %v2120_v20 = vadd.f32 %v6226_v10, %v8446_v13  ;;  %v8450_v13 = vld [vmem:[#allocation32_spill] sm:$0xff] }
 0x536   : > { %v2945_v57 = vsel %vm8381_vm3, %v2623_v8, %v6840_v50  ;;  %v2099_v50 = vadd.f32 %v6226_v10, %v6852_v40  ;;  %v8443_v8 = vld [vmem:[#allocation25_spill] sm:$0xff]  ;;  %v2795_v39 = vsel %vm2294_vm5, %v2794_v41, %v2790_v11  ;;  %v2105_v22 = vadd.f32 %v6226_v10, %v8448_v58 }
 0x537   : > { %v6988_v47 = vpop.xlane.xlu0 %1948  ;;  %v6991_v34 = vsel %vm8380_vm11, %v2702_v37, %v2945_v57  ;;  %v2117_v37 = vadd.f32 %v6226_v10, %v8443_v8  ;;  %v8444_v57 = vld [vmem:[#allocation26_spill] sm:$0xff]  ;;  %v2800_v12 = vsel %vm2301_vm6, %v2799_v60, %v2795_v39  ;;  %v2735_v35 = vrot.slane %v2103_v48, %v6296_v42 }
 0x538   : > { %v2715_v40 = vrot.slane %v2099_v50, %v6247_v38  ;;  %v2119_v33 = vadd.f32 %v6226_v10, %v8444_v57  ;;  %v2730_v2 = vrot.slane %v2102_v17, %v6287_v21  ;;  %v2819_v60 = vrot.slane %v2120_v20, %v6307_v28 }
 0x539   : > { %v2123_v48 = vadd.f32 %v6226_v10, %v6901_v54  ;;  %v2745_v57 = vrot.slane %v2105_v22, %v6300_v24  ;;  %v2106_v54 = vadd.f32 %v6226_v10, %v8450_v13  ;;  %vm8451_vm11 = vcmask 589312  }
 0x53a   : > { %v2716_v19 = vsel %vm2294_vm5, %v2715_v40, %v2711_v45  ;;  %v2121_v40 = vadd.f32 %v6226_v10, %v8447_v4  ;;  %v2804_v45 = vrot.slane %v2117_v37, %v6256_v53  ;;  %vm8452_vm3 = vmmov %vm8451_vm11  ;;  %v2125_v13 = vadd.f32 %v6226_v10, %v6988_v47 }
 0x53b   : > { %v6993_v3 = vpop.xlane.xlu0 %1951  ;;  %v2721_v49 = vsel %vm2301_vm6, %v2720_v51, %v2716_v19  ;;  %v2809_v51 = vrot.slane %v2118_v59, %v6287_v21  ;;  %v2814_v19 = vrot.slane %v2119_v33, %v6296_v42  ;;  %v1961_v33 = vpop.xlane.xlu1 %1960 }
 0x53c   : > { %v2726_v16 = vsel %vm2308_vm7, %v2725_v1, %v2721_v49  ;;  %v8449_v49 = vld [vmem:[#allocation31_spill] sm:$0xff]  ;;  %v2740_v1 = vrot.slane %v2104_v56, %v6307_v28  ;;  %v2805_v26 = vsel %vm2308_vm7, %v2804_v45, %v2800_v12  ;;  %v2824_v17 = vrot.slane %v2121_v40, %v6300_v24 }
 0x53d   : > { %v2122_v41 = vadd.f32 %v6226_v10, %v8449_v49  ;;  %v2731_v59 = vsel %vm2315_vm8, %v2730_v2, %v2726_v16  ;;  %v2810_v37 = vsel %vm2315_vm8, %v2809_v51, %v2805_v26  ;;  %v2834_v40 = vrot.slane %v2123_v48, %v6363_v5 }
 0x53e   : > { %v2736_v8 = vsel %vm2322_vm9, %v2735_v35, %v2731_v59  ;;  %v2815_v9 = vsel %vm2322_vm9, %v2814_v19, %v2810_v37  ;;  %v2107_v51 = vadd.f32 %v6226_v10, %v6911_v36  ;;  %v2129_v58 = vadd.f32 %v6226_v10, %v1961_v33 }
 0x53f   : > { %v6995_v62 = vpop.xlane.xlu0 %1909  ;;  %v2829_v56 = vrot.slane %v2122_v41, %v6333_v43  ;;  %v2741_v39 = vsel %vm2329_vm10, %v2740_v1, %v2736_v8  ;;  %v2820_v4 = vsel %vm2329_vm10, %v2819_v60, %v2815_v9  ;;  %v7094_v2 = vadd.f32 %v6226_v10, %v6928_v30  ;;  %v1994_v60 = vpop.xlane.xlu1 %1993 }
 0x540   : > { %v2825_v35 = vsel %vm8451_vm11, %v2824_v17, %v2820_v4  ;;  %v2108_v45 = vadd.f32 %v6226_v10, %v6951_v61  ;;  %v2750_v49 = vrot.slane %v2106_v54, %v6333_v43  ;;  %v2109_v30 = vadd.f32 %v6226_v10, %v6980_v46 }
 0x541   : > { %v2830_v19 = vsel %vm2343_vm12, %v2829_v56, %v2825_v35  ;;  %v2864_v59 = vrot.slane %v2129_v58, %v6235_v18  ;;  %v2140_v4 = vadd.f32 %v6226_v10, %v1994_v60  ;;  %v2111_v35 = vadd.f32 %v6226_v10, %v7003_v6 }
 0x542   : > { %v2835_v1 = vsel %vm2350_vm13, %v2834_v40, %v2830_v19  ;;  %v2760_v17 = vrot.slane %v2108_v45, %v6321_v15  ;;  %v2112_v40 = vadd.f32 %v6226_v10, %v6995_v62  ;;  %v2844_v62 = vrot.slane %v2125_v13, %v6355_v7 }
 0x543   : > { %v1964_v44 = vpop.xlane.xlu0 %1963  ;;  %v2918_v19 = vrot.slane %v2140_v4, %v6321_v15  ;;  %vm4222_vm11 = vcmask 1041408  }
 0x544   : > { %v2130_v20 = vadd.f32 %v6226_v10, %v1964_v44  ;;  %v2746_v44 = vsel %vm8452_vm3, %v2745_v57, %v2741_v39  ;;  %v2765_v57 = vrot.slane %v2109_v30, %v6355_v7 }
 0x546   : > { %v2868_v36 = vrot.slane %v2130_v20, %v6231_v23  ;;  %v2126_v20 = vadd.f32 %v6226_v10, %v6993_v3 }
 0x547   : > { %v6999_v32 = vpop.xlane.xlu0 %1966 }
 0x548   : > { %v2131_v12 = vadd.f32 %v6226_v10, %v6999_v32  ;;  %v2869_v18 = vsel %vm2287_vm4, %v2868_v36, %v2864_v59  ;;  %vm8453_vm4 = vmmov %vm8452_vm3 }
 0x54a   : > { %v2873_v48 = vrot.slane %v2131_v12, %v6247_v38  ;;  %v2751_v38 = vsel %vm2343_vm12, %v2750_v49, %v2746_v44  ;;  %v2780_v49 = vrot.slane %v2112_v40, %v6410_v29 }
 0x54b   : > { %v1970_v52 = vpop.xlane.xlu0 %1969 }
 0x54c   : > { %v2132_v22 = vadd.f32 %v6226_v10, %v1970_v52  ;;  %v2874_v33 = vsel %vm2294_vm5, %v2873_v48, %v2869_v18  ;;  %vm2948_vm5 = vcmask 1045509  }
 0x54e   : > { %v2878_v26 = vrot.slane %v2132_v22, %v6259_v55  ;;  %v2127_v22 = vadd.f32 %v6226_v10, %v7024_v27 }
 0x54f   : > { %v1973_v25 = vpop.xlane.xlu0 %1972 }
 0x550   : > { %v2133_v32 = vadd.f32 %v6226_v10, %v1973_v25  ;;  %v2755_v25 = vrot.slane %v2107_v51, %v6363_v5 }
 0x552   : > { %v2883_v46 = vrot.slane %v2133_v32, %v6256_v53  ;;  %v2756_v56 = vsel %vm2350_vm13, %v2755_v25, %v2751_v38 }
 0x553   : > { %v1976_v50 = vpop.xlane.xlu0 %1975 }
 0x554   : > { %v2134_v41 = vadd.f32 %v6226_v10, %v1976_v50  ;;  %v2839_v50 = vrot.slane %v7094_v2, %v6321_v15  ;;  %v2128_v15 = vadd.f32 %v6226_v10, %v7050_v14 }
 0x556   : > { %v2888_v55 = vrot.slane %v2134_v41, %v6287_v21  ;;  %v2761_v21 = vsel %vm2357_vm14, %v2760_v17, %v2756_v56  ;;  %v2840_v41 = vsel %vm2357_vm14, %v2839_v50, %v2835_v1 }
 0x557   : > { %v1979_v11 = vpop.xlane.xlu0 %1978  ;;  %v2766_v3 = vsel %vm2364_vm15, %v2765_v57, %v2761_v21 }
 0x558   : > { %v2135_v61 = vadd.f32 %v6226_v10, %v1979_v11  ;;  %v2110_v11 = vadd.f32 %v6226_v10, %v6997_v31  ;;  %v2879_v31 = vsel %vm2301_vm6, %v2878_v26, %v2874_v33  ;;  %v2854_v26 = vrot.slane %v2127_v22, %v6395_v63 }
 0x559   : > { %v2884_v39 = vsel %vm2308_vm7, %v2883_v46, %v2879_v31  ;;  %vm2950_vm6 = vcmask 1046534   ;;  %vm2952_vm7 = vcmask 1047559  }
 0x55a   : > { %v2893_v9 = vrot.slane %v2135_v61, %v6296_v42  ;;  %v2889_v47 = vsel %vm2315_vm8, %v2888_v55, %v2884_v39  ;;  %v8457_v39 = vld [vmem:[#allocation21_spill] sm:$0xff] }
 0x55b   : > { %v1982_v16 = vpop.xlane.xlu0 %1981 }
 0x55c   : > { %v2136_v23 = vadd.f32 %v6226_v10, %v1982_v16  ;;  %v1997_v16 = vpop.xlane.xlu1 %1996  ;;  %v2894_v51 = vsel %vm2322_vm9, %v2893_v9, %v2889_v47  ;;  %vm3885_vm9 = vcmask 31744  }
 0x55d   : > { %v2141_v2 = vadd.f32 %v6226_v10, %v1997_v16 }
 0x55e   : > { %v2898_v54 = vrot.slane %v2136_v23, %v6307_v28 }
 0x55f   : > { %v1985_v52 = vpop.xlane.xlu0 %1984  ;;  %v2923_v59 = vrot.slane %v2141_v2, %v6355_v7 }
 0x560   : > { %v2137_v8 = vadd.f32 %v6226_v10, %v1985_v52  ;;  %v2899_v44 = vsel %vm2329_vm10, %v2898_v54, %v2894_v51  ;;  %v2775_v52 = vrot.slane %v2111_v35, %v6395_v63  ;;  %v2006_v30 = vpop.xlane.xlu1 %2005 }
 0x561   : > { %v2144_v50 = vadd.f32 %v6226_v10, %v2006_v30 }
 0x562   : > { %v2903_v42 = vrot.slane %v2137_v8, %v6300_v24  ;;  %v2770_v24 = vrot.slane %v2110_v11, %v6381_v0  ;;  %v2859_v11 = vrot.slane %v2128_v15, %v6410_v29 }
 0x563   : > { %v1988_v37 = vpop.xlane.xlu0 %1987  ;;  %v2938_v55 = vrot.slane %v2144_v50, %v6410_v29 }
 0x564   : > { %v2138_v53 = vadd.f32 %v6226_v10, %v1988_v37  ;;  %v2904_v6 = vsel %vm8453_vm4, %v2903_v42, %v2899_v44  ;;  %v2771_v32 = vsel %vm2371_vm0, %v2770_v24, %v2766_v3 }
 0x565   : > { %v2776_v1 = vsel %vm2378_vm1, %v2775_v52, %v2771_v32 }
 0x566   : > { %v2908_v12 = vrot.slane %v2138_v53, %v6333_v43  ;;  %v2849_v43 = vrot.slane %v2126_v20, %v6381_v0  ;;  %v2781_v23 = vsel %vm2385_vm2, %v2780_v49, %v2776_v1  ;;  %v8456_v20 = vld [vmem:[#allocation20_spill] sm:$0xff] }
 0x567   : > { %v1991_v28 = vpop.xlane.xlu0 %1990  ;;  %v2949_v18 = vsel %vm2948_vm5, %v2781_v23, %v6991_v34  ;;  %v3290_v16 = vsub.s32 1, %v8456_v20  ;;  %v3357_v4 = vsub.s32 2, %v8456_v20  ;;  %v3558_v51 = vsub.s32 5, %v8456_v20 }
 0x568   : > { %v2139_v58 = vadd.f32 %v6226_v10, %v1991_v28  ;;  %v2909_v27 = vsel %vm2343_vm12, %v2908_v12, %v2904_v6  ;;  %v3424_v12 = vsub.s32 3, %v8456_v20  ;;  %v3491_v28 = vsub.s32 4, %v8456_v20 }
 0x569   : > { %v3625_v24 = vsub.s32 6, %v8456_v20  ;;  %vm8547_vm12 = vcmask 1041409  }
 0x56a   : > { %v2913_v45 = vrot.slane %v2139_v58, %v6363_v5  ;;  %v2845_v5 = vsel %vm2364_vm15, %v2844_v62, %v2840_v41  ;;  %v3692_v62 = vsub.s32 7, %v8456_v20  ;;  %v7448_v20 = vld [vmem:[%s8459_s2 + $0x148] sm:$0xff]  }
 0x56b   : > { %v2000_v36 = vpop.xlane.xlu0 %1999  ;;  %v2850_v25 = vsel %vm2371_vm0, %v2849_v43, %v2845_v5 }
 0x56c   : > { %v2914_v60 = vsel %vm2350_vm13, %v2913_v45, %v2909_v27  ;;  %v2142_v48 = vadd.f32 %v6226_v10, %v2000_v36  ;;  %v2855_v14 = vsel %vm2378_vm1, %v2854_v26, %v2850_v25  ;;  %vm8551_vm13 = vcmask 1042434  }
 0x56d   : > { %v2919_v61 = vsel %vm2357_vm14, %v2918_v19, %v2914_v60  ;;  %v2860_v57 = vsel %vm2385_vm2, %v2859_v11, %v2855_v14  ;;  %v7369_v14 = vld [vmem:[%s8459_s2 + $0x8] sm:$0xff]   ;;  %vm8552_vm14 = vcmask 261120  }
 0x56e   : > { %v2928_v17 = vrot.slane %v2142_v48, %v6381_v0  ;;  %v2924_v8 = vsel %vm2364_vm15, %v2923_v59, %v2919_v61  ;;  %v8454_v0 = vld [vmem:[#allocation23_spill] sm:$0xff]  ;;  %v2951_v9 = vsel %vm2950_vm6, %v2860_v57, %v2949_v18  ;;  %v7374_v11 = vld [vmem:[%s8459_s2 + $0x48] sm:$0xff]   ;;  %vm8553_vm15 = vcmask 1043459  }
 0x56f   : > { %v2003_v46 = vpop.xlane.xlu0 %2002  ;;  %vm2147_vm8 = vcmp.lt.s32.totalorder %v8454_v0, 16  ;;  %v7393_v0 = vld [vmem:[%s8459_s2 + $0x100] sm:$0xff]  }
 0x570   : > { %v2143_v38 = vadd.f32 %v6226_v10, %v2003_v46  ;;  %v2929_v37 = vsel %vm2371_vm0, %v2928_v17, %v2924_v8  ;;  %v4825_v46 = vld [vmem:[%s8459_s2] sm:$0xff]   ;;  %vm8554_vm0 = vcmask 1044484  }
 0x571   : > { %v7359_v8 = vld [vmem:[%s8459_s2 + $0x40] sm:$0xff]   ;;  %v4827_v57 = vunpack.c.h.bf16 %v4825_v46 }
 0x572   : > { %v2933_v7 = vrot.slane %v2143_v38, %v6395_v63  ;;  %v7364_v38 = vld [vmem:[%s8459_s2 + $0x80] sm:$0xff]  }
 0x574   : > { %v2934_v10 = vsel %vm2378_vm1, %v2933_v7, %v2929_v37  ;;  %v7388_v37 = vld [vmem:[%s8459_s2 + $0x88] sm:$0xff]  }
 0x575   : > { %v2939_v33 = vsel %vm2385_vm2, %v2938_v55, %v2934_v10  ;;  %v7383_v55 = vld [vmem:[%s8459_s2 + $0xc0] sm:$0xff]   ;;  %v4826_v10 = vunpack.c.l.bf16 %v4825_v46  ;;  %v7491_v46 = vld [vmem:[%s8459_s2 + $0x1c8] sm:$0xff]   ;;  %vm8556_vm2 = vmmov %vm8552_vm14 }
 0x576   : > { %v2953_v63 = vsel %vm2952_vm7, %v2939_v33, %v2951_v9  ;;  %v7500_v9 = vld [vmem:[%s8459_s2 + $0x110] sm:$0xff]  }
 0x577   : > { %v2955_v53 = vsel %vm2147_vm8, %v2953_v63, -1e+30  ;;  %v7400_v63 = vld [vmem:[%s8459_s2 + $0xc8] sm:$0xff]  }
 0x578   : > { %2956 = vmax.xlane.f32.xlu0 %v2955_v53 }
 0x601   : > { %v2957_v34 = vpop.xlane.xlu0 %2956 }
 0x602   : > { %v2958_v56 = vsub.f32 %v2955_v53, %v2957_v34  ;;  %v8467_v53 = vunpack.c.l.bf16 %v7359_v8 }
 0x604   : > { %v2959_v29 = vmul.f32 1.442695, %v2958_v56 }
 0x606   : > { %5341 = vpow2.f32 %v2959_v29  ;;  %v7464_v29 = vld [vmem:[%s8459_s2 + $0x90] sm:$0xff]  }
 0x607   : > { %8462 = vst [vmem:[#allocation28_spill] sm:$0xff] %v7464_v29 }
 0x613   : > { %v5342_v13 = vpop.eup %5341 }
 0x614   : > { %2961 = vadd.xlane.f32.xlu1 %v5342_v13 }
 0x69d   : > { %v2962_v31 = vpop.xlane.xlu1 %2961 }
 0x69e   : > { %5343 = vrcp.f32 %v2962_v31  ;;  %v7416_v31 = vld [vmem:[%s8459_s2 + $0x108] sm:$0xff]  }
 0x6ab   : > { %v5344_v54 = vpop.eup %5343 }
 0x6ac   : > { %v7189_v21 = vmul.f32 %v5344_v54, %v5342_v13  ;;  %v7411_v13 = vld [vmem:[%s8459_s2 + $0x140] sm:$0xff]   ;;  %v7473_v54 = vld [vmem:[%s8459_s2 + $0x188] sm:$0xff]  }
 0x6ad   : > { %8463 = vst [vmem:[#allocation30_spill] sm:$0xff] %v7473_v54 }
 0x6ae   : > { %8455 = vst [vmem:[#allocation24_spill] sm:$0xff] %v7189_v21  ;;  %v7194_v42 = vrot.slane %v7189_v21, %v8457_v39  ;;  %v7200_v40 = vrot.slane %v7189_v21, %v3290_v16  ;;  %v7205_v47 = vrot.slane %v7189_v21, %v3357_v4  ;;  %v7214_v35 = vrot.slane %v7189_v21, %v3424_v12  ;;  %v7425_v4 = vld [vmem:[%s8459_s2 + $0x180] sm:$0xff]   ;;  %v7430_v12 = vld [vmem:[%s8459_s2 + $0x10] sm:$0xff]  }
 0x6af   : > { %v7219_v3 = vrot.slane %v7189_v21, %v3491_v28  ;;  %v7229_v58 = vrot.slane %v7189_v21, %v3558_v51  ;;  %v7237_v22 = vrot.slane %v7189_v21, %v3625_v24  ;;  %v7247_v44 = vrot.slane %v7189_v21, %v3692_v62  ;;  %v7443_v16 = vld [vmem:[%s8459_s2 + $0x50] sm:$0xff]   ;;  %v7453_v24 = vld [vmem:[%s8459_s2 + $0x1c0] sm:$0xff]   ;;  %v7505_v21 = vld [vmem:[%s8459_s2 + $0x18] sm:$0xff]  }
 0x6b0   : > { %3230 = vbcast.lane.b32.xlu1 %v7194_v42, 264  ;;  %3226 = vbcast.lane.b32.xlu0 %v7194_v42, 256  ;;  %8458 = vst [vmem:[#allocation25_spill] sm:$0xff] %v7214_v35  ;;  %8461 = vst [vmem:[#allocation27_spill] sm:$0xff] %v7453_v24  ;;  %v7486_v62 = vld [vmem:[%s8459_s2 + $0xd0] sm:$0xff]   ;;  %v7520_v24 = vld [vmem:[%s8459_s2 + $0x58] sm:$0xff]  }
 0x6b1   : > { %8466 = vst [vmem:[#allocation32_spill] sm:$0xff] %v7520_v24 }
 0x6b4   : > { %3293 = vbcast.lane.b32.xlu1 %v7200_v40, 256  ;;  %3297 = vbcast.lane.b32.xlu0 %v7200_v40, 264 }
 0x6b8   : > { %3360 = vbcast.lane.b32.xlu1 %v7205_v47, 256  ;;  %3364 = vbcast.lane.b32.xlu0 %v7205_v47, 264 }
 0x6bc   : > { %3234 = vbcast.lane.b32.xlu1 %v7194_v42, 272  ;;  %3301 = vbcast.lane.b32.xlu0 %v7200_v40, 272 }
 0x6c0   : > { %3427 = vbcast.lane.b32.xlu1 %v7214_v35, 256  ;;  %3431 = vbcast.lane.b32.xlu0 %v7214_v35, 264 }
 0x6c4   : > { %3368 = vbcast.lane.b32.xlu1 %v7205_v47, 272  ;;  %3494 = vbcast.lane.b32.xlu0 %v7219_v3, 256 }
 0x6c8   : > { %3498 = vbcast.lane.b32.xlu1 %v7219_v3, 264  ;;  %3238 = vbcast.lane.b32.xlu0 %v7194_v42, 280 }
 0x6cc   : > { %3305 = vbcast.lane.b32.xlu1 %v7200_v40, 280  ;;  %3435 = vbcast.lane.b32.xlu0 %v7214_v35, 272 }
 0x6d0   : > { %3561 = vbcast.lane.b32.xlu1 %v7229_v58, 256  ;;  %3565 = vbcast.lane.b32.xlu0 %v7229_v58, 264 }
 0x6d4   : > { %3372 = vbcast.lane.b32.xlu1 %v7205_v47, 280  ;;  %3502 = vbcast.lane.b32.xlu0 %v7219_v3, 272 }
 0x6d8   : > { %3628 = vbcast.lane.b32.xlu1 %v7237_v22, 256  ;;  %3632 = vbcast.lane.b32.xlu0 %v7237_v22, 264 }
 0x6dc   : > { %3242 = vbcast.lane.b32.xlu1 %v7194_v42, 288  ;;  %3309 = vbcast.lane.b32.xlu0 %v7200_v40, 288 }
 0x6e0   : > { %3439 = vbcast.lane.b32.xlu1 %v7214_v35, 280  ;;  %3569 = vbcast.lane.b32.xlu0 %v7229_v58, 272 }
 0x6e4   : > { %3695 = vbcast.lane.b32.xlu1 %v7247_v44, 256  ;;  %3699 = vbcast.lane.b32.xlu0 %v7247_v44, 264 }
 0x6e8   : > { %3376 = vbcast.lane.b32.xlu1 %v7205_v47, 288  ;;  %3506 = vbcast.lane.b32.xlu0 %v7219_v3, 280 }
 0x6ec   : > { %3636 = vbcast.lane.b32.xlu1 %v7237_v22, 272  ;;  %3246 = vbcast.lane.b32.xlu0 %v7194_v42, 296 }
 0x6f0   : > { %3313 = vbcast.lane.b32.xlu1 %v7200_v40, 296  ;;  %3443 = vbcast.lane.b32.xlu0 %v7214_v35, 288 }
 0x6f4   : > { %3573 = vbcast.lane.b32.xlu1 %v7229_v58, 280  ;;  %3703 = vbcast.lane.b32.xlu0 %v7247_v44, 272 }
 0x6f8   : > { %3380 = vbcast.lane.b32.xlu1 %v7205_v47, 296  ;;  %3510 = vbcast.lane.b32.xlu0 %v7219_v3, 288 }
 0x6fc   : > { %3640 = vbcast.lane.b32.xlu1 %v7237_v22, 280  ;;  %3250 = vbcast.lane.b32.xlu0 %v7194_v42, 304 }
 0x700   : > { %3317 = vbcast.lane.b32.xlu1 %v7200_v40, 304  ;;  %3447 = vbcast.lane.b32.xlu0 %v7214_v35, 296 }
 0x704   : > { %3577 = vbcast.lane.b32.xlu1 %v7229_v58, 288  ;;  %3707 = vbcast.lane.b32.xlu0 %v7247_v44, 280 }
 0x708   : > { %3384 = vbcast.lane.b32.xlu1 %v7205_v47, 304  ;;  %3514 = vbcast.lane.b32.xlu0 %v7219_v3, 296 }
 0x70c   : > { %3644 = vbcast.lane.b32.xlu1 %v7237_v22, 288  ;;  %3254 = vbcast.lane.b32.xlu0 %v7194_v42, 312 }
 0x710   : > { %3321 = vbcast.lane.b32.xlu1 %v7200_v40, 312  ;;  %3451 = vbcast.lane.b32.xlu0 %v7214_v35, 304 }
 0x714   : > { %3581 = vbcast.lane.b32.xlu1 %v7229_v58, 296  ;;  %3711 = vbcast.lane.b32.xlu0 %v7247_v44, 288 }
 0x718   : > { %3388 = vbcast.lane.b32.xlu1 %v7205_v47, 312  ;;  %3518 = vbcast.lane.b32.xlu0 %v7219_v3, 304 }
 0x71c   : > { %3648 = vbcast.lane.b32.xlu1 %v7237_v22, 296  ;;  %3258 = vbcast.lane.b32.xlu0 %v7194_v42, 320 }
 0x720   : > { %3325 = vbcast.lane.b32.xlu1 %v7200_v40, 320  ;;  %3455 = vbcast.lane.b32.xlu0 %v7214_v35, 312 }
 0x722   : > { %v7281_v43 = vpop.permute.xlu1 %3230  ;;  %v7283_v2 = vpop.permute.xlu0 %3226 }
 0x723   : > { %v3758_v39 = vmul.f32 %v4827_v57, %v7281_v43  ;;  %v3757_v43 = vmul.f32 %v4826_v10, %v7283_v2 }
 0x724   : > { %3585 = vbcast.lane.b32.xlu1 %v7229_v58, 304  ;;  %3715 = vbcast.lane.b32.xlu0 %v7247_v44, 296 }
 0x725   : > { %v3887_v2 = vsel %vm3885_vm9, %v3758_v39, 0.0  ;;  %v3886_v54 = vsel %vm3885_vm9, %v3757_v43, 0.0  ;;  %v8470_v39 = vunpack.c.h.bf16 %v7359_v8  ;;  %v8474_v43 = vunpack.c.l.bf16 %v7369_v14 }
 0x726   : > { %v7287_v6 = vpop.permute.xlu1 %3293  ;;  %v7289_v45 = vpop.permute.xlu0 %3297 }
 0x727   : > { %v3773_v10 = vmul.f32 %v8467_v53, %v7287_v6  ;;  %v3774_v29 = vmul.f32 %v8470_v39, %v7289_v45  ;;  %v8471_v6 = vunpack.c.l.bf16 %v7364_v38  ;;  %v8475_v45 = vunpack.c.l.bf16 %v7374_v11 }
 0x728   : > { %3392 = vbcast.lane.b32.xlu1 %v7205_v47, 320  ;;  %3522 = vbcast.lane.b32.xlu0 %v7219_v3, 312  ;;  %v8477_v39 = vunpack.c.h.bf16 %v7383_v55 }
 0x72a   : > { %v7293_v32 = vpop.permute.xlu1 %3360  ;;  %v7295_v19 = vpop.permute.xlu0 %3364 }
 0x72b   : > { %v3789_v53 = vmul.f32 %v8471_v6, %v7293_v32 }
 0x72c   : > { %3652 = vbcast.lane.b32.xlu1 %v7237_v22, 304  ;;  %3262 = vbcast.lane.b32.xlu0 %v7194_v42, 328 }
 0x72e   : > { %v7299_v49 = vpop.permute.xlu1 %3234  ;;  %v7301_v27 = vpop.permute.xlu0 %3301 }
 0x72f   : > { %v3775_v8 = vmul.f32 %v8475_v45, %v7301_v27  ;;  %v3923_v45 = vsel %vm3885_vm9, %v3773_v10, 0.0 }
 0x730   : > { %3329 = vbcast.lane.b32.xlu1 %v7200_v40, 328  ;;  %3459 = vbcast.lane.b32.xlu0 %v7214_v35, 320 }
 0x731   : > { %v3926_v10 = vsel %vm3885_vm9, %v3775_v8, 0.0 }
 0x732   : > { %v7305_v36 = vpop.permute.xlu1 %3427  ;;  %v7307_v41 = vpop.permute.xlu0 %3431 }
 0x734   : > { %3589 = vbcast.lane.b32.xlu1 %v7229_v58, 312  ;;  %3719 = vbcast.lane.b32.xlu0 %v7247_v44, 304 }
 0x736   : > { %v7311_v52 = vpop.permute.xlu1 %3368  ;;  %v7313_v30 = vpop.permute.xlu0 %3494 }
 0x738   : > { %3396 = vbcast.lane.b32.xlu1 %v7205_v47, 328  ;;  %3526 = vbcast.lane.b32.xlu0 %v7219_v3, 320 }
 0x73a   : > { %v7317_v60 = vpop.permute.xlu1 %3498  ;;  %v7319_v48 = vpop.permute.xlu0 %3238 }
 0x73c   : > { %3656 = vbcast.lane.b32.xlu1 %v7237_v22, 312  ;;  %3266 = vbcast.lane.b32.xlu0 %v7194_v42, 336 }
 0x73e   : > { %v7323_v5 = vpop.permute.xlu1 %3305  ;;  %v7325_v61 = vpop.permute.xlu0 %3435 }
 0x740   : > { %3333 = vbcast.lane.b32.xlu1 %v7200_v40, 336  ;;  %3463 = vbcast.lane.b32.xlu0 %v7214_v35, 328 }
 0x742   : > { %v7329_v15 = vpop.permute.xlu1 %3561  ;;  %v7331_v25 = vpop.permute.xlu0 %3565 }
 0x744   : > { %3593 = vbcast.lane.b32.xlu1 %v7229_v58, 320  ;;  %3723 = vbcast.lane.b32.xlu0 %v7247_v44, 312 }
 0x746   : > { %v7335_v59 = vpop.permute.xlu1 %3372  ;;  %v7337_v1 = vpop.permute.xlu0 %3502 }
 0x748   : > { %3400 = vbcast.lane.b32.xlu1 %v7205_v47, 336  ;;  %3530 = vbcast.lane.b32.xlu0 %v7219_v3, 328 }
 0x74a   : > { %v7341_v26 = vpop.permute.xlu1 %3628  ;;  %v7343_v23 = vpop.permute.xlu0 %3632 }
 0x74c   : > { %3660 = vbcast.lane.b32.xlu1 %v7237_v22, 320  ;;  %3270 = vbcast.lane.b32.xlu0 %v7194_v42, 344 }
 0x74e   : > { %v7347_v50 = vpop.permute.xlu1 %3242  ;;  %v7349_v17 = vpop.permute.xlu0 %3309 }
 0x750   : > { %3337 = vbcast.lane.b32.xlu1 %v7200_v40, 344  ;;  %3467 = vbcast.lane.b32.xlu0 %v7214_v35, 336 }
 0x752   : > { %v7376_v7 = vpop.permute.xlu1 %3439  ;;  %v7378_v18 = vpop.permute.xlu0 %3569 }
 0x754   : > { %3597 = vbcast.lane.b32.xlu1 %v7229_v58, 328  ;;  %3727 = vbcast.lane.b32.xlu0 %v7247_v44, 320 }
 0x756   : > { %v7432_v28 = vpop.permute.xlu1 %3695  ;;  %v7434_v51 = vpop.permute.xlu0 %3699 }
 0x757   : > { %8460 = vst [vmem:[#allocation26_spill] sm:$0xff] %v7434_v51  ;;  %v7535_v51 = vld [vmem:[%s8459_s2 + $0x150] sm:$0xff]  }
 0x758   : > { %3404 = vbcast.lane.b32.xlu1 %v7205_v47, 344  ;;  %3534 = vbcast.lane.b32.xlu0 %v7219_v3, 336 }
 0x75a   : > { %v7479_v56 = vpop.permute.xlu1 %3376  ;;  %v7481_v34 = vpop.permute.xlu0 %3506 }
 0x75b   : > { %8464 = vst [vmem:[#allocation29_spill] sm:$0xff] %v7479_v56  ;;  %8465 = vst [vmem:[#allocation31_spill] sm:$0xff] %v7481_v34  ;;  %v8472_v34 = vunpack.c.h.bf16 %v7364_v38  ;;  %v7550_v56 = vld [vmem:[%s8459_s2 + $0x98] sm:$0xff]   ;;  %v8476_v38 = vunpack.c.l.bf16 %v7383_v55  ;;  %v8478_v55 = vunpack.c.l.bf16 %v7388_v37 }
 0x75c   : > { %3664 = vbcast.lane.b32.xlu1 %v7237_v22, 328  ;;  %3274 = vbcast.lane.b32.xlu0 %v7194_v42, 352  ;;  %8473 = vst [vmem:[#allocation21_spill] sm:$0xff] %v7550_v56 }
 0x75e   : > { %v7526_v33 = vpop.permute.xlu1 %3636  ;;  %v7528_v57 = vpop.permute.xlu0 %3246 }
 0x75f   : > { %8468 = vst [vmem:[#allocation23_spill] sm:$0xff] %v7526_v33  ;;  %8469 = vst [vmem:[#allocation20_spill] sm:$0xff] %v7528_v57  ;;  %v3790_v57 = vmul.f32 %v8472_v34, %v7295_v19  ;;  %v3759_v33 = vmul.f32 %v8474_v43, %v7299_v49  ;;  %v3805_v34 = vmul.f32 %v8476_v38, %v7305_v36  ;;  %v3924_v36 = vsel %vm3885_vm9, %v3774_v29, 0.0 }
 0x760   : > { %3341 = vbcast.lane.b32.xlu1 %v7200_v40, 352  ;;  %3471 = vbcast.lane.b32.xlu0 %v7214_v35, 344  ;;  %v3806_v49 = vmul.f32 %v8477_v39, %v7307_v41  ;;  %v3888_v43 = vadd.f32 %v3887_v2, %v3886_v54  ;;  %v3960_v38 = vsel %vm3885_vm9, %v3789_v53, 0.0  ;;  %v3791_v39 = vmul.f32 %v8478_v55, %v7311_v52  ;;  %v7584_v54 = vld [vmem:[%s8459_s2 + $0x190] sm:$0xff]  }
 0x761   : > { %v3961_v41 = vsel %vm3885_vm9, %v3790_v57, 0.0  ;;  %v3889_v2 = vsel %vm3885_vm9, %v3759_v33, 0.0  ;;  %v8479_v29 = vunpack.c.h.bf16 %v7393_v0  ;;  %v8480_v57 = vunpack.c.h.bf16 %v7369_v14 }
 0x762   : > { %v7571_v35 = vpop.permute.xlu1 %3313  ;;  %v3444_v32 = vpop.permute.xlu0 %3443  ;;  %v3997_v52 = vsel %vm3885_vm9, %v3805_v34, 0.0  ;;  %v3998_v55 = vsel %vm3885_vm9, %v3806_v49, 0.0  ;;  %v8481_v33 = vunpack.c.h.bf16 %v7374_v11  ;;  %v8482_v19 = vunpack.c.l.bf16 %v7400_v63 }
 0x763   : > { %v3822_v24 = vmul.f32 %v8479_v29, %v7317_v60  ;;  %v3760_v53 = vmul.f32 %v8480_v57, %v7319_v48  ;;  %v3925_v29 = vadd.f32 %v3924_v36, %v3923_v45  ;;  %v3962_v27 = vadd.f32 %v3961_v41, %v3960_v38 }
 0x764   : > { %3601 = vbcast.lane.b32.xlu1 %v7229_v58, 336  ;;  %3731 = vbcast.lane.b32.xlu0 %v7247_v44, 328  ;;  %v3776_v8 = vmul.f32 %v8481_v33, %v7323_v5  ;;  %v3807_v60 = vmul.f32 %v8482_v19, %v7325_v61  ;;  %v8483_v48 = vunpack.c.l.bf16 %v7393_v0  ;;  %v5026_v34 = vunpack.c.l.bf16 %v7584_v54 }
 0x765   : > { %v3890_v56 = vadd.f32 %v3889_v2, %v3888_v43  ;;  %v3963_v49 = vsel %vm3885_vm9, %v3791_v39, 0.0  ;;  %v8484_v5 = vunpack.c.l.bf16 %v7411_v13  ;;  %v8485_v61 = vunpack.c.h.bf16 %v7411_v13 }
 0x766   : > { %v3821_v14 = vmul.f32 %v8483_v48, %v7313_v30  ;;  %v3574_v57 = vpop.permute.xlu1 %3573  ;;  %v3704_v6 = vpop.permute.xlu0 %3703  ;;  %v3927_v45 = vadd.f32 %v3926_v10, %v3925_v29  ;;  %v3999_v36 = vadd.f32 %v3998_v55, %v3997_v52  ;;  %v4035_v0 = vsel %vm3885_vm9, %v3822_v24, 0.0 }
 0x767   : > { %v3837_v11 = vmul.f32 %v8484_v5, %v7329_v15  ;;  %v3838_v19 = vmul.f32 %v8485_v61, %v7331_v25  ;;  %v3891_v30 = vsel %vm3885_vm9, %v3760_v53, 0.0  ;;  %v3928_v43 = vsel %vm3885_vm9, %v3776_v8, 0.0 }
 0x768   : > { %3408 = vbcast.lane.b32.xlu1 %v7205_v47, 352  ;;  %3538 = vbcast.lane.b32.xlu0 %v7219_v3, 344  ;;  %v4000_v38 = vsel %vm3885_vm9, %v3807_v60, 0.0  ;;  %v8486_v15 = vunpack.c.h.bf16 %v7388_v37  ;;  %v8487_v25 = vunpack.c.l.bf16 %v7416_v31  ;;  %v3964_v39 = vadd.f32 %v3963_v49, %v3962_v27 }
 0x769   : > { %v4034_v24 = vsel %vm3885_vm9, %v3821_v14, 0.0  ;;  %v8488_v2 = vunpack.c.l.bf16 %v7425_v4  ;;  %v8489_v53 = vunpack.c.h.bf16 %v7425_v4  ;;  %v4072_v37 = vsel %vm3885_vm9, %v3838_v19, 0.0 }
 0x76a   : > { %v3792_v41 = vmul.f32 %v8486_v15, %v7335_v59  ;;  %v3823_v13 = vmul.f32 %v8487_v25, %v7337_v1  ;;  %v3381_v55 = vpop.permute.xlu1 %3380  ;;  %v3511_v33 = vpop.permute.xlu0 %3510  ;;  %v4036_v8 = vadd.f32 %v4035_v0, %v4034_v24  ;;  %v4071_v59 = vsel %vm3885_vm9, %v3837_v11, 0.0  ;;  %v8497_v15 = vld [vmem:[#allocation26_spill] sm:$0xff] }
 0x76b   : > { %v3853_v10 = vmul.f32 %v8488_v2, %v7341_v26  ;;  %v3854_v52 = vmul.f32 %v8489_v53, %v7343_v23  ;;  %v8490_v1 = vunpack.c.h.bf16 %v7400_v63  ;;  %v7639_v60 = vadd.f32 %v3891_v30, %v3890_v56  ;;  %v8499_v2 = vld [vmem:[#allocation29_spill] sm:$0xff] }
 0x76c   : > { %v7641_v29 = vadd.f32 %v3928_v43, %v3927_v45  ;;  %v4001_v26 = vadd.f32 %v4000_v38, %v3999_v36  ;;  %3668 = vbcast.lane.b32.xlu1 %v7237_v22, 336  ;;  %3278 = vbcast.lane.b32.xlu0 %v7194_v42, 360  ;;  %v4839_v23 = vunpack.c.h.bf16 %v7505_v21  ;;  %v3965_v4 = vsel %vm3885_vm9, %v3792_v41, 0.0  ;;  %v8495_v43 = vld [vmem:[#allocation27_spill] sm:$0xff] }
 0x76d   : > { %v3808_v27 = vmul.f32 %v8490_v1, %v7376_v7  ;;  %v4037_v48 = vsel %vm3885_vm9, %v3823_v13, 0.0  ;;  %v8491_v14 = vunpack.c.l.bf16 %v7448_v20  ;;  %v8492_v7 = vunpack.c.l.bf16 %v7486_v62 }
 0x76e   : > { %v4073_v49 = vadd.f32 %v4072_v37, %v4071_v59  ;;  %v4108_v5 = vsel %vm3885_vm9, %v3853_v10, 0.0  ;;  %v4109_v11 = vsel %vm3885_vm9, %v3854_v52, 0.0  ;;  %v8493_v61 = vunpack.c.l.bf16 %v7430_v12  ;;  %v3641_v45 = vpop.permute.xlu1 %3640  ;;  %v3251_v36 = vpop.permute.xlu0 %3250  ;;  %v8502_v52 = vld [vmem:[#allocation25_spill] sm:$0xff] }
 0x76f   : > { %v3839_v63 = vmul.f32 %v8491_v14, %v7378_v18  ;;  %v3809_v56 = vmul.f32 %v8492_v7, %v3444_v32  ;;  %v8494_v0 = vunpack.c.l.bf16 %v7443_v16  ;;  %v4002_v18 = vsel %vm3885_vm9, %v3808_v27, 0.0  ;;  %v8506_v7 = vld [vmem:[#allocation31_spill] sm:$0xff] }
 0x770   : > { %v3761_v19 = vmul.f32 %v8493_v61, %v7347_v50  ;;  %v8496_v32 = vunpack.c.l.bf16 %v8495_v43  ;;  %v8498_v41 = vunpack.c.h.bf16 %v8495_v43  ;;  %v3966_v13 = vadd.f32 %v3965_v4, %v3964_v39  ;;  %v8500_v50 = vld [vmem:[#allocation28_spill] sm:$0xff]  ;;  %3345 = vbcast.lane.b32.xlu1 %v7200_v40, 360  ;;  %3475 = vbcast.lane.b32.xlu0 %v8502_v52, 352 }
 0x771   : > { %v3777_v30 = vmul.f32 %v8494_v0, %v7349_v17  ;;  %v4038_v24 = vadd.f32 %v4037_v48, %v4036_v8  ;;  %v8501_v10 = vunpack.c.l.bf16 %v8500_v50  ;;  %v8503_v17 = vld [vmem:[#allocation32_spill] sm:$0xff]  ;;  %v4074_v37 = vsel %vm3885_vm9, %v3839_v63, 0.0 }
 0x772   : > { %v3869_v38 = vmul.f32 %v8496_v32, %v7432_v28  ;;  %v3870_v25 = vmul.f32 %v8498_v41, %v8497_v15  ;;  %v4871_v59 = vunpack.c.h.bf16 %v8503_v17  ;;  %v4004_v28 = vsel %vm3885_vm9, %v3809_v56, 0.0  ;;  %v3318_v43 = vpop.permute.xlu1 %3317  ;;  %v3448_v32 = vpop.permute.xlu0 %3447 }
 0x773   : > { %v3793_v53 = vmul.f32 %v8501_v10, %v8499_v2  ;;  %v8504_v1 = vunpack.c.h.bf16 %v7448_v20  ;;  %v8505_v39 = vunpack.c.l.bf16 %v7491_v46  ;;  %v4110_v4 = vadd.f32 %v4109_v11, %v4108_v5  ;;  %v8512_v2 = vld [vmem:[#allocation30_spill] sm:$0xff] }
 0x774   : > { %v3893_v48 = vsel %vm3885_vm9, %v3761_v19, 0.0  ;;  %v4003_v14 = vadd.f32 %v4002_v18, %v4001_v26  ;;  %v8507_v61 = vunpack.c.h.bf16 %v7416_v31  ;;  %v7685_v63 = vsel %vm3885_vm9, %v3777_v30, 0.0  ;;  %3605 = vbcast.lane.b32.xlu1 %v7229_v58, 344  ;;  %3735 = vbcast.lane.b32.xlu0 %v7247_v44, 336 }
 0x775   : > { %v3840_v27 = vmul.f32 %v8504_v1, %v3574_v57  ;;  %v3871_v8 = vmul.f32 %v8505_v39, %v3704_v6  ;;  %v4145_v56 = vsel %vm3885_vm9, %v3869_v38, 0.0  ;;  %v4146_v20 = vsel %vm3885_vm9, %v3870_v25, 0.0  ;;  %v8511_v25 = vld [vmem:[#allocation23_spill] sm:$0xff]  ;;  %v8514_v1 = vld [vmem:[#allocation20_spill] sm:$0xff] }
 0x776   : > { %v3824_v0 = vmul.f32 %v8507_v61, %v8506_v7  ;;  %v8508_v57 = vunpack.c.h.bf16 %v7486_v62  ;;  %v4075_v5 = vadd.f32 %v4074_v37, %v4073_v49  ;;  %v3967_v11 = vsel %vm3885_vm9, %v3793_v53, 0.0  ;;  %v3578_v53 = vpop.permute.xlu1 %3577  ;;  %v3708_v37 = vpop.permute.xlu0 %3707 }
 0x777   : > { %v4005_v26 = vadd.f32 %v4004_v28, %v4003_v14  ;;  %v8509_v19 = vunpack.c.h.bf16 %v8500_v50  ;;  %v4076_v30 = vsel %vm3885_vm9, %v3840_v27, 0.0  ;;  %v4148_v18 = vsel %vm3885_vm9, %v3871_v8, 0.0 }
 0x778   : > { %v3810_v6 = vmul.f32 %v8508_v57, %v3448_v32  ;;  %v8510_v38 = vunpack.c.l.bf16 %v7500_v9  ;;  %v4147_v49 = vadd.f32 %v4146_v20, %v4145_v56  ;;  %v4039_v41 = vsel %vm3885_vm9, %v3824_v0, 0.0  ;;  %3412 = vbcast.lane.b32.xlu1 %v7205_v47, 360  ;;  %3542 = vbcast.lane.b32.xlu0 %v7219_v3, 352 }
 0x779   : > { %v3794_v31 = vmul.f32 %v8509_v19, %v3381_v55  ;;  %v8513_v50 = vunpack.c.l.bf16 %v8512_v2  ;;  %v3968_v28 = vadd.f32 %v3967_v11, %v3966_v13  ;;  %v8515_v27 = vunpack.c.h.bf16 %v7430_v12 }
 0x77a   : > { %v3825_v15 = vmul.f32 %v8510_v38, %v3511_v33  ;;  %v4006_v62 = vsel %vm3885_vm9, %v3810_v6, 0.0  ;;  %v8516_v33 = vunpack.c.l.bf16 %v7535_v51  ;;  %v8517_v14 = vunpack.c.h.bf16 %v7491_v46 }
 0x77b   : > { %v3855_v55 = vmul.f32 %v8513_v50, %v8511_v25  ;;  %v7705_v10 = vadd.f32 %v4006_v62, %v4005_v26  ;;  %v3762_v39 = vmul.f32 %v8515_v27, %v8514_v1  ;;  %v4077_v61 = vadd.f32 %v4076_v30, %v4075_v5 }
 0x77c   : > { %v3841_v8 = vmul.f32 %v8516_v33, %v3578_v53  ;;  %v3872_v7 = vmul.f32 %v8517_v14, %v3708_v37  ;;  %v4149_v0 = vadd.f32 %v4148_v18, %v4147_v49  ;;  %v3969_v32 = vsel %vm3885_vm9, %v3794_v31, 0.0  ;;  %v3515_v31 = vpop.permute.xlu0 %3514  ;;  %3672 = vbcast.lane.b32.xlu1 %v7237_v22, 344  ;;  %3282 = vbcast.lane.b32.xlu0 %v7194_v42, 368 }
 0x77d   : > { %v8518_v56 = vunpack.c.h.bf16 %v8512_v2  ;;  %v4041_v12 = vsel %vm3885_vm9, %v3825_v15, 0.0  ;;  %v8519_v13 = vunpack.c.l.bf16 %v7505_v21  ;;  %v4040_v5 = vadd.f32 %v4039_v41, %v4038_v24 }
 0x77e   : > { %v4078_v6 = vsel %vm3885_vm9, %v3841_v8, 0.0  ;;  %v4150_v46 = vsel %vm3885_vm9, %v3872_v7, 0.0  ;;  %v4111_v11 = vsel %vm3885_vm9, %v3855_v55, 0.0  ;;  %v3895_v30 = vsel %vm3885_vm9, %v3762_v39, 0.0 }
 0x77f   : > { %v3856_v20 = vmul.f32 %v8518_v56, %v3641_v45  ;;  %v3763_v57 = vmul.f32 %v8519_v13, %v3251_v36  ;;  %v7725_v26 = vadd.f32 %v4078_v6, %v4077_v61  ;;  %v7727_v19 = vadd.f32 %v4150_v46, %v4149_v0  ;;  %v3385_v45 = vpop.permute.xlu1 %3384  ;;  %v8521_v36 = vld [vmem:[#allocation21_spill] sm:$0xff] }
 0x780   : > { %v8520_v18 = vunpack.c.h.bf16 %v7443_v16  ;;  %v8522_v15 = vunpack.c.l.bf16 %v8521_v36  ;;  %v8523_v49 = vunpack.c.h.bf16 %v7500_v9  ;;  %v3894_v41 = vadd.f32 %v3893_v48, %v7639_v60  ;;  %v3255_v39 = vpop.permute.xlu0 %3254  ;;  %3349 = vbcast.lane.b32.xlu1 %v7200_v40, 368  ;;  %3479 = vbcast.lane.b32.xlu0 %v8502_v52, 360  ;;  %v7764_v0 = vld [vmem:[%s8459_s2 + $0x1d0] sm:$0xff]  }
 0x781   : > { %v3970_v25 = vadd.f32 %v3969_v32, %v3968_v28  ;;  %v4042_v2 = vadd.f32 %v4041_v12, %v4040_v5  ;;  %v4113_v50 = vsel %vm3885_vm9, %v3856_v20, 0.0  ;;  %v3897_v16 = vsel %vm3885_vm9, %v3763_v57, 0.0  ;;  %v7778_v5 = vld [vmem:[%s8459_s2 + $0x118] sm:$0xff]  }
 0x782   : > { %v3778_v38 = vmul.f32 %v8520_v18, %v7571_v35  ;;  %v3795_v62 = vmul.f32 %v8522_v15, %v3385_v45  ;;  %v3826_v24 = vmul.f32 %v8523_v49, %v3515_v31  ;;  %v7744_v35 = vld [vmem:[%s8459_s2 + $0xd8] sm:$0xff]   ;;  %v8524_v9 = vunpack.c.l.bf16 %v8503_v17 }
 0x783   : > { %v4112_v53 = vadd.f32 %v4111_v11, %v4110_v4  ;;  %v3896_v37 = vadd.f32 %v3895_v30, %v3894_v41  ;;  %v3645_v27 = vpop.permute.xlu1 %3644  ;;  %v3764_v14 = vmul.f32 %v4839_v23, %v3255_v39  ;;  %v3931_v7 = vadd.f32 %v7685_v63, %v7641_v29 }
 0x784   : > { %v3779_v55 = vmul.f32 %v8524_v9, %v3318_v43  ;;  %v3971_v60 = vsel %vm3885_vm9, %v3795_v62, 0.0  ;;  %v4043_v48 = vsel %vm3885_vm9, %v3826_v24, 0.0  ;;  %v3932_v33 = vsel %vm3885_vm9, %v3778_v38, 0.0  ;;  %v3452_v20 = vpop.permute.xlu0 %3451  ;;  %3609 = vbcast.lane.b32.xlu1 %v7229_v58, 352  ;;  %3739 = vbcast.lane.b32.xlu0 %v7247_v44, 344  ;;  %v7790_v62 = vld [vmem:[%s8459_s2 + $0x20] sm:$0xff]  }
 0x785   : > { %v3972_v28 = vadd.f32 %v3971_v60, %v3970_v25  ;;  %v4044_v1 = vadd.f32 %v4043_v48, %v4042_v2  ;;  %v3857_v8 = vmul.f32 %v5026_v34, %v3645_v27  ;;  %v4934_v43 = vunpack.c.l.bf16 %v7744_v35 }
 0x786   : > { %v4114_v61 = vadd.f32 %v4113_v50, %v4112_v53  ;;  %v3898_v4 = vadd.f32 %v3897_v16, %v3896_v37  ;;  %v3934_v34 = vsel %vm3885_vm9, %v3779_v55, 0.0  ;;  %v3899_v23 = vsel %vm3885_vm9, %v3764_v14, 0.0  ;;  %v7803_v55 = vld [vmem:[%s8459_s2 + $0x60] sm:$0xff]  }
 0x787   : > { %v4115_v21 = vsel %vm3885_vm9, %v3857_v8, 0.0  ;;  %v3933_v32 = vadd.f32 %v3932_v33, %v3931_v7  ;;  %v3322_v63 = vpop.permute.xlu1 %3321  ;;  %v3811_v13 = vmul.f32 %v4934_v43, %v3452_v20  ;;  %v4995_v57 = vunpack.c.h.bf16 %v7535_v51 }
 0x788   : > { %v4116_v56 = vadd.f32 %v4115_v21, %v4114_v61  ;;  %v3900_v29 = vadd.f32 %v3899_v23, %v3898_v4  ;;  %v3780_v12 = vmul.f32 %v4871_v59, %v3322_v63  ;;  %v5058_v6 = vunpack.c.l.bf16 %v7764_v0  ;;  %v3712_v31 = vpop.permute.xlu0 %3711  ;;  %3416 = vbcast.lane.b32.xlu1 %v7205_v47, 368  ;;  %3546 = vbcast.lane.b32.xlu0 %v7219_v3, 360 }
 0x789   : > { %v3935_v46 = vadd.f32 %v3934_v34, %v3933_v32  ;;  %v4008_v17 = vsel %vm3885_vm9, %v3811_v13, 0.0  ;;  %v4903_v38 = vunpack.c.h.bf16 %v8521_v36  ;;  %v4966_v15 = vunpack.c.l.bf16 %v7778_v5  ;;  %v7825_v34 = vld [vmem:[%s8459_s2 + $0xa0] sm:$0xff]  }
 0x78a   : > { %v3936_v11 = vsel %vm3885_vm9, %v3780_v12, 0.0  ;;  %v4009_v45 = vadd.f32 %v4008_v17, %v7705_v10  ;;  %v3873_v18 = vmul.f32 %v5058_v6, %v3712_v31  ;;  %v5027_v16 = vunpack.c.h.bf16 %v7584_v54 }
 0x78b   : > { %v3937_v59 = vadd.f32 %v3936_v11, %v3935_v46  ;;  %v3582_v51 = vpop.permute.xlu1 %3581  ;;  %v4842_v9 = vunpack.c.l.bf16 %v7790_v62  ;;  %v4874_v39 = vunpack.c.l.bf16 %v7803_v55  ;;  %v4935_v33 = vunpack.c.h.bf16 %v7744_v35 }
 0x78c   : > { %v3842_v30 = vmul.f32 %v4995_v57, %v3582_v51  ;;  %v4152_v10 = vsel %vm3885_vm9, %v3873_v18, 0.0  ;;  %v3519_v25 = vpop.permute.xlu0 %3518  ;;  %3676 = vbcast.lane.b32.xlu1 %v7237_v22, 352  ;;  %3286 = vbcast.lane.b32.xlu0 %v7194_v42, 376  ;;  %v7814_v42 = vld [vmem:[%s8459_s2 + $0x158] sm:$0xff]   ;;  %v4967_v13 = vunpack.c.h.bf16 %v7778_v5 }
 0x78d   : > { %v4153_v41 = vadd.f32 %v4152_v10, %v7727_v19  ;;  %v3827_v50 = vmul.f32 %v4966_v15, %v3519_v25  ;;  %v4998_v35 = vunpack.c.l.bf16 %v7814_v42  ;;  %v7836_v57 = vld [vmem:[%s8459_s2 + $0x198] sm:$0xff]  }
 0x78e   : > { %v4080_v49 = vsel %vm3885_vm9, %v3842_v30, 0.0  ;;  %v5030_v5 = vunpack.c.l.bf16 %v7836_v57  ;;  %v7847_v30 = vld [vmem:[%s8459_s2 + $0xe0] sm:$0xff]  }
 0x78f   : > { %v4081_v24 = vadd.f32 %v4080_v49, %v7725_v26  ;;  %v3389_v36 = vpop.permute.xlu1 %3388  ;;  %v4045_v19 = vsel %vm3885_vm9, %v3827_v50, 0.0  ;;  %v4938_v25 = vunpack.c.l.bf16 %v7847_v30 }
 0x790   : > { %v3796_v2 = vmul.f32 %v4903_v38, %v3389_v36  ;;  %v4046_v48 = vadd.f32 %v4045_v19, %v4044_v1  ;;  %v3259_v37 = vpop.permute.xlu0 %3258  ;;  %3353 = vbcast.lane.b32.xlu1 %v7200_v40, 376  ;;  %3483 = vbcast.lane.b32.xlu0 %v8502_v52, 368  ;;  %v5059_v40 = vunpack.c.h.bf16 %v7764_v0  ;;  %v4906_v0 = vunpack.c.l.bf16 %v7825_v34 }
 0x791   : > { %v3765_v27 = vmul.f32 %v4842_v9, %v3259_v37  ;;  %v7869_v37 = vld [vmem:[%s8459_s2 + $0x120] sm:$0xff]  }
 0x792   : > { %v3973_v26 = vsel %vm3885_vm9, %v3796_v2, 0.0 }
 0x793   : > { %v3974_v60 = vadd.f32 %v3973_v26, %v3972_v28  ;;  %v3649_v53 = vpop.permute.xlu1 %3648  ;;  %v3901_v1 = vsel %vm3885_vm9, %v3765_v27, 0.0 }
 0x794   : > { %v3858_v54 = vmul.f32 %v5027_v16, %v3649_v53  ;;  %v3902_v14 = vadd.f32 %v3901_v1, %v3900_v29  ;;  %v3456_v7 = vpop.permute.xlu0 %3455  ;;  %3613 = vbcast.lane.b32.xlu1 %v7229_v58, 360  ;;  %3743 = vbcast.lane.b32.xlu0 %v7247_v44, 352  ;;  %v4907_v1 = vunpack.c.h.bf16 %v7825_v34 }
 0x795   : > { %v3812_v4 = vmul.f32 %v4935_v33, %v3456_v7  ;;  %v4327_v7 = vstv %s5445_s29 }
 0x796   : > { %v4117_v28 = vsel %vm3885_vm9, %v3858_v54, 0.0 }
 0x797   : > { %v4118_v8 = vadd.f32 %v4117_v28, %v4116_v56  ;;  %v3326_v43 = vpop.permute.xlu1 %3325  ;;  %v4010_v23 = vsel %vm3885_vm9, %v3812_v4, 0.0 }
 0x798   : > { %v3781_v61 = vmul.f32 %v4874_v39, %v3326_v43  ;;  %v4011_v56 = vadd.f32 %v4010_v23, %v4009_v45  ;;  %v3716_v63 = vpop.permute.xlu0 %3715  ;;  %3420 = vbcast.lane.b32.xlu1 %v7205_v47, 376  ;;  %3550 = vbcast.lane.b32.xlu0 %v7219_v3, 368  ;;  %v4843_v47 = vunpack.c.h.bf16 %v7790_v62  ;;  %v4875_v62 = vunpack.c.h.bf16 %v7803_v55  ;;  %v4326_v43 = vld [vmem:[%s8351_s4] sm:$0xff] }
 0x799   : > { %v3874_v12 = vmul.f32 %v5059_v40, %v3716_v63  ;;  %vm4328_vm10 = vcmp.gt.s32.totalorder %v4326_v43, %v4327_v7  ;;  %v7895_v63 = vld [vmem:[%s8459_s2 + $0x68] sm:$0xff]  }
 0x79a   : > { %v3938_v21 = vsel %vm3885_vm9, %v3781_v61, 0.0  ;;  %v7884_v61 = vld [vmem:[%s8459_s2 + $0x28] sm:$0xff]  }
 0x79b   : > { %v3939_v32 = vadd.f32 %v3938_v21, %v3937_v59  ;;  %v3586_v29 = vpop.permute.xlu1 %3585  ;;  %v4154_v46 = vsel %vm3885_vm9, %v3874_v12, 0.0 }
 0x79c   : > { %v3843_v20 = vmul.f32 %v4998_v35, %v3586_v29  ;;  %v4155_v17 = vadd.f32 %v4154_v46, %v4153_v41  ;;  %v3523_v45 = vpop.permute.xlu0 %3522  ;;  %3680 = vbcast.lane.b32.xlu1 %v7237_v22, 360  ;;  %3487 = vbcast.lane.b32.xlu0 %v8502_v52, 376  ;;  %v7858_v52 = vld [vmem:[%s8459_s2 + $0x1d8] sm:$0xff]   ;;  %v4846_v29 = vunpack.c.l.bf16 %v7884_v61 }
 0x79d   : > { %v3828_v31 = vmul.f32 %v4967_v13, %v3523_v45  ;;  %v5062_v53 = vunpack.c.l.bf16 %v7858_v52  ;;  %v7905_v45 = vld [vmem:[%s8459_s2 + $0x160] sm:$0xff]  }
 0x79e   : > { %v4082_v6 = vsel %vm3885_vm9, %v3843_v20, 0.0 }
 0x79f   : > { %v4083_v11 = vadd.f32 %v4082_v6, %v4081_v24  ;;  %v3393_v59 = vpop.permute.xlu1 %3392  ;;  %v4047_v38 = vsel %vm3885_vm9, %v3828_v31, 0.0 }
 0x7a0   : > { %v3797_v51 = vmul.f32 %v4906_v0, %v3393_v59  ;;  %v4048_v49 = vadd.f32 %v4047_v38, %v4046_v48  ;;  %v3263_v24 = vpop.permute.xlu0 %3262  ;;  %3617 = vbcast.lane.b32.xlu1 %v7229_v58, 368  ;;  %3747 = vbcast.lane.b32.xlu0 %v7247_v44, 360  ;;  %v4999_v48 = vunpack.c.h.bf16 %v7814_v42  ;;  %v8525_v0 = vmov 0  }
 0x7a1   : > { %v3766_v36 = vmul.f32 %v4843_v47, %v3263_v24  ;;  %v4329_v13 = vsel %vm4328_vm10, 1, %v8525_v0 }
 0x7a2   : > { %v3975_v18 = vsel %vm3885_vm9, %v3797_v51, 0.0  ;;  %v8527_v51 = vld [vmem:[#allocation19_spill] sm:$0xff] }
 0x7a3   : > { %v3976_v15 = vadd.f32 %v3975_v18, %v3974_v60  ;;  %v3653_v10 = vpop.permute.xlu1 %3652  ;;  %v3903_v50 = vsel %vm3885_vm9, %v3766_v36, 0.0 }
 0x7a4   : > { %v3859_v41 = vmul.f32 %v5030_v5, %v3653_v10  ;;  %v3904_v9 = vadd.f32 %v3903_v50, %v3902_v14  ;;  %v3460_v19 = vpop.permute.xlu0 %3459  ;;  %3554 = vbcast.lane.b32.xlu1 %v7219_v3, 376  ;;  %3684 = vbcast.lane.b32.xlu0 %v7237_v22, 368  ;;  %v4970_v3 = vunpack.c.l.bf16 %v7869_v37 }
 0x7a5   : > { %v3813_v60 = vmul.f32 %v4938_v25, %v3460_v19  ;;  %v7920_v25 = vld [vmem:[%s8459_s2 + $0xa8] sm:$0xff]  }
 0x7a6   : > { %v4119_v2 = vsel %vm3885_vm9, %v3859_v41, 0.0  ;;  %v5063_v41 = vunpack.c.h.bf16 %v7858_v52 }
 0x7a7   : > { %v4120_v16 = vadd.f32 %v4119_v2, %v4118_v8  ;;  %v3330_v26 = vpop.permute.xlu1 %3329  ;;  %v4012_v27 = vsel %vm3885_vm9, %v3813_v60, 0.0  ;;  %v4910_v60 = vunpack.c.l.bf16 %v7920_v25 }
 0x7a8   : > { %v3782_v55 = vmul.f32 %v4875_v62, %v3330_v26  ;;  %v4013_v33 = vadd.f32 %v4012_v27, %v4011_v56  ;;  %v3720_v42 = vpop.permute.xlu0 %3719  ;;  %3621 = vbcast.lane.b32.xlu1 %v7229_v58, 376  ;;  %3751 = vbcast.lane.b32.xlu0 %v7247_v44, 368  ;;  %v5031_v58 = vunpack.c.h.bf16 %v7836_v57  ;;  %v8528_v62 = vld [vmem:[#allocation18_spill] sm:$0xff] }
 0x7a9   : > { %v3875_v14 = vmul.f32 %v5062_v53, %v3720_v42  ;;  %v7929_v53 = vld [vmem:[%s8459_s2 + $0x1a0] sm:$0xff]  }
 0x7aa   : > { %v3940_v54 = vsel %vm3885_vm9, %v3782_v55, 0.0 }
 0x7ab   : > { %v3941_v39 = vadd.f32 %v3940_v54, %v3939_v32  ;;  %v3590_v28 = vpop.permute.xlu1 %3589  ;;  %v4156_v35 = vsel %vm3885_vm9, %v3875_v14, 0.0  ;;  %v5034_v14 = vunpack.c.l.bf16 %v7929_v53 }
 0x7ac   : > { %v3844_v8 = vmul.f32 %v4999_v48, %v3590_v28  ;;  %v4157_v34 = vadd.f32 %v4156_v35, %v4155_v17  ;;  %v3527_v23 = vpop.permute.xlu0 %3526  ;;  %3688 = vbcast.lane.b32.xlu1 %v7237_v22, 376  ;;  %3755 = vbcast.lane.b32.xlu0 %v7247_v44, 376  ;;  %v4878_v22 = vunpack.c.l.bf16 %v7895_v63  ;;  %v4939_v44 = vunpack.c.h.bf16 %v7847_v30  ;;  %v4194_v30 = vld [vmem:[%s8360_s13] sm:$0x3] }
 0x7ad   : > { %v3829_v56 = vmul.f32 %v4970_v3, %v3527_v23  ;;  %v4224_v36 = vsel %vm4222_vm11, %v4194_v30, 0  ;;  %v4971_v48 = vunpack.c.h.bf16 %v7869_v37  ;;  %v4847_v3 = vunpack.c.h.bf16 %v7884_v61  ;;  %v7938_v37 = vld [vmem:[%s8459_s2 + $0xe8] sm:$0xff]   ;;  %v7947_v61 = vld [vmem:[%s8459_s2 + $0x1e0] sm:$0xff]  }
 0x7ae   : > { %v4084_v4 = vsel %vm3885_vm9, %v3844_v8, 0.0  ;;  %5242 = vmatpush3.bf16.msra.mxu0 %v4224_v36 }
 0x7af   : > { %v4085_v40 = vadd.f32 %v4084_v4, %v4083_v11  ;;  %v3397_v21 = vpop.permute.xlu1 %3396  ;;  %v4049_v12 = vsel %vm3885_vm9, %v3829_v56, 0.0  ;;  %v4942_v56 = vunpack.c.l.bf16 %v7938_v37 }
 0x7b0   : > { %v3798_v32 = vmul.f32 %v4907_v1, %v3397_v21  ;;  %v4050_v46 = vadd.f32 %v4049_v12, %v4048_v49  ;;  %v3267_v11 = vpop.permute.xlu0 %3266  ;;  %4331 = vperm.xlu1 %5324, %v4329_v13   ;;  %807 = vrot.lane.b32.xlu0 %v8527_v51, %s8526_s17  ;;  %v5002_v49 = vunpack.c.l.bf16 %v7905_v45 }
 0x7b1   : > { %v3767_v59 = vmul.f32 %v4846_v29, %v3267_v11  ;;  %v7956_v11 = vld [vmem:[%s8459_s2 + $0x128] sm:$0xff]  }
 0x7b2   : > { %v3977_v20 = vsel %vm3885_vm9, %v3798_v32, 0.0  ;;  %v4879_v32 = vunpack.c.h.bf16 %v7895_v63  ;;  %v5066_v63 = vunpack.c.l.bf16 %v7947_v61 }
 0x7b3   : > { %v3978_v6 = vadd.f32 %v3977_v20, %v3976_v15  ;;  %v3657_v57 = vpop.permute.xlu1 %3656  ;;  %v3905_v5 = vsel %vm3885_vm9, %v3767_v59, 0.0 }
 0x7b4   : > { %v3860_v17 = vmul.f32 %v5031_v58, %v3657_v57  ;;  %v3906_v18 = vadd.f32 %v3905_v5, %v3904_v9  ;;  %v3464_v15 = vpop.permute.xlu0 %3463  ;;  %812 = vrot.lane.b32.xlu1 %v8528_v62, %s5462_s21  ;;  %v5003_v57 = vunpack.c.h.bf16 %v7905_v45  ;;  %v4974_v45 = vunpack.c.l.bf16 %v7956_v11 }
 0x7b5   : > { %v3814_v24 = vmul.f32 %v4939_v44, %v3464_v15 }
 0x7b6   : > { %v4121_v31 = vsel %vm3885_vm9, %v3860_v17, 0.0 }
 0x7b7   : > { %v4122_v47 = vadd.f32 %v4121_v31, %v4120_v16  ;;  %v3334_v38 = vpop.permute.xlu1 %3333  ;;  %v4014_v50 = vsel %vm3885_vm9, %v3814_v24, 0.0 }
 0x7b8   : > { %v3783_v10 = vmul.f32 %v4878_v22, %v3334_v38  ;;  %v4015_v9 = vadd.f32 %v4014_v50, %v4013_v33  ;;  %v3724_v19 = vpop.permute.xlu0 %3723  ;;  %v7965_v38 = vld [vmem:[%s8459_s2 + $0x30] sm:$0xff]  }
 0x7b9   : > { %v3876_v52 = vmul.f32 %v5063_v41, %v3724_v19  ;;  %v7978_v50 = vld [vmem:[%s8459_s2 + $0x70] sm:$0xff]  }
 0x7ba   : > { %v3942_v2 = vsel %vm3885_vm9, %v3783_v10, 0.0 }
 0x7bb   : > { %v3943_v16 = vadd.f32 %v3942_v2, %v3941_v39  ;;  %v3594_v26 = vpop.permute.xlu1 %3593  ;;  %v4158_v27 = vsel %vm3885_vm9, %v3876_v52, 0.0  ;;  %v4850_v2 = vunpack.c.l.bf16 %v7965_v38 }
 0x7bc   : > { %v3845_v55 = vmul.f32 %v5002_v49, %v3594_v26  ;;  %v4159_v39 = vadd.f32 %v4158_v27, %v4157_v34  ;;  %v3531_v42 = vpop.permute.xlu0 %3530 }
 0x7bd   : > { %v3830_v8 = vmul.f32 %v4971_v48, %v3531_v42 }
 0x7be   : > { %v4086_v54 = vsel %vm3885_vm9, %v3845_v55, 0.0 }
 0x7bf   : > { %v4087_v28 = vadd.f32 %v4086_v54, %v4085_v40  ;;  %v3401_v33 = vpop.permute.xlu1 %3400  ;;  %v4051_v7 = vsel %vm3885_vm9, %v3830_v8, 0.0  ;;  %v4943_v54 = vunpack.c.h.bf16 %v7938_v37 }
 0x7c0   : > { %v3799_v1 = vmul.f32 %v4910_v60, %v3401_v33  ;;  %v4052_v35 = vadd.f32 %v4051_v7, %v4050_v46  ;;  %v3271_v34 = vpop.permute.xlu0 %3270 }
 0x7c1   : > { %v3768_v23 = vmul.f32 %v4847_v3, %v3271_v34 }
 0x7c2   : > { %v3979_v43 = vsel %vm3885_vm9, %v3799_v1, 0.0 }
 0x7c3   : > { %v3980_v4 = vadd.f32 %v3979_v43, %v3978_v6  ;;  %v3661_v40 = vpop.permute.xlu1 %3660  ;;  %v3907_v29 = vsel %vm3885_vm9, %v3768_v23, 0.0 }
 0x7c4   : > { %v3861_v21 = vmul.f32 %v5034_v14, %v3661_v40  ;;  %v3908_v12 = vadd.f32 %v3907_v29, %v3906_v18  ;;  %v3468_v13 = vpop.permute.xlu0 %3467  ;;  %v4911_v18 = vunpack.c.h.bf16 %v7920_v25  ;;  %v5035_v25 = vunpack.c.h.bf16 %v7929_v53 }
 0x7c5   : > { %v3815_v46 = vmul.f32 %v4942_v56, %v3468_v13  ;;  %v4882_v53 = vunpack.c.l.bf16 %v7978_v50 }
 0x7c6   : > { %v4123_v58 = vsel %vm3885_vm9, %v3861_v21, 0.0 }
 0x7c7   : > { %v4124_v20 = vadd.f32 %v4123_v58, %v4122_v47  ;;  %v3338_v0 = vpop.permute.xlu1 %3337  ;;  %v4016_v59 = vsel %vm3885_vm9, %v3815_v46, 0.0  ;;  %v8028_v46 = vld [vmem:[%s8459_s2 + $0xb0] sm:$0xff]  }
 0x7c8   : > { %v3784_v6 = vmul.f32 %v4879_v32, %v3338_v0  ;;  %v4017_v44 = vadd.f32 %v4016_v59, %v4015_v9  ;;  %v3728_v31 = vpop.permute.xlu0 %3727  ;;  %v8048_v59 = vld [vmem:[%s8459_s2 + $0x38] sm:$0xff]  }
 0x7c9   : > { %v3877_v47 = vmul.f32 %v5066_v63, %v3728_v31  ;;  %v8038_v63 = vld [vmem:[%s8459_s2 + $0xf0] sm:$0xff]   ;;  %v5067_v31 = vunpack.c.h.bf16 %v7947_v61  ;;  %v4883_v61 = vunpack.c.h.bf16 %v7978_v50 }
 0x7ca   : > { %v3944_v17 = vsel %vm3885_vm9, %v3784_v6, 0.0  ;;  %v8023_v6 = vld [vmem:[%s8459_s2 + $0x168] sm:$0xff]  }
 0x7cb   : > { %v3945_v22 = vadd.f32 %v3944_v17, %v3943_v16  ;;  %v3598_v51 = vpop.permute.xlu1 %3597  ;;  %v4160_v49 = vsel %vm3885_vm9, %v3877_v47, 0.0  ;;  %v8043_v17 = vld [vmem:[%s8459_s2 + $0x1e8] sm:$0xff]   ;;  %v4851_v47 = vunpack.c.h.bf16 %v7965_v38  ;;  %v8073_v38 = vld [vmem:[%s8459_s2 + $0x170] sm:$0xff]  }
 0x7cc   : > { %v3846_v5 = vmul.f32 %v5003_v57, %v3598_v51  ;;  %v7971_v10 = vadd.f32 %v4160_v49, %v4159_v39  ;;  %v3535_v41 = vpop.permute.xlu0 %3534  ;;  %v8033_v57 = vld [vmem:[%s8459_s2 + $0x1a8] sm:$0xff]   ;;  %v5006_v51 = vunpack.c.l.bf16 %v8023_v6 }
 0x7cd   : > { %v3831_v62 = vmul.f32 %v4974_v45, %v3535_v41  ;;  %v8064_v45 = vld [vmem:[%s8459_s2 + $0x78] sm:$0xff]   ;;  %v5038_v49 = vunpack.c.l.bf16 %v8033_v57 }
 0x7ce   : > { %v4088_v15 = vsel %vm3885_vm9, %v3846_v5, 0.0  ;;  %v4914_v5 = vunpack.c.l.bf16 %v8028_v46  ;;  %v8078_v41 = vld [vmem:[%s8459_s2 + $0xb8] sm:$0xff]  }
 0x7cf   : > { %v7969_v30 = vadd.f32 %v4088_v15, %v4087_v28  ;;  %v3405_v24 = vpop.permute.xlu1 %3404  ;;  %v4053_v9 = vsel %vm3885_vm9, %v3831_v62, 0.0  ;;  %v4975_v15 = vunpack.c.h.bf16 %v7956_v11  ;;  %v5070_v11 = vunpack.c.l.bf16 %v8043_v17 }
 0x7d0   : > { %v3800_v36 = vmul.f32 %v4911_v18, %v3405_v24  ;;  %v7984_v19 = vadd.f32 %v4053_v9, %v4052_v35  ;;  %v3275_v52 = vpop.permute.xlu0 %3274  ;;  %v8059_v18 = vld [vmem:[%s8459_s2 + $0x130] sm:$0xff]   ;;  %v5007_v24 = vunpack.c.h.bf16 %v8023_v6  ;;  %v4915_v62 = vunpack.c.h.bf16 %v8028_v46 }
 0x7d1   : > { %v3769_v48 = vmul.f32 %v4850_v2, %v3275_v52  ;;  %v8087_v2 = vld [vmem:[%s8459_s2 + $0x1b0] sm:$0xff]   ;;  %v4886_v9 = vunpack.c.l.bf16 %v8064_v45  ;;  %v8529_v46 = vunpack.c.l.bf16 %v8059_v18 }
 0x7d2   : > { %v3981_v16 = vsel %vm3885_vm9, %v3800_v36, 0.0  ;;  %v4946_v36 = vunpack.c.l.bf16 %v8038_v63 }
 0x7d3   : > { %v7982_v26 = vadd.f32 %v3981_v16, %v3980_v4  ;;  %v3665_v55 = vpop.permute.xlu1 %3664  ;;  %v3909_v28 = vsel %vm3885_vm9, %v3769_v48, 0.0  ;;  %v8100_v48 = vld [vmem:[%s8459_s2 + $0xf8] sm:$0xff]  }
 0x7d4   : > { %v3862_v60 = vmul.f32 %v5035_v25, %v3665_v55  ;;  %v7992_v33 = vadd.f32 %v3909_v28, %v3908_v12  ;;  %v3472_v1 = vpop.permute.xlu0 %3471  ;;  %v4854_v25 = vunpack.c.l.bf16 %v8048_v59 }
 0x7d5   : > { %v3816_v14 = vmul.f32 %v4943_v54, %v3472_v1 }
 0x7d6   : > { %v4125_v27 = vsel %vm3885_vm9, %v3862_v60, 0.0 }
 0x7d7   : > { %v7990_v39 = vadd.f32 %v4125_v27, %v4124_v20  ;;  %v3342_v42 = vpop.permute.xlu1 %3341  ;;  %v4018_v43 = vsel %vm3885_vm9, %v3816_v14, 0.0  ;;  %v4855_v14 = vunpack.c.h.bf16 %v8048_v59 }
 0x7d8   : > { %v3785_v8 = vmul.f32 %v4882_v53, %v3342_v42  ;;  %v7998_v4 = vadd.f32 %v4018_v43, %v4017_v44  ;;  %v3732_v35 = vpop.permute.xlu0 %3731  ;;  %v8108_v42 = vld [vmem:[%s8459_s2 + $0x1f0] sm:$0xff]   ;;  %v8117_v43 = vld [vmem:[%s8459_s2 + $0x138] sm:$0xff]  }
 0x7d9   : > { %v3878_v1 = vmul.f32 %v5067_v31, %v3732_v35 }
 0x7da   : > { %v3946_v3 = vsel %vm3885_vm9, %v3785_v8, 0.0  ;;  %v8125_v8 = vld [vmem:[%s8459_s2 + $0x178] sm:$0xff]  }
 0x7db   : > { %v7996_v7 = vadd.f32 %v3946_v3, %v3945_v22  ;;  %v3602_v37 = vpop.permute.xlu1 %3601  ;;  %v4887_v3 = vunpack.c.h.bf16 %v8064_v45 }
 0x7dc   : > { %v8002_v34 = vpop.permute.xlu0 %3538  ;;  %v3847_v59 = vmul.f32 %v5006_v51, %v3602_v37  ;;  %v4162_v51 = vsel %vm3885_vm9, %v3878_v1, 0.0 }
 0x7df   : > { %v8000_v40 = vpop.permute.xlu1 %3408 }
 0x7e0   : > { %v3279_v23 = vpop.permute.xlu0 %3278  ;;  %v3801_v31 = vmul.f32 %v4914_v5, %v8000_v40  ;;  %v4163_v5 = vadd.f32 %v4162_v51, %v7971_v10 }
 0x7e1   : > { %v3770_v53 = vmul.f32 %v4851_v47, %v3279_v23 }
 0x7e3   : > { %v8004_v21 = vpop.permute.xlu1 %3668  ;;  %v3911_v27 = vsel %vm3885_vm9, %v3770_v53, 0.0  ;;  %v4090_v53 = vsel %vm3885_vm9, %v3847_v59, 0.0 }
 0x7e4   : > { %v8008_v56 = vpop.permute.xlu0 %3475  ;;  %v4091_v40 = vadd.f32 %v4090_v53, %v7969_v30  ;;  %v3983_v30 = vsel %vm3885_vm9, %v3801_v31, 0.0 }
 0x7e5   : > { %v3817_v37 = vmul.f32 %v4946_v36, %v8008_v56  ;;  %v3984_v31 = vadd.f32 %v3983_v30, %v7982_v26  ;;  %v8535_v30 = vunpack.c.h.bf16 %v8043_v17 }
 0x7e7   : > { %v8006_v32 = vpop.permute.xlu1 %3345 }
 0x7e8   : > { %v8012_v29 = vpop.permute.xlu0 %3735  ;;  %v3786_v54 = vmul.f32 %v4883_v61, %v8006_v32  ;;  %v8149_v32 = vld [vmem:[%s8459_s2 + $0x1f8] sm:$0xff]  }
 0x7e9   : > { %v5078_v59 = vunpack.c.l.bf16 %v8149_v32  ;;  %v5079_v1 = vunpack.c.h.bf16 %v8149_v32  ;;  %v3879_v10 = vmul.f32 %v5070_v11, %v8012_v29 }
 0x7ea   : > { %v3948_v50 = vsel %vm3885_vm9, %v3786_v54, 0.0  ;;  %v4020_v54 = vsel %vm3885_vm9, %v3817_v37, 0.0 }
 0x7eb   : > { %v8010_v58 = vpop.permute.xlu1 %3605 }
 0x7ec   : > { %v8016_v12 = vpop.permute.xlu0 %3542 }
 0x7ef   : > { %v8014_v20 = vpop.permute.xlu1 %3412 }
 0x7f0   : > { %v3283_v13 = vpop.permute.xlu0 %3282  ;;  %v3802_v56 = vmul.f32 %v4915_v62, %v8014_v20  ;;  %v3833_v62 = vmul.f32 %v8529_v46, %v8016_v12 }
 0x7f1   : > { %v3771_v23 = vmul.f32 %v4854_v25, %v3283_v13  ;;  %v8134_v25 = vld [vmem:[%s8459_s2 + $0x1b8] sm:$0xff]   ;;  %v3912_v13 = vadd.f32 %v3911_v27, %v7992_v33  ;;  %v3848_v33 = vmul.f32 %v5007_v24, %v8010_v58  ;;  %v8530_v27 = vunpack.c.l.bf16 %v8078_v41 }
 0x7f3   : > { %v8018_v0 = vpop.permute.xlu1 %3672  ;;  %v3913_v55 = vsel %vm3885_vm9, %v3771_v23, 0.0  ;;  %v4092_v20 = vsel %vm3885_vm9, %v3848_v33, 0.0 }
 0x7f4   : > { %v8050_v44 = vpop.permute.xlu0 %3479  ;;  %v3914_v61 = vadd.f32 %v3913_v55, %v3912_v13  ;;  %v4093_v53 = vadd.f32 %v4092_v20, %v4091_v40 }
 0x7f7   : > { %v3350_v22 = vpop.permute.xlu1 %3349 }
 0x7f8   : > { %v8095_v60 = vpop.permute.xlu0 %3739  ;;  %v3787_v28 = vmul.f32 %v4886_v9, %v3350_v22  ;;  %v3832_v22 = vmul.f32 %v4975_v15, %v8002_v34  ;;  %v3863_v9 = vmul.f32 %v5038_v49, %v8004_v21  ;;  %v3949_v15 = vadd.f32 %v3948_v50, %v7996_v7 }
 0x7fa   : > { %v3950_v34 = vsel %vm3885_vm9, %v3787_v28, 0.0  ;;  %v4055_v6 = vsel %vm3885_vm9, %v3832_v22, 0.0  ;;  %v4127_v58 = vsel %vm3885_vm9, %v3863_v9, 0.0 }
 0x7fb   : > { %v8093_v52 = vpop.permute.xlu1 %3609  ;;  %v3951_v7 = vadd.f32 %v3950_v34, %v3949_v15  ;;  %v4128_v12 = vadd.f32 %v4127_v58, %v7990_v39  ;;  %v8537_v58 = vunpack.c.h.bf16 %v8078_v41 }
 0x7fc   : > { %v8127_v16 = vpop.permute.xlu0 %3546 }
 0x7ff   : > { %v3417_v45 = vpop.permute.xlu1 %3416 }
 0x800   : > { %v3287_v23 = vpop.permute.xlu0 %3286  ;;  %v3803_v28 = vmul.f32 %v8530_v27, %v3417_v45  ;;  %v4021_v45 = vadd.f32 %v4020_v54, %v7998_v4  ;;  %v8533_v4 = vunpack.c.l.bf16 %v8100_v48 }
 0x801   : > { %v3772_v47 = vmul.f32 %v4855_v14, %v3287_v23  ;;  %v4164_v23 = vsel %vm3885_vm9, %v3879_v10, 0.0 }
 0x802   : > { %v3987_v26 = vsel %vm3885_vm9, %v3803_v28, 0.0  ;;  %v4165_v20 = vadd.f32 %v4164_v23, %v4163_v5 }
 0x803   : > { %v3677_v35 = vpop.permute.xlu1 %3676  ;;  %v3915_v21 = vsel %vm3885_vm9, %v3772_v47, 0.0  ;;  %v8531_v47 = vunpack.c.h.bf16 %v8038_v63  ;;  %v4057_v63 = vsel %vm3885_vm9, %v3833_v62, 0.0 }
 0x804   : > { %v3916_v49 = vadd.f32 %v3915_v21, %v3914_v61  ;;  %v3484_v55 = vpop.permute.xlu0 %3483  ;;  %v4056_v61 = vadd.f32 %v4055_v6, %v7984_v19 }
 0x805   : > { %v3818_v13 = vmul.f32 %v8531_v47, %v8050_v44  ;;  %v8532_v44 = vunpack.c.h.bf16 %v8033_v57  ;;  %v3819_v40 = vmul.f32 %v8533_v4, %v3484_v55  ;;  %v3880_v57 = vmul.f32 %v8535_v30, %v8095_v60 }
 0x806   : > { %v3917_v50 = vrot.slane %v3916_v49, 4  ;;  %v8538_v55 = vunpack.c.l.bf16 %v8087_v2  ;;  %v4058_v46 = vadd.f32 %v4057_v63, %v4056_v61  ;;  %v8540_v61 = vunpack.c.h.bf16 %v8073_v38 }
 0x807   : > { %v3354_v36 = vpop.permute.xlu1 %3353  ;;  %v3864_v34 = vmul.f32 %v8532_v44, %v8018_v0  ;;  %v4022_v19 = vsel %vm3885_vm9, %v3818_v13, 0.0  ;;  %v8536_v0 = vunpack.c.h.bf16 %v8059_v18  ;;  %v4024_v18 = vsel %vm3885_vm9, %v3819_v40, 0.0 }
 0x808   : > { %v3788_v24 = vmul.f32 %v4887_v3, %v3354_v36  ;;  %v3985_v3 = vsel %vm3885_vm9, %v3802_v56, 0.0  ;;  %v3918_v29 = vadd.f32 %v3917_v50, %v3916_v49  ;;  %v3744_v51 = vpop.permute.xlu0 %3743  ;;  %v8534_v49 = vunpack.c.l.bf16 %v8073_v38 }
 0x809   : > { %v3986_v33 = vadd.f32 %v3985_v3, %v3984_v31  ;;  %v3834_v6 = vmul.f32 %v8536_v0, %v8127_v16  ;;  %v3865_v10 = vmul.f32 %v8538_v55, %v3677_v35  ;;  %v4023_v28 = vadd.f32 %v4022_v19, %v4021_v45 }
 0x80a   : > { %v3952_v14 = vsel %vm3885_vm9, %v3788_v24, 0.0  ;;  %v3919_v22 = vrot.slane %v3918_v29, 2  ;;  %v3849_v36 = vmul.f32 %v8534_v49, %v8093_v52  ;;  %v4129_v52 = vsel %vm3885_vm9, %v3864_v34, 0.0 }
 0x80b   : > { %v3953_v11 = vadd.f32 %v3952_v14, %v3951_v7  ;;  %v3614_v37 = vpop.permute.xlu1 %3613  ;;  %v3988_v54 = vadd.f32 %v3987_v26, %v3986_v33  ;;  %v4166_v35 = vsel %vm3885_vm9, %v3880_v57, 0.0  ;;  %v8539_v3 = vunpack.c.h.bf16 %v8100_v48 }
 0x80c   : > { %v3920_v21 = vadd.f32 %v3919_v22, %v3918_v29  ;;  %v3551_v56 = vpop.permute.xlu0 %3550  ;;  %v4094_v14 = vsel %vm3885_vm9, %v3849_v36, 0.0  ;;  %v4059_v47 = vsel %vm3885_vm9, %v3834_v6, 0.0  ;;  %v4131_v13 = vsel %vm3885_vm9, %v3865_v10, 0.0 }
 0x80d   : > { %v3954_v9 = vrot.slane %v3953_v11, 4  ;;  %v4025_v31 = vadd.f32 %v4024_v18, %v4023_v28  ;;  %v3850_v23 = vmul.f32 %v8540_v61, %v3614_v37  ;;  %v8541_v22 = vunpack.c.l.bf16 %v8117_v43 }
 0x80e   : > { %v3921_v7 = vrot.slane %v3920_v21, 1  ;;  %v4130_v33 = vadd.f32 %v4129_v52, %v4128_v12  ;;  %v4095_v19 = vadd.f32 %v4094_v14, %v4093_v53  ;;  %v8543_v30 = vunpack.c.l.bf16 %v8125_v8 }
 0x80f   : > { %v3955_v39 = vadd.f32 %v3954_v9, %v3953_v11  ;;  %v3421_v15 = vpop.permute.xlu1 %3420  ;;  %v3835_v45 = vmul.f32 %v8541_v22, %v3551_v56  ;;  %v4096_v56 = vsel %vm3885_vm9, %v3850_v23, 0.0 }
 0x810   : > { %v3804_v24 = vmul.f32 %v8537_v58, %v3421_v15  ;;  %v3922_v60 = vadd.f32 %v3921_v7, %v3920_v21  ;;  %v3488_v41 = vpop.permute.xlu0 %3487  ;;  %v4167_v21 = vadd.f32 %v4166_v35, %v4165_v20  ;;  %v4060_v15 = vadd.f32 %v4059_v47, %v4058_v46 }
 0x811   : > { %v3956_v50 = vrot.slane %v3955_v39, 2  ;;  %v3820_v5 = vmul.f32 %v8539_v3, %v3488_v41  ;;  %v4132_v38 = vadd.f32 %v4131_v13, %v4130_v33  ;;  %v4061_v36 = vsel %vm3885_vm9, %v3835_v45, 0.0 }
 0x812   : > { %v3989_v17 = vsel %vm3885_vm9, %v3804_v24, 0.0  ;;  %v4186_v63 = vpack.c.bf16 %v3922_v60, %v3922_v60  ;;  %v8544_v58 = vunpack.c.h.bf16 %v8087_v2  ;;  %v8545_v7 = vunpack.c.h.bf16 %v8108_v42 }
 0x813   : > { %v3957_v62 = vadd.f32 %v3956_v50, %v3955_v39  ;;  %v3990_v16 = vadd.f32 %v3989_v17, %v3988_v54  ;;  %v3681_v27 = vpop.permute.xlu1 %3680  ;;  %v4026_v9 = vsel %vm3885_vm9, %v3820_v5, 0.0  ;;  %v8542_v39 = vunpack.c.l.bf16 %v8108_v42 }
 0x814   : > { %v3748_v26 = vpop.permute.xlu0 %3747  ;;  %v4027_v40 = vadd.f32 %v4026_v9, %v4025_v31  ;;  %v4203_v0 = vunpack.c.l.b16 %v4186_v63  ;;  %v3866_v24 = vmul.f32 %v8544_v58, %v3681_v27  ;;  %v8546_v20 = vunpack.c.h.bf16 %v8117_v43 }
 0x815   : > { %v3958_v29 = vrot.slane %v3957_v62, 1  ;;  %v3991_v11 = vrot.slane %v3990_v16, 4  ;;  %v3881_v4 = vmul.f32 %v8542_v39, %v3744_v51  ;;  %v3882_v50 = vmul.f32 %v8545_v7, %v3748_v26 }
 0x816   : > { %v4028_v12 = vrot.slane %v4027_v40, 4  ;;  %v4062_v60 = vadd.f32 %v4061_v36, %v4060_v15  ;;  %v4097_v2 = vadd.f32 %v4096_v56, %v4095_v19  ;;  %v4133_v42 = vsel %vm3885_vm9, %v3866_v24, 0.0 }
 0x817   : > { %v3959_v44 = vadd.f32 %v3958_v29, %v3957_v62  ;;  %v3992_v48 = vadd.f32 %v3991_v11, %v3990_v16  ;;  %v3618_v34 = vpop.permute.xlu1 %3617  ;;  %v4168_v55 = vsel %vm3885_vm9, %v3881_v4, 0.0  ;;  %v8548_v62 = vunpack.c.l.bf16 %v8134_v25 }
 0x818   : > { %v3851_v57 = vmul.f32 %v8543_v30, %v3618_v34  ;;  %v3685_v54 = vpop.permute.xlu0 %3684  ;;  %v4029_v10 = vadd.f32 %v4028_v12, %v4027_v40  ;;  %v4169_v28 = vadd.f32 %v4168_v55, %v4167_v21  ;;  %v4170_v47 = vsel %vm3885_vm9, %v3882_v50, 0.0 }
 0x819   : > { %v4187_v37 = vpack.c.bf16 %v3959_v44, %v3959_v44  ;;  %v3993_v49 = vrot.slane %v3992_v48, 2  ;;  %v3867_v18 = vmul.f32 %v8548_v62, %v3685_v54  ;;  %v8549_v13 = vunpack.c.h.bf16 %v8125_v8 }
 0x81a   : > { %v4030_v16 = vrot.slane %v4029_v10, 2  ;;  %v4098_v27 = vsel %vm3885_vm9, %v3851_v57, 0.0  ;;  %v4134_v45 = vadd.f32 %v4133_v42, %v4132_v38 }
 0x81b   : > { %v4204_v6 = vunpack.c.l.b16 %v4187_v37  ;;  %v3994_v53 = vadd.f32 %v3993_v49, %v3992_v48  ;;  %v3555_v51 = vpop.permute.xlu1 %3554  ;;  %v4099_v61 = vadd.f32 %v4098_v27, %v4097_v2  ;;  %v4135_v22 = vsel %vm3885_vm9, %v3867_v18, 0.0 }
 0x81c   : > { %v3836_v46 = vmul.f32 %v8546_v20, %v3555_v51  ;;  %v3752_v3 = vpop.permute.xlu0 %3751  ;;  %v4031_v5 = vadd.f32 %v4030_v16, %v4029_v10  ;;  %v4171_v48 = vadd.f32 %v4170_v47, %v4169_v28  ;;  %v4136_v39 = vadd.f32 %v4135_v22, %v4134_v45 }
 0x81d   : > { %v4211_v52 = vsel %vm8547_vm12, %v4204_v6, %v4203_v0  ;;  %v3995_v17 = vrot.slane %v3994_v53, 1  ;;  %v3883_v11 = vmul.f32 %v5078_v59, %v3752_v3  ;;  %v8550_v59 = vunpack.c.h.bf16 %v8134_v25 }
 0x81e   : > { %v4063_v41 = vsel %vm3885_vm9, %v3836_v46, 0.0  ;;  %v4032_v9 = vrot.slane %v4031_v5, 1 }
 0x81f   : > { %v3996_v14 = vadd.f32 %v3995_v17, %v3994_v53  ;;  %v4064_v35 = vadd.f32 %v4063_v41, %v4062_v60  ;;  %v3622_v43 = vpop.permute.xlu1 %3621  ;;  %v4172_v63 = vsel %vm3885_vm9, %v3883_v11, 0.0 }
 0x820   : > { %v3852_v29 = vmul.f32 %v8549_v13, %v3622_v43  ;;  %v3756_v19 = vpop.permute.xlu0 %3755  ;;  %v4033_v21 = vadd.f32 %v4032_v9, %v4031_v5  ;;  %v4173_v49 = vadd.f32 %v4172_v63, %v4171_v48  ;;  %v8555_v43 = vld [vmem:[#allocation24_spill] sm:$0xff]  ;;  %v4560_v9 = vld [vmem:[%s8361_s14] ss:$0 sm:$0xff] }
 0x821   : > { %v4188_v31 = vpack.c.bf16 %v3996_v14, %v3996_v14  ;;  %v4065_v23 = vrot.slane %v4064_v35, 4  ;;  %v3884_v40 = vmul.f32 %v5079_v1, %v3756_v19 }
 0x822   : > { %v4100_v33 = vsel %vm3885_vm9, %v3852_v29, 0.0  ;;  %v4189_v56 = vpack.c.bf16 %v4033_v21, %v4033_v21 }
 0x823   : > { %v4205_v44 = vunpack.c.l.b16 %v4188_v31  ;;  %v4066_v34 = vadd.f32 %v4065_v23, %v4064_v35  ;;  %v4101_v26 = vadd.f32 %v4100_v33, %v4099_v61  ;;  %v3689_v8 = vpop.permute.xlu1 %3688  ;;  %v4174_v12 = vsel %vm3885_vm9, %v3884_v40, 0.0  ;;  %v8557_v33 = vld [vmem:[#allocation22_spill] sm:$0xff] }
 0x824   : > { %v3868_v4 = vmul.f32 %v8550_v59, %v3689_v8  ;;  %v4175_v6 = vadd.f32 %v4174_v12, %v4173_v49  ;;  %v808_v53 = vpop.permute.xlu0 %807  ;;  %v4206_v25 = vunpack.c.l.b16 %v4189_v56 }
 0x825   : > { %v4212_v15 = vsel %vm8551_vm13, %v4205_v44, %v4211_v52  ;;  %v4067_v38 = vrot.slane %v4066_v34, 2  ;;  %v4102_v37 = vrot.slane %v4101_v26, 4  ;;  %810 = vst.msk [vmem:[#allocation2] sm:$0xff] %vm8552_vm14, %v808_v53 }
 0x826   : > { %v4137_v36 = vsel %vm3885_vm9, %v3868_v4, 0.0  ;;  %v4176_v24 = vrot.slane %v4175_v6, 4  ;;  %v4213_v51 = vsel %vm8553_vm15, %v4206_v25, %v4212_v15 }
 0x827   : > { %v4068_v30 = vadd.f32 %v4067_v38, %v4066_v34  ;;  %v4103_v57 = vadd.f32 %v4102_v37, %v4101_v26  ;;  %v4138_v0 = vadd.f32 %v4137_v36, %v4136_v39 }
 0x828   : > { %v4177_v7 = vadd.f32 %v4176_v24, %v4175_v6 }
 0x829   : > { %v4069_v32 = vrot.slane %v4068_v30, 1  ;;  %v4104_v1 = vrot.slane %v4103_v57, 2  ;;  %v4139_v58 = vrot.slane %v4138_v0, 4 }
 0x82a   : > { %v4178_v52 = vrot.slane %v4177_v7, 2 }
 0x82b   : > { %v4070_v54 = vadd.f32 %v4069_v32, %v4068_v30  ;;  %v4105_v55 = vadd.f32 %v4104_v1, %v4103_v57  ;;  %v4140_v10 = vadd.f32 %v4139_v58, %v4138_v0  ;;  %v4332_v2 = vpop.permute.xlu1 %4331 }
 0x82c   : > { %v4179_v18 = vadd.f32 %v4178_v52, %v4177_v7  ;;  %vm4333_vm1 = vcmp.eq.s32.totalorder %v4332_v2, 1 }
 0x82d   : > { %v4190_v50 = vpack.c.bf16 %v4070_v54, %v4070_v54  ;;  %v4106_v20 = vrot.slane %v4105_v55, 1  ;;  %v4141_v46 = vrot.slane %v4140_v10, 2  ;;  %v4336_v3 = vsel %vm4333_vm1, %v8555_v43, 0.0 }
 0x82e   : > { %v4180_v28 = vrot.slane %v4179_v18, 1  ;;  %4337 = vst [vmem:[%s5623_s22] sm:$0xff] %v4336_v3 }
 0x82f   : > { %v4207_v17 = vunpack.c.l.b16 %v4190_v50  ;;  %v4107_v60 = vadd.f32 %v4106_v20, %v4105_v55  ;;  %v4142_v62 = vadd.f32 %v4141_v46, %v4140_v10  ;;  %v813_v5 = vpop.permute.xlu1 %812 }
 0x830   : > { %v4181_v35 = vadd.f32 %v4180_v28, %v4179_v18  ;;  %815 = vst.msk [vmem:[#allocation3] sm:$0xff] %vm8556_vm2, %v813_v5 }
 0x831   : > { %v4214_v16 = vsel %vm8554_vm0, %v4207_v17, %v4213_v51  ;;  %v4191_v27 = vpack.c.bf16 %v4107_v60, %v4107_v60  ;;  %v4143_v41 = vrot.slane %v4142_v62, 1 }
 0x832   : > { %v4193_v29 = vpack.c.bf16 %v4181_v35, %v4181_v35 }
 0x833   : > { %v4208_v14 = vunpack.c.l.b16 %v4191_v27  ;;  %v4144_v42 = vadd.f32 %v4143_v41, %v4142_v62 }
 0x834   : > { %v4210_v31 = vunpack.c.l.b16 %v4193_v29 }
 0x835   : > { %v4215_v47 = vsel %vm2948_vm5, %v4208_v14, %v4214_v16  ;;  %v4192_v13 = vpack.c.bf16 %v4144_v42, %v4144_v42 }
 0x837   : > { %v4209_v11 = vunpack.c.l.b16 %v4192_v13 }
 0x839   : > { %v4216_v61 = vsel %vm2950_vm6, %v4209_v11, %v4215_v47 }
 0x83a   : > { %v4217_v23 = vsel %vm2952_vm7, %v4210_v31, %v4216_v61 }
 0x83b   : > { %v4218_v22 = vpack.c.b16 %v4217_v23, %v4217_v23 }
 0x83d   : > { %5244 = vmatmul.mubr.msk.bf16.vlgmr.msra.gmra.mxu0 %vm3885_vm9, %v4218_v22 }
 0x8fd   : > { %v4260_v45 = vpop.f32.mrf.mxu0 }
 0x8fe   : > { %v4313_v63 = vadd.f32 %v8557_v33, %v4260_v45 }
 0x8ff   : > { %v5245_v44 = vpop.f32.mrf.mxu0 }
 0x900   : > { %v4325_v48 = vadd.f32 %v4560_v9, %v4313_v63 }
 0x901   : > { %v4263_v34 = vpop.f32.mrf.mxu0 }
 0x902   : > { %v4334_v26 = vsel %vm4333_vm1, %v4325_v48, 0.0 }
 0x903   : > { %4335 = vst [vmem:[%s5621_s28] sm:$0xff] %v4334_v26  ;;  %v5246_v8 = vpop.f32.mrf.mxu0 }
 0x904 PF: > { %p4561_p2 = scmp.lt.s32.totalorder %s5445_s29, %s5626_s25 }
 0x906   : > { %4341 = sbr.rel (%p4561_p2) target bundleno = 2317 (0x90d), region = 88 }
 0x90b   : > { %v5463_v19 = vmov 0.0  }
 0x90c   : > { %4342 = vst [vmem:[%s5621_s28] sm:$0xff] %v5463_v19  ;;  %4343 = vst [vmem:[%s5623_s22] sm:$0xff] %v5463_v19 }
 0x90d PF: > { %s8395_s3 = sshll.u32 %s5445_s29, 7  ;;  %s4364_s23 = sshll.u32 %s5621_s28, 4  ;;  %s4365_s23 = int_to_ptr.vmem [resolvable:$true] %s4364_s23 }
 0x90e   : > { %s4362_s11 = scalar_lea.hbm %s8362_s15, %s8395_s3  ;;  %s4345_s25 = scalar_lea.sflag [#allocation8], %s5613_s24 }
 0x90f   : > { %s5347_s30 = scalar_lea.vmem %s4365_s23, 128  ;;  %s5464_s17 = smov [#allocation7]  }
 0x910   : > { %p5348_p3 = scmp.ne.s32.totalorder %s4365_s23, %s5347_s30  ;;  %s5351_s18 = sshll.u32 %s5464_s17, 4  ;;  %s5352_s18 = int_to_ptr.vmem [resolvable:$false] %s5351_s18 }
 0x911   : > { %s5353_s1 = scalar_lea.vmem %s5352_s18, 256  ;;  %p5354_p7 = scmp.lt.s32.totalorder %s4365_s23, %s5352_s18 }
 0x912   : > { %p5349_p5 = pnand %p5348_p3, %p5597_p4  ;;  %p5355_p9 = scmp.lt.s32.totalorder %s5353_s1, %s5347_s30 }
 0x914   : > { %p5350_p6 = pneg %p5349_p5  ;;  %p5356_p10 = por %p5355_p9, %p5354_p7 }
 0x916   : > { %p5357_p11 = pnand %p5356_p10, %p5350_p6 }
 0x918   : > { %5360 = shalt.err (!%p5357_p11)
}
 0x919   : > { %s5361_s21 = scalar_lea.hbm %s4362_s11, 128  ;;  %s5365_s19 = scalar_lea.hbm %s8362_s15, 896 }
 0x91a   : > { %p5362_p12 = scmp.ne.s32.totalorder %s4362_s11, %s5361_s21  ;;  %p5366_p1 = scmp.lt.s32.totalorder %s4362_s11, %s8362_s15 }
 0x91b   : > { %p5367_p2 = scmp.lt.s32.totalorder %s5365_s19, %s5361_s21 }
 0x91c   : > { %p5363_p13 = pnand %p5362_p12, %p5597_p4 }
 0x91d   : > { %p5368_p3 = por %p5367_p2, %p5366_p1 }
 0x91e   : > { %p5364_p0 = pneg %p5363_p13 }
 0x920   : > { %p5369_p5 = pnand %p5368_p3, %p5364_p0 }
 0x922   : > { %5372 = shalt.err (!%p5369_p5)
}
 0x923   : > { %5255 = dma.vmem_to_hbm [thread:$0]  (%p5597_p4), %s4365_s23, 128, %s4362_s11, %s4345_s25  }
 0x924   : > { %s8558_s30 = sshll.u32 %s5445_s29, 7  ;;  %s4378_s28 = sshll.u32 %s5623_s22, 4  ;;  %s4379_s28 = int_to_ptr.vmem [resolvable:$true] %s4378_s28 }
 0x925   : > { %s4376_s1 = scalar_lea.hbm %s8363_s16, %s8558_s30  ;;  %s4350_s2 = scalar_lea.sflag [#allocation10], %s5613_s24 }
 0x926   : > { %s5373_s3 = scalar_lea.vmem %s4379_s28, 128  ;;  %s5465_s21 = smov [#allocation9]  }
 0x927   : > { %p5374_p6 = scmp.ne.s32.totalorder %s4379_s28, %s5373_s3  ;;  %s5377_s5 = sshll.u32 %s5465_s21, 4  ;;  %s5378_s5 = int_to_ptr.vmem [resolvable:$false] %s5377_s5 }
 0x928   : > { %s5379_s19 = scalar_lea.vmem %s5378_s5, 256  ;;  %p5380_p10 = scmp.lt.s32.totalorder %s4379_s28, %s5378_s5 }
 0x929   : > { %p5375_p7 = pnand %p5374_p6, %p5597_p4  ;;  %p5381_p11 = scmp.lt.s32.totalorder %s5379_s19, %s5373_s3 }
 0x92b   : > { %p5376_p9 = pneg %p5375_p7  ;;  %p5382_p12 = por %p5381_p11, %p5380_p10 }
 0x92d   : > { %p5383_p13 = pnand %p5382_p12, %p5376_p9 }
 0x92f   : > { %5386 = shalt.err (!%p5383_p13)
}
 0x930   : > { %s5387_s29 = scalar_lea.hbm %s4376_s1, 128  ;;  %s5391_s11 = scalar_lea.hbm %s8363_s16, 896 }
 0x931   : > { %p5388_p0 = scmp.ne.s32.totalorder %s4376_s1, %s5387_s29  ;;  %p5392_p3 = scmp.lt.s32.totalorder %s4376_s1, %s8363_s16 }
 0x932   : > { %p5393_p5 = scmp.lt.s32.totalorder %s5391_s11, %s5387_s29 }
 0x933   : > { %p5389_p1 = pnand %p5388_p0, %p5597_p4 }
 0x934   : > { %p5394_p6 = por %p5393_p5, %p5392_p3 }
 0x935   : > { %p5390_p2 = pneg %p5389_p1 }
 0x937   : > { %p5395_p7 = pnand %p5394_p6, %p5390_p2 }
 0x939   : > { %5398 = shalt.err (!%p5395_p7)
}
 0x93a   : > { %5256 = dma.vmem_to_hbm [thread:$0]  (%p5597_p4), %s4379_s28, 128, %s4376_s1, %s4350_s2  }
 0x93b PF: > { %p5266_p9 = scmp.ge.s32.totalorder %s5453_s0, 2  ;;  %s4390_s17 = sand.u32 1, %s5433_s26  }
 0x93c   : > { %s4391_s18 = scalar_lea.sflag [#allocation8], %s4390_s17 }
 0x93d   : > { %p5260_p10 = pnand %p5266_p9, %p5604_p8 }
 0x93f   : > { %p5261_p11 = pneg %p5260_p10 }
 0x941   : > { %5424 = dma.done.wait (%p5261_p11), %s4391_s18, 128  }
 0x942   : > { %5426 = vsyncadd (%p5261_p11), %s4391_s18, 4294967168  ;;  %s4400_s3 = scalar_lea.sflag [#allocation10], %s4390_s17 }
 0x943   : > { %5428 = dma.done.wait (%p5261_p11), %s4400_s3, 128  }
 0x944   : > { %5430 = vsyncadd (%p5261_p11), %s4400_s3, 4294967168  ;;  %s36_s0 = sadd.s32 1, %s5453_s0   ;;  %s8560_s20 = sld [smem:[#allocation13_spill]] }
 0x945   : > { %p33_p12 = scmp.ge.s32.totalorder %s36_s0, 9   ;;  %s8561_s28 = sld [smem:[#allocation17_spill]] }
 0x946   : > { %s8562_s29 = sld [smem:[#allocation14_spill]]  ;;  %s8564_s26 = smov %s5437_s27 }
 0x947   : > { %s8563_s30 = sld [smem:[#allocation15_spill]]  ;;  %35 = sbr.rel (!%p33_p12) target bundleno = 19 (0x13), region = 149 }
 0x94a   : > { %s8565_s27 = smov %s8560_s20 }
 0x94c   :  { %4405 = vsyncpa [#allocation8], 1 }
 0x94d   :  { %4407 = vsyncpa [#allocation8 + $0x1], 1 }
 0x94e   :  { %4408 = vsyncpa [#allocation10], 1 }
 0x94f   :  { %4410 = vsyncpa [#allocation10 + $0x1], 1 }

// kernel: tpu_custom_call.1
= control target key start
LH: loop header
LB: loop body
LE: loop exit
PB: predicated region body
PF: predicated region fallthrough
CT: control target
= control target key end

     0   :  { %s8347_s0 = inlined_call_operand.<no memory space> [shape: s32[1], index: 0, kind: input, shape index: {}]   ;;  %s8348_s1 = inlined_call_operand.vmem [shape: bf16[7,8,16], index: 1, kind: input, shape index: {}]   ;;  %s8349_s2 = inlined_call_operand.vmem [shape: bf16[8,128,4], index: 2, kind: input, shape index: {}]   ;;  %s8350_s3 = inlined_call_operand.vmem [shape: bf16[8,128,32], index: 3, kind: input, shape index: {}]   ;;  %s8351_s4 = inlined_call_operand.vmem [shape: s32[8,1], index: 4, kind: input, shape index: {}]   ;;  %s8352_s5 = inlined_call_operand.vmem [shape: bf16[16,128], index: 5, kind: input, shape index: {}]   ;;  %s8353_s6 = inlined_call_operand.vmem [shape: bf16[32,128], index: 6, kind: input, shape index: {}]   ;;  %s8354_s7 = inlined_call_operand.vmem [shape: f32[1,128], index: 7, kind: input, shape index: {}]   ;;  %s8355_s8 = inlined_call_operand.vmem [shape: bf16[32,32], index: 8, kind: input, shape index: {}]   ;;  %s8356_s9 = inlined_call_operand.vmem [shape: f32[1,32], index: 9, kind: input, shape index: {}]   ;;  %s8357_s10 = inlined_call_operand.vmem [shape: f32[1,32], index: 10, kind: input, shape index: {}]   ;;  %s8358_s11 = inlined_call_operand.<no memory space> [shape: f32[1,1], index: 11, kind: input, shape index: {}]   ;;  %s8359_s12 = inlined_call_operand.vmem [shape: bf16[32,128], index: 12, kind: input, shape index: {}]   ;;  %s8360_s13 = inlined_call_operand.vmem [shape: bf16[4,128], index: 13, kind: input, shape index: {}]   ;;  %s8361_s14 = inlined_call_operand.vmem [shape: f32[1,128], index: 14, kind: input, shape index: {}]   ;;  %s8362_s15 = inlined_call_operand.hbm [shape: f32[7,8,128], index: 15, kind: output, shape index: {0}]   ;;  %s8363_s16 = inlined_call_operand.hbm [shape: f32[7,8,128], index: 16, kind: output, shape index: {1}]  }
   0x1   :  { %8396 = sst [smem:[#allocation33_spill]] %s8347_s0  ;;  %v23_v0 = vstv %s8358_s11 }
   0x2   :  { %8397 = sst [smem:[#allocation34_spill]] %s8348_s1  ;;  %24 = vst [vmem:[#allocation6] sm:$0x1] %v23_v0 }
   0x3   :  { %8398 = sst [smem:[#allocation35_spill]] %s8349_s2 }
   0x4   :  { %8399 = sst [smem:[#allocation36_spill]] %s8350_s3 }
   0x5   :  { %8400 = sst [smem:[#allocation37_spill]] %s8352_s5 }
   0x6   :  { %s8401_s23 = sld [smem:[#allocation33_spill]] }
   0xc   :  { %22 = sst [smem:[#allocation5]] %s8401_s23 }
   0xd   :  { %25 = vsyncpa [#allocation8], 0 }
   0xe   :  { %27 = vsyncpa [#allocation8 + $0x1], 0 }
   0xf   :  { %28 = vsyncpa [#allocation10], 0 }
  0x10   :  { %30 = vsyncpa [#allocation10 + $0x1], 0  ;;  %s5557_s26 = smov 0   ;;  %s5559_s27 = smov 0  }
  0x11   :  { %s5561_s28 = smov 0   ;;  %s5563_s29 = smov 0  }
  0x12   :  { %s5565_s30 = smov 0   ;;  %s5567_s0 = smov 0  }
  0x13 LB: > { %8402 = sst [smem:[#allocation13_spill]] %s5441_s28  ;;  %s4527_s11 = sadd.s32 4294967295, %s5453_s0   ;;  %s5453_s0 = sphi %s5567_s0, %s36_s0   ;;  %s5449_s30 = sphi %s5565_s30, %s8563_s30   ;;  %s5445_s29 = sphi %s5563_s29, %s8562_s29   ;;  %s5441_s28 = sphi %s5561_s28, %s8561_s28   ;;  %s5437_s27 = sphi %s5559_s27, %s8565_s27   ;;  %s5433_s26 = sphi %s5557_s26, %s8564_s26  }
  0x14   : > { %8403 = sst [smem:[#allocation14_spill]] %s5449_s30  ;;  %s4528_s17 = sadd.s32 4294967294, %s5453_s0  }
  0x15   : > { %s45_s18 = sadd.s32 1, %s5449_s30  ;;  %s385_s19 = sadd.s32 1, %s5441_s28 }
  0x16   : > { %p46_p0 = scmp.ge.s32.totalorder %s45_s18, 7  ;;  %p395_p1 = scmp.ne.s32.totalorder %s5441_s28, %s5437_s27 }
  0x17   : > { %p396_p2 = scmp.eq.s32.totalorder %s4527_s11, 6  ;;  %p401_p3 = scmp.ne.s32.totalorder %s5437_s27, %s5433_s26 }
  0x18   : > { %s8567_s18 = smov (%p46_p0, %s45_s18), 0  ;;  %p402_p5 = scmp.eq.s32.totalorder %s4528_s17, 6 }
  0x19   : > { %8404 = sst [smem:[#allocation15_spill]] %s8567_s18  ;;  %p5597_p4 = por %p396_p2, %p395_p1 }
  0x1a   : > { %s380_s21 = ssub.s32 %s5449_s30, %s8567_s18  ;;  %p4536_p6 = scmp.ge.s32.totalorder %s5453_s0, 1 }
  0x1b   : > { %p383_p7 = scmp.eq.s32.totalorder %s380_s21, 0  ;;  %p5604_p8 = por %p402_p5, %p401_p3 }
  0x1c   : > { %p527_p9 = scmp.lt.s32.totalorder %s5453_s0, 8 }
  0x1d   : > { %s8406_s22 = scalar_select %p5604_p8, 1, 0 }
  0x1e   : > { %s5610_s23 = scalar_select %p383_p7, %s5441_s28, %s385_s19  }
  0x1f   : > { %8407 = sst [smem:[#allocation16_spill]] %s8406_s22  ;;  %p528_p10 = pnand %p4536_p6, %p527_p9 }
  0x20   : > { %8408 = sst [smem:[#allocation17_spill]] %s5610_s23  ;;  %s5613_s24 = sand.u32 (!%p528_p10), 1, %s5437_s27  }
  0x21   : > { %531 = sbr.rel (%p528_p10) target bundleno = 2363 (0x93b), region = 76  ;;  %s604_s25 = sld [smem:[#allocation5]] (!%p528_p10) }
  0x22   : > { %s4537_s11 = sshll.u32 (!%p528_p10), %s5613_s24, 3  ;;  %s8409_s1 = sld [smem:[#allocation34_spill]] (!%p528_p10) }
  0x23   : > { %s5621_s28 = scalar_lea.vmem (!%p528_p10), [#allocation7], %s4537_s11  ;;  %s5623_s22 = scalar_lea.vmem (!%p528_p10), [#allocation9], %s4537_s11 }
  0x24   : > { %p4541_p0 = scmp.ne.s32.totalorder (!%p528_p10), %s5445_s29, 0 }
  0x27   : > { %s4539_s17 = sadd.s32 4294967295, %s604_s25 }
  0x28   : > { %p606_p11 = scmp.gt.s32.totalorder %s4539_s17, 0 }
  0x2a   : > { %s8569_s17 = smov (!%p606_p11, %s4539_s17), 0 }
  0x2b   : > { %p608_p12 = scmp.lt.s32.totalorder %s5445_s29, %s8569_s17 }
  0x2d   : > { %s609_s21 = scalar_select %p608_p12, %s5445_s29, %s8569_s17 }
  0x2f   : > { %p610_p13 = scmp.lt.s32.totalorder %s609_s21, 6  ;;  %645 = sbr.rel (%p4541_p0) target bundleno = 54 (0x36), region = 80 }
  0x31   : > { %s8571_s21 = smov (!%p610_p13, %s609_s21), 6 }
  0x32   : > { %s4540_s18 = sshll.u32 %s8571_s21, 2 }
  0x33   : > { %s616_s23 = scalar_lea.vmem %s8409_s1, %s4540_s18 }
  0x34   : > { %vm646_vm0 = vcmask 261120   ;;  %v5455_v1 = vmov 0.0  }
  0x35   : > { %647 = vst.msk [vmem:[#allocation2] sm:$0xff] %vm646_vm0, %v5455_v1  ;;  %648 = vst.msk [vmem:[#allocation3] sm:$0xff] %vm646_vm0, %v5455_v1 }
  0x36 PF: > { %s5626_s25 = sld [smem:[#allocation5]] }
  0x3c   : > { %p4542_p1 = scmp.ge.s32.totalorder %s5445_s29, %s5626_s25 }
  0x3e   : > { %653 = sbr.rel (%p4542_p1) target bundleno = 2308 (0x904), region = 84 }
  0x43   : > { %v5326_v2 = vld [vmem:[%s8353_s6 + $0x8] sm:$0xff]   ;;  %v5456_v3 = vmov 0.0   ;;  %s8410_s5 = sld [smem:[#allocation37_spill]]  ;;  %vm5457_vm1 = vmmov 0   ;;  %v656_v5 = vld [vmem:[%s616_s23] sm:$0xf]  ;;  %v1019_v45 = vlaneseq }
  0x44   : > { %5219 = vmatprep.subr.bf16.mxu0 %v5456_v3  ;;  %5227 = vmatprep.subr.bf16.mxu1 %v5456_v3  ;;  %v5328_v6 = vld [vmem:[%s8353_s6] sm:$0xff]   ;;  %vm726_vm2 = vcmask 130048   ;;  %vm8378_vm3 = vcmask 261120   ;;  %s5458_s18 = smov 64   ;;  %v655_v21 = vld [vmem:[#allocation3] sm:$0xff]  ;;  %s8368_s11 = smov 32  }
  0x45   : > { %5220 = vmatpush3.bf16.msra.mxu0 %v5326_v2  ;;  %5229 = vmatprep.mubr.msk.bf16.mxu1 %vm5457_vm1, %v5456_v3  ;;  %v654_v7 = vld [vmem:[#allocation2] sm:$0xff]  ;;  %v5329_v32 = vld [vmem:[%s8355_s8 + $0x8] sm:$0xff]   ;;  %v4555_v36 = vld [vmem:[#allocation6] ss:$0 sm:$0xff]  ;;  %v8369_v38 = vmov 0   ;;  %v5688_v47 = vshrl.u32 %v1019_v45, 7 }
  0x46   : > { %5221 = vmatprep.subr.bf16.mxu0 %v5456_v3  ;;  %5223 = vmatprep.mubr.msk.bf16.mxu0 %vm5457_vm1, %v5456_v3  ;;  %v659_v8 = vpack.c.bf16 %v654_v7, %v654_v7  ;;  %v4548_v12 = vld [vmem:[%s8354_s7] ss:$0 sm:$0xff]  ;;  %v5331_v40 = vld [vmem:[%s8359_s12 + $0x8] sm:$0xff]   ;;  %v5461_v43 = vmov 1966171168   ;;  %s8414_s3 = sld [smem:[#allocation36_spill]] }
  0x47   : > { %v5330_v33 = vld [vmem:[%s8355_s8] sm:$0xff]   ;;  %5324 = vset.pattern.permute.xlu1 %v8369_v38  ;;  %5325 = vset.pattern.permute.xlu0 %v8369_v38  ;;  %v1017_v44 = vunpack.c.l.s4 %v5461_v43  ;;  %8413 = vst [vmem:[#allocation20_spill] sm:$0xff] %v5688_v47  ;;  %v5703_v56 = vsub.s32 0, %v5688_v47  ;;  %vm2287_vm4 = vcmask 130112   ;;  %vm2294_vm5 = vcmask 195712   ;;  %s8459_s2 = sld [smem:[#allocation35_spill]] }
  0x48   : > { %v5332_v42 = vld [vmem:[%s8359_s12] sm:$0xff]   ;;  %vm2301_vm6 = vcmask 261312   ;;  %vm2308_vm7 = vcmask 326912   ;;  %vm2315_vm8 = vcmask 392512   ;;  %vm2322_vm9 = vcmask 458112   ;;  %s8526_s17 = smov 32  }
  0x49   : > { %v5327_v4 = vld [vmem:[%s8410_s5] sm:$0xff]   ;;  %5222 = vmatpush3.bf16.msra.mxu0 %v5328_v6  ;;  %v1018_v46 = vunpack.c.0.s8 %v1017_v44  ;;  %8415 = vst [vmem:[#allocation21_spill] sm:$0xff] %v5703_v56  ;;  %vm2329_vm10 = vcmask 523712   ;;  %vm8370_vm11 = vcmask 589312   ;;  %vm2343_vm12 = vcmask 654912   ;;  %s5462_s21 = smov 96  }
  0x4a   : > { %5228 = vmatpush3.bf16.msra.mxu1 %v5327_v4  ;;  %5241 = vmatprep.subr.bf16.mxu0 %v5456_v3  ;;  %v4550_v48 = vld [vmem:[%s8356_s9] ss:$0 sm:$0xff]  ;;  %vm2350_vm13 = vcmask 720512   ;;  %vm2357_vm14 = vcmask 786112   ;;  %vm2364_vm15 = vcmask 851712   ;;  %vm2371_vm0 = vcmask 917312  }
  0x4b   : > { %5233 = vmatprep.subr.bf16.mxu1 %v5456_v3  ;;  %v5694_v49 = vsub.s32 %v1018_v46, %v5688_v47 }
  0x4c   : > { %5224 = vmatmul.mubr.msk.bf16.vlgmr.msra.gmra.mxu0 %vm8378_vm3, %v659_v8  ;;  %v4569_v55 = vld [vmem:[%s8414_s3] sm:$0xff]   ;;  %v5080_v60 = vld [vmem:[%s8414_s3 + $0x8] sm:$0xff]   ;;  %v5081_v61 = vld [vmem:[%s8414_s3 + $0x10] sm:$0xff]  }
  0x4d   : > { %5230 = vmatmul.mubr.msk.bf16.vlgmr.msra.gmra.mxu1 %vm726_vm2, %v656_v5  ;;  %5243 = vmatprep.mubr.msk.bf16.mxu0 %vm5457_vm1, %v5456_v3  ;;  %v4571_v63 = vunpack.c.h.bf16 %v4569_v55  ;;  %v4570_v0 = vunpack.c.l.bf16 %v4569_v55  ;;  %v4574_v4 = vunpack.c.l.bf16 %v5080_v60  ;;  %v4578_v5 = vunpack.c.l.bf16 %v5081_v61  ;;  %v5082_v6 = vld [vmem:[%s8414_s3 + $0x18] sm:$0xff]   ;;  %v5083_v7 = vld [vmem:[%s8414_s3 + $0x20] sm:$0xff]  }
  0x4e   : > { %5237 = vmatprep.mubr.msk.bf16.mxu1 %vm5457_vm1, %v5456_v3  ;;  %5234 = vmatpush3.bf16.msra.mxu1 %v5329_v32  ;;  %v4587_v46 = vunpack.c.h.bf16 %v5083_v7  ;;  %vm2385_vm2 = vcmask 1048512  }
  0x4f   : > { %5235 = vmatprep.subr.bf16.mxu1 %v5456_v3 }
  0x52   : > { %5236 = vmatpush3.bf16.msra.mxu1 %v5330_v33 }
  0x53   : > { %5247 = vmatprep.subr.bf16.mxu1 %v5456_v3 }
 0x10c   : > { %v714_v11 = vpop.f32.mrf.mxu0 }
 0x10d   : > { %v764_v9 = vpop.f32.mrf.mxu1 }
 0x10e   : > { %v765_v13 = vadd.f32 %v764_v9, %v714_v11  ;;  %v5225_v15 = vpop.f32.mrf.mxu0  ;;  %v4575_v9 = vunpack.c.h.bf16 %v5080_v60 }
 0x10f   : > { %v5231_v10 = vpop.f32.mrf.mxu1  ;;  %v5745_v15 = vld [vmem:[%s8357_s10] ss:$0 sm:$0xff] }
 0x110   : > { %v777_v16 = vadd.f32 %v4548_v12, %v765_v13  ;;  %v717_v18 = vpop.f32.mrf.mxu0  ;;  %v4579_v10 = vunpack.c.h.bf16 %v5081_v61 }
 0x111   : > { %v767_v14 = vpop.f32.mrf.mxu1 }
 0x112   : > { %5333 = vtanh.f32 %v777_v16  ;;  %v5226_v19 = vpop.f32.mrf.mxu0  ;;  %v4549_v22 = vmul.f32 -1.442695, %v777_v16  ;;  %v5740_v14 = vld [vmem:[%s8414_s3 + $0x28] sm:$0xff]   ;;  %v4582_v16 = vunpack.c.l.bf16 %v5082_v6 }
 0x113   : > { %v5232_v17 = vpop.f32.mrf.mxu1 }
 0x114   : > { %5335 = vpow2.f32 %v4549_v22  ;;  %v4586_v17 = vunpack.c.l.bf16 %v5083_v7  ;;  %v5087_v7 = vld [vmem:[%s8414_s3 + $0x40] sm:$0xff]  }
 0x11f   : > { %v5334_v20 = vpop.eup %5333 }
 0x120   : > { %791 = vrot.lane.b32.xlu0 %v5334_v20, %s5458_s18 }
 0x121   : > { %v5336_v23 = vpop.eup %5335 }
 0x122   : > { %v781_v24 = vadd.f32 1.0, %v5336_v23 }
 0x124   : > { %786 = vrot.lane.b32.xlu0 %v655_v21, %s8368_s11  ;;  %5337 = vrcp.f32 %v781_v24 }
 0x131   : > { %v5338_v25 = vpop.eup %5337 }
 0x192   : > { %v792_v26 = vpop.permute.xlu0 %791 }
 0x193   : > { %v794_v27 = vmul.f32 %v5338_v25, %v792_v26  ;;  %v4591_v26 = vunpack.c.h.bf16 %v5740_v14 }
 0x195   : > { %796 = vrot.lane.b32.xlu1 %v794_v27, %s8368_s11 }
 0x196   : > { %v787_v28 = vpop.permute.xlu0 %786 }
 0x197   : > { %v789_v29 = vmul.f32 %v5338_v25, %v787_v28 }
 0x207   : > { %v797_v30 = vpop.permute.xlu1 %796 }
 0x208   : > { %v5658_v31 = vadd.f32 %v797_v30, %v789_v29 }
 0x20a   : > { %8411 = vst [vmem:[#allocation18_spill] sm:$0xff] %v5658_v31  ;;  %5339 = vtanh.f32 %v5658_v31 }
 0x217   : > { %v5340_v34 = vpop.eup %5339 }
 0x218   : > { %802 = vrot.lane.b32.xlu1 %v5340_v34, %s5458_s18 }
 0x21c   : > { %2014 = vperm.xlu1 %5324, %v4555_v36  }
 0x28a   : > { %v803_v35 = vpop.permute.xlu1 %802 }
 0x28b   : > { %v5669_v37 = vmul.f32 %v5338_v25, %v803_v35  ;;  %v4583_v25 = vunpack.c.h.bf16 %v5082_v6  ;;  %v5086_v6 = vld [vmem:[%s8414_s3 + $0x38] sm:$0xff]  }
 0x28d   : > { %8412 = vst [vmem:[#allocation19_spill] sm:$0xff] %v5669_v37  ;;  %v816_v39 = vpack.c.bf16 %v5669_v37, %v5669_v37 }
 0x28f   : > { %829 = vrot.lane.b32.xlu0 %v816_v39, %s8368_s11  ;;  %v5085_v39 = vld [vmem:[%s8414_s3 + $0x30] sm:$0xff]  }
 0x301   : > { %v830_v41 = vpop.permute.xlu0 %829 }
 0x302   : > { %5238 = vmatmul.mubr.msk.bf16.vlgmr.msra.gmra.mxu1 %vm8378_vm3, %v830_v41 }
 0x303   : > { %5248 = vmatpush3.bf16.msra.mxu1 %v5331_v40  ;;  %5251 = vmatprep.mubr.msk.bf16.mxu1 %vm5457_vm1, %v5456_v3  ;;  %vm2378_vm1 = vcmask 982912  }
 0x304   : > { %5249 = vmatprep.subr.bf16.mxu1 %v5456_v3 }
 0x307   : > { %5250 = vmatpush3.bf16.msra.mxu1 %v5332_v42 }
 0x30a   : > { %5252 = vmatmul.mubr.msk.bf16.vlgmr.msra.gmra.mxu1 %vm8378_vm3, %v830_v41 }
 0x3c2   : > { %v880_v50 = vpop.f32.mrf.mxu1 }
 0x3c3   : > { %v881_v51 = vadd.f32 %v4550_v48, %v880_v50  ;;  %v4594_v48 = vunpack.c.l.bf16 %v5085_v39 }
 0x3c4   : > { %v5239_v52 = vpop.f32.mrf.mxu1 }
 0x3c5   : > { %v1015_v53 = vcombine.high %v881_v51, %v881_v51  ;;  %v5697_v54 = vrot.slane %v881_v51, %v5694_v49 }
 0x3c6   : > { %v883_v57 = vpop.f32.mrf.mxu1 }
 0x3c7   : > { %v5706_v58 = vrot.slane %v1015_v53, %v5694_v49  ;;  %v5710_v59 = vrot.slane %v5697_v54, %v5694_v49  ;;  %v1030_v44 = vcombine.high %v5697_v54, %v5697_v54 }
 0x3c8   : > { %v5240_v62 = vpop.f32.mrf.mxu1 }
 0x3c9   : > { %v1031_v1 = vcombine.high %v5706_v58, %v5706_v58  ;;  %v5722_v2 = vrot.slane %v5710_v59, %v5703_v56  ;;  %v5772_v54 = vrot.slane %v1030_v44, %v5694_v49  ;;  %v4590_v62 = vunpack.c.l.bf16 %v5740_v14 }
 0x3ca   : > { %v5724_v3 = vpop.f32.mrf.mxu1 }
 0x3cb   : > { %8416 = vst [vmem:[#allocation22_spill] sm:$0xff] %v5724_v3  ;;  %v5733_v8 = vrot.slane %v1031_v1, %v5694_v49  ;;  %v1233_v12 = vadd.f32 %v4571_v63, %v5722_v2  ;;  %v1232_v13 = vadd.f32 %v4570_v0, %v5722_v2  ;;  %v1234_v21 = vadd.f32 %v4574_v4, %v5722_v2 }
 0x3cc   : > { %v5253_v11 = vpop.f32.mrf.mxu1  ;;  %v1236_v22 = vadd.f32 %v4578_v5, %v5722_v2  ;;  %v1235_v23 = vadd.f32 %v4575_v9, %v5722_v2  ;;  %v1237_v24 = vadd.f32 %v4579_v10, %v5722_v2  ;;  %v1238_v35 = vadd.f32 %v4582_v16, %v5722_v2 }
 0x3cd   : > { %v1361_v19 = vmax.f32 %v1233_v12, 0.0  ;;  %v1360_v20 = vmax.f32 %v1232_v13, 0.0  ;;  %v1362_v30 = vmax.f32 %v1234_v21, 0.0  ;;  %v1240_v36 = vadd.f32 %v4586_v17, %v5722_v2 }
 0x3ce   : > { %v4315_v18 = vpop.f32.mrf.mxu1  ;;  %v1364_v32 = vmax.f32 %v1236_v22, 0.0  ;;  %v1363_v33 = vmax.f32 %v1235_v23, 0.0  ;;  %v1365_v34 = vmax.f32 %v1237_v24, 0.0  ;;  %v1366_v52 = vmax.f32 %v1238_v35, 0.0  ;;  %v5800_v22 = vld [vmem:[%s8414_s3 + $0x80] sm:$0xff]  }
 0x3cf   : > { %v1496_v28 = vmul.f32 %v5745_v15, %v1361_v19  ;;  %v1495_v29 = vmul.f32 %v5745_v15, %v1360_v20  ;;  %v1497_v42 = vmul.f32 %v5745_v15, %v1362_v30  ;;  %v1368_v53 = vmax.f32 %v1240_v36, 0.0 }
 0x3d0   : > { %v5254_v27 = vpop.f32.mrf.mxu1  ;;  %v1499_v43 = vmul.f32 %v5745_v15, %v1364_v32  ;;  %v1498_v50 = vmul.f32 %v5745_v15, %v1363_v33  ;;  %v1500_v51 = vmul.f32 %v5745_v15, %v1365_v34  ;;  %v1239_v60 = vadd.f32 %v4583_v25, %v5722_v2  ;;  %v5813_v34 = vld [vmem:[%s8414_s3 + $0x88] sm:$0xff]  }
 0x3d1   : > { %v1626_v40 = vsel %vm8378_vm3, %v1496_v28, 0.0  ;;  %v1623_v41 = vsel %vm8378_vm3, %v1495_v29, 0.0  ;;  %v1629_v55 = vsel %vm8378_vm3, %v1497_v42, 0.0  ;;  %v1243_v61 = vadd.f32 %v4591_v26, %v5722_v2 }
 0x3d2   : > { %1627 = vadd.xlane.f32.xlu0 %v1626_v40  ;;  %1624 = vadd.xlane.f32.xlu1 %v1623_v41  ;;  %v1635_v57 = vsel %vm8378_vm3, %v1499_v43, 0.0  ;;  %v4595_v63 = vunpack.c.h.bf16 %v5085_v39  ;;  %v1632_v0 = vsel %vm8378_vm3, %v1498_v50, 0.0  ;;  %v1638_v1 = vsel %vm8378_vm3, %v1500_v51, 0.0  ;;  %v5088_v50 = vld [vmem:[%s8414_s3 + $0x48] sm:$0xff]   ;;  %v5089_v51 = vld [vmem:[%s8414_s3 + $0x50] sm:$0xff]  }
 0x3d3   : > { %v1501_v4 = vmul.f32 %v5745_v15, %v1366_v52  ;;  %v1503_v5 = vmul.f32 %v5745_v15, %v1368_v53  ;;  %v1367_v9 = vmax.f32 %v1239_v60, 0.0  ;;  %v1371_v10 = vmax.f32 %v1243_v61, 0.0 }
 0x3d4   : > { %v1241_v11 = vadd.f32 %v4587_v46, %v5722_v2  ;;  %v1244_v12 = vadd.f32 %v4594_v48, %v5722_v2  ;;  %v1060_v13 = vcombine.high %v5710_v59, %v5710_v59  ;;  %v5791_v14 = vrot.slane %v5772_v54, %v5703_v56 }
 0x3d5   : > { %v4598_v16 = vunpack.c.l.bf16 %v5086_v6  ;;  %v4602_v17 = vunpack.c.l.bf16 %v5087_v7  ;;  %v1641_v18 = vsel %vm8378_vm3, %v1501_v4, 0.0  ;;  %v1647_v19 = vsel %vm8378_vm3, %v1503_v5, 0.0 }
 0x3d6   : > { %1630 = vadd.xlane.f32.xlu0 %v1629_v55  ;;  %1636 = vadd.xlane.f32.xlu1 %v1635_v57  ;;  %v1242_v20 = vadd.f32 %v4590_v62, %v5722_v2  ;;  %v1245_v21 = vadd.f32 %v4595_v63, %v5722_v2  ;;  %v1502_v59 = vmul.f32 %v5745_v15, %v1367_v9  ;;  %v1369_v24 = vmax.f32 %v1241_v11, 0.0 }
 0x3d7   : > { %v1506_v23 = vmul.f32 %v5745_v15, %v1371_v10  ;;  %v1372_v25 = vmax.f32 %v1244_v12, 0.0  ;;  %v5805_v26 = vrot.slane %v1060_v13, %v5703_v56  ;;  %v4599_v27 = vunpack.c.h.bf16 %v5086_v6 }
 0x3d8   : > { %v4634_v28 = vunpack.c.l.bf16 %v5800_v22  ;;  %v1370_v29 = vmax.f32 %v1242_v20, 0.0  ;;  %v1373_v30 = vmax.f32 %v1245_v21, 0.0  ;;  %v1246_v32 = vadd.f32 %v4598_v16, %v5722_v2 }
 0x3d9   : > { %v1248_v33 = vadd.f32 %v4602_v17, %v5791_v14  ;;  %v1644_v35 = vsel %vm8378_vm3, %v1502_v59, 0.0  ;;  %v1656_v36 = vsel %vm8378_vm3, %v1506_v23, 0.0  ;;  %v1504_v39 = vmul.f32 %v5745_v15, %v1369_v24 }
 0x3da   : > { %1633 = vadd.xlane.f32.xlu0 %v1632_v0  ;;  %1639 = vadd.xlane.f32.xlu1 %v1638_v1  ;;  %v1507_v40 = vmul.f32 %v5745_v15, %v1372_v25  ;;  %v4603_v41 = vunpack.c.h.bf16 %v5087_v7  ;;  %v4638_v42 = vunpack.c.l.bf16 %v5813_v34  ;;  %v1505_v43 = vmul.f32 %v5745_v15, %v1370_v29 }
 0x3db   : > { %v1508_v44 = vmul.f32 %v5745_v15, %v1373_v30  ;;  %v1374_v46 = vmax.f32 %v1246_v32, 0.0  ;;  %v1376_v48 = vmax.f32 %v1248_v33, 0.0  ;;  %v1650_v52 = vsel %vm8378_vm3, %v1504_v39, 0.0 }
 0x3dc   : > { %v1659_v53 = vsel %vm8378_vm3, %v1507_v40, 0.0  ;;  %v1247_v55 = vadd.f32 %v4599_v27, %v5722_v2  ;;  %v1264_v57 = vadd.f32 %v4634_v28, %v5805_v26  ;;  %v5834_v60 = vrot.slane %v5706_v58, %v5694_v49  ;;  %v5843_v2 = vld [vmem:[%s8414_s3 + $0x100] sm:$0xff]   ;;  %v5097_v27 = vld [vmem:[%s8414_s3 + $0x90] sm:$0xff]  }
 0x3dd   : > { %v4606_v61 = vunpack.c.l.bf16 %v5088_v50  ;;  %v4610_v62 = vunpack.c.l.bf16 %v5089_v51  ;;  %v1653_v63 = vsel %vm8378_vm3, %v1505_v43, 0.0  ;;  %v1662_v0 = vsel %vm8378_vm3, %v1508_v44, 0.0 }
 0x3de   : > { %1642 = vadd.xlane.f32.xlu0 %v1641_v18  ;;  %1648 = vadd.xlane.f32.xlu1 %v1647_v19  ;;  %v1509_v1 = vmul.f32 %v5745_v15, %v1374_v46  ;;  %v1511_v4 = vmul.f32 %v5745_v15, %v1376_v48  ;;  %v1375_v5 = vmax.f32 %v1247_v55, 0.0  ;;  %v1392_v6 = vmax.f32 %v1264_v57, 0.0  ;;  %v5886_v57 = vld [vmem:[%s8414_s3 + $0x98] sm:$0xff]  }
 0x3df   : > { %v1249_v49 = vadd.f32 %v4603_v41, %v5791_v14  ;;  %v1266_v58 = vadd.f32 %v4638_v42, %v5805_v26  ;;  %v5849_v7 = vrot.slane %v5834_v60, %v5703_v56  ;;  %v4635_v9 = vunpack.c.h.bf16 %v5800_v22  ;;  %v5112_v42 = vld [vmem:[%s8414_s3 + $0x108] sm:$0xff]  }
 0x3e0   : > { %v4699_v10 = vunpack.c.h.bf16 %v5843_v2  ;;  %v1665_v11 = vsel %vm8378_vm3, %v1509_v1, 0.0  ;;  %v1671_v12 = vsel %vm8378_vm3, %v1511_v4, 0.0  ;;  %v1250_v13 = vadd.f32 %v4606_v61, %v5791_v14 }
 0x3e1   : > { %v1252_v16 = vadd.f32 %v4610_v62, %v5791_v14  ;;  %v1510_v17 = vmul.f32 %v5745_v15, %v1375_v5  ;;  %v1527_v18 = vmul.f32 %v5745_v15, %v1392_v6  ;;  %v1377_v19 = vmax.f32 %v1249_v49, 0.0 }
 0x3e2   : > { %1645 = vadd.xlane.f32.xlu0 %v1644_v35  ;;  %1657 = vadd.xlane.f32.xlu1 %v1656_v36  ;;  %v1394_v20 = vmax.f32 %v1266_v58, 0.0  ;;  %v4607_v21 = vunpack.c.h.bf16 %v5088_v50  ;;  %v4611_v22 = vunpack.c.h.bf16 %v5089_v51  ;;  %v1378_v59 = vmax.f32 %v1250_v13, 0.0  ;;  %v5898_v58 = vld [vmem:[%s8414_s3 + $0x110] sm:$0xff]  }
 0x3e3   : > { %v1380_v23 = vmax.f32 %v1252_v16, 0.0  ;;  %v1265_v24 = vadd.f32 %v4635_v9, %v5805_v26  ;;  %v1297_v25 = vadd.f32 %v4699_v10, %v5849_v7  ;;  %v1668_v28 = vsel %vm8378_vm3, %v1510_v17, 0.0 }
 0x3e4   : > { %v1719_v29 = vsel %vm8378_vm3, %v1527_v18, 0.0  ;;  %v1512_v30 = vmul.f32 %v5745_v15, %v1377_v19  ;;  %v1529_v32 = vmul.f32 %v5745_v15, %v1394_v20  ;;  %v4639_v33 = vunpack.c.h.bf16 %v5813_v34 }
 0x3e5   : > { %v4643_v35 = vunpack.c.h.bf16 %v5097_v27  ;;  %v1513_v36 = vmul.f32 %v5745_v15, %v1378_v59  ;;  %v1515_v39 = vmul.f32 %v5745_v15, %v1380_v23  ;;  %v1393_v40 = vmax.f32 %v1265_v24, 0.0 }
 0x3e6   : > { %1651 = vadd.xlane.f32.xlu0 %v1650_v52  ;;  %1660 = vadd.xlane.f32.xlu1 %v1659_v53  ;;  %v1425_v41 = vmax.f32 %v1297_v25, 0.0  ;;  %v1674_v43 = vsel %vm8378_vm3, %v1512_v30, 0.0  ;;  %v1725_v44 = vsel %vm8378_vm3, %v1529_v32, 0.0  ;;  %v1251_v46 = vadd.f32 %v4607_v21, %v5791_v14  ;;  %v5091_v21 = vld [vmem:[%s8414_s3 + $0x60] sm:$0xff]  }
 0x3e7   : > { %v1253_v48 = vadd.f32 %v4611_v22, %v5791_v14  ;;  %v4703_v34 = vunpack.c.h.bf16 %v5112_v42  ;;  %v4698_v50 = vunpack.c.l.bf16 %v5843_v2  ;;  %v1677_v51 = vsel %vm8378_vm3, %v1513_v36, 0.0  ;;  %v5090_v22 = vld [vmem:[%s8414_s3 + $0x58] sm:$0xff]  }
 0x3e8   : > { %v1683_v52 = vsel %vm8378_vm3, %v1515_v39, 0.0  ;;  %v1528_v53 = vmul.f32 %v5745_v15, %v1393_v40  ;;  %v1560_v55 = vmul.f32 %v5745_v15, %v1425_v41  ;;  %v1379_v61 = vmax.f32 %v1251_v46, 0.0 }
 0x3e9   : > { %v1381_v62 = vmax.f32 %v1253_v48, 0.0  ;;  %v4646_v1 = vunpack.c.l.bf16 %v5886_v57  ;;  %v4642_v4 = vunpack.c.l.bf16 %v5097_v27  ;;  %v1299_v6 = vadd.f32 %v4703_v34, %v5849_v7  ;;  %v5099_v34 = vld [vmem:[%s8414_s3 + $0xa0] sm:$0xff]  }
 0x3ea   : > { %1654 = vadd.xlane.f32.xlu0 %v1653_v63  ;;  %1663 = vadd.xlane.f32.xlu1 %v1662_v0  ;;  %v1267_v63 = vadd.f32 %v4639_v33, %v5805_v26  ;;  %v1269_v0 = vadd.f32 %v4643_v35, %v5805_v26  ;;  %v1722_v2 = vsel %vm8378_vm3, %v1528_v53, 0.0  ;;  %v1818_v5 = vsel %vm8378_vm3, %v1560_v55, 0.0 }
 0x3eb   : > { %v1296_v49 = vadd.f32 %v4698_v50, %v5849_v7  ;;  %v1514_v9 = vmul.f32 %v5745_v15, %v1379_v61  ;;  %v1516_v10 = vmul.f32 %v5745_v15, %v1381_v62  ;;  %v4706_v13 = vunpack.c.l.bf16 %v5898_v58 }
 0x3ec   : > { %v4702_v16 = vunpack.c.l.bf16 %v5112_v42  ;;  %v1427_v17 = vmax.f32 %v1299_v6, 0.0  ;;  %v1270_v19 = vadd.f32 %v4646_v1, %v5805_v26  ;;  %v1268_v20 = vadd.f32 %v4642_v4, %v5805_v26  ;;  %v5938_v4 = vld [vmem:[%s8414_s3 + $0x68] sm:$0xff]  }
 0x3ed   : > { %v1424_v18 = vmax.f32 %v1296_v49, 0.0  ;;  %v1680_v59 = vsel %vm8378_vm3, %v1514_v9, 0.0  ;;  %v1686_v23 = vsel %vm8378_vm3, %v1516_v10, 0.0  ;;  %v4618_v27 = vunpack.c.l.bf16 %v5091_v21 }
 0x3ee   : > { %1666 = vadd.xlane.f32.xlu1 %v1665_v11  ;;  %1672 = vadd.xlane.f32.xlu0 %v1671_v12  ;;  %v1395_v11 = vmax.f32 %v1267_v63, 0.0  ;;  %v1397_v12 = vmax.f32 %v1269_v0, 0.0  ;;  %v1398_v32 = vmax.f32 %v1270_v19, 0.0  ;;  %v1396_v33 = vmax.f32 %v1268_v20, 0.0 }
 0x3ef   : > { %v1559_v30 = vmul.f32 %v5745_v15, %v1424_v18  ;;  %v1300_v39 = vadd.f32 %v4706_v13, %v5849_v7  ;;  %v1298_v40 = vadd.f32 %v4702_v16, %v5849_v7  ;;  %v4619_v41 = vunpack.c.h.bf16 %v5091_v21  ;;  %v5114_v16 = vld [vmem:[%s8414_s3 + $0x118] sm:$0xff]  }
 0x3f0   : > { %v1530_v24 = vmul.f32 %v5745_v15, %v1395_v11  ;;  %v1532_v25 = vmul.f32 %v5745_v15, %v1397_v12  ;;  %v4615_v42 = vunpack.c.h.bf16 %v5090_v22  ;;  %v1533_v46 = vmul.f32 %v5745_v15, %v1398_v32 }
 0x3f1   : > { %v1531_v48 = vmul.f32 %v5745_v15, %v1396_v33  ;;  %v1428_v50 = vmax.f32 %v1300_v39, 0.0  ;;  %v4650_v55 = vunpack.c.l.bf16 %v5099_v34  ;;  %v4647_v61 = vunpack.c.h.bf16 %v5886_v57 }
 0x3f2   : > { %1669 = vadd.xlane.f32.xlu1 %v1668_v28  ;;  %1720 = vadd.xlane.f32.xlu0 %v1719_v29  ;;  %v4614_v28 = vunpack.c.l.bf16 %v5090_v22  ;;  %v1562_v29 = vmul.f32 %v5745_v15, %v1427_v17  ;;  %v1728_v35 = vsel %vm8378_vm3, %v1530_v24, 0.0  ;;  %v1734_v36 = vsel %vm8378_vm3, %v1532_v25, 0.0  ;;  %v5100_v25 = vld [vmem:[%s8414_s3 + $0xa8] sm:$0xff]  }
 0x3f3   : > { %v1737_v62 = vsel %vm8378_vm3, %v1533_v46, 0.0  ;;  %v1731_v63 = vsel %vm8378_vm3, %v1531_v48, 0.0  ;;  %v1257_v0 = vadd.f32 %v4619_v41, %v5791_v14  ;;  %v1255_v1 = vadd.f32 %v4615_v42, %v5791_v14  ;;  %v5115_v41 = vld [vmem:[%s8414_s3 + $0x120] sm:$0xff]  }
 0x3f4   : > { %v1254_v53 = vadd.f32 %v4614_v28, %v5791_v14  ;;  %v4622_v57 = vunpack.c.l.bf16 %v5938_v4  ;;  %v4707_v9 = vunpack.c.h.bf16 %v5898_v58  ;;  %v1272_v12 = vadd.f32 %v4650_v55, %v5805_v26  ;;  %v5093_v55 = vld [vmem:[%s8414_s3 + $0x70] sm:$0xff]  }
 0x3f5   : > { %v1385_v10 = vmax.f32 %v1257_v0, 0.0  ;;  %v1383_v11 = vmax.f32 %v1255_v1, 0.0  ;;  %v1271_v13 = vadd.f32 %v4647_v61, %v5805_v26  ;;  %v4651_v58 = vunpack.c.h.bf16 %v5099_v34 }
 0x3f6   : > { %1675 = vadd.xlane.f32.xlu1 %v1674_v43  ;;  %1726 = vadd.xlane.f32.xlu0 %v1725_v44  ;;  %v1824_v43 = vsel %vm8378_vm3, %v1562_v29, 0.0  ;;  %v1815_v44 = vsel %vm8378_vm3, %v1559_v30, 0.0  ;;  %v1382_v49 = vmax.f32 %v1254_v53, 0.0  ;;  %v4710_v21 = vunpack.c.l.bf16 %v5114_v16 }
 0x3f7   : > { %v1520_v22 = vmul.f32 %v5745_v15, %v1385_v10  ;;  %v1399_v24 = vmax.f32 %v1271_v13, 0.0  ;;  %v1258_v29 = vadd.f32 %v4622_v57, %v5791_v14  ;;  %v1301_v30 = vadd.f32 %v4707_v9, %v5849_v7 }
 0x3f8   : > { %v1517_v20 = vmul.f32 %v5745_v15, %v1382_v49  ;;  %v4711_v32 = vunpack.c.h.bf16 %v5114_v16  ;;  %v4654_v33 = vunpack.c.l.bf16 %v5100_v25  ;;  %v1302_v46 = vadd.f32 %v4710_v21, %v5849_v7 }
 0x3f9   : > { %v1386_v42 = vmax.f32 %v1258_v29, 0.0  ;;  %v4623_v48 = vunpack.c.h.bf16 %v5938_v4  ;;  %v4714_v34 = vunpack.c.l.bf16 %v5115_v41  ;;  %v4626_v1 = vunpack.c.l.bf16 %v5093_v55 }
 0x3fa   : > { %1678 = vadd.xlane.f32.xlu1 %v1677_v51  ;;  %1684 = vadd.xlane.f32.xlu0 %v1683_v52  ;;  %v1426_v51 = vmax.f32 %v1298_v40, 0.0  ;;  %v1256_v52 = vadd.f32 %v4618_v27, %v5791_v14  ;;  %v1689_v28 = vsel %vm8378_vm3, %v1517_v20, 0.0  ;;  %v1534_v40 = vmul.f32 %v5745_v15, %v1399_v24  ;;  %v5094_v20 = vld [vmem:[%s8414_s3 + $0x78] sm:$0xff]  }
 0x3fb   : > { %v1274_v53 = vadd.f32 %v4654_v33, %v5805_v26  ;;  %v1521_v61 = vmul.f32 %v5745_v15, %v1386_v42  ;;  %v1430_v0 = vmax.f32 %v1302_v46, 0.0  ;;  %v4655_v4 = vunpack.c.h.bf16 %v5100_v25 }
 0x3fc   : > { %v1384_v6 = vmax.f32 %v1256_v52, 0.0  ;;  %v1303_v52 = vadd.f32 %v4711_v32, %v5849_v7  ;;  %v1304_v49 = vadd.f32 %v4714_v34, %v5849_v7  ;;  %v4715_v13 = vunpack.c.h.bf16 %v5115_v41  ;;  %v5116_v32 = vld [vmem:[%s8414_s3 + $0x128] sm:$0xff]  }
 0x3fd   : > { %v1701_v57 = vsel %vm8378_vm3, %v1521_v61, 0.0  ;;  %v4630_v24 = vunpack.c.l.bf16 %v5094_v20  ;;  %v4718_v41 = vunpack.c.l.bf16 %v5116_v32 }
 0x3fe   : > { %1723 = vadd.xlane.f32.xlu1 %v1722_v2  ;;  %1819 = vadd.xlane.f32.xlu0 %v1818_v5  ;;  %v1563_v2 = vmul.f32 %v5745_v15, %v1428_v50  ;;  %v1561_v5 = vmul.f32 %v5745_v15, %v1426_v51  ;;  %v1519_v19 = vmul.f32 %v5745_v15, %v1384_v6  ;;  %v1740_v51 = vsel %vm8378_vm3, %v1534_v40, 0.0 }
 0x3ff   : > { %v1259_v6 = vadd.f32 %v4623_v48, %v5791_v14  ;;  %v4631_v40 = vunpack.c.h.bf16 %v5094_v20  ;;  %v5118_v48 = vld [vmem:[%s8414_s3 + $0x138] sm:$0xff]  }
 0x400   : > { %v1827_v17 = vsel %vm8378_vm3, %v1563_v2, 0.0  ;;  %v1821_v18 = vsel %vm8378_vm3, %v1561_v5, 0.0  ;;  %v1695_v27 = vsel %vm8378_vm3, %v1519_v19, 0.0  ;;  %v1431_v2 = vmax.f32 %v1303_v52, 0.0 }
 0x401   : > { %v1402_v5 = vmax.f32 %v1274_v53, 0.0  ;;  %v1432_v19 = vmax.f32 %v1304_v49, 0.0  ;;  %v4726_v53 = vunpack.c.l.bf16 %v5118_v48  ;;  %v4727_v49 = vunpack.c.h.bf16 %v5118_v48 }
 0x402   : > { %1681 = vadd.xlane.f32.xlu1 %v1680_v59  ;;  %1687 = vadd.xlane.f32.xlu0 %v1686_v23  ;;  %v1518_v59 = vmul.f32 %v5745_v15, %v1383_v11  ;;  %v1400_v23 = vmax.f32 %v1272_v12, 0.0  ;;  %v1565_v11 = vmul.f32 %v5745_v15, %v1430_v0  ;;  %v4627_v12 = vunpack.c.h.bf16 %v5093_v55 }
 0x403   : > { %v1566_v16 = vmul.f32 %v5745_v15, %v1431_v2  ;;  %v1306_v0 = vadd.f32 %v4718_v41, %v5849_v7 }
 0x404   : > { %v1535_v39 = vmul.f32 %v5745_v15, %v1400_v23  ;;  %v1275_v23 = vadd.f32 %v4655_v4, %v5805_v26 }
 0x406   : > { %1729 = vadd.xlane.f32.xlu1 %v1728_v35  ;;  %1735 = vadd.xlane.f32.xlu0 %v1734_v36  ;;  %v1698_v35 = vsel %vm8378_vm3, %v1520_v22, 0.0  ;;  %v1692_v36 = vsel %vm8378_vm3, %v1518_v59, 0.0  ;;  %v1743_v50 = vsel %vm8378_vm3, %v1535_v39, 0.0  ;;  %v1833_v22 = vsel %vm8378_vm3, %v1565_v11, 0.0 }
 0x407   : > { %v1260_v59 = vadd.f32 %v4626_v1, %v5791_v14  ;;  %v1305_v39 = vadd.f32 %v4715_v13, %v5849_v7  ;;  %v1434_v11 = vmax.f32 %v1306_v0, 0.0  ;;  %v6035_v13 = vld [vmem:[%s8414_s3 + $0xb8] sm:$0xff]  }
 0x408   : > { %v4663_v48 = vunpack.c.h.bf16 %v6035_v13 }
 0x409   : > { %v1388_v33 = vmax.f32 %v1260_v59, 0.0  ;;  %v1433_v52 = vmax.f32 %v1305_v39, 0.0 }
 0x40a   : > { %1825 = vadd.xlane.f32.xlu0 %v1824_v43  ;;  %1816 = vadd.xlane.f32.xlu1 %v1815_v44  ;;  %v1429_v43 = vmax.f32 %v1301_v30, 0.0  ;;  %v1273_v44 = vadd.f32 %v4651_v58, %v5805_v26  ;;  %v5101_v58 = vld [vmem:[%s8414_s3 + $0xb0] sm:$0xff]   ;;  %v1567_v30 = vmul.f32 %v5745_v15, %v1432_v19 }
 0x40b   : > { %v4658_v25 = vunpack.c.l.bf16 %v5101_v58  ;;  %v1523_v34 = vmul.f32 %v5745_v15, %v1388_v33  ;;  %v4659_v55 = vunpack.c.h.bf16 %v5101_v58  ;;  %v4662_v58 = vunpack.c.l.bf16 %v6035_v13  ;;  %v6118_v13 = vld [vmem:[%s8414_s3 + $0x150] sm:$0xff]  }
 0x40d   : > { %v1276_v46 = vadd.f32 %v4658_v25, %v5805_v26  ;;  %v1707_v1 = vsel %vm8378_vm3, %v1523_v34, 0.0  ;;  %v6056_v25 = vld [vmem:[%s8414_s3 + $0x130] sm:$0xff]  }
 0x40e   : > { %1738 = vadd.xlane.f32.xlu0 %v1737_v62  ;;  %1732 = vadd.xlane.f32.xlu1 %v1731_v63  ;;  %v1564_v62 = vmul.f32 %v5745_v15, %v1429_v43  ;;  %v1401_v63 = vmax.f32 %v1273_v44, 0.0  ;;  %v1839_v43 = vsel %vm8378_vm3, %v1567_v30, 0.0  ;;  %v1262_v44 = vadd.f32 %v4630_v24, %v5791_v14  ;;  %v5104_v24 = vld [vmem:[%s8414_s3 + $0xc8] sm:$0xff]  }
 0x40f   : > { %v4722_v33 = vunpack.c.l.bf16 %v6056_v25  ;;  %v4723_v0 = vunpack.c.h.bf16 %v6056_v25  ;;  %v4738_v25 = vunpack.c.l.bf16 %v6118_v13 }
 0x410   : > { %v1830_v9 = vsel %vm8378_vm3, %v1564_v62, 0.0  ;;  %v1536_v10 = vmul.f32 %v5745_v15, %v1401_v63  ;;  %v1390_v61 = vmax.f32 %v1262_v44, 0.0  ;;  %v1404_v62 = vmax.f32 %v1276_v46, 0.0 }
 0x411   : > { %v1263_v63 = vadd.f32 %v4631_v40, %v5791_v14  ;;  %v1278_v40 = vadd.f32 %v4662_v58, %v5805_v26  ;;  %v4671_v46 = vunpack.c.h.bf16 %v5104_v24 }
 0x412   : > { %1828 = vadd.xlane.f32.xlu0 %v1827_v17  ;;  %1822 = vadd.xlane.f32.xlu1 %v1821_v18  ;;  %v1537_v17 = vmul.f32 %v5745_v15, %v1402_v5  ;;  %v1387_v18 = vmax.f32 %v1259_v6, 0.0  ;;  %v1746_v21 = vsel %vm8378_vm3, %v1536_v10, 0.0  ;;  %v1568_v5 = vmul.f32 %v5745_v15, %v1433_v52 }
 0x413   : > { %v1062_v6 = vcombine.high %v5772_v54, %v5772_v54  ;;  %v1391_v10 = vmax.f32 %v1263_v63, 0.0  ;;  %v1308_v52 = vadd.f32 %v4722_v33, %v5849_v7 }
 0x414   : > { %v1522_v29 = vmul.f32 %v5745_v15, %v1387_v18  ;;  %v1277_v18 = vadd.f32 %v4659_v55, %v5805_v26 }
 0x415   : > { %v6042_v19 = vrot.slane %v1062_v6, %v5703_v56  ;;  %v1526_v59 = vmul.f32 %v5745_v15, %v1391_v10  ;;  %v6091_v6 = vld [vmem:[%s8414_s3 + $0x180] sm:$0xff]   ;;  %v1436_v10 = vmax.f32 %v1308_v52, 0.0 }
 0x416   : > { %1696 = vadd.xlane.f32.xlu0 %v1695_v27  ;;  %1690 = vadd.xlane.f32.xlu1 %v1689_v28  ;;  %v1836_v27 = vsel %vm8378_vm3, %v1566_v16, 0.0  ;;  %v1749_v28 = vsel %vm8378_vm3, %v1537_v17, 0.0  ;;  %v1704_v42 = vsel %vm8378_vm3, %v1522_v29, 0.0  ;;  %v1842_v16 = vsel %vm8378_vm3, %v1568_v5, 0.0 }
 0x417   : > { %v1310_v17 = vadd.f32 %v4726_v53, %v5849_v7  ;;  %v1311_v29 = vadd.f32 %v4727_v49, %v5849_v7  ;;  %v6073_v53 = vld [vmem:[%s8414_s3 + $0x140] sm:$0xff]   ;;  %v6096_v49 = vld [vmem:[%s8414_s3 + $0x188] sm:$0xff]  }
 0x418   : > { %v4731_v58 = vunpack.c.h.bf16 %v6073_v53 }
 0x41a   : > { %1699 = vadd.xlane.f32.xlu0 %v1698_v35  ;;  %1693 = vadd.xlane.f32.xlu1 %v1692_v36  ;;  %v1403_v35 = vmax.f32 %v1275_v23, 0.0  ;;  %v1261_v36 = vadd.f32 %v4627_v12, %v5791_v14  ;;  %v1539_v14 = vmul.f32 %v5745_v15, %v1404_v62  ;;  %v6030_v12 = vld [vmem:[%s8414_s3 + $0xc0] sm:$0xff]   ;;  %v1569_v23 = vmul.f32 %v5745_v15, %v1434_v11  ;;  %v6108_v11 = vld [vmem:[%s8414_s3 + $0xd8] sm:$0xff]  }
 0x41b   : > { %v4667_v20 = vunpack.c.h.bf16 %v6030_v12  ;;  %v4666_v5 = vunpack.c.l.bf16 %v6030_v12  ;;  %v6113_v12 = vld [vmem:[%s8414_s3 + $0x148] sm:$0xff]  }
 0x41d   : > { %v1281_v39 = vadd.f32 %v4667_v20, %v6042_v19  ;;  %v4762_v20 = vunpack.c.l.bf16 %v6091_v6 }
 0x41e   : > { %1744 = vadd.xlane.f32.xlu0 %v1743_v50  ;;  %1741 = vadd.xlane.f32.xlu1 %v1740_v51  ;;  %v1538_v50 = vmul.f32 %v5745_v15, %v1403_v35  ;;  %v1389_v51 = vmax.f32 %v1261_v36, 0.0  ;;  %v1716_v35 = vsel %vm8378_vm3, %v1526_v59, 0.0  ;;  %v1845_v36 = vsel %vm8378_vm3, %v1569_v23, 0.0 }
 0x41f   : > { %v1409_v34 = vmax.f32 %v1281_v39, 0.0  ;;  %v4678_v23 = vunpack.c.l.bf16 %v6108_v11 }
 0x420   : > { %v1752_v4 = vsel %vm8378_vm3, %v1538_v50, 0.0  ;;  %v1524_v2 = vmul.f32 %v5745_v15, %v1389_v51  ;;  %v1406_v50 = vmax.f32 %v1278_v40, 0.0  ;;  %v4763_v40 = vunpack.c.h.bf16 %v6091_v6 }
 0x422   : > { %1702 = vadd.xlane.f32.xlu0 %v1701_v57  ;;  %1831 = vadd.xlane.f32.xlu1 %v1830_v9  ;;  %v4719_v57 = vunpack.c.h.bf16 %v5116_v32  ;;  %v1525_v9 = vmul.f32 %v5745_v15, %v1390_v61  ;;  %v1710_v54 = vsel %vm8378_vm3, %v1524_v2, 0.0  ;;  %v4670_v32 = vunpack.c.l.bf16 %v5104_v24 }
 0x423   : > { %v4730_v2 = vunpack.c.l.bf16 %v6073_v53  ;;  %v4734_v24 = vunpack.c.l.bf16 %v6113_v12  ;;  %v1280_v53 = vadd.f32 %v4666_v5, %v6042_v19 }
 0x424   : > { %v1307_v30 = vadd.f32 %v4719_v57, %v5849_v7  ;;  %v1282_v51 = vadd.f32 %v4670_v32, %v6042_v19  ;;  %v1544_v57 = vmul.f32 %v5745_v15, %v1409_v34  ;;  %v6146_v32 = vld [vmem:[%s8414_s3 + $0xe0] sm:$0xff]   ;;  %v6161_v34 = vld [vmem:[%s8414_s3 + $0x158] sm:$0xff]  }
 0x426   : > { %1747 = vadd.xlane.f32.xlu0 %v1746_v21  ;;  %1834 = vadd.xlane.f32.xlu1 %v1833_v22  ;;  %v1713_v21 = vsel %vm8378_vm3, %v1525_v9, 0.0  ;;  %v1755_v22 = vsel %vm8378_vm3, %v1539_v14, 0.0  ;;  %v1435_v44 = vmax.f32 %v1307_v30, 0.0  ;;  %v1541_v9 = vmul.f32 %v5745_v15, %v1406_v50  ;;  %v6141_v30 = vld [vmem:[%s8414_s3 + $0x190] sm:$0xff]   ;;  %v6166_v50 = vld [vmem:[%s8414_s3 + $0x198] sm:$0xff]  }
 0x427   : > { %v1410_v14 = vmax.f32 %v1282_v51, 0.0  ;;  %v4771_v5 = vunpack.c.h.bf16 %v6141_v30 }
 0x428   : > { %v1570_v63 = vmul.f32 %v5745_v15, %v1435_v44  ;;  %v4735_v44 = vunpack.c.h.bf16 %v6113_v12 }
 0x42a   : > { %1837 = vadd.xlane.f32.xlu0 %v1836_v27  ;;  %1750 = vadd.xlane.f32.xlu1 %v1749_v28  ;;  %v1438_v27 = vmax.f32 %v1310_v17, 0.0  ;;  %v1405_v28 = vmax.f32 %v1277_v18, 0.0  ;;  %v1283_v17 = vadd.f32 %v4671_v46, %v6042_v19  ;;  %v1279_v18 = vadd.f32 %v4663_v48, %v5805_v26 }
 0x42b   : > { %v1770_v26 = vsel %vm8378_vm3, %v1544_v57, 0.0  ;;  %v4770_v46 = vunpack.c.l.bf16 %v6141_v30  ;;  %v4767_v48 = vunpack.c.h.bf16 %v6096_v49  ;;  %v4742_v57 = vunpack.c.l.bf16 %v6161_v34 }
 0x42c   : > { %v1573_v41 = vmul.f32 %v5745_v15, %v1438_v27  ;;  %v1761_v27 = vsel %vm8378_vm3, %v1541_v9, 0.0  ;;  %v1411_v33 = vmax.f32 %v1283_v17, 0.0  ;;  %v4774_v9 = vunpack.c.l.bf16 %v6166_v50  ;;  %v6192_v17 = vld [vmem:[%s8414_s3 + $0xe8] sm:$0xff]  }
 0x42e   : > { %1705 = vadd.xlane.f32.xlu0 %v1704_v42  ;;  %1840 = vadd.xlane.f32.xlu1 %v1839_v43  ;;  %v1540_v42 = vmul.f32 %v5745_v15, %v1405_v28  ;;  %v1439_v43 = vmax.f32 %v1311_v29, 0.0  ;;  %v1857_v55 = vsel %vm8378_vm3, %v1573_v41, 0.0  ;;  %v1545_v28 = vmul.f32 %v5745_v15, %v1410_v14 }
 0x42f   : > { %v1571_v29 = vmul.f32 %v5745_v15, %v1436_v10  ;;  %v4679_v41 = vunpack.c.h.bf16 %v6108_v11 }
 0x430   : > { %v1758_v61 = vsel %vm8378_vm3, %v1540_v42, 0.0  ;;  %v1574_v62 = vmul.f32 %v5745_v15, %v1439_v43  ;;  %v4739_v43 = vunpack.c.h.bf16 %v6118_v13  ;;  %v1773_v51 = vsel %vm8378_vm3, %v1545_v28, 0.0 }
 0x431   : > { %v1851_v52 = vsel %vm8378_vm3, %v1571_v29, 0.0 }
 0x432   : > { %1708 = vadd.xlane.f32.xlu0 %v1707_v1  ;;  %1753 = vadd.xlane.f32.xlu1 %v1752_v4  ;;  %v1061_v1 = vcombine.high %v5834_v60, %v5834_v60  ;;  %v6084_v4 = vrot.slane %v5733_v8, %v5703_v56  ;;  %v6101_v60 = vld [vmem:[%s8414_s3 + $0xd0] sm:$0xff]  }
 0x433   : > { %v4675_v42 = vunpack.c.h.bf16 %v6101_v60 }
 0x434   : > { %v6129_v59 = vrot.slane %v1061_v1, %v5703_v56  ;;  %v1312_v39 = vadd.f32 %v4730_v2, %v6084_v4  ;;  %v6177_v1 = vld [vmem:[%s8414_s3 + $0x1a0] sm:$0xff]   ;;  %v6180_v2 = vand.u32 127, %v1019_v45  ;;  %v1313_v14 = vadd.f32 %v4731_v58, %v6084_v4 }
 0x435   : > { %v6197_v45 = vld [vmem:[%s8414_s3 + $0x160] sm:$0xff]   ;;  %v4743_v58 = vunpack.c.h.bf16 %v6161_v34 }
 0x436   : > { %1711 = vadd.xlane.f32.xlu0 %v1710_v54  ;;  %1843 = vadd.xlane.f32.xlu1 %v1842_v16  ;;  %v1860_v54 = vsel %vm8378_vm3, %v1574_v62, 0.0  ;;  %v1848_v16 = vsel %vm8378_vm3, %v1570_v63, 0.0  ;;  %8417 = vst [vmem:[#allocation23_spill] sm:$0xff] %v6180_v2  ;;  %v2352_v13 = vadd.s32 4294967208, %v6180_v2  ;;  %v1332_v12 = vadd.f32 %v4770_v46, %v6129_v59 }
 0x43a   : > { %1714 = vadd.xlane.f32.xlu0 %v1713_v21  ;;  %1756 = vadd.xlane.f32.xlu1 %v1755_v22  ;;  %v4766_v21 = vunpack.c.l.bf16 %v6096_v49  ;;  %v4674_v22 = vunpack.c.l.bf16 %v6101_v60  ;;  %v1333_v49 = vadd.f32 %v4771_v5, %v6129_v59 }
 0x43c   : > { %v1330_v10 = vadd.f32 %v4766_v21, %v6129_v59 }
 0x43e   : > { %1717 = vadd.xlane.f32.xlu0 %v1716_v35  ;;  %1846 = vadd.xlane.f32.xlu1 %v1845_v36  ;;  %v1407_v35 = vmax.f32 %v1279_v18, 0.0  ;;  %v1309_v36 = vadd.f32 %v4723_v0, %v5849_v7  ;;  %v4682_v7 = vunpack.c.l.bf16 %v6146_v32  ;;  %v1440_v0 = vmax.f32 %v1312_v39, 0.0 }
 0x43f   : > { %v1408_v18 = vmax.f32 %v1280_v53, 0.0  ;;  %v1458_v53 = vmax.f32 %v1330_v10, 0.0  ;;  %v6226_v10 = vpop.permute.xlu1 %2014  ;;  %v2324_v39 = vadd.s32 4294967240, %v6180_v2 }
 0x440   : > { %v1542_v62 = vmul.f32 %v5745_v15, %v1407_v35  ;;  %v1437_v63 = vmax.f32 %v1309_v36, 0.0  ;;  %v1575_v29 = vmul.f32 %v5745_v15, %v1440_v0  ;;  %v2282_v35 = vadd.s32 4294967288, %v6180_v2 }
 0x442   : > { %1858 = vadd.xlane.f32.xlu0 %v1857_v55  ;;  %1759 = vadd.xlane.f32.xlu1 %v1758_v61  ;;  %v1328_v55 = vadd.f32 %v4762_v20, %v6129_v59  ;;  %v1546_v61 = vmul.f32 %v5745_v15, %v1411_v33  ;;  %v1572_v28 = vmul.f32 %v5745_v15, %v1437_v63  ;;  %v6208_v33 = vld [vmem:[%s8414_s3 + $0x1a8] sm:$0xff]  }
 0x444   : > { %v1456_v20 = vmax.f32 %v1328_v55, 0.0  ;;  %v1284_v55 = vadd.f32 %v4674_v22, %v6042_v19  ;;  %v2289_v22 = vadd.s32 4294967280, %v6180_v2 }
 0x446   : > { %1861 = vadd.xlane.f32.xlu0 %v1860_v54  ;;  %1849 = vadd.xlane.f32.xlu1 %v1848_v16  ;;  %v4683_v54 = vunpack.c.h.bf16 %v6146_v32  ;;  %v4775_v16 = vunpack.c.h.bf16 %v6166_v50  ;;  %v1591_v63 = vmul.f32 %v5745_v15, %v1456_v20  ;;  %v2303_v20 = vadd.s32 4294967264, %v6180_v2 }
 0x447   : > { %v1412_v0 = vmax.f32 %v1284_v55, 0.0  ;;  %v6247_v38 = vsub.s32 %v2289_v22, %v5688_v47 }
 0x44a   : > { %1771 = vadd.xlane.f32.xlu0 %v1770_v26  ;;  %1762 = vadd.xlane.f32.xlu1 %v1761_v27  ;;  %v1776_v26 = vsel %vm8378_vm3, %v1546_v61, 0.0  ;;  %v1764_v27 = vsel %vm8378_vm3, %v1542_v62, 0.0  ;;  %v1286_v61 = vadd.f32 %v4678_v23, %v6042_v19  ;;  %v1543_v62 = vmul.f32 %v5745_v15, %v1408_v18 }
 0x44b   : > { %v6231_v23 = vsub.s32 %v2282_v35, %v5688_v47  ;;  %v6235_v18 = vsub.s32 %v6180_v2, %v5688_v47  ;;  %v1314_v35 = vadd.f32 %v4734_v24, %v6084_v4  ;;  %v2310_v24 = vadd.s32 4294967256, %v6180_v2 }
 0x44d   : > { %v6287_v21 = vsub.s32 %v2310_v24, %v5688_v47 }
 0x44e   : > { %1774 = vadd.xlane.f32.xlu0 %v1773_v51  ;;  %1852 = vadd.xlane.f32.xlu1 %v1851_v52  ;;  %v1441_v52 = vmax.f32 %v1313_v14, 0.0  ;;  %v1863_v14 = vsel %vm8378_vm3, %v1575_v29, 0.0  ;;  %v1414_v51 = vmax.f32 %v1286_v61, 0.0  ;;  %v1287_v61 = vadd.f32 %v4679_v41, %v6042_v19 }
 0x44f   : > { %v1442_v41 = vmax.f32 %v1314_v35, 0.0  ;;  %v1285_v35 = vadd.f32 %v4675_v42, %v6042_v19 }
 0x450   : > { %v1576_v29 = vmul.f32 %v5745_v15, %v1441_v52  ;;  %v1316_v52 = vadd.f32 %v4738_v25, %v6084_v4 }
 0x452   : > { %1777 = vadd.xlane.f32.xlu0 %v1776_v26  ;;  %1765 = vadd.xlane.f32.xlu1 %v1764_v27  ;;  %v1854_v27 = vsel %vm8378_vm3, %v1572_v28, 0.0  ;;  %v2296_v28 = vadd.s32 4294967272, %v6180_v2  ;;  %v1593_v26 = vmul.f32 %v5745_v15, %v1458_v53  ;;  %v1329_v15 = vadd.f32 %v4763_v40, %v6129_v59  ;;  %v6270_v40 = vld [vmem:[%s8357_s10] ss:$0 sm:$0xff] }
 0x453   : > { %v6256_v53 = vsub.s32 %v2303_v20, %v5688_v47  ;;  %v1547_v22 = vmul.f32 %v6270_v40, %v1412_v0  ;;  %v1549_v20 = vmul.f32 %v6270_v40, %v1414_v51  ;;  %v1415_v51 = vmax.f32 %v1287_v61, 0.0 }
 0x454   : > { %v6259_v55 = vsub.s32 %v2296_v28, %v5688_v47  ;;  %v1917_v6 = vsel %vm8378_vm3, %v1593_v26, 0.0  ;;  %v2331_v26 = vadd.s32 4294967232, %v6180_v2  ;;  %v1577_v60 = vmul.f32 %v6270_v40, %v1442_v41 }
 0x456   : > { %1855 = vadd.xlane.f32.xlu1 %v1854_v27  ;;  %1864 = vadd.xlane.f32.xlu0 %v1863_v14  ;;  %v1767_v27 = vsel %vm8378_vm3, %v1543_v62, 0.0  ;;  %v1911_v14 = vsel %vm8378_vm3, %v1591_v63, 0.0  ;;  %v1866_v63 = vsel %vm8378_vm3, %v1576_v29, 0.0  ;;  %v1444_v29 = vmax.f32 %v1316_v52, 0.0 }
 0x457   : > { %v1779_v52 = vsel %vm8378_vm3, %v1547_v22, 0.0  ;;  %v6300_v24 = vsub.s32 %v2331_v26, %v5688_v47 }
 0x458   : > { %v1579_v22 = vmul.f32 %v6270_v40, %v1444_v29 }
 0x45a   : > { %1768 = vadd.xlane.f32.xlu1 %v1767_v27  ;;  %1912 = vadd.xlane.f32.xlu0 %v1911_v14  ;;  %v2317_v27 = vadd.s32 4294967248, %v6180_v2  ;;  %v1457_v14 = vmax.f32 %v1329_v15, 0.0  ;;  %v1785_v15 = vsel %vm8378_vm3, %v1549_v20, 0.0 }
 0x45b   : > { %v1628_v62 = vpop.xlane.xlu0 %1627  ;;  %v1625_v25 = vpop.xlane.xlu1 %1624 }
 0x45c   : > { %v2018_v28 = vadd.f32 %v6226_v10, %v1628_v62  ;;  %v2017_v11 = vadd.f32 %v6226_v10, %v1625_v25  ;;  %v6296_v42 = vsub.s32 %v2317_v27, %v5688_v47  ;;  %v1592_v20 = vmul.f32 %v6270_v40, %v1457_v14 }
 0x45d   : > { %v1315_v14 = vadd.f32 %v4735_v44, %v6084_v4 }
 0x45e   : > { %v2286_v36 = vrot.slane %v2018_v28, %v6231_v23  ;;  %v2281_v0 = vrot.slane %v2017_v11, %v6235_v18  ;;  %1867 = vadd.xlane.f32.xlu1 %v1866_v63  ;;  %1918 = vadd.xlane.f32.xlu0 %v1917_v6  ;;  %v1317_v63 = vadd.f32 %v4739_v43, %v6084_v4  ;;  %v1413_v11 = vmax.f32 %v1285_v35, 0.0 }
 0x45f   : > { %v1631_v62 = vpop.xlane.xlu0 %1630  ;;  %v1637_v25 = vpop.xlane.xlu1 %1636  ;;  %v6307_v28 = vsub.s32 %v2324_v39, %v5688_v47  ;;  %v1869_v39 = vsel %vm8378_vm3, %v1577_v60, 0.0  ;;  %v1875_v35 = vsel %vm8378_vm3, %v1579_v22, 0.0  ;;  %v1443_v46 = vmax.f32 %v1315_v14, 0.0 }
 0x460   : > { %v2288_v61 = vsel %vm2287_vm4, %v2286_v36, %v2281_v0  ;;  %v2019_v6 = vadd.f32 %v6226_v10, %v1631_v62  ;;  %v1550_v36 = vmul.f32 %v6270_v40, %v1415_v51  ;;  %v2021_v41 = vadd.f32 %v6226_v10, %v1637_v25 }
 0x461   : > { %v1445_v26 = vmax.f32 %v1317_v63, 0.0  ;;  %v2338_v0 = vadd.s32 4294967224, %v6180_v2  ;;  %v1914_v25 = vsel %vm8378_vm3, %v1592_v20, 0.0 }
 0x462   : > { %v2293_v43 = vrot.slane %v2019_v6, %v6247_v38  ;;  %1780 = vadd.xlane.f32.xlu1 %v1779_v52  ;;  %1786 = vadd.xlane.f32.xlu0 %v1785_v15  ;;  %v6321_v15 = vsub.s32 %v2352_v13, %v5688_v47  ;;  %v1788_v63 = vsel %vm8378_vm3, %v1550_v36, 0.0  ;;  %v2359_v6 = vadd.s32 4294967200, %v6180_v2 }
 0x463   : > { %v1634_v27 = vpop.xlane.xlu0 %1633  ;;  %v1640_v29 = vpop.xlane.xlu1 %1639  ;;  %v2307_v60 = vrot.slane %v2021_v41, %v6256_v53  ;;  %v1580_v13 = vmul.f32 %v6270_v40, %v1445_v26  ;;  %v2345_v26 = vadd.s32 4294967216, %v6180_v2 }
 0x464   : > { %v2295_v62 = vsel %vm2294_vm5, %v2293_v43, %v2288_v61  ;;  %v2020_v52 = vadd.f32 %v6226_v10, %v1634_v27  ;;  %v2022_v51 = vadd.f32 %v6226_v10, %v1640_v29  ;;  %v1548_v61 = vmul.f32 %v6270_v40, %v1413_v11 }
 0x465   : > { %v6333_v43 = vsub.s32 %v2338_v0, %v5688_v47  ;;  %v1331_v11 = vadd.f32 %v4767_v48, %v6129_v59  ;;  %v1288_v0 = vadd.f32 %v4682_v7, %v6042_v19  ;;  %v6355_v7 = vsub.s32 %v2359_v6, %v5688_v47 }
 0x466   : > { %v2300_v44 = vrot.slane %v2020_v52, %v6259_v55  ;;  %1870 = vadd.xlane.f32.xlu1 %v1869_v39  ;;  %1876 = vadd.xlane.f32.xlu0 %v1875_v35  ;;  %v2314_v29 = vrot.slane %v2022_v51, %v6287_v21  ;;  %v1460_v52 = vmax.f32 %v1332_v12, 0.0  ;;  %v1782_v51 = vsel %vm8378_vm3, %v1548_v61, 0.0 }
 0x467   : > { %v1643_v22 = vpop.xlane.xlu0 %1642  ;;  %v1649_v20 = vpop.xlane.xlu1 %1648  ;;  %v1878_v12 = vsel %vm8378_vm3, %v1580_v13, 0.0  ;;  %v2366_v61 = vadd.s32 4294967192, %v6180_v2  ;;  %v6363_v5 = vsub.s32 %v2345_v26, %v5688_v47  ;;  %v1318_v6 = vadd.f32 %v4742_v57, %v6084_v4 }
 0x468   : > { %v2302_v27 = vsel %vm2301_vm6, %v2300_v44, %v2295_v62  ;;  %v2023_v36 = vadd.f32 %v6226_v10, %v1643_v22  ;;  %v2025_v48 = vadd.f32 %v6226_v10, %v1649_v20  ;;  %v1578_v44 = vmul.f32 %v6270_v40, %v1443_v46 }
 0x469   : > { %v2309_v41 = vsel %vm2308_vm7, %v2307_v60, %v2302_v27  ;;  %v1459_v60 = vmax.f32 %v1331_v11, 0.0  ;;  %v1595_v30 = vmul.f32 %v6270_v40, %v1460_v52  ;;  %v1416_v22 = vmax.f32 %v1288_v0, 0.0 }
 0x46a   : > { %v2316_v14 = vsel %vm2315_vm8, %v2314_v29, %v2309_v41  ;;  %v2321_v62 = vrot.slane %v2023_v36, %v6296_v42  ;;  %1915 = vadd.xlane.f32.xlu1 %v1914_v25  ;;  %1789 = vadd.xlane.f32.xlu0 %v1788_v63  ;;  %v2373_v13 = vadd.s32 4294967184, %v6180_v2  ;;  %v1461_v46 = vmax.f32 %v1333_v49, 0.0 }
 0x46b   : > { %v1646_v39 = vpop.xlane.xlu0 %1645  ;;  %v1658_v35 = vpop.xlane.xlu1 %1657  ;;  %v2335_v27 = vrot.slane %v2025_v48, %v6300_v24  ;;  %v1872_v11 = vsel %vm8378_vm3, %v1578_v44, 0.0  ;;  %v1334_v41 = vadd.f32 %v4774_v9, %v6129_v59  ;;  %v1289_v57 = vadd.f32 %v4683_v54, %v6042_v19 }
 0x46c   : > { %v2323_v25 = vsel %vm2322_vm9, %v2321_v62, %v2316_v14  ;;  %v2024_v63 = vadd.f32 %v6226_v10, %v1646_v39  ;;  %v6381_v0 = vsub.s32 %v2366_v61, %v5688_v47  ;;  %v1594_v14 = vmul.f32 %v6270_v40, %v1459_v60 }
 0x46d   : > { %v1551_v9 = vmul.f32 %v6270_v40, %v1416_v22  ;;  %v1446_v49 = vmax.f32 %v1318_v6, 0.0  ;;  %v1596_v54 = vmul.f32 %v6270_v40, %v1461_v46  ;;  %v2380_v48 = vadd.s32 4294967176, %v6180_v2 }
 0x46e   : > { %v2328_v20 = vrot.slane %v2024_v63, %v6307_v28  ;;  %1783 = vadd.xlane.f32.xlu1 %v1782_v51  ;;  %1879 = vadd.xlane.f32.xlu0 %v1878_v12  ;;  %v1923_v51 = vsel %vm8378_vm3, %v1595_v30, 0.0  ;;  %v1335_v39 = vadd.f32 %v4775_v16, %v6129_v59  ;;  %v2028_v12 = vadd.f32 %v6226_v10, %v1658_v35 }
 0x46f   : > { %v1652_v29 = vpop.xlane.xlu0 %1651  ;;  %v1661_v36 = vpop.xlane.xlu1 %1660  ;;  %v6395_v63 = vsub.s32 %v2373_v13, %v5688_v47  ;;  %v1462_v61 = vmax.f32 %v1334_v41, 0.0  ;;  %v1417_v60 = vmax.f32 %v1289_v57, 0.0  ;;  %v1791_v16 = vsel %vm8378_vm3, %v1551_v9, 0.0 }
 0x470   : > { %v2330_v52 = vsel %vm2329_vm10, %v2328_v20, %v2323_v25  ;;  %v2026_v26 = vadd.f32 %v6226_v10, %v1652_v29  ;;  %v2029_v22 = vadd.f32 %v6226_v10, %v1661_v36  ;;  %v1920_v20 = vsel %vm8378_vm3, %v1594_v14, 0.0 }
 0x471   : > { %v2337_v62 = vsel %vm8370_vm11, %v2335_v27, %v2330_v52  ;;  %v1581_v35 = vmul.f32 %v6270_v40, %v1446_v49  ;;  %v1319_v13 = vadd.f32 %v4743_v58, %v6084_v4  ;;  %v1926_v27 = vsel %vm8378_vm3, %v1596_v54, 0.0 }
 0x472   : > { %v2342_v32 = vrot.slane %v2026_v26, %v6333_v43  ;;  %1873 = vadd.xlane.f32.xlu1 %v1872_v11  ;;  %1924 = vadd.xlane.f32.xlu0 %v1923_v51  ;;  %v6410_v29 = vsub.s32 %v2380_v48, %v5688_v47  ;;  %v1463_v36 = vmax.f32 %v1335_v39, 0.0  ;;  %v2356_v11 = vrot.slane %v2028_v12, %v6321_v15 }
 0x473   : > { %v1655_v44 = vpop.xlane.xlu0 %1654  ;;  %v1664_v25 = vpop.xlane.xlu1 %1663  ;;  %v1597_v52 = vmul.f32 %v6270_v40, %v1462_v61  ;;  %v1552_v34 = vmul.f32 %v6270_v40, %v1417_v60  ;;  %v8418_v58 = vunpack.c.l.bf16 %v6177_v1  ;;  %v2363_v14 = vrot.slane %v2029_v22, %v6355_v7 }
 0x474   : > { %v2344_v30 = vsel %vm2343_vm12, %v2342_v32, %v2337_v62  ;;  %v2027_v6 = vadd.f32 %v6226_v10, %v1655_v44  ;;  %v2030_v50 = vadd.f32 %v6226_v10, %v1664_v25  ;;  %v8419_v9 = vunpack.c.l.bf16 %v6192_v17 }
 0x475   : > { %v1336_v26 = vadd.f32 %v8418_v58, %v6129_v59  ;;  %v1881_v48 = vsel %vm8378_vm3, %v1581_v35, 0.0  ;;  %v1447_v39 = vmax.f32 %v1319_v13, 0.0  ;;  %v1598_v25 = vmul.f32 %v6270_v40, %v1463_v36  ;;  %v6446_v36 = vld [vmem:[%s8414_s3 + $0xf0] sm:$0xff]  }
 0x476   : > { %v2349_v46 = vrot.slane %v2027_v6, %v6363_v5  ;;  %1921 = vadd.xlane.f32.xlu1 %v1920_v20  ;;  %1792 = vadd.xlane.f32.xlu0 %v1791_v16  ;;  %v1290_v49 = vadd.f32 %v8419_v9, %v6042_v19  ;;  %v2370_v54 = vrot.slane %v2030_v50, %v6381_v0  ;;  %v1929_v22 = vsel %vm8378_vm3, %v1597_v52, 0.0 }
 0x477   : > { %v6413_v41 = vpop.xlane.xlu0 %1672  ;;  %v1667_v57 = vpop.xlane.xlu1 %1666  ;;  %v1794_v6 = vsel %vm8378_vm3, %v1552_v34, 0.0  ;;  %v8420_v20 = vunpack.c.h.bf16 %v6177_v1  ;;  %v1464_v13 = vmax.f32 %v1336_v26, 0.0  ;;  %v1582_v1 = vmul.f32 %v6270_v40, %v1447_v39  ;;  %v6473_v39 = vld [vmem:[%s8414_s3 + $0x170] sm:$0xff]  }
 0x478   : > { %v2351_v62 = vsel %vm2350_vm13, %v2349_v46, %v2344_v30  ;;  %v2031_v51 = vadd.f32 %v6226_v10, %v1667_v57  ;;  %v8421_v46 = vunpack.c.l.bf16 %v6197_v45  ;;  %v1418_v57 = vmax.f32 %v1290_v49, 0.0 }
 0x479   : > { %v2358_v32 = vsel %vm2357_vm14, %v2356_v11, %v2351_v62  ;;  %v1337_v50 = vadd.f32 %v8420_v20, %v6129_v59  ;;  %v6451_v11 = vld [vmem:[%s8414_s3 + $0xf8] sm:$0xff]   ;;  %v8422_v52 = vunpack.c.l.bf16 %v6208_v33  ;;  %v8423_v58 = vunpack.c.h.bf16 %v6192_v17  ;;  %v6468_v17 = vld [vmem:[%s8414_s3 + $0x168] sm:$0xff]  }
 0x47a   : > { %v2365_v12 = vsel %vm2364_vm15, %v2363_v14, %v2358_v32  ;;  %v2377_v44 = vrot.slane %v2031_v51, %v6395_v63  ;;  %1927 = vadd.xlane.f32.xlu1 %v1926_v27  ;;  %1882 = vadd.xlane.f32.xlu0 %v1881_v48  ;;  %v1320_v27 = vadd.f32 %v8421_v46, %v6084_v4  ;;  %v4783_v62 = vunpack.c.h.bf16 %v6208_v33  ;;  %v6478_v33 = vld [vmem:[%s8414_s3 + $0x178] sm:$0xff]  }
 0x47b   : > { %v2372_v61 = vsel %vm2371_vm0, %v2370_v54, %v2365_v12  ;;  %v1721_v60 = vpop.xlane.xlu0 %1720  ;;  %v1670_v30 = vpop.xlane.xlu1 %1669  ;;  %v1338_v34 = vadd.f32 %v8422_v52, %v6129_v59  ;;  %v1291_v26 = vadd.f32 %v8423_v58, %v6042_v19  ;;  %v1932_v32 = vsel %vm8378_vm3, %v1598_v25, 0.0 }
 0x47c   : > { %v2379_v16 = vsel %vm2378_vm1, %v2377_v44, %v2372_v61  ;;  %v2032_v35 = vadd.f32 %v6226_v10, %v1670_v30  ;;  %v1465_v54 = vmax.f32 %v1337_v50, 0.0  ;;  %v4690_v49 = vunpack.c.l.bf16 %v6446_v36 }
 0x47d   : > { %v4695_v48 = vunpack.c.h.bf16 %v6451_v11  ;;  %v1599_v44 = vmul.f32 %v6270_v40, %v1464_v13  ;;  %v1448_v25 = vmax.f32 %v1320_v27, 0.0  ;;  %v8424_v61 = vunpack.c.h.bf16 %v6197_v45 }
 0x47e   : > { %v2384_v14 = vrot.slane %v2032_v35, %v6410_v29  ;;  %1930 = vadd.xlane.f32.xlu1 %v1929_v22  ;;  %1795 = vadd.xlane.f32.xlu0 %v1794_v6  ;;  %v6490_v22 = vld [vmem:[%s8414_s3 + $0x1b8] sm:$0xff]   ;;  %v1884_v6 = vsel %vm8378_vm3, %v1582_v1, 0.0  ;;  %v1553_v20 = vmul.f32 %v6270_v40, %v1418_v57  ;;  %v1466_v50 = vmax.f32 %v1338_v34, 0.0 }
 0x47f   : > { %v1727_v51 = vpop.xlane.xlu0 %1726  ;;  %v1676_v9 = vpop.xlane.xlu1 %1675  ;;  %v1321_v30 = vadd.f32 %v8424_v61, %v6084_v4  ;;  %v1419_v35 = vmax.f32 %v1291_v26, 0.0  ;;  %v4755_v13 = vunpack.c.h.bf16 %v6473_v39  ;;  %v4691_v45 = vunpack.c.h.bf16 %v6446_v36 }
 0x480   : > { %v6481_v12 = vsel %vm2385_vm2, %v2384_v14, %v2379_v16  ;;  %v4750_v16 = vunpack.c.l.bf16 %v6468_v17  ;;  %v4758_v46 = vunpack.c.l.bf16 %v6478_v33  ;;  %v1600_v58 = vmul.f32 %v6270_v40, %v1465_v54 }
 0x481   : > { %v1935_v14 = vsel %vm8378_vm3, %v1599_v44, 0.0  ;;  %v1449_v36 = vmax.f32 %v1321_v30, 0.0  ;;  %v1797_v61 = vsel %vm8378_vm3, %v1553_v20, 0.0  ;;  %v1554_v54 = vmul.f32 %v6270_v40, %v1419_v35 }
 0x482   : > { %1933 = vadd.xlane.f32.xlu1 %v1932_v32  ;;  %1885 = vadd.xlane.f32.xlu0 %v1884_v6  ;;  %v1583_v32 = vmul.f32 %v6270_v40, %v1448_v25  ;;  %v1601_v6 = vmul.f32 %v6270_v40, %v1466_v50  ;;  %v1339_v1 = vadd.f32 %v4783_v62, %v6129_v59  ;;  %v1938_v35 = vsel %vm8378_vm3, %v1600_v58, 0.0 }
 0x483   : > { %v1685_v27 = vpop.xlane.xlu0 %1684  ;;  %v1679_v52 = vpop.xlane.xlu1 %1678  ;;  %v2049_v57 = vadd.f32 %v6226_v10, %v1721_v60  ;;  %v2034_v34 = vadd.f32 %v6226_v10, %v1676_v9  ;;  %v1292_v26 = vadd.f32 %v4690_v49, %v6042_v19  ;;  %v2051_v25 = vadd.f32 %v6226_v10, %v1727_v51 }
 0x484   : > { %v2035_v30 = vadd.f32 %v6226_v10, %v1679_v52  ;;  %v1295_v62 = vadd.f32 %v4695_v48, %v6042_v19  ;;  %v2033_v60 = vadd.f32 %v6226_v10, %v6413_v41  ;;  %v1887_v49 = vsel %vm8378_vm3, %v1583_v32, 0.0 }
 0x485   : > { %v1941_v51 = vsel %vm8378_vm3, %v1601_v6, 0.0  ;;  %v1800_v52 = vsel %vm8378_vm3, %v1554_v54, 0.0  ;;  %v1322_v44 = vadd.f32 %v4750_v16, %v6084_v4  ;;  %v2469_v58 = vrot.slane %v2049_v57, %v6235_v18 }
 0x486   : > { %1936 = vadd.xlane.f32.xlu1 %v1935_v14  ;;  %1798 = vadd.xlane.f32.xlu0 %v1797_v61  ;;  %v1584_v14 = vmul.f32 %v6270_v40, %v1449_v36  ;;  %v1467_v61 = vmax.f32 %v1339_v1, 0.0  ;;  %v2394_v48 = vrot.slane %v2034_v34, %v6231_v23  ;;  %v1420_v41 = vmax.f32 %v1292_v26, 0.0 }
 0x487   : > { %v6516_v20 = vpop.xlane.xlu0 %1819  ;;  %v1724_v50 = vpop.xlane.xlu1 %1723  ;;  %v2478_v32 = vrot.slane %v2051_v25, %v6247_v38  ;;  %v2037_v36 = vadd.f32 %v6226_v10, %v1685_v27  ;;  %v2399_v6 = vrot.slane %v2035_v30, %v6247_v38  ;;  %v1325_v1 = vadd.f32 %v4755_v13, %v6084_v4 }
 0x488   : > { %v2050_v9 = vadd.f32 %v6226_v10, %v1724_v50  ;;  %v2390_v16 = vrot.slane %v2033_v60, %v6235_v18  ;;  %v1602_v25 = vmul.f32 %v6270_v40, %v1467_v61  ;;  %v1423_v27 = vmax.f32 %v1295_v62, 0.0 }
 0x489   : > { %v1293_v30 = vadd.f32 %v4691_v45, %v6042_v19  ;;  %v1326_v60 = vadd.f32 %v4758_v46, %v6084_v4  ;;  %v1555_v62 = vmul.f32 %v6270_v40, %v1420_v41  ;;  %v1450_v61 = vmax.f32 %v1322_v44, 0.0  ;;  %v6554_v45 = vld [vmem:[%s8414_s3 + $0x1b0] sm:$0xff]  }
 0x48a   : > { %v2473_v3 = vrot.slane %v2050_v9, %v6231_v23  ;;  %1939 = vadd.xlane.f32.xlu1 %v1938_v35  ;;  %1888 = vadd.xlane.f32.xlu0 %v1887_v49  ;;  %v2395_v9 = vsel %vm2287_vm4, %v2394_v48, %v2390_v16  ;;  %v2409_v49 = vrot.slane %v2037_v36, %v6256_v53  ;;  %v8425_v46 = vunpack.c.h.bf16 %v6468_v17  ;;  %v6564_v36 = vld [vmem:[%s8414_s3 + $0x1c0] sm:$0xff]  }
 0x48b   : > { %v1688_v50 = vpop.xlane.xlu0 %1687  ;;  %v1682_v54 = vpop.xlane.xlu1 %1681  ;;  %v1944_v41 = vsel %vm8378_vm3, %v1602_v25, 0.0  ;;  %v1454_v17 = vmax.f32 %v1326_v60, 0.0 }
 0x48c   : > { %v2474_v57 = vsel %vm2287_vm4, %v2473_v3, %v2469_v58  ;;  %v2038_v34 = vadd.f32 %v6226_v10, %v1688_v50  ;;  %v2036_v35 = vadd.f32 %v6226_v10, %v1682_v54  ;;  %v1890_v3 = vsel %vm8378_vm3, %v1584_v14, 0.0 }
 0x48d   : > { %v6540_v26 = vsel %vm2294_vm5, %v2478_v32, %v2474_v57  ;;  %v2400_v58 = vsel %vm2294_vm5, %v2399_v6, %v2395_v9  ;;  %v1323_v48 = vadd.f32 %v8425_v46, %v6084_v4  ;;  %v1558_v6 = vmul.f32 %v6270_v40, %v1423_v27 }
 0x48e   : > { %v2404_v13 = vrot.slane %v2036_v35, %v6259_v55  ;;  %1942 = vadd.xlane.f32.xlu1 %v1941_v51  ;;  %1801 = vadd.xlane.f32.xlu0 %v1800_v52  ;;  %v2414_v51 = vrot.slane %v2038_v34, %v6287_v21  ;;  %v1453_v52 = vmax.f32 %v1325_v1, 0.0  ;;  %v1421_v54 = vmax.f32 %v1293_v30, 0.0  ;;  %v6572_v1 = vld [vmem:[%s8414_s3 + $0x1e8] sm:$0xff]  }
 0x48f   : > { %v1736_v32 = vpop.xlane.xlu0 %1735  ;;  %v1730_v50 = vpop.xlane.xlu1 %1729  ;;  %v4754_v57 = vunpack.c.l.bf16 %v6473_v39  ;;  %v4786_v34 = vunpack.c.l.bf16 %v6554_v45  ;;  %v1585_v30 = vmul.f32 %v6270_v40, %v1450_v61  ;;  %v4794_v9 = vunpack.c.l.bf16 %v6564_v36 }
 0x490   : > { %v2405_v14 = vsel %vm2301_vm6, %v2404_v13, %v2400_v58  ;;  %v2052_v35 = vadd.f32 %v6226_v10, %v1730_v50  ;;  %v8426_v39 = vcombine.high %v5733_v8, %v5733_v8  ;;  %v1451_v58 = vmax.f32 %v1323_v48, 0.0 }
 0x491   : > { %v2410_v44 = vsel %vm2308_vm7, %v2409_v49, %v2405_v14  ;;  %v1588_v49 = vmul.f32 %v6270_v40, %v1453_v52  ;;  %v4815_v50 = vunpack.c.h.bf16 %v6572_v1  ;;  %v1803_v61 = vsel %vm8378_vm3, %v1555_v62, 0.0 }
 0x492   : > { %1891 = vadd.xlane.f32.xlu0 %v1890_v3  ;;  %1945 = vadd.xlane.f32.xlu1 %v1944_v41  ;;  %v6575_v16 = vsel %vm2315_vm8, %v2414_v51, %v2410_v44  ;;  %v6586_v3 = vld [vmem:[%s8414_s3 + $0x1f0] sm:$0xff]   ;;  %v6592_v60 = vrot.slane %v8426_v39, %v5703_v56  ;;  %v1812_v51 = vsel %vm8378_vm3, %v1558_v6, 0.0  ;;  %v1556_v14 = vmul.f32 %v6270_v40, %v1421_v54 }
 0x493   : > { %v1826_v25 = vpop.xlane.xlu0 %1825  ;;  %v1817_v27 = vpop.xlane.xlu1 %1816  ;;  %v8427_v46 = vunpack.c.l.bf16 %v6490_v22  ;;  %v1589_v8 = vmul.f32 %v6270_v40, %v1454_v17  ;;  %v8428_v52 = vunpack.c.l.bf16 %v6451_v11  ;;  %v8429_v41 = vunpack.c.h.bf16 %v6490_v22 }
 0x494   : > { %v2054_v54 = vadd.f32 %v6226_v10, %v1736_v32  ;;  %v2483_v39 = vrot.slane %v2052_v35, %v6259_v55  ;;  %v1893_v17 = vsel %vm8378_vm3, %v1585_v30, 0.0  ;;  %v1902_v11 = vsel %vm8378_vm3, %v1588_v49, 0.0 }
 0x495   : > { %v1342_v44 = vadd.f32 %v8427_v46, %v6129_v59  ;;  %v1294_v48 = vadd.f32 %v8428_v52, %v6042_v19  ;;  %v1343_v62 = vadd.f32 %v8429_v41, %v6129_v59  ;;  %v2081_v46 = vadd.f32 %v6226_v10, %v1817_v27 }
 0x496   : > { %1804 = vadd.xlane.f32.xlu0 %v1803_v61  ;;  %1813 = vadd.xlane.f32.xlu1 %v1812_v51  ;;  %v1586_v22 = vmul.f32 %v6270_v40, %v1451_v58  ;;  %v2082_v52 = vadd.f32 %v6226_v10, %v6516_v20  ;;  %v1806_v32 = vsel %vm8378_vm3, %v1556_v14, 0.0  ;;  %v1324_v27 = vadd.f32 %v4754_v57, %v6084_v4 }
 0x497   : > { %v1739_v61 = vpop.xlane.xlu0 %1738  ;;  %v1733_v51 = vpop.xlane.xlu1 %1732  ;;  %v1470_v35 = vmax.f32 %v1342_v44, 0.0  ;;  %v1905_v30 = vsel %vm8378_vm3, %v1589_v8, 0.0  ;;  %v2493_v49 = vrot.slane %v2054_v54, %v6287_v21  ;;  %v2484_v58 = vsel %vm2301_vm6, %v2483_v39, %v6540_v26 }
 0x498   : > { %v2055_v13 = vadd.f32 %v6226_v10, %v1739_v61  ;;  %v2053_v19 = vadd.f32 %v6226_v10, %v1733_v51  ;;  %v1422_v61 = vmax.f32 %v1294_v48, 0.0  ;;  %v1471_v51 = vmax.f32 %v1343_v62, 0.0 }
 0x499   : > { %v2084_v20 = vadd.f32 %v6226_v10, %v1826_v25  ;;  %v2627_v14 = vrot.slane %v2081_v46, %v6235_v18  ;;  %v2631_v48 = vrot.slane %v2082_v52, %v6231_v23  ;;  %v1605_v26 = vmul.f32 %v6270_v40, %v1470_v35 }
 0x49a   : > { %v2488_v41 = vrot.slane %v2053_v19, %v6256_v53  ;;  %1894 = vadd.xlane.f32.xlu0 %v1893_v17  ;;  %1903 = vadd.xlane.f32.xlu1 %v1902_v11  ;;  %v2498_v57 = vrot.slane %v2055_v13, %v6296_v42  ;;  %v1344_v25 = vadd.f32 %v4794_v9, %v6592_v60  ;;  %v1452_v39 = vmax.f32 %v1324_v27, 0.0 }
 0x49b   : > { %v1829_v44 = vpop.xlane.xlu0 %1828  ;;  %v1823_v6 = vpop.xlane.xlu1 %1822  ;;  %v1340_v46 = vadd.f32 %v4786_v34, %v6129_v59  ;;  %v2632_v11 = vsel %vm2287_vm4, %v2631_v48, %v2627_v14  ;;  %v1896_v35 = vsel %vm8378_vm3, %v1586_v22, 0.0  ;;  %v1355_v9 = vadd.f32 %v4815_v50, %v6592_v60  ;;  %v6656_v22 = vld [vmem:[%s8414_s3 + $0x1f8] sm:$0xff]  }
 0x49c   : > { %v2489_v17 = vsel %vm2308_vm7, %v2488_v41, %v2484_v58  ;;  %v2085_v19 = vadd.f32 %v6226_v10, %v1829_v44  ;;  %v2083_v8 = vadd.f32 %v6226_v10, %v1823_v6  ;;  %v2641_v6 = vrot.slane %v2084_v20, %v6259_v55 }
 0x49d   : > { %v2494_v62 = vsel %vm2315_vm8, %v2493_v49, %v2489_v17  ;;  %v1557_v27 = vmul.f32 %v6270_v40, %v1422_v61  ;;  %v1953_v58 = vsel %vm8378_vm3, %v1605_v26, 0.0  ;;  %v1606_v20 = vmul.f32 %v6270_v40, %v1471_v51 }
 0x49e   : > { %v2636_v54 = vrot.slane %v2083_v8, %v6247_v38  ;;  %1807 = vadd.xlane.f32.xlu0 %v1806_v32  ;;  %1906 = vadd.xlane.f32.xlu1 %v1905_v30  ;;  %v6639_v13 = vsel %vm2322_vm9, %v2498_v57, %v2494_v62  ;;  %v2646_v49 = vrot.slane %v2085_v19, %v6256_v53  ;;  %v1472_v14 = vmax.f32 %v1344_v25, 0.0 }
 0x49f   : > { %v1697_v52 = vpop.xlane.xlu0 %1696  ;;  %v1691_v41 = vpop.xlane.xlu1 %1690  ;;  %v1587_v50 = vmul.f32 %v6270_v40, %v1452_v39  ;;  %v1468_v61 = vmax.f32 %v1340_v46, 0.0  ;;  %v8430_v57 = vunpack.c.h.bf16 %v6554_v45  ;;  %v1483_v62 = vmax.f32 %v1355_v9, 0.0 }
 0x4a0   : > { %v2637_v32 = vsel %vm2294_vm5, %v2636_v54, %v2632_v11  ;;  %v2039_v30 = vadd.f32 %v6226_v10, %v1691_v41  ;;  %v2041_v51 = vadd.f32 %v6226_v10, %v1697_v52  ;;  %v4759_v26 = vunpack.c.h.bf16 %v6478_v33 }
 0x4a1   : > { %v2642_v34 = vsel %vm2301_vm6, %v2641_v6, %v2637_v32  ;;  %v1341_v17 = vadd.f32 %v8430_v57, %v6129_v59  ;;  %v4823_v39 = vunpack.c.h.bf16 %v6656_v22  ;;  %v4795_v46 = vunpack.c.h.bf16 %v6564_v36 }
 0x4a2   : > { %1897 = vadd.xlane.f32.xlu0 %v1896_v35  ;;  %1954 = vadd.xlane.f32.xlu1 %v1953_v58  ;;  %v6660_v44 = vsel %vm2308_vm7, %v2646_v49, %v2642_v34  ;;  %v2419_v19 = vrot.slane %v2039_v30, %v6296_v42  ;;  %v1809_v45 = vsel %vm8378_vm3, %v1557_v27, 0.0  ;;  %v1956_v59 = vsel %vm8378_vm3, %v1606_v20, 0.0 }
 0x4a3   : > { %v1700_v8 = vpop.xlane.xlu0 %1699  ;;  %v1694_v48 = vpop.xlane.xlu1 %1693  ;;  %v1607_v6 = vmul.f32 %v6270_v40, %v1472_v14  ;;  %v8431_v11 = vunpack.c.l.bf16 %v6586_v3  ;;  %v1899_v41 = vsel %vm8378_vm3, %v1587_v50, 0.0  ;;  %v1603_v35 = vmul.f32 %v6270_v40, %v1468_v61  ;;  %v5136_v61 = vld [vmem:[%s8414_s3 + $0x1c8] sm:$0xff]  }
 0x4a4   : > { %v2042_v25 = vadd.f32 %v6226_v10, %v1700_v8  ;;  %v2040_v54 = vadd.f32 %v6226_v10, %v1694_v48  ;;  %v1469_v9 = vmax.f32 %v1341_v17, 0.0  ;;  %v2429_v36 = vrot.slane %v2041_v51, %v6300_v24 }
 0x4a5   : > { %v1356_v52 = vadd.f32 %v8431_v11, %v6592_v60  ;;  %v2420_v49 = vsel %vm2322_vm9, %v2419_v19, %v6575_v16  ;;  %v1618_v27 = vmul.f32 %v6270_v40, %v1483_v62  ;;  %v1327_v34 = vadd.f32 %v4759_v26, %v6084_v4 }
 0x4a6   : > { %v2424_v33 = vrot.slane %v2040_v54, %v6307_v28  ;;  %1810 = vadd.xlane.f32.xlu0 %v1809_v45  ;;  %1957 = vadd.xlane.f32.xlu1 %v1956_v59  ;;  %v2434_v58 = vrot.slane %v2042_v25, %v6333_v43  ;;  %v1959_v57 = vsel %vm8378_vm3, %v1607_v6, 0.0  ;;  %v1359_v51 = vadd.f32 %v4823_v39, %v6592_v60 }
 0x4a7   : > { %v1745_v32 = vpop.xlane.xlu0 %1744  ;;  %v1742_v30 = vpop.xlane.xlu1 %1741  ;;  %v1484_v17 = vmax.f32 %v1356_v52, 0.0  ;;  %v1604_v26 = vmul.f32 %v6270_v40, %v1469_v9  ;;  %v1345_v25 = vadd.f32 %v4795_v46, %v6592_v60  ;;  %v4798_v54 = vunpack.c.l.bf16 %v5136_v61 }
 0x4a8   : > { %v2425_v20 = vsel %vm2329_vm10, %v2424_v33, %v2420_v49  ;;  %v2057_v14 = vadd.f32 %v6226_v10, %v1745_v32  ;;  %v2056_v50 = vadd.f32 %v6226_v10, %v1742_v30  ;;  %v1947_v59 = vsel %vm8378_vm3, %v1603_v35, 0.0 }
 0x4a9   : > { %v2430_v16 = vsel %vm8370_vm11, %v2429_v36, %v2425_v20  ;;  %v1992_v6 = vsel %vm8378_vm3, %v1618_v27, 0.0  ;;  %v1619_v52 = vmul.f32 %v6270_v40, %v1484_v17  ;;  %v1455_v33 = vmax.f32 %v1327_v34, 0.0  ;;  %v5137_v20 = vld [vmem:[%s8414_s3 + $0x1d0] sm:$0xff]  }
 0x4aa   : > { %v2508_v4 = vrot.slane %v2057_v14, %v6300_v24  ;;  %v2503_v19 = vrot.slane %v2056_v50, %v6307_v28  ;;  %1900 = vadd.xlane.f32.xlu0 %v1899_v41  ;;  %1960 = vadd.xlane.f32.xlu1 %v1959_v57  ;;  %v2435_v8 = vsel %vm2343_vm12, %v2434_v58, %v2430_v16  ;;  %v1487_v41 = vmax.f32 %v1359_v51, 0.0 }
 0x4ab   : > { %v1703_v48 = vpop.xlane.xlu0 %1702  ;;  %v6699_v62 = vpop.xlane.xlu1 %1831  ;;  %v1950_v35 = vsel %vm8378_vm3, %v1604_v26, 0.0  ;;  %v1473_v49 = vmax.f32 %v1345_v25, 0.0  ;;  %v1346_v32 = vadd.f32 %v4798_v54, %v6592_v60  ;;  %v1995_v30 = vsel %vm8378_vm3, %v1619_v52, 0.0 }
 0x4ac   : > { %v2504_v45 = vsel %vm2329_vm10, %v2503_v19, %v6639_v13  ;;  %v2043_v39 = vadd.f32 %v6226_v10, %v1703_v48  ;;  %v1590_v27 = vmul.f32 %v6270_v40, %v1455_v33  ;;  %v1622_v34 = vmul.f32 %v6270_v40, %v1487_v41 }
 0x4ad   : > { %v6709_v11 = vsel %vm8370_vm11, %v2508_v4, %v2504_v45  ;;  %v4799_v58 = vunpack.c.h.bf16 %v5136_v61  ;;  %v1608_v16 = vmul.f32 %v6270_v40, %v1473_v49  ;;  %v4802_v57 = vunpack.c.l.bf16 %v5137_v20 }
 0x4ae   : > { %v2439_v9 = vrot.slane %v2043_v39, %v6363_v5  ;;  %1948 = vadd.xlane.f32.xlu0 %v1947_v59  ;;  %1993 = vadd.xlane.f32.xlu1 %v1992_v6  ;;  %v1908_v17 = vsel %vm8378_vm3, %v1590_v27, 0.0  ;;  %v2004_v51 = vsel %vm8378_vm3, %v1622_v34, 0.0  ;;  %v1474_v4 = vmax.f32 %v1346_v32, 0.0  ;;  %v5138_v39 = vld [vmem:[%s8414_s3 + $0x1d8] sm:$0xff]  }
 0x4af   : > { %v6713_v46 = vpop.xlane.xlu0 %1747  ;;  %v6715_v13 = vpop.xlane.xlu1 %1834  ;;  %v1347_v61 = vadd.f32 %v4799_v58, %v6592_v60  ;;  %v1348_v48 = vadd.f32 %v4802_v57, %v6592_v60  ;;  %v1962_v26 = vsel %vm8378_vm3, %v1608_v16, 0.0  ;;  %v4803_v45 = vunpack.c.h.bf16 %v5137_v20 }
 0x4b0   : > { %v6718_v36 = vsel %vm2350_vm13, %v2439_v9, %v2435_v8  ;;  %v1609_v25 = vmul.f32 %v6270_v40, %v1474_v4  ;;  %v4806_v52 = vunpack.c.l.bf16 %v5138_v39  ;;  %v4807_v34 = vunpack.c.h.bf16 %v5138_v39 }
 0x4b1   : > { %v1475_v54 = vmax.f32 %v1347_v61, 0.0  ;;  %v1476_v9 = vmax.f32 %v1348_v48, 0.0  ;;  %vm8371_vm11 = vcmask 1041409  }
 0x4b2   : > { %1951 = vadd.xlane.f32.xlu0 %v1950_v35  ;;  %1996 = vadd.xlane.f32.xlu1 %v1995_v30  ;;  %v1965_v33 = vsel %vm8378_vm3, %v1609_v25, 0.0  ;;  %v1349_v35 = vadd.f32 %v4803_v45, %v6592_v60  ;;  %v1350_v27 = vadd.f32 %v4806_v52, %v6592_v60 }
 0x4b3   : > { %v6728_v14 = vpop.xlane.xlu0 %1837  ;;  %v6730_v50 = vpop.xlane.xlu1 %1750  ;;  %v1610_v41 = vmul.f32 %v6270_v40, %v1475_v54  ;;  %v1611_v16 = vmul.f32 %v6270_v40, %v1476_v9 }
 0x4b4   : > { %v1477_v57 = vmax.f32 %v1349_v35, 0.0 }
 0x4b5   : > { %v1968_v20 = vsel %vm8378_vm3, %v1610_v41, 0.0  ;;  %v1971_v45 = vsel %vm8378_vm3, %v1611_v16, 0.0 }
 0x4b6   : > { %1909 = vadd.xlane.f32.xlu0 %v1908_v17  ;;  %2005 = vadd.xlane.f32.xlu1 %v2004_v51  ;;  %v5139_v17 = vld [vmem:[%s8414_s3 + $0x1e0] sm:$0xff]   ;;  %v1612_v39 = vmul.f32 %v6270_v40, %v1477_v57 }
 0x4b7   : > { %v1706_v19 = vpop.xlane.xlu0 %1705  ;;  %v6736_v8 = vpop.xlane.xlu1 %1840  ;;  %v4810_v25 = vunpack.c.l.bf16 %v5139_v17 }
 0x4b8   : > { %v2044_v30 = vadd.f32 %v6226_v10, %v1706_v19 }
 0x4ba   : > { %1963 = vadd.xlane.f32.xlu0 %v1962_v26  ;;  %v2444_v19 = vrot.slane %v2044_v30, %v6321_v15  ;;  %v1351_v26 = vadd.f32 %v4807_v34, %v6592_v60  ;;  %v1352_v30 = vadd.f32 %v4810_v25, %v6592_v60  ;;  %v4811_v34 = vunpack.c.h.bf16 %v5139_v17 }
 0x4bb   : > { %v1709_v59 = vpop.xlane.xlu0 %1708  ;;  %v6744_v6 = vpop.xlane.xlu1 %1753  ;;  %v4814_v25 = vunpack.c.l.bf16 %v6572_v1 }
 0x4bc   : > { %v2045_v58 = vadd.f32 %v6226_v10, %v1709_v59  ;;  %v1478_v59 = vmax.f32 %v1350_v27, 0.0  ;;  %v2445_v35 = vsel %vm2357_vm14, %v2444_v19, %v6718_v36  ;;  %v1974_v27 = vsel %vm8378_vm3, %v1612_v39, 0.0 }
 0x4bd   : > { %v1479_v16 = vmax.f32 %v1351_v26, 0.0  ;;  %v1480_v39 = vmax.f32 %v1352_v30, 0.0  ;;  %v2059_v30 = vadd.f32 %v6226_v10, %v6730_v50 }
 0x4be   : > { %1966 = vadd.xlane.f32.xlu0 %v1965_v33  ;;  %v2449_v54 = vrot.slane %v2045_v58, %v6355_v7 }
 0x4bf   : > { %v1712_v49 = vpop.xlane.xlu0 %1711  ;;  %v6749_v32 = vpop.xlane.xlu1 %1843 }
 0x4c0   : > { %v2046_v51 = vadd.f32 %v6226_v10, %v1712_v49  ;;  %v2450_v58 = vsel %vm2364_vm15, %v2449_v54, %v2445_v35  ;;  %v5346_v54 = vld [vmem:[%s8357_s10] ss:$0 sm:$0xff] }
 0x4c2   : > { %1969 = vadd.xlane.f32.xlu0 %v1968_v20  ;;  %v2454_v52 = vrot.slane %v2046_v51, %v6381_v0  ;;  %v1613_v20 = vmul.f32 %v6270_v40, %v1478_v59 }
 0x4c3   : > { %v1715_v4 = vpop.xlane.xlu0 %1714  ;;  %v1757_v61 = vpop.xlane.xlu1 %1756 }
 0x4c4   : > { %v2047_v48 = vadd.f32 %v6226_v10, %v1715_v4  ;;  %v2455_v57 = vsel %vm2371_vm0, %v2454_v52, %v2450_v58  ;;  %v1977_v26 = vsel %vm8378_vm3, %v1613_v20, 0.0 }
 0x4c6   : > { %1972 = vadd.xlane.f32.xlu0 %v1971_v45  ;;  %v2459_v33 = vrot.slane %v2047_v48, %v6395_v63  ;;  %v1353_v48 = vadd.f32 %v4811_v34, %v6592_v60  ;;  %v1614_v45 = vmul.f32 %v5346_v54, %v1479_v16  ;;  %v4822_v16 = vunpack.c.l.bf16 %v6656_v22 }
 0x4c7   : > { %v1718_v41 = vpop.xlane.xlu0 %1717  ;;  %v6768_v9 = vpop.xlane.xlu1 %1846 }
 0x4c8   : > { %v2048_v49 = vadd.f32 %v6226_v10, %v1718_v41  ;;  %v2460_v36 = vsel %vm2378_vm1, %v2459_v33, %v2455_v57  ;;  %v1354_v33 = vadd.f32 %v4814_v25, %v6592_v60  ;;  %v1980_v1 = vsel %vm8378_vm3, %v1614_v45, 0.0 }
 0x4c9   : > { %v1615_v41 = vmul.f32 %v5346_v54, %v1480_v39  ;;  %v1481_v35 = vmax.f32 %v1353_v48, 0.0  ;;  %v2061_v57 = vadd.f32 %v6226_v10, %v1757_v61 }
 0x4ca   : > { %v2464_v51 = vrot.slane %v2048_v49, %v6410_v29  ;;  %1975 = vadd.xlane.f32.xlu0 %v1974_v27  ;;  %v2058_v49 = vadd.f32 %v6226_v10, %v6713_v46  ;;  %v2060_v27 = vadd.f32 %v6226_v10, %v6744_v6  ;;  %v1482_v20 = vmax.f32 %v1354_v33, 0.0 }
 0x4cb   : > { %v6780_v4 = vpop.xlane.xlu0 %1858  ;;  %v1760_v19 = vpop.xlane.xlu1 %1759  ;;  %v1358_v33 = vadd.f32 %v4822_v16, %v6592_v60 }
 0x4cc   : > { %v2465_v17 = vsel %vm2385_vm2, %v2464_v51, %v2460_v36  ;;  %v1616_v51 = vmul.f32 %v5346_v54, %v1481_v35  ;;  %v2513_v36 = vrot.slane %v2058_v49, %v6333_v43  ;;  %v2062_v50 = vadd.f32 %v6226_v10, %v1760_v19 }
 0x4cd   : > { %v2941_v40 = vsel %vm8371_vm11, %v2465_v17, %v6481_v12  ;;  %v4819_v12 = vunpack.c.h.bf16 %v6586_v3  ;;  %v1983_v3 = vsel %vm8378_vm3, %v1615_v41, 0.0  ;;  %v2518_v17 = vrot.slane %v2059_v30, %v6363_v5 }
 0x4ce   : > { %1978 = vadd.xlane.f32.xlu0 %v1977_v26  ;;  %v2523_v22 = vrot.slane %v2060_v27, %v6321_v15  ;;  %v1617_v61 = vmul.f32 %v5346_v54, %v1482_v20  ;;  %v2528_v26 = vrot.slane %v2061_v57, %v6355_v7  ;;  %v1986_v45 = vsel %vm8378_vm3, %v1616_v51, 0.0 }
 0x4cf   : > { %v6791_v59 = vpop.xlane.xlu0 %1861  ;;  %v6793_v52 = vpop.xlane.xlu1 %1849  ;;  %v1357_v46 = vadd.f32 %v4819_v12, %v6592_v60  ;;  %v2514_v19 = vsel %vm2343_vm12, %v2513_v36, %v6709_v11  ;;  %v1486_v16 = vmax.f32 %v1358_v33, 0.0  ;;  %vm8379_vm11 = vcmask 1042434  }
 0x4d0   : > { %v2519_v41 = vsel %vm2350_vm13, %v2518_v17, %v2514_v19  ;;  %v1989_v60 = vsel %vm8378_vm3, %v1617_v61, 0.0 }
 0x4d1   : > { %v1485_v39 = vmax.f32 %v1357_v46, 0.0  ;;  %v2524_v30 = vsel %vm2357_vm14, %v2523_v22, %v2519_v41 }
 0x4d2   : > { %1981 = vadd.xlane.f32.xlu0 %v1980_v1  ;;  %v2533_v1 = vrot.slane %v2062_v50, %v6381_v0  ;;  %v2529_v27 = vsel %vm2364_vm15, %v2528_v26, %v2524_v30 }
 0x4d3   : > { %v6802_v34 = vpop.xlane.xlu0 %1771  ;;  %v1763_v58 = vpop.xlane.xlu1 %1762  ;;  %v1620_v20 = vmul.f32 %v5346_v54, %v1485_v39 }
 0x4d4   : > { %v2063_v48 = vadd.f32 %v6226_v10, %v1763_v58  ;;  %v2534_v11 = vsel %vm2371_vm0, %v2533_v1, %v2529_v27  ;;  %v2066_v56 = vadd.f32 %v6226_v10, %v6802_v34  ;;  %v2088_v34 = vadd.f32 %v6226_v10, %v6728_v14 }
 0x4d5   : > { %v1998_v17 = vsel %vm8378_vm3, %v1620_v20, 0.0 }
 0x4d6   : > { %1984 = vadd.xlane.f32.xlu0 %v1983_v3  ;;  %v2538_v35 = vrot.slane %v2063_v48, %v6395_v63  ;;  %v1621_v48 = vmul.f32 %v5346_v54, %v1486_v16  ;;  %v2661_v14 = vrot.slane %v2088_v34, %v6307_v28 }
 0x4d7   : > { %v6814_v6 = vpop.xlane.xlu0 %1774  ;;  %v6816_v25 = vpop.xlane.xlu1 %1852 }
 0x4d8   : > { %v2539_v3 = vsel %vm2378_vm1, %v2538_v35, %v2534_v11  ;;  %v2001_v26 = vsel %vm8378_vm3, %v1621_v48, 0.0  ;;  %vm8441_vm3 = vcmask 589312  }
 0x4da   : > { %1987 = vadd.xlane.f32.xlu0 %v1986_v45 }
 0x4db   : > { %v1778_v12 = vpop.xlane.xlu0 %1777  ;;  %v1766_v49 = vpop.xlane.xlu1 %1765 }
 0x4dc   : > { %v2064_v58 = vadd.f32 %v6226_v10, %v1766_v49 }
 0x4de   : > { %v2543_v57 = vrot.slane %v2064_v58, %v6410_v29  ;;  %1990 = vadd.xlane.f32.xlu0 %v1989_v60 }
 0x4df   : > { %v6834_v51 = vpop.xlane.xlu0 %1864  ;;  %v6836_v46 = vpop.xlane.xlu1 %1855 }
 0x4e0   : > { %v2544_v36 = vsel %vm2385_vm2, %v2543_v57, %v2539_v3 }
 0x4e1   : > { %v6840_v50 = vsel %vm8379_vm11, %v2544_v36, %v2941_v40  ;;  %vm8380_vm11 = vcmask 1044484  }
 0x4e2   : > { %1999 = vadd.xlane.f32.xlu0 %v1998_v17 }
 0x4e3   : > { %v6843_v22 = vpop.xlane.xlu0 %1912  ;;  %v1769_v61 = vpop.xlane.xlu1 %1768 }
 0x4e4   : > { %v2065_v31 = vadd.f32 %v6226_v10, %v1769_v61  ;;  %v2552_v61 = vrot.slane %v2066_v56, %v6231_v23 }
 0x4e6   : > { %2002 = vadd.xlane.f32.xlu0 %v2001_v26  ;;  %v2548_v2 = vrot.slane %v2065_v31, %v6235_v18  ;;  %v2068_v31 = vadd.f32 %v6226_v10, %v1778_v12 }
 0x4e7   : > { %v6846_v45 = vpop.xlane.xlu0 %1918  ;;  %v6848_v39 = vpop.xlane.xlu1 %1867 }
 0x4eb   : > { %v1787_v33 = vpop.xlane.xlu0 %1786  ;;  %v1781_v19 = vpop.xlane.xlu1 %1780 }
 0x4ef   : > { %v6850_v1 = vpop.xlane.xlu0 %1876  ;;  %v6852_v40 = vpop.xlane.xlu1 %1870 }
 0x4f3   : > { %v1790_v41 = vpop.xlane.xlu0 %1789  ;;  %v6854_v35 = vpop.xlane.xlu1 %1915 }
 0x4f7   : > { %v6856_v54 = vpop.xlane.xlu0 %1879  ;;  %v1784_v49 = vpop.xlane.xlu1 %1783 }
 0x4f8   : > { %8432 = vst [vmem:[#allocation24_spill] sm:$0xff] %v6856_v54 }
 0x4fb   : > { %v6858_v30 = vpop.xlane.xlu0 %1924  ;;  %v6860_v58 = vpop.xlane.xlu1 %1873 }
 0x4fc   : > { %8433 = vst [vmem:[#allocation25_spill] sm:$0xff] %v6858_v30 }
 0x4ff   : > { %v1793_v27 = vpop.xlane.xlu0 %1792  ;;  %v6862_v60 = vpop.xlane.xlu1 %1921 }
 0x503   : > { %v6864_v20 = vpop.xlane.xlu0 %1882  ;;  %v6866_v16 = vpop.xlane.xlu1 %1927 }
 0x507   : > { %v1796_v11 = vpop.xlane.xlu0 %1795  ;;  %v6868_v57 = vpop.xlane.xlu1 %1930 }
 0x508   : > { %8434 = vst [vmem:[#allocation26_spill] sm:$0xff] %v6868_v57 }
 0x50b   : > { %v6870_v3 = vpop.xlane.xlu0 %1885  ;;  %v6872_v36 = vpop.xlane.xlu1 %1933 }
 0x50c   : > { %8435 = vst [vmem:[#allocation27_spill] sm:$0xff] %v6870_v3  ;;  %8436 = vst [vmem:[#allocation28_spill] sm:$0xff] %v6872_v36  ;;  %v2086_v36 = vadd.f32 %v6226_v10, %v6699_v62  ;;  %v2070_v3 = vadd.f32 %v6226_v10, %v1784_v49 }
 0x50e   : > { %v2651_v30 = vrot.slane %v2086_v36, %v6287_v21  ;;  %v2572_v49 = vrot.slane %v2070_v3, %v6287_v21 }
 0x50f   : > { %v1799_v17 = vpop.xlane.xlu0 %1798  ;;  %v6876_v26 = vpop.xlane.xlu1 %1936 }
 0x510   : > { %8438 = vst [vmem:[#allocation30_spill] sm:$0xff] %v6876_v26  ;;  %v2087_v26 = vadd.f32 %v6226_v10, %v6715_v13  ;;  %v2089_v13 = vadd.f32 %v6226_v10, %v6736_v8  ;;  %v2071_v8 = vadd.f32 %v6226_v10, %v1787_v33  ;;  %v2093_v33 = vadd.f32 %v6226_v10, %v6816_v25 }
 0x512   : > { %v2656_v56 = vrot.slane %v2087_v26, %v6296_v42  ;;  %v2090_v26 = vadd.f32 %v6226_v10, %v6749_v32  ;;  %v2073_v32 = vadd.f32 %v6226_v10, %v1793_v27  ;;  %v2075_v27 = vadd.f32 %v6226_v10, %v1799_v17 }
 0x513   : > { %v6874_v48 = vpop.xlane.xlu0 %1888  ;;  %v6881_v47 = vpop.xlane.xlu1 %1939 }
 0x514   : > { %8437 = vst [vmem:[#allocation29_spill] sm:$0xff] %v6874_v48  ;;  %8439 = vst [vmem:[#allocation31_spill] sm:$0xff] %v6881_v47  ;;  %v2067_v48 = vadd.f32 %v6226_v10, %v6814_v6  ;;  %v2069_v47 = vadd.f32 %v6226_v10, %v1781_v19  ;;  %v2562_v19 = vrot.slane %v2068_v31, %v6259_v55 }
 0x515   : > { %v2092_v31 = vadd.f32 %v6226_v10, %v6793_v52  ;;  %v2094_v52 = vadd.f32 %v6226_v10, %v6836_v46  ;;  %v2686_v46 = vrot.slane %v2093_v33, %v6355_v7 }
 0x516   : > { %v2557_v6 = vrot.slane %v2067_v48, %v6247_v38  ;;  %v2652_v48 = vsel %vm2315_vm8, %v2651_v30, %v6660_v44 }
 0x517   : > { %v1802_v37 = vpop.xlane.xlu0 %1801  ;;  %v6901_v54 = vpop.xlane.xlu1 %1942 }
 0x51b   : > { %v6884_v57 = vpop.xlane.xlu0 %1891  ;;  %v6928_v30 = vpop.xlane.xlu1 %1945 }
 0x51c   : > { %8440 = vst [vmem:[#allocation32_spill] sm:$0xff] %v6884_v57  ;;  %v2553_v57 = vsel %vm2287_vm4, %v2552_v61, %v2548_v2  ;;  %v2567_v2 = vrot.slane %v2069_v47, %v6256_v53  ;;  %v2657_v61 = vsel %vm2322_vm9, %v2656_v56, %v2652_v48  ;;  %v2091_v47 = vadd.f32 %v6226_v10, %v6768_v9 }
 0x51d   : > { %v2558_v12 = vsel %vm2294_vm5, %v2557_v6, %v2553_v57  ;;  %v2666_v57 = vrot.slane %v2089_v13, %v6300_v24  ;;  %v2662_v3 = vsel %vm2329_vm10, %v2661_v14, %v2657_v61  ;;  %v2072_v6 = vadd.f32 %v6226_v10, %v1790_v41 }
 0x51e   : > { %v2563_v34 = vsel %vm2301_vm6, %v2562_v19, %v2558_v12  ;;  %v2074_v56 = vadd.f32 %v6226_v10, %v1796_v11  ;;  %v2671_v14 = vrot.slane %v2090_v26, %v6333_v43  ;;  %v2577_v12 = vrot.slane %v2071_v8, %v6296_v42 }
 0x51f   : > { %v1805_v62 = vpop.xlane.xlu0 %1804  ;;  %v2568_v44 = vsel %vm2308_vm7, %v2567_v2, %v2563_v34  ;;  %v2667_v2 = vsel %vm8441_vm3, %v2666_v57, %v2662_v3  ;;  %v2676_v25 = vrot.slane %v2091_v47, %v6363_v5  ;;  %v2076_v41 = vadd.f32 %v6226_v10, %v1802_v37  ;;  %v1814_v34 = vpop.xlane.xlu1 %1813 }
 0x520   : > { %v2573_v9 = vsel %vm2315_vm8, %v2572_v49, %v2568_v44  ;;  %v2681_v19 = vrot.slane %v2092_v31, %v6321_v15  ;;  %v2587_v49 = vrot.slane %v2073_v32, %v6300_v24  ;;  %v2077_v48 = vadd.f32 %v6226_v10, %v1805_v62 }
 0x521   : > { %v2578_v11 = vsel %vm2322_vm9, %v2577_v12, %v2573_v9  ;;  %v2582_v26 = vrot.slane %v2072_v6, %v6307_v28  ;;  %v2592_v17 = vrot.slane %v2074_v56, %v6333_v43  ;;  %v2672_v37 = vsel %vm2343_vm12, %v2671_v14, %v2667_v2 }
 0x522   : > { %v2691_v57 = vrot.slane %v2094_v52, %v6381_v0  ;;  %v2597_v47 = vrot.slane %v2075_v27, %v6363_v5  ;;  %v2677_v3 = vsel %vm2350_vm13, %v2676_v25, %v2672_v37  ;;  %v2095_v62 = vadd.f32 %v6226_v10, %v6780_v4 }
 0x523   : > { %v6911_v36 = vpop.xlane.xlu0 %1894  ;;  %v2583_v31 = vsel %vm2329_vm10, %v2582_v26, %v2578_v11  ;;  %v2602_v44 = vrot.slane %v2076_v41, %v6321_v15  ;;  %v2682_v32 = vsel %vm2357_vm14, %v2681_v19, %v2677_v3  ;;  %v2607_v6 = vrot.slane %v2077_v48, %v6355_v7 }
 0x524   : > { %v2588_v33 = vsel %vm8441_vm3, %v2587_v49, %v2583_v31  ;;  %v2687_v9 = vsel %vm2364_vm15, %v2686_v46, %v2682_v32  ;;  %v2096_v4 = vadd.f32 %v6226_v10, %v6791_v59  ;;  %v2696_v25 = vrot.slane %v2095_v62, %v6395_v63  ;;  %v6997_v31 = vpop.xlane.xlu1 %1903 }
 0x525   : > { %v2593_v56 = vsel %vm2343_vm12, %v2592_v17, %v2588_v33  ;;  %v2692_v12 = vsel %vm2371_vm0, %v2691_v57, %v2687_v9  ;;  %vm8381_vm3 = vcmask 1043459   ;;  %v2098_v33 = vadd.f32 %v6226_v10, %v6848_v39 }
 0x526   : > { %v2598_v27 = vsel %vm2350_vm13, %v2597_v47, %v2593_v56  ;;  %v2697_v49 = vsel %vm2378_vm1, %v2696_v25, %v2692_v12  ;;  %v2701_v26 = vrot.slane %v2096_v4, %v6410_v29  ;;  %v2114_v9 = vadd.f32 %v6226_v10, %v6854_v35 }
 0x527   : > { %v1808_v13 = vpop.xlane.xlu0 %1807  ;;  %v2603_v41 = vsel %vm2357_vm14, %v2602_v44, %v2598_v27  ;;  %v2097_v56 = vadd.f32 %v6226_v10, %v6834_v51  ;;  %v2710_v39 = vrot.slane %v2098_v33, %v6231_v23  ;;  %v2115_v4 = vadd.f32 %v6226_v10, %v6846_v45 }
 0x528   : > { %v2078_v8 = vadd.f32 %v6226_v10, %v1808_v13  ;;  %v2080_v13 = vadd.f32 %v6226_v10, %v1814_v34  ;;  %v2608_v19 = vsel %vm2364_vm15, %v2607_v6, %v2603_v41  ;;  %v2702_v37 = vsel %vm2385_vm2, %v2701_v26, %v2697_v49  ;;  %v7003_v6 = vpop.xlane.xlu1 %1906  ;;  %v8442_v26 = vld [vmem:[#allocation24_spill] sm:$0xff] }
 0x529   : > { %v2789_v12 = vrot.slane %v2114_v9, %v6231_v23  ;;  %v2706_v35 = vrot.slane %v2097_v56, %v6235_v18  ;;  %v2794_v41 = vrot.slane %v2115_v4, %v6247_v38  ;;  %v8445_v9 = vld [vmem:[#allocation27_spill] sm:$0xff]  ;;  %v8447_v4 = vld [vmem:[#allocation30_spill] sm:$0xff] }
 0x52a   : > { %v2612_v14 = vrot.slane %v2078_v8, %v6381_v0  ;;  %v2622_v48 = vrot.slane %v2080_v13, %v6410_v29  ;;  %v2100_v13 = vadd.f32 %v6226_v10, %v6860_v58  ;;  %v2116_v58 = vadd.f32 %v6226_v10, %v6862_v60 }
 0x52b   : > { %v6951_v61 = vpop.xlane.xlu0 %1897  ;;  %v2711_v45 = vsel %vm2287_vm4, %v2710_v39, %v2706_v35  ;;  %v2104_v56 = vadd.f32 %v6226_v10, %v8445_v9 }
 0x52c   : > { %v2613_v59 = vsel %vm2371_vm0, %v2612_v14, %v2608_v19  ;;  %v2113_v14 = vadd.f32 %v6226_v10, %v6843_v22  ;;  %v2720_v51 = vrot.slane %v2100_v13, %v6259_v55  ;;  %v7024_v27 = vpop.xlane.xlu1 %1954  ;;  %v2799_v60 = vrot.slane %v2116_v58, %v6259_v55  ;;  %v8446_v13 = vld [vmem:[#allocation28_spill] sm:$0xff]  ;;  %v8448_v58 = vld [vmem:[#allocation29_spill] sm:$0xff] }
 0x52e   : > { %v2785_v22 = vrot.slane %v2113_v14, %v6235_v18 }
 0x52f   : > { %v1811_v52 = vpop.xlane.xlu0 %1810 }
 0x530   : > { %v2079_v2 = vadd.f32 %v6226_v10, %v1811_v52  ;;  %v7050_v14 = vpop.xlane.xlu1 %1957 }
 0x532   : > { %v2617_v11 = vrot.slane %v2079_v2, %v6395_v63  ;;  %v2101_v2 = vadd.f32 %v6226_v10, %v6850_v1 }
 0x533   : > { %v6980_v46 = vpop.xlane.xlu0 %1900 }
 0x534   : > { %v2618_v17 = vsel %vm2378_vm1, %v2617_v11, %v2613_v59  ;;  %v2790_v11 = vsel %vm2287_vm4, %v2789_v12, %v2785_v22  ;;  %v2118_v59 = vadd.f32 %v6226_v10, %v6866_v16  ;;  %v2725_v1 = vrot.slane %v2101_v2, %v6256_v53 }
 0x535   : > { %v2623_v8 = vsel %vm2385_vm2, %v2622_v48, %v2618_v17  ;;  %v2103_v48 = vadd.f32 %v6226_v10, %v6864_v20  ;;  %v2102_v17 = vadd.f32 %v6226_v10, %v8442_v26  ;;  %v2120_v20 = vadd.f32 %v6226_v10, %v8446_v13  ;;  %v8450_v13 = vld [vmem:[#allocation32_spill] sm:$0xff] }
 0x536   : > { %v2945_v57 = vsel %vm8381_vm3, %v2623_v8, %v6840_v50  ;;  %v2099_v50 = vadd.f32 %v6226_v10, %v6852_v40  ;;  %v8443_v8 = vld [vmem:[#allocation25_spill] sm:$0xff]  ;;  %v2795_v39 = vsel %vm2294_vm5, %v2794_v41, %v2790_v11  ;;  %v2105_v22 = vadd.f32 %v6226_v10, %v8448_v58 }
 0x537   : > { %v6988_v47 = vpop.xlane.xlu0 %1948  ;;  %v6991_v34 = vsel %vm8380_vm11, %v2702_v37, %v2945_v57  ;;  %v2117_v37 = vadd.f32 %v6226_v10, %v8443_v8  ;;  %v8444_v57 = vld [vmem:[#allocation26_spill] sm:$0xff]  ;;  %v2800_v12 = vsel %vm2301_vm6, %v2799_v60, %v2795_v39  ;;  %v2735_v35 = vrot.slane %v2103_v48, %v6296_v42 }
 0x538   : > { %v2715_v40 = vrot.slane %v2099_v50, %v6247_v38  ;;  %v2119_v33 = vadd.f32 %v6226_v10, %v8444_v57  ;;  %v2730_v2 = vrot.slane %v2102_v17, %v6287_v21  ;;  %v2819_v60 = vrot.slane %v2120_v20, %v6307_v28 }
 0x539   : > { %v2123_v48 = vadd.f32 %v6226_v10, %v6901_v54  ;;  %v2745_v57 = vrot.slane %v2105_v22, %v6300_v24  ;;  %v2106_v54 = vadd.f32 %v6226_v10, %v8450_v13  ;;  %vm8451_vm11 = vcmask 589312  }
 0x53a   : > { %v2716_v19 = vsel %vm2294_vm5, %v2715_v40, %v2711_v45  ;;  %v2121_v40 = vadd.f32 %v6226_v10, %v8447_v4  ;;  %v2804_v45 = vrot.slane %v2117_v37, %v6256_v53  ;;  %vm8452_vm3 = vmmov %vm8451_vm11  ;;  %v2125_v13 = vadd.f32 %v6226_v10, %v6988_v47 }
 0x53b   : > { %v6993_v3 = vpop.xlane.xlu0 %1951  ;;  %v2721_v49 = vsel %vm2301_vm6, %v2720_v51, %v2716_v19  ;;  %v2809_v51 = vrot.slane %v2118_v59, %v6287_v21  ;;  %v2814_v19 = vrot.slane %v2119_v33, %v6296_v42  ;;  %v1961_v33 = vpop.xlane.xlu1 %1960 }
 0x53c   : > { %v2726_v16 = vsel %vm2308_vm7, %v2725_v1, %v2721_v49  ;;  %v8449_v49 = vld [vmem:[#allocation31_spill] sm:$0xff]  ;;  %v2740_v1 = vrot.slane %v2104_v56, %v6307_v28  ;;  %v2805_v26 = vsel %vm2308_vm7, %v2804_v45, %v2800_v12  ;;  %v2824_v17 = vrot.slane %v2121_v40, %v6300_v24 }
 0x53d   : > { %v2122_v41 = vadd.f32 %v6226_v10, %v8449_v49  ;;  %v2731_v59 = vsel %vm2315_vm8, %v2730_v2, %v2726_v16  ;;  %v2810_v37 = vsel %vm2315_vm8, %v2809_v51, %v2805_v26  ;;  %v2834_v40 = vrot.slane %v2123_v48, %v6363_v5 }
 0x53e   : > { %v2736_v8 = vsel %vm2322_vm9, %v2735_v35, %v2731_v59  ;;  %v2815_v9 = vsel %vm2322_vm9, %v2814_v19, %v2810_v37  ;;  %v2107_v51 = vadd.f32 %v6226_v10, %v6911_v36  ;;  %v2129_v58 = vadd.f32 %v6226_v10, %v1961_v33 }
 0x53f   : > { %v6995_v62 = vpop.xlane.xlu0 %1909  ;;  %v2829_v56 = vrot.slane %v2122_v41, %v6333_v43  ;;  %v2741_v39 = vsel %vm2329_vm10, %v2740_v1, %v2736_v8  ;;  %v2820_v4 = vsel %vm2329_vm10, %v2819_v60, %v2815_v9  ;;  %v7094_v2 = vadd.f32 %v6226_v10, %v6928_v30  ;;  %v1994_v60 = vpop.xlane.xlu1 %1993 }
 0x540   : > { %v2825_v35 = vsel %vm8451_vm11, %v2824_v17, %v2820_v4  ;;  %v2108_v45 = vadd.f32 %v6226_v10, %v6951_v61  ;;  %v2750_v49 = vrot.slane %v2106_v54, %v6333_v43  ;;  %v2109_v30 = vadd.f32 %v6226_v10, %v6980_v46 }
 0x541   : > { %v2830_v19 = vsel %vm2343_vm12, %v2829_v56, %v2825_v35  ;;  %v2864_v59 = vrot.slane %v2129_v58, %v6235_v18  ;;  %v2140_v4 = vadd.f32 %v6226_v10, %v1994_v60  ;;  %v2111_v35 = vadd.f32 %v6226_v10, %v7003_v6 }
 0x542   : > { %v2835_v1 = vsel %vm2350_vm13, %v2834_v40, %v2830_v19  ;;  %v2760_v17 = vrot.slane %v2108_v45, %v6321_v15  ;;  %v2112_v40 = vadd.f32 %v6226_v10, %v6995_v62  ;;  %v2844_v62 = vrot.slane %v2125_v13, %v6355_v7 }
 0x543   : > { %v1964_v44 = vpop.xlane.xlu0 %1963  ;;  %v2918_v19 = vrot.slane %v2140_v4, %v6321_v15  ;;  %vm4222_vm11 = vcmask 1041408  }
 0x544   : > { %v2130_v20 = vadd.f32 %v6226_v10, %v1964_v44  ;;  %v2746_v44 = vsel %vm8452_vm3, %v2745_v57, %v2741_v39  ;;  %v2765_v57 = vrot.slane %v2109_v30, %v6355_v7 }
 0x546   : > { %v2868_v36 = vrot.slane %v2130_v20, %v6231_v23  ;;  %v2126_v20 = vadd.f32 %v6226_v10, %v6993_v3 }
 0x547   : > { %v6999_v32 = vpop.xlane.xlu0 %1966 }
 0x548   : > { %v2131_v12 = vadd.f32 %v6226_v10, %v6999_v32  ;;  %v2869_v18 = vsel %vm2287_vm4, %v2868_v36, %v2864_v59  ;;  %vm8453_vm4 = vmmov %vm8452_vm3 }
 0x54a   : > { %v2873_v48 = vrot.slane %v2131_v12, %v6247_v38  ;;  %v2751_v38 = vsel %vm2343_vm12, %v2750_v49, %v2746_v44  ;;  %v2780_v49 = vrot.slane %v2112_v40, %v6410_v29 }
 0x54b   : > { %v1970_v52 = vpop.xlane.xlu0 %1969 }
 0x54c   : > { %v2132_v22 = vadd.f32 %v6226_v10, %v1970_v52  ;;  %v2874_v33 = vsel %vm2294_vm5, %v2873_v48, %v2869_v18  ;;  %vm2948_vm5 = vcmask 1045509  }
 0x54e   : > { %v2878_v26 = vrot.slane %v2132_v22, %v6259_v55  ;;  %v2127_v22 = vadd.f32 %v6226_v10, %v7024_v27 }
 0x54f   : > { %v1973_v25 = vpop.xlane.xlu0 %1972 }
 0x550   : > { %v2133_v32 = vadd.f32 %v6226_v10, %v1973_v25  ;;  %v2755_v25 = vrot.slane %v2107_v51, %v6363_v5 }
 0x552   : > { %v2883_v46 = vrot.slane %v2133_v32, %v6256_v53  ;;  %v2756_v56 = vsel %vm2350_vm13, %v2755_v25, %v2751_v38 }
 0x553   : > { %v1976_v50 = vpop.xlane.xlu0 %1975 }
 0x554   : > { %v2134_v41 = vadd.f32 %v6226_v10, %v1976_v50  ;;  %v2839_v50 = vrot.slane %v7094_v2, %v6321_v15  ;;  %v2128_v15 = vadd.f32 %v6226_v10, %v7050_v14 }
 0x556   : > { %v2888_v55 = vrot.slane %v2134_v41, %v6287_v21  ;;  %v2761_v21 = vsel %vm2357_vm14, %v2760_v17, %v2756_v56  ;;  %v2840_v41 = vsel %vm2357_vm14, %v2839_v50, %v2835_v1 }
 0x557   : > { %v1979_v11 = vpop.xlane.xlu0 %1978  ;;  %v2766_v3 = vsel %vm2364_vm15, %v2765_v57, %v2761_v21 }
 0x558   : > { %v2135_v61 = vadd.f32 %v6226_v10, %v1979_v11  ;;  %v2110_v11 = vadd.f32 %v6226_v10, %v6997_v31  ;;  %v2879_v31 = vsel %vm2301_vm6, %v2878_v26, %v2874_v33  ;;  %v2854_v26 = vrot.slane %v2127_v22, %v6395_v63 }
 0x559   : > { %v2884_v39 = vsel %vm2308_vm7, %v2883_v46, %v2879_v31  ;;  %vm2950_vm6 = vcmask 1046534   ;;  %vm2952_vm7 = vcmask 1047559  }
 0x55a   : > { %v2893_v9 = vrot.slane %v2135_v61, %v6296_v42  ;;  %v2889_v47 = vsel %vm2315_vm8, %v2888_v55, %v2884_v39  ;;  %v8457_v39 = vld [vmem:[#allocation21_spill] sm:$0xff] }
 0x55b   : > { %v1982_v16 = vpop.xlane.xlu0 %1981 }
 0x55c   : > { %v2136_v23 = vadd.f32 %v6226_v10, %v1982_v16  ;;  %v1997_v16 = vpop.xlane.xlu1 %1996  ;;  %v2894_v51 = vsel %vm2322_vm9, %v2893_v9, %v2889_v47  ;;  %vm3885_vm9 = vcmask 31744  }
 0x55d   : > { %v2141_v2 = vadd.f32 %v6226_v10, %v1997_v16 }
 0x55e   : > { %v2898_v54 = vrot.slane %v2136_v23, %v6307_v28 }
 0x55f   : > { %v1985_v52 = vpop.xlane.xlu0 %1984  ;;  %v2923_v59 = vrot.slane %v2141_v2, %v6355_v7 }
 0x560   : > { %v2137_v8 = vadd.f32 %v6226_v10, %v1985_v52  ;;  %v2899_v44 = vsel %vm2329_vm10, %v2898_v54, %v2894_v51  ;;  %v2775_v52 = vrot.slane %v2111_v35, %v6395_v63  ;;  %v2006_v30 = vpop.xlane.xlu1 %2005 }
 0x561   : > { %v2144_v50 = vadd.f32 %v6226_v10, %v2006_v30 }
 0x562   : > { %v2903_v42 = vrot.slane %v2137_v8, %v6300_v24  ;;  %v2770_v24 = vrot.slane %v2110_v11, %v6381_v0  ;;  %v2859_v11 = vrot.slane %v2128_v15, %v6410_v29 }
 0x563   : > { %v1988_v37 = vpop.xlane.xlu0 %1987  ;;  %v2938_v55 = vrot.slane %v2144_v50, %v6410_v29 }
 0x564   : > { %v2138_v53 = vadd.f32 %v6226_v10, %v1988_v37  ;;  %v2904_v6 = vsel %vm8453_vm4, %v2903_v42, %v2899_v44  ;;  %v2771_v32 = vsel %vm2371_vm0, %v2770_v24, %v2766_v3 }
 0x565   : > { %v2776_v1 = vsel %vm2378_vm1, %v2775_v52, %v2771_v32 }
 0x566   : > { %v2908_v12 = vrot.slane %v2138_v53, %v6333_v43  ;;  %v2849_v43 = vrot.slane %v2126_v20, %v6381_v0  ;;  %v2781_v23 = vsel %vm2385_vm2, %v2780_v49, %v2776_v1  ;;  %v8456_v20 = vld [vmem:[#allocation20_spill] sm:$0xff] }
 0x567   : > { %v1991_v28 = vpop.xlane.xlu0 %1990  ;;  %v2949_v18 = vsel %vm2948_vm5, %v2781_v23, %v6991_v34  ;;  %v3290_v16 = vsub.s32 1, %v8456_v20  ;;  %v3357_v4 = vsub.s32 2, %v8456_v20  ;;  %v3558_v51 = vsub.s32 5, %v8456_v20 }
 0x568   : > { %v2139_v58 = vadd.f32 %v6226_v10, %v1991_v28  ;;  %v2909_v27 = vsel %vm2343_vm12, %v2908_v12, %v2904_v6  ;;  %v3424_v12 = vsub.s32 3, %v8456_v20  ;;  %v3491_v28 = vsub.s32 4, %v8456_v20 }
 0x569   : > { %v3625_v24 = vsub.s32 6, %v8456_v20  ;;  %vm8547_vm12 = vcmask 1041409  }
 0x56a   : > { %v2913_v45 = vrot.slane %v2139_v58, %v6363_v5  ;;  %v2845_v5 = vsel %vm2364_vm15, %v2844_v62, %v2840_v41  ;;  %v3692_v62 = vsub.s32 7, %v8456_v20  ;;  %v7448_v20 = vld [vmem:[%s8459_s2 + $0x148] sm:$0xff]  }
 0x56b   : > { %v2000_v36 = vpop.xlane.xlu0 %1999  ;;  %v2850_v25 = vsel %vm2371_vm0, %v2849_v43, %v2845_v5 }
 0x56c   : > { %v2914_v60 = vsel %vm2350_vm13, %v2913_v45, %v2909_v27  ;;  %v2142_v48 = vadd.f32 %v6226_v10, %v2000_v36  ;;  %v2855_v14 = vsel %vm2378_vm1, %v2854_v26, %v2850_v25  ;;  %vm8551_vm13 = vcmask 1042434  }
 0x56d   : > { %v2919_v61 = vsel %vm2357_vm14, %v2918_v19, %v2914_v60  ;;  %v2860_v57 = vsel %vm2385_vm2, %v2859_v11, %v2855_v14  ;;  %v7369_v14 = vld [vmem:[%s8459_s2 + $0x8] sm:$0xff]   ;;  %vm8552_vm14 = vcmask 261120  }
 0x56e   : > { %v2928_v17 = vrot.slane %v2142_v48, %v6381_v0  ;;  %v2924_v8 = vsel %vm2364_vm15, %v2923_v59, %v2919_v61  ;;  %v8454_v0 = vld [vmem:[#allocation23_spill] sm:$0xff]  ;;  %v2951_v9 = vsel %vm2950_vm6, %v2860_v57, %v2949_v18  ;;  %v7374_v11 = vld [vmem:[%s8459_s2 + $0x48] sm:$0xff]   ;;  %vm8553_vm15 = vcmask 1043459  }
 0x56f   : > { %v2003_v46 = vpop.xlane.xlu0 %2002  ;;  %vm2147_vm8 = vcmp.lt.s32.totalorder %v8454_v0, 16  ;;  %v7393_v0 = vld [vmem:[%s8459_s2 + $0x100] sm:$0xff]  }
 0x570   : > { %v2143_v38 = vadd.f32 %v6226_v10, %v2003_v46  ;;  %v2929_v37 = vsel %vm2371_vm0, %v2928_v17, %v2924_v8  ;;  %v4825_v46 = vld [vmem:[%s8459_s2] sm:$0xff]   ;;  %vm8554_vm0 = vcmask 1044484  }
 0x571   : > { %v7359_v8 = vld [vmem:[%s8459_s2 + $0x40] sm:$0xff]   ;;  %v4827_v57 = vunpack.c.h.bf16 %v4825_v46 }
 0x572   : > { %v2933_v7 = vrot.slane %v2143_v38, %v6395_v63  ;;  %v7364_v38 = vld [vmem:[%s8459_s2 + $0x80] sm:$0xff]  }
 0x574   : > { %v2934_v10 = vsel %vm2378_vm1, %v2933_v7, %v2929_v37  ;;  %v7388_v37 = vld [vmem:[%s8459_s2 + $0x88] sm:$0xff]  }
 0x575   : > { %v2939_v33 = vsel %vm2385_vm2, %v2938_v55, %v2934_v10  ;;  %v7383_v55 = vld [vmem:[%s8459_s2 + $0xc0] sm:$0xff]   ;;  %v4826_v10 = vunpack.c.l.bf16 %v4825_v46  ;;  %v7491_v46 = vld [vmem:[%s8459_s2 + $0x1c8] sm:$0xff]   ;;  %vm8556_vm2 = vmmov %vm8552_vm14 }
 0x576   : > { %v2953_v63 = vsel %vm2952_vm7, %v2939_v33, %v2951_v9  ;;  %v7500_v9 = vld [vmem:[%s8459_s2 + $0x110] sm:$0xff]  }
 0x577   : > { %v2955_v53 = vsel %vm2147_vm8, %v2953_v63, -1e+30  ;;  %v7400_v63 = vld [vmem:[%s8459_s2 + $0xc8] sm:$0xff]  }
 0x578   : > { %2956 = vmax.xlane.f32.xlu0 %v2955_v53 }
 0x601   : > { %v2957_v34 = vpop.xlane.xlu0 %2956 }
 0x602   : > { %v2958_v56 = vsub.f32 %v2955_v53, %v2957_v34  ;;  %v8467_v53 = vunpack.c.l.bf16 %v7359_v8 }
 0x604   : > { %v2959_v29 = vmul.f32 1.442695, %v2958_v56 }
 0x606   : > { %5341 = vpow2.f32 %v2959_v29  ;;  %v7464_v29 = vld [vmem:[%s8459_s2 + $0x90] sm:$0xff]  }
 0x607   : > { %8462 = vst [vmem:[#allocation28_spill] sm:$0xff] %v7464_v29 }
 0x613   : > { %v5342_v13 = vpop.eup %5341 }
 0x614   : > { %2961 = vadd.xlane.f32.xlu1 %v5342_v13 }
 0x69d   : > { %v2962_v31 = vpop.xlane.xlu1 %2961 }
 0x69e   : > { %5343 = vrcp.f32 %v2962_v31  ;;  %v7416_v31 = vld [vmem:[%s8459_s2 + $0x108] sm:$0xff]  }
 0x6ab   : > { %v5344_v54 = vpop.eup %5343 }
 0x6ac   : > { %v7189_v21 = vmul.f32 %v5344_v54, %v5342_v13  ;;  %v7411_v13 = vld [vmem:[%s8459_s2 + $0x140] sm:$0xff]   ;;  %v7473_v54 = vld [vmem:[%s8459_s2 + $0x188] sm:$0xff]  }
 0x6ad   : > { %8463 = vst [vmem:[#allocation30_spill] sm:$0xff] %v7473_v54 }
 0x6ae   : > { %8455 = vst [vmem:[#allocation24_spill] sm:$0xff] %v7189_v21  ;;  %v7194_v42 = vrot.slane %v7189_v21, %v8457_v39  ;;  %v7200_v40 = vrot.slane %v7189_v21, %v3290_v16  ;;  %v7205_v47 = vrot.slane %v7189_v21, %v3357_v4  ;;  %v7214_v35 = vrot.slane %v7189_v21, %v3424_v12  ;;  %v7425_v4 = vld [vmem:[%s8459_s2 + $0x180] sm:$0xff]   ;;  %v7430_v12 = vld [vmem:[%s8459_s2 + $0x10] sm:$0xff]  }
 0x6af   : > { %v7219_v3 = vrot.slane %v7189_v21, %v3491_v28  ;;  %v7229_v58 = vrot.slane %v7189_v21, %v3558_v51  ;;  %v7237_v22 = vrot.slane %v7189_v21, %v3625_v24  ;;  %v7247_v44 = vrot.slane %v7189_v21, %v3692_v62  ;;  %v7443_v16 = vld [vmem:[%s8459_s2 + $0x50] sm:$0xff]   ;;  %v7453_v24 = vld [vmem:[%s8459_s2 + $0x1c0] sm:$0xff]   ;;  %v7505_v21 = vld [vmem:[%s8459_s2 + $0x18] sm:$0xff]  }
 0x6b0   : > { %3230 = vbcast.lane.b32.xlu1 %v7194_v42, 264  ;;  %3226 = vbcast.lane.b32.xlu0 %v7194_v42, 256  ;;  %8458 = vst [vmem:[#allocation25_spill] sm:$0xff] %v7214_v35  ;;  %8461 = vst [vmem:[#allocation27_spill] sm:$0xff] %v7453_v24  ;;  %v7486_v62 = vld [vmem:[%s8459_s2 + $0xd0] sm:$0xff]   ;;  %v7520_v24 = vld [vmem:[%s8459_s2 + $0x58] sm:$0xff]  }
 0x6b1   : > { %8466 = vst [vmem:[#allocation32_spill] sm:$0xff] %v7520_v24 }
 0x6b4   : > { %3293 = vbcast.lane.b32.xlu1 %v7200_v40, 256  ;;  %3297 = vbcast.lane.b32.xlu0 %v7200_v40, 264 }
 0x6b8   : > { %3360 = vbcast.lane.b32.xlu1 %v7205_v47, 256  ;;  %3364 = vbcast.lane.b32.xlu0 %v7205_v47, 264 }
 0x6bc   : > { %3234 = vbcast.lane.b32.xlu1 %v7194_v42, 272  ;;  %3301 = vbcast.lane.b32.xlu0 %v7200_v40, 272 }
 0x6c0   : > { %3427 = vbcast.lane.b32.xlu1 %v7214_v35, 256  ;;  %3431 = vbcast.lane.b32.xlu0 %v7214_v35, 264 }
 0x6c4   : > { %3368 = vbcast.lane.b32.xlu1 %v7205_v47, 272  ;;  %3494 = vbcast.lane.b32.xlu0 %v7219_v3, 256 }
 0x6c8   : > { %3498 = vbcast.lane.b32.xlu1 %v7219_v3, 264  ;;  %3238 = vbcast.lane.b32.xlu0 %v7194_v42, 280 }
 0x6cc   : > { %3305 = vbcast.lane.b32.xlu1 %v7200_v40, 280  ;;  %3435 = vbcast.lane.b32.xlu0 %v7214_v35, 272 }
 0x6d0   : > { %3561 = vbcast.lane.b32.xlu1 %v7229_v58, 256  ;;  %3565 = vbcast.lane.b32.xlu0 %v7229_v58, 264 }
 0x6d4   : > { %3372 = vbcast.lane.b32.xlu1 %v7205_v47, 280  ;;  %3502 = vbcast.lane.b32.xlu0 %v7219_v3, 272 }
 0x6d8   : > { %3628 = vbcast.lane.b32.xlu1 %v7237_v22, 256  ;;  %3632 = vbcast.lane.b32.xlu0 %v7237_v22, 264 }
 0x6dc   : > { %3242 = vbcast.lane.b32.xlu1 %v7194_v42, 288  ;;  %3309 = vbcast.lane.b32.xlu0 %v7200_v40, 288 }
 0x6e0   : > { %3439 = vbcast.lane.b32.xlu1 %v7214_v35, 280  ;;  %3569 = vbcast.lane.b32.xlu0 %v7229_v58, 272 }
 0x6e4   : > { %3695 = vbcast.lane.b32.xlu1 %v7247_v44, 256  ;;  %3699 = vbcast.lane.b32.xlu0 %v7247_v44, 264 }
 0x6e8   : > { %3376 = vbcast.lane.b32.xlu1 %v7205_v47, 288  ;;  %3506 = vbcast.lane.b32.xlu0 %v7219_v3, 280 }
 0x6ec   : > { %3636 = vbcast.lane.b32.xlu1 %v7237_v22, 272  ;;  %3246 = vbcast.lane.b32.xlu0 %v7194_v42, 296 }
 0x6f0   : > { %3313 = vbcast.lane.b32.xlu1 %v7200_v40, 296  ;;  %3443 = vbcast.lane.b32.xlu0 %v7214_v35, 288 }
 0x6f4   : > { %3573 = vbcast.lane.b32.xlu1 %v7229_v58, 280  ;;  %3703 = vbcast.lane.b32.xlu0 %v7247_v44, 272 }
 0x6f8   : > { %3380 = vbcast.lane.b32.xlu1 %v7205_v47, 296  ;;  %3510 = vbcast.lane.b32.xlu0 %v7219_v3, 288 }
 0x6fc   : > { %3640 = vbcast.lane.b32.xlu1 %v7237_v22, 280  ;;  %3250 = vbcast.lane.b32.xlu0 %v7194_v42, 304 }
 0x700   : > { %3317 = vbcast.lane.b32.xlu1 %v7200_v40, 304  ;;  %3447 = vbcast.lane.b32.xlu0 %v7214_v35, 296 }
 0x704   : > { %3577 = vbcast.lane.b32.xlu1 %v7229_v58, 288  ;;  %3707 = vbcast.lane.b32.xlu0 %v7247_v44, 280 }
 0x708   : > { %3384 = vbcast.lane.b32.xlu1 %v7205_v47, 304  ;;  %3514 = vbcast.lane.b32.xlu0 %v7219_v3, 296 }
 0x70c   : > { %3644 = vbcast.lane.b32.xlu1 %v7237_v22, 288  ;;  %3254 = vbcast.lane.b32.xlu0 %v7194_v42, 312 }
 0x710   : > { %3321 = vbcast.lane.b32.xlu1 %v7200_v40, 312  ;;  %3451 = vbcast.lane.b32.xlu0 %v7214_v35, 304 }
 0x714   : > { %3581 = vbcast.lane.b32.xlu1 %v7229_v58, 296  ;;  %3711 = vbcast.lane.b32.xlu0 %v7247_v44, 288 }
 0x718   : > { %3388 = vbcast.lane.b32.xlu1 %v7205_v47, 312  ;;  %3518 = vbcast.lane.b32.xlu0 %v7219_v3, 304 }
 0x71c   : > { %3648 = vbcast.lane.b32.xlu1 %v7237_v22, 296  ;;  %3258 = vbcast.lane.b32.xlu0 %v7194_v42, 320 }
 0x720   : > { %3325 = vbcast.lane.b32.xlu1 %v7200_v40, 320  ;;  %3455 = vbcast.lane.b32.xlu0 %v7214_v35, 312 }
 0x722   : > { %v7281_v43 = vpop.permute.xlu1 %3230  ;;  %v7283_v2 = vpop.permute.xlu0 %3226 }
 0x723   : > { %v3758_v39 = vmul.f32 %v4827_v57, %v7281_v43  ;;  %v3757_v43 = vmul.f32 %v4826_v10, %v7283_v2 }
 0x724   : > { %3585 = vbcast.lane.b32.xlu1 %v7229_v58, 304  ;;  %3715 = vbcast.lane.b32.xlu0 %v7247_v44, 296 }
 0x725   : > { %v3887_v2 = vsel %vm3885_vm9, %v3758_v39, 0.0  ;;  %v3886_v54 = vsel %vm3885_vm9, %v3757_v43, 0.0  ;;  %v8470_v39 = vunpack.c.h.bf16 %v7359_v8  ;;  %v8474_v43 = vunpack.c.l.bf16 %v7369_v14 }
 0x726   : > { %v7287_v6 = vpop.permute.xlu1 %3293  ;;  %v7289_v45 = vpop.permute.xlu0 %3297 }
 0x727   : > { %v3773_v10 = vmul.f32 %v8467_v53, %v7287_v6  ;;  %v3774_v29 = vmul.f32 %v8470_v39, %v7289_v45  ;;  %v8471_v6 = vunpack.c.l.bf16 %v7364_v38  ;;  %v8475_v45 = vunpack.c.l.bf16 %v7374_v11 }
 0x728   : > { %3392 = vbcast.lane.b32.xlu1 %v7205_v47, 320  ;;  %3522 = vbcast.lane.b32.xlu0 %v7219_v3, 312  ;;  %v8477_v39 = vunpack.c.h.bf16 %v7383_v55 }
 0x72a   : > { %v7293_v32 = vpop.permute.xlu1 %3360  ;;  %v7295_v19 = vpop.permute.xlu0 %3364 }
 0x72b   : > { %v3789_v53 = vmul.f32 %v8471_v6, %v7293_v32 }
 0x72c   : > { %3652 = vbcast.lane.b32.xlu1 %v7237_v22, 304  ;;  %3262 = vbcast.lane.b32.xlu0 %v7194_v42, 328 }
 0x72e   : > { %v7299_v49 = vpop.permute.xlu1 %3234  ;;  %v7301_v27 = vpop.permute.xlu0 %3301 }
 0x72f   : > { %v3775_v8 = vmul.f32 %v8475_v45, %v7301_v27  ;;  %v3923_v45 = vsel %vm3885_vm9, %v3773_v10, 0.0 }
 0x730   : > { %3329 = vbcast.lane.b32.xlu1 %v7200_v40, 328  ;;  %3459 = vbcast.lane.b32.xlu0 %v7214_v35, 320 }
 0x731   : > { %v3926_v10 = vsel %vm3885_vm9, %v3775_v8, 0.0 }
 0x732   : > { %v7305_v36 = vpop.permute.xlu1 %3427  ;;  %v7307_v41 = vpop.permute.xlu0 %3431 }
 0x734   : > { %3589 = vbcast.lane.b32.xlu1 %v7229_v58, 312  ;;  %3719 = vbcast.lane.b32.xlu0 %v7247_v44, 304 }
 0x736   : > { %v7311_v52 = vpop.permute.xlu1 %3368  ;;  %v7313_v30 = vpop.permute.xlu0 %3494 }
 0x738   : > { %3396 = vbcast.lane.b32.xlu1 %v7205_v47, 328  ;;  %3526 = vbcast.lane.b32.xlu0 %v7219_v3, 320 }
 0x73a   : > { %v7317_v60 = vpop.permute.xlu1 %3498  ;;  %v7319_v48 = vpop.permute.xlu0 %3238 }
 0x73c   : > { %3656 = vbcast.lane.b32.xlu1 %v7237_v22, 312  ;;  %3266 = vbcast.lane.b32.xlu0 %v7194_v42, 336 }
 0x73e   : > { %v7323_v5 = vpop.permute.xlu1 %3305  ;;  %v7325_v61 = vpop.permute.xlu0 %3435 }
 0x740   : > { %3333 = vbcast.lane.b32.xlu1 %v7200_v40, 336  ;;  %3463 = vbcast.lane.b32.xlu0 %v7214_v35, 328 }
 0x742   : > { %v7329_v15 = vpop.permute.xlu1 %3561  ;;  %v7331_v25 = vpop.permute.xlu0 %3565 }
 0x744   : > { %3593 = vbcast.lane.b32.xlu1 %v7229_v58, 320  ;;  %3723 = vbcast.lane.b32.xlu0 %v7247_v44, 312 }
 0x746   : > { %v7335_v59 = vpop.permute.xlu1 %3372  ;;  %v7337_v1 = vpop.permute.xlu0 %3502 }
 0x748   : > { %3400 = vbcast.lane.b32.xlu1 %v7205_v47, 336  ;;  %3530 = vbcast.lane.b32.xlu0 %v7219_v3, 328 }
 0x74a   : > { %v7341_v26 = vpop.permute.xlu1 %3628  ;;  %v7343_v23 = vpop.permute.xlu0 %3632 }
 0x74c   : > { %3660 = vbcast.lane.b32.xlu1 %v7237_v22, 320  ;;  %3270 = vbcast.lane.b32.xlu0 %v7194_v42, 344 }
 0x74e   : > { %v7347_v50 = vpop.permute.xlu1 %3242  ;;  %v7349_v17 = vpop.permute.xlu0 %3309 }
 0x750   : > { %3337 = vbcast.lane.b32.xlu1 %v7200_v40, 344  ;;  %3467 = vbcast.lane.b32.xlu0 %v7214_v35, 336 }
 0x752   : > { %v7376_v7 = vpop.permute.xlu1 %3439  ;;  %v7378_v18 = vpop.permute.xlu0 %3569 }
 0x754   : > { %3597 = vbcast.lane.b32.xlu1 %v7229_v58, 328  ;;  %3727 = vbcast.lane.b32.xlu0 %v7247_v44, 320 }
 0x756   : > { %v7432_v28 = vpop.permute.xlu1 %3695  ;;  %v7434_v51 = vpop.permute.xlu0 %3699 }
 0x757   : > { %8460 = vst [vmem:[#allocation26_spill] sm:$0xff] %v7434_v51  ;;  %v7535_v51 = vld [vmem:[%s8459_s2 + $0x150] sm:$0xff]  }
 0x758   : > { %3404 = vbcast.lane.b32.xlu1 %v7205_v47, 344  ;;  %3534 = vbcast.lane.b32.xlu0 %v7219_v3, 336 }
 0x75a   : > { %v7479_v56 = vpop.permute.xlu1 %3376  ;;  %v7481_v34 = vpop.permute.xlu0 %3506 }
 0x75b   : > { %8464 = vst [vmem:[#allocation29_spill] sm:$0xff] %v7479_v56  ;;  %8465 = vst [vmem:[#allocation31_spill] sm:$0xff] %v7481_v34  ;;  %v8472_v34 = vunpack.c.h.bf16 %v7364_v38  ;;  %v7550_v56 = vld [vmem:[%s8459_s2 + $0x98] sm:$0xff]   ;;  %v8476_v38 = vunpack.c.l.bf16 %v7383_v55  ;;  %v8478_v55 = vunpack.c.l.bf16 %v7388_v37 }
 0x75c   : > { %3664 = vbcast.lane.b32.xlu1 %v7237_v22, 328  ;;  %3274 = vbcast.lane.b32.xlu0 %v7194_v42, 352  ;;  %8473 = vst [vmem:[#allocation21_spill] sm:$0xff] %v7550_v56 }
 0x75e   : > { %v7526_v33 = vpop.permute.xlu1 %3636  ;;  %v7528_v57 = vpop.permute.xlu0 %3246 }
 0x75f   : > { %8468 = vst [vmem:[#allocation23_spill] sm:$0xff] %v7526_v33  ;;  %8469 = vst [vmem:[#allocation20_spill] sm:$0xff] %v7528_v57  ;;  %v3790_v57 = vmul.f32 %v8472_v34, %v7295_v19  ;;  %v3759_v33 = vmul.f32 %v8474_v43, %v7299_v49  ;;  %v3805_v34 = vmul.f32 %v8476_v38, %v7305_v36  ;;  %v3924_v36 = vsel %vm3885_vm9, %v3774_v29, 0.0 }
 0x760   : > { %3341 = vbcast.lane.b32.xlu1 %v7200_v40, 352  ;;  %3471 = vbcast.lane.b32.xlu0 %v7214_v35, 344  ;;  %v3806_v49 = vmul.f32 %v8477_v39, %v7307_v41  ;;  %v3888_v43 = vadd.f32 %v3887_v2, %v3886_v54  ;;  %v3960_v38 = vsel %vm3885_vm9, %v3789_v53, 0.0  ;;  %v3791_v39 = vmul.f32 %v8478_v55, %v7311_v52  ;;  %v7584_v54 = vld [vmem:[%s8459_s2 + $0x190] sm:$0xff]  }
 0x761   : > { %v3961_v41 = vsel %vm3885_vm9, %v3790_v57, 0.0  ;;  %v3889_v2 = vsel %vm3885_vm9, %v3759_v33, 0.0  ;;  %v8479_v29 = vunpack.c.h.bf16 %v7393_v0  ;;  %v8480_v57 = vunpack.c.h.bf16 %v7369_v14 }
 0x762   : > { %v7571_v35 = vpop.permute.xlu1 %3313  ;;  %v3444_v32 = vpop.permute.xlu0 %3443  ;;  %v3997_v52 = vsel %vm3885_vm9, %v3805_v34, 0.0  ;;  %v3998_v55 = vsel %vm3885_vm9, %v3806_v49, 0.0  ;;  %v8481_v33 = vunpack.c.h.bf16 %v7374_v11  ;;  %v8482_v19 = vunpack.c.l.bf16 %v7400_v63 }
 0x763   : > { %v3822_v24 = vmul.f32 %v8479_v29, %v7317_v60  ;;  %v3760_v53 = vmul.f32 %v8480_v57, %v7319_v48  ;;  %v3925_v29 = vadd.f32 %v3924_v36, %v3923_v45  ;;  %v3962_v27 = vadd.f32 %v3961_v41, %v3960_v38 }
 0x764   : > { %3601 = vbcast.lane.b32.xlu1 %v7229_v58, 336  ;;  %3731 = vbcast.lane.b32.xlu0 %v7247_v44, 328  ;;  %v3776_v8 = vmul.f32 %v8481_v33, %v7323_v5  ;;  %v3807_v60 = vmul.f32 %v8482_v19, %v7325_v61  ;;  %v8483_v48 = vunpack.c.l.bf16 %v7393_v0  ;;  %v5026_v34 = vunpack.c.l.bf16 %v7584_v54 }
 0x765   : > { %v3890_v56 = vadd.f32 %v3889_v2, %v3888_v43  ;;  %v3963_v49 = vsel %vm3885_vm9, %v3791_v39, 0.0  ;;  %v8484_v5 = vunpack.c.l.bf16 %v7411_v13  ;;  %v8485_v61 = vunpack.c.h.bf16 %v7411_v13 }
 0x766   : > { %v3821_v14 = vmul.f32 %v8483_v48, %v7313_v30  ;;  %v3574_v57 = vpop.permute.xlu1 %3573  ;;  %v3704_v6 = vpop.permute.xlu0 %3703  ;;  %v3927_v45 = vadd.f32 %v3926_v10, %v3925_v29  ;;  %v3999_v36 = vadd.f32 %v3998_v55, %v3997_v52  ;;  %v4035_v0 = vsel %vm3885_vm9, %v3822_v24, 0.0 }
 0x767   : > { %v3837_v11 = vmul.f32 %v8484_v5, %v7329_v15  ;;  %v3838_v19 = vmul.f32 %v8485_v61, %v7331_v25  ;;  %v3891_v30 = vsel %vm3885_vm9, %v3760_v53, 0.0  ;;  %v3928_v43 = vsel %vm3885_vm9, %v3776_v8, 0.0 }
 0x768   : > { %3408 = vbcast.lane.b32.xlu1 %v7205_v47, 352  ;;  %3538 = vbcast.lane.b32.xlu0 %v7219_v3, 344  ;;  %v4000_v38 = vsel %vm3885_vm9, %v3807_v60, 0.0  ;;  %v8486_v15 = vunpack.c.h.bf16 %v7388_v37  ;;  %v8487_v25 = vunpack.c.l.bf16 %v7416_v31  ;;  %v3964_v39 = vadd.f32 %v3963_v49, %v3962_v27 }
 0x769   : > { %v4034_v24 = vsel %vm3885_vm9, %v3821_v14, 0.0  ;;  %v8488_v2 = vunpack.c.l.bf16 %v7425_v4  ;;  %v8489_v53 = vunpack.c.h.bf16 %v7425_v4  ;;  %v4072_v37 = vsel %vm3885_vm9, %v3838_v19, 0.0 }
 0x76a   : > { %v3792_v41 = vmul.f32 %v8486_v15, %v7335_v59  ;;  %v3823_v13 = vmul.f32 %v8487_v25, %v7337_v1  ;;  %v3381_v55 = vpop.permute.xlu1 %3380  ;;  %v3511_v33 = vpop.permute.xlu0 %3510  ;;  %v4036_v8 = vadd.f32 %v4035_v0, %v4034_v24  ;;  %v4071_v59 = vsel %vm3885_vm9, %v3837_v11, 0.0  ;;  %v8497_v15 = vld [vmem:[#allocation26_spill] sm:$0xff] }
 0x76b   : > { %v3853_v10 = vmul.f32 %v8488_v2, %v7341_v26  ;;  %v3854_v52 = vmul.f32 %v8489_v53, %v7343_v23  ;;  %v8490_v1 = vunpack.c.h.bf16 %v7400_v63  ;;  %v7639_v60 = vadd.f32 %v3891_v30, %v3890_v56  ;;  %v8499_v2 = vld [vmem:[#allocation29_spill] sm:$0xff] }
 0x76c   : > { %v7641_v29 = vadd.f32 %v3928_v43, %v3927_v45  ;;  %v4001_v26 = vadd.f32 %v4000_v38, %v3999_v36  ;;  %3668 = vbcast.lane.b32.xlu1 %v7237_v22, 336  ;;  %3278 = vbcast.lane.b32.xlu0 %v7194_v42, 360  ;;  %v4839_v23 = vunpack.c.h.bf16 %v7505_v21  ;;  %v3965_v4 = vsel %vm3885_vm9, %v3792_v41, 0.0  ;;  %v8495_v43 = vld [vmem:[#allocation27_spill] sm:$0xff] }
 0x76d   : > { %v3808_v27 = vmul.f32 %v8490_v1, %v7376_v7  ;;  %v4037_v48 = vsel %vm3885_vm9, %v3823_v13, 0.0  ;;  %v8491_v14 = vunpack.c.l.bf16 %v7448_v20  ;;  %v8492_v7 = vunpack.c.l.bf16 %v7486_v62 }
 0x76e   : > { %v4073_v49 = vadd.f32 %v4072_v37, %v4071_v59  ;;  %v4108_v5 = vsel %vm3885_vm9, %v3853_v10, 0.0  ;;  %v4109_v11 = vsel %vm3885_vm9, %v3854_v52, 0.0  ;;  %v8493_v61 = vunpack.c.l.bf16 %v7430_v12  ;;  %v3641_v45 = vpop.permute.xlu1 %3640  ;;  %v3251_v36 = vpop.permute.xlu0 %3250  ;;  %v8502_v52 = vld [vmem:[#allocation25_spill] sm:$0xff] }
 0x76f   : > { %v3839_v63 = vmul.f32 %v8491_v14, %v7378_v18  ;;  %v3809_v56 = vmul.f32 %v8492_v7, %v3444_v32  ;;  %v8494_v0 = vunpack.c.l.bf16 %v7443_v16  ;;  %v4002_v18 = vsel %vm3885_vm9, %v3808_v27, 0.0  ;;  %v8506_v7 = vld [vmem:[#allocation31_spill] sm:$0xff] }
 0x770   : > { %v3761_v19 = vmul.f32 %v8493_v61, %v7347_v50  ;;  %v8496_v32 = vunpack.c.l.bf16 %v8495_v43  ;;  %v8498_v41 = vunpack.c.h.bf16 %v8495_v43  ;;  %v3966_v13 = vadd.f32 %v3965_v4, %v3964_v39  ;;  %v8500_v50 = vld [vmem:[#allocation28_spill] sm:$0xff]  ;;  %3345 = vbcast.lane.b32.xlu1 %v7200_v40, 360  ;;  %3475 = vbcast.lane.b32.xlu0 %v8502_v52, 352 }
 0x771   : > { %v3777_v30 = vmul.f32 %v8494_v0, %v7349_v17  ;;  %v4038_v24 = vadd.f32 %v4037_v48, %v4036_v8  ;;  %v8501_v10 = vunpack.c.l.bf16 %v8500_v50  ;;  %v8503_v17 = vld [vmem:[#allocation32_spill] sm:$0xff]  ;;  %v4074_v37 = vsel %vm3885_vm9, %v3839_v63, 0.0 }
 0x772   : > { %v3869_v38 = vmul.f32 %v8496_v32, %v7432_v28  ;;  %v3870_v25 = vmul.f32 %v8498_v41, %v8497_v15  ;;  %v4871_v59 = vunpack.c.h.bf16 %v8503_v17  ;;  %v4004_v28 = vsel %vm3885_vm9, %v3809_v56, 0.0  ;;  %v3318_v43 = vpop.permute.xlu1 %3317  ;;  %v3448_v32 = vpop.permute.xlu0 %3447 }
 0x773   : > { %v3793_v53 = vmul.f32 %v8501_v10, %v8499_v2  ;;  %v8504_v1 = vunpack.c.h.bf16 %v7448_v20  ;;  %v8505_v39 = vunpack.c.l.bf16 %v7491_v46  ;;  %v4110_v4 = vadd.f32 %v4109_v11, %v4108_v5  ;;  %v8512_v2 = vld [vmem:[#allocation30_spill] sm:$0xff] }
 0x774   : > { %v3893_v48 = vsel %vm3885_vm9, %v3761_v19, 0.0  ;;  %v4003_v14 = vadd.f32 %v4002_v18, %v4001_v26  ;;  %v8507_v61 = vunpack.c.h.bf16 %v7416_v31  ;;  %v7685_v63 = vsel %vm3885_vm9, %v3777_v30, 0.0  ;;  %3605 = vbcast.lane.b32.xlu1 %v7229_v58, 344  ;;  %3735 = vbcast.lane.b32.xlu0 %v7247_v44, 336 }
 0x775   : > { %v3840_v27 = vmul.f32 %v8504_v1, %v3574_v57  ;;  %v3871_v8 = vmul.f32 %v8505_v39, %v3704_v6  ;;  %v4145_v56 = vsel %vm3885_vm9, %v3869_v38, 0.0  ;;  %v4146_v20 = vsel %vm3885_vm9, %v3870_v25, 0.0  ;;  %v8511_v25 = vld [vmem:[#allocation23_spill] sm:$0xff]  ;;  %v8514_v1 = vld [vmem:[#allocation20_spill] sm:$0xff] }
 0x776   : > { %v3824_v0 = vmul.f32 %v8507_v61, %v8506_v7  ;;  %v8508_v57 = vunpack.c.h.bf16 %v7486_v62  ;;  %v4075_v5 = vadd.f32 %v4074_v37, %v4073_v49  ;;  %v3967_v11 = vsel %vm3885_vm9, %v3793_v53, 0.0  ;;  %v3578_v53 = vpop.permute.xlu1 %3577  ;;  %v3708_v37 = vpop.permute.xlu0 %3707 }
 0x777   : > { %v4005_v26 = vadd.f32 %v4004_v28, %v4003_v14  ;;  %v8509_v19 = vunpack.c.h.bf16 %v8500_v50  ;;  %v4076_v30 = vsel %vm3885_vm9, %v3840_v27, 0.0  ;;  %v4148_v18 = vsel %vm3885_vm9, %v3871_v8, 0.0 }
 0x778   : > { %v3810_v6 = vmul.f32 %v8508_v57, %v3448_v32  ;;  %v8510_v38 = vunpack.c.l.bf16 %v7500_v9  ;;  %v4147_v49 = vadd.f32 %v4146_v20, %v4145_v56  ;;  %v4039_v41 = vsel %vm3885_vm9, %v3824_v0, 0.0  ;;  %3412 = vbcast.lane.b32.xlu1 %v7205_v47, 360  ;;  %3542 = vbcast.lane.b32.xlu0 %v7219_v3, 352 }
 0x779   : > { %v3794_v31 = vmul.f32 %v8509_v19, %v3381_v55  ;;  %v8513_v50 = vunpack.c.l.bf16 %v8512_v2  ;;  %v3968_v28 = vadd.f32 %v3967_v11, %v3966_v13  ;;  %v8515_v27 = vunpack.c.h.bf16 %v7430_v12 }
 0x77a   : > { %v3825_v15 = vmul.f32 %v8510_v38, %v3511_v33  ;;  %v4006_v62 = vsel %vm3885_vm9, %v3810_v6, 0.0  ;;  %v8516_v33 = vunpack.c.l.bf16 %v7535_v51  ;;  %v8517_v14 = vunpack.c.h.bf16 %v7491_v46 }
 0x77b   : > { %v3855_v55 = vmul.f32 %v8513_v50, %v8511_v25  ;;  %v7705_v10 = vadd.f32 %v4006_v62, %v4005_v26  ;;  %v3762_v39 = vmul.f32 %v8515_v27, %v8514_v1  ;;  %v4077_v61 = vadd.f32 %v4076_v30, %v4075_v5 }
 0x77c   : > { %v3841_v8 = vmul.f32 %v8516_v33, %v3578_v53  ;;  %v3872_v7 = vmul.f32 %v8517_v14, %v3708_v37  ;;  %v4149_v0 = vadd.f32 %v4148_v18, %v4147_v49  ;;  %v3969_v32 = vsel %vm3885_vm9, %v3794_v31, 0.0  ;;  %v3515_v31 = vpop.permute.xlu0 %3514  ;;  %3672 = vbcast.lane.b32.xlu1 %v7237_v22, 344  ;;  %3282 = vbcast.lane.b32.xlu0 %v7194_v42, 368 }
 0x77d   : > { %v8518_v56 = vunpack.c.h.bf16 %v8512_v2  ;;  %v4041_v12 = vsel %vm3885_vm9, %v3825_v15, 0.0  ;;  %v8519_v13 = vunpack.c.l.bf16 %v7505_v21  ;;  %v4040_v5 = vadd.f32 %v4039_v41, %v4038_v24 }
 0x77e   : > { %v4078_v6 = vsel %vm3885_vm9, %v3841_v8, 0.0  ;;  %v4150_v46 = vsel %vm3885_vm9, %v3872_v7, 0.0  ;;  %v4111_v11 = vsel %vm3885_vm9, %v3855_v55, 0.0  ;;  %v3895_v30 = vsel %vm3885_vm9, %v3762_v39, 0.0 }
 0x77f   : > { %v3856_v20 = vmul.f32 %v8518_v56, %v3641_v45  ;;  %v3763_v57 = vmul.f32 %v8519_v13, %v3251_v36  ;;  %v7725_v26 = vadd.f32 %v4078_v6, %v4077_v61  ;;  %v7727_v19 = vadd.f32 %v4150_v46, %v4149_v0  ;;  %v3385_v45 = vpop.permute.xlu1 %3384  ;;  %v8521_v36 = vld [vmem:[#allocation21_spill] sm:$0xff] }
 0x780   : > { %v8520_v18 = vunpack.c.h.bf16 %v7443_v16  ;;  %v8522_v15 = vunpack.c.l.bf16 %v8521_v36  ;;  %v8523_v49 = vunpack.c.h.bf16 %v7500_v9  ;;  %v3894_v41 = vadd.f32 %v3893_v48, %v7639_v60  ;;  %v3255_v39 = vpop.permute.xlu0 %3254  ;;  %3349 = vbcast.lane.b32.xlu1 %v7200_v40, 368  ;;  %3479 = vbcast.lane.b32.xlu0 %v8502_v52, 360  ;;  %v7764_v0 = vld [vmem:[%s8459_s2 + $0x1d0] sm:$0xff]  }
 0x781   : > { %v3970_v25 = vadd.f32 %v3969_v32, %v3968_v28  ;;  %v4042_v2 = vadd.f32 %v4041_v12, %v4040_v5  ;;  %v4113_v50 = vsel %vm3885_vm9, %v3856_v20, 0.0  ;;  %v3897_v16 = vsel %vm3885_vm9, %v3763_v57, 0.0  ;;  %v7778_v5 = vld [vmem:[%s8459_s2 + $0x118] sm:$0xff]  }
 0x782   : > { %v3778_v38 = vmul.f32 %v8520_v18, %v7571_v35  ;;  %v3795_v62 = vmul.f32 %v8522_v15, %v3385_v45  ;;  %v3826_v24 = vmul.f32 %v8523_v49, %v3515_v31  ;;  %v7744_v35 = vld [vmem:[%s8459_s2 + $0xd8] sm:$0xff]   ;;  %v8524_v9 = vunpack.c.l.bf16 %v8503_v17 }
 0x783   : > { %v4112_v53 = vadd.f32 %v4111_v11, %v4110_v4  ;;  %v3896_v37 = vadd.f32 %v3895_v30, %v3894_v41  ;;  %v3645_v27 = vpop.permute.xlu1 %3644  ;;  %v3764_v14 = vmul.f32 %v4839_v23, %v3255_v39  ;;  %v3931_v7 = vadd.f32 %v7685_v63, %v7641_v29 }
 0x784   : > { %v3779_v55 = vmul.f32 %v8524_v9, %v3318_v43  ;;  %v3971_v60 = vsel %vm3885_vm9, %v3795_v62, 0.0  ;;  %v4043_v48 = vsel %vm3885_vm9, %v3826_v24, 0.0  ;;  %v3932_v33 = vsel %vm3885_vm9, %v3778_v38, 0.0  ;;  %v3452_v20 = vpop.permute.xlu0 %3451  ;;  %3609 = vbcast.lane.b32.xlu1 %v7229_v58, 352  ;;  %3739 = vbcast.lane.b32.xlu0 %v7247_v44, 344  ;;  %v7790_v62 = vld [vmem:[%s8459_s2 + $0x20] sm:$0xff]  }
 0x785   : > { %v3972_v28 = vadd.f32 %v3971_v60, %v3970_v25  ;;  %v4044_v1 = vadd.f32 %v4043_v48, %v4042_v2  ;;  %v3857_v8 = vmul.f32 %v5026_v34, %v3645_v27  ;;  %v4934_v43 = vunpack.c.l.bf16 %v7744_v35 }
 0x786   : > { %v4114_v61 = vadd.f32 %v4113_v50, %v4112_v53  ;;  %v3898_v4 = vadd.f32 %v3897_v16, %v3896_v37  ;;  %v3934_v34 = vsel %vm3885_vm9, %v3779_v55, 0.0  ;;  %v3899_v23 = vsel %vm3885_vm9, %v3764_v14, 0.0  ;;  %v7803_v55 = vld [vmem:[%s8459_s2 + $0x60] sm:$0xff]  }
 0x787   : > { %v4115_v21 = vsel %vm3885_vm9, %v3857_v8, 0.0  ;;  %v3933_v32 = vadd.f32 %v3932_v33, %v3931_v7  ;;  %v3322_v63 = vpop.permute.xlu1 %3321  ;;  %v3811_v13 = vmul.f32 %v4934_v43, %v3452_v20  ;;  %v4995_v57 = vunpack.c.h.bf16 %v7535_v51 }
 0x788   : > { %v4116_v56 = vadd.f32 %v4115_v21, %v4114_v61  ;;  %v3900_v29 = vadd.f32 %v3899_v23, %v3898_v4  ;;  %v3780_v12 = vmul.f32 %v4871_v59, %v3322_v63  ;;  %v5058_v6 = vunpack.c.l.bf16 %v7764_v0  ;;  %v3712_v31 = vpop.permute.xlu0 %3711  ;;  %3416 = vbcast.lane.b32.xlu1 %v7205_v47, 368  ;;  %3546 = vbcast.lane.b32.xlu0 %v7219_v3, 360 }
 0x789   : > { %v3935_v46 = vadd.f32 %v3934_v34, %v3933_v32  ;;  %v4008_v17 = vsel %vm3885_vm9, %v3811_v13, 0.0  ;;  %v4903_v38 = vunpack.c.h.bf16 %v8521_v36  ;;  %v4966_v15 = vunpack.c.l.bf16 %v7778_v5  ;;  %v7825_v34 = vld [vmem:[%s8459_s2 + $0xa0] sm:$0xff]  }
 0x78a   : > { %v3936_v11 = vsel %vm3885_vm9, %v3780_v12, 0.0  ;;  %v4009_v45 = vadd.f32 %v4008_v17, %v7705_v10  ;;  %v3873_v18 = vmul.f32 %v5058_v6, %v3712_v31  ;;  %v5027_v16 = vunpack.c.h.bf16 %v7584_v54 }
 0x78b   : > { %v3937_v59 = vadd.f32 %v3936_v11, %v3935_v46  ;;  %v3582_v51 = vpop.permute.xlu1 %3581  ;;  %v4842_v9 = vunpack.c.l.bf16 %v7790_v62  ;;  %v4874_v39 = vunpack.c.l.bf16 %v7803_v55  ;;  %v4935_v33 = vunpack.c.h.bf16 %v7744_v35 }
 0x78c   : > { %v3842_v30 = vmul.f32 %v4995_v57, %v3582_v51  ;;  %v4152_v10 = vsel %vm3885_vm9, %v3873_v18, 0.0  ;;  %v3519_v25 = vpop.permute.xlu0 %3518  ;;  %3676 = vbcast.lane.b32.xlu1 %v7237_v22, 352  ;;  %3286 = vbcast.lane.b32.xlu0 %v7194_v42, 376  ;;  %v7814_v42 = vld [vmem:[%s8459_s2 + $0x158] sm:$0xff]   ;;  %v4967_v13 = vunpack.c.h.bf16 %v7778_v5 }
 0x78d   : > { %v4153_v41 = vadd.f32 %v4152_v10, %v7727_v19  ;;  %v3827_v50 = vmul.f32 %v4966_v15, %v3519_v25  ;;  %v4998_v35 = vunpack.c.l.bf16 %v7814_v42  ;;  %v7836_v57 = vld [vmem:[%s8459_s2 + $0x198] sm:$0xff]  }
 0x78e   : > { %v4080_v49 = vsel %vm3885_vm9, %v3842_v30, 0.0  ;;  %v5030_v5 = vunpack.c.l.bf16 %v7836_v57  ;;  %v7847_v30 = vld [vmem:[%s8459_s2 + $0xe0] sm:$0xff]  }
 0x78f   : > { %v4081_v24 = vadd.f32 %v4080_v49, %v7725_v26  ;;  %v3389_v36 = vpop.permute.xlu1 %3388  ;;  %v4045_v19 = vsel %vm3885_vm9, %v3827_v50, 0.0  ;;  %v4938_v25 = vunpack.c.l.bf16 %v7847_v30 }
 0x790   : > { %v3796_v2 = vmul.f32 %v4903_v38, %v3389_v36  ;;  %v4046_v48 = vadd.f32 %v4045_v19, %v4044_v1  ;;  %v3259_v37 = vpop.permute.xlu0 %3258  ;;  %3353 = vbcast.lane.b32.xlu1 %v7200_v40, 376  ;;  %3483 = vbcast.lane.b32.xlu0 %v8502_v52, 368  ;;  %v5059_v40 = vunpack.c.h.bf16 %v7764_v0  ;;  %v4906_v0 = vunpack.c.l.bf16 %v7825_v34 }
 0x791   : > { %v3765_v27 = vmul.f32 %v4842_v9, %v3259_v37  ;;  %v7869_v37 = vld [vmem:[%s8459_s2 + $0x120] sm:$0xff]  }
 0x792   : > { %v3973_v26 = vsel %vm3885_vm9, %v3796_v2, 0.0 }
 0x793   : > { %v3974_v60 = vadd.f32 %v3973_v26, %v3972_v28  ;;  %v3649_v53 = vpop.permute.xlu1 %3648  ;;  %v3901_v1 = vsel %vm3885_vm9, %v3765_v27, 0.0 }
 0x794   : > { %v3858_v54 = vmul.f32 %v5027_v16, %v3649_v53  ;;  %v3902_v14 = vadd.f32 %v3901_v1, %v3900_v29  ;;  %v3456_v7 = vpop.permute.xlu0 %3455  ;;  %3613 = vbcast.lane.b32.xlu1 %v7229_v58, 360  ;;  %3743 = vbcast.lane.b32.xlu0 %v7247_v44, 352  ;;  %v4907_v1 = vunpack.c.h.bf16 %v7825_v34 }
 0x795   : > { %v3812_v4 = vmul.f32 %v4935_v33, %v3456_v7  ;;  %v4327_v7 = vstv %s5445_s29 }
 0x796   : > { %v4117_v28 = vsel %vm3885_vm9, %v3858_v54, 0.0 }
 0x797   : > { %v4118_v8 = vadd.f32 %v4117_v28, %v4116_v56  ;;  %v3326_v43 = vpop.permute.xlu1 %3325  ;;  %v4010_v23 = vsel %vm3885_vm9, %v3812_v4, 0.0 }
 0x798   : > { %v3781_v61 = vmul.f32 %v4874_v39, %v3326_v43  ;;  %v4011_v56 = vadd.f32 %v4010_v23, %v4009_v45  ;;  %v3716_v63 = vpop.permute.xlu0 %3715  ;;  %3420 = vbcast.lane.b32.xlu1 %v7205_v47, 376  ;;  %3550 = vbcast.lane.b32.xlu0 %v7219_v3, 368  ;;  %v4843_v47 = vunpack.c.h.bf16 %v7790_v62  ;;  %v4875_v62 = vunpack.c.h.bf16 %v7803_v55  ;;  %v4326_v43 = vld [vmem:[%s8351_s4] sm:$0xff] }
 0x799   : > { %v3874_v12 = vmul.f32 %v5059_v40, %v3716_v63  ;;  %vm4328_vm10 = vcmp.gt.s32.totalorder %v4326_v43, %v4327_v7  ;;  %v7895_v63 = vld [vmem:[%s8459_s2 + $0x68] sm:$0xff]  }
 0x79a   : > { %v3938_v21 = vsel %vm3885_vm9, %v3781_v61, 0.0  ;;  %v7884_v61 = vld [vmem:[%s8459_s2 + $0x28] sm:$0xff]  }
 0x79b   : > { %v3939_v32 = vadd.f32 %v3938_v21, %v3937_v59  ;;  %v3586_v29 = vpop.permute.xlu1 %3585  ;;  %v4154_v46 = vsel %vm3885_vm9, %v3874_v12, 0.0 }
 0x79c   : > { %v3843_v20 = vmul.f32 %v4998_v35, %v3586_v29  ;;  %v4155_v17 = vadd.f32 %v4154_v46, %v4153_v41  ;;  %v3523_v45 = vpop.permute.xlu0 %3522  ;;  %3680 = vbcast.lane.b32.xlu1 %v7237_v22, 360  ;;  %3487 = vbcast.lane.b32.xlu0 %v8502_v52, 376  ;;  %v7858_v52 = vld [vmem:[%s8459_s2 + $0x1d8] sm:$0xff]   ;;  %v4846_v29 = vunpack.c.l.bf16 %v7884_v61 }
 0x79d   : > { %v3828_v31 = vmul.f32 %v4967_v13, %v3523_v45  ;;  %v5062_v53 = vunpack.c.l.bf16 %v7858_v52  ;;  %v7905_v45 = vld [vmem:[%s8459_s2 + $0x160] sm:$0xff]  }
 0x79e   : > { %v4082_v6 = vsel %vm3885_vm9, %v3843_v20, 0.0 }
 0x79f   : > { %v4083_v11 = vadd.f32 %v4082_v6, %v4081_v24  ;;  %v3393_v59 = vpop.permute.xlu1 %3392  ;;  %v4047_v38 = vsel %vm3885_vm9, %v3828_v31, 0.0 }
 0x7a0   : > { %v3797_v51 = vmul.f32 %v4906_v0, %v3393_v59  ;;  %v4048_v49 = vadd.f32 %v4047_v38, %v4046_v48  ;;  %v3263_v24 = vpop.permute.xlu0 %3262  ;;  %3617 = vbcast.lane.b32.xlu1 %v7229_v58, 368  ;;  %3747 = vbcast.lane.b32.xlu0 %v7247_v44, 360  ;;  %v4999_v48 = vunpack.c.h.bf16 %v7814_v42  ;;  %v8525_v0 = vmov 0  }
 0x7a1   : > { %v3766_v36 = vmul.f32 %v4843_v47, %v3263_v24  ;;  %v4329_v13 = vsel %vm4328_vm10, 1, %v8525_v0 }
 0x7a2   : > { %v3975_v18 = vsel %vm3885_vm9, %v3797_v51, 0.0  ;;  %v8527_v51 = vld [vmem:[#allocation19_spill] sm:$0xff] }
 0x7a3   : > { %v3976_v15 = vadd.f32 %v3975_v18, %v3974_v60  ;;  %v3653_v10 = vpop.permute.xlu1 %3652  ;;  %v3903_v50 = vsel %vm3885_vm9, %v3766_v36, 0.0 }
 0x7a4   : > { %v3859_v41 = vmul.f32 %v5030_v5, %v3653_v10  ;;  %v3904_v9 = vadd.f32 %v3903_v50, %v3902_v14  ;;  %v3460_v19 = vpop.permute.xlu0 %3459  ;;  %3554 = vbcast.lane.b32.xlu1 %v7219_v3, 376  ;;  %3684 = vbcast.lane.b32.xlu0 %v7237_v22, 368  ;;  %v4970_v3 = vunpack.c.l.bf16 %v7869_v37 }
 0x7a5   : > { %v3813_v60 = vmul.f32 %v4938_v25, %v3460_v19  ;;  %v7920_v25 = vld [vmem:[%s8459_s2 + $0xa8] sm:$0xff]  }
 0x7a6   : > { %v4119_v2 = vsel %vm3885_vm9, %v3859_v41, 0.0  ;;  %v5063_v41 = vunpack.c.h.bf16 %v7858_v52 }
 0x7a7   : > { %v4120_v16 = vadd.f32 %v4119_v2, %v4118_v8  ;;  %v3330_v26 = vpop.permute.xlu1 %3329  ;;  %v4012_v27 = vsel %vm3885_vm9, %v3813_v60, 0.0  ;;  %v4910_v60 = vunpack.c.l.bf16 %v7920_v25 }
 0x7a8   : > { %v3782_v55 = vmul.f32 %v4875_v62, %v3330_v26  ;;  %v4013_v33 = vadd.f32 %v4012_v27, %v4011_v56  ;;  %v3720_v42 = vpop.permute.xlu0 %3719  ;;  %3621 = vbcast.lane.b32.xlu1 %v7229_v58, 376  ;;  %3751 = vbcast.lane.b32.xlu0 %v7247_v44, 368  ;;  %v5031_v58 = vunpack.c.h.bf16 %v7836_v57  ;;  %v8528_v62 = vld [vmem:[#allocation18_spill] sm:$0xff] }
 0x7a9   : > { %v3875_v14 = vmul.f32 %v5062_v53, %v3720_v42  ;;  %v7929_v53 = vld [vmem:[%s8459_s2 + $0x1a0] sm:$0xff]  }
 0x7aa   : > { %v3940_v54 = vsel %vm3885_vm9, %v3782_v55, 0.0 }
 0x7ab   : > { %v3941_v39 = vadd.f32 %v3940_v54, %v3939_v32  ;;  %v3590_v28 = vpop.permute.xlu1 %3589  ;;  %v4156_v35 = vsel %vm3885_vm9, %v3875_v14, 0.0  ;;  %v5034_v14 = vunpack.c.l.bf16 %v7929_v53 }
 0x7ac   : > { %v3844_v8 = vmul.f32 %v4999_v48, %v3590_v28  ;;  %v4157_v34 = vadd.f32 %v4156_v35, %v4155_v17  ;;  %v3527_v23 = vpop.permute.xlu0 %3526  ;;  %3688 = vbcast.lane.b32.xlu1 %v7237_v22, 376  ;;  %3755 = vbcast.lane.b32.xlu0 %v7247_v44, 376  ;;  %v4878_v22 = vunpack.c.l.bf16 %v7895_v63  ;;  %v4939_v44 = vunpack.c.h.bf16 %v7847_v30  ;;  %v4194_v30 = vld [vmem:[%s8360_s13] sm:$0x3] }
 0x7ad   : > { %v3829_v56 = vmul.f32 %v4970_v3, %v3527_v23  ;;  %v4224_v36 = vsel %vm4222_vm11, %v4194_v30, 0  ;;  %v4971_v48 = vunpack.c.h.bf16 %v7869_v37  ;;  %v4847_v3 = vunpack.c.h.bf16 %v7884_v61  ;;  %v7938_v37 = vld [vmem:[%s8459_s2 + $0xe8] sm:$0xff]   ;;  %v7947_v61 = vld [vmem:[%s8459_s2 + $0x1e0] sm:$0xff]  }
 0x7ae   : > { %v4084_v4 = vsel %vm3885_vm9, %v3844_v8, 0.0  ;;  %5242 = vmatpush3.bf16.msra.mxu0 %v4224_v36 }
 0x7af   : > { %v4085_v40 = vadd.f32 %v4084_v4, %v4083_v11  ;;  %v3397_v21 = vpop.permute.xlu1 %3396  ;;  %v4049_v12 = vsel %vm3885_vm9, %v3829_v56, 0.0  ;;  %v4942_v56 = vunpack.c.l.bf16 %v7938_v37 }
 0x7b0   : > { %v3798_v32 = vmul.f32 %v4907_v1, %v3397_v21  ;;  %v4050_v46 = vadd.f32 %v4049_v12, %v4048_v49  ;;  %v3267_v11 = vpop.permute.xlu0 %3266  ;;  %4331 = vperm.xlu1 %5324, %v4329_v13   ;;  %807 = vrot.lane.b32.xlu0 %v8527_v51, %s8526_s17  ;;  %v5002_v49 = vunpack.c.l.bf16 %v7905_v45 }
 0x7b1   : > { %v3767_v59 = vmul.f32 %v4846_v29, %v3267_v11  ;;  %v7956_v11 = vld [vmem:[%s8459_s2 + $0x128] sm:$0xff]  }
 0x7b2   : > { %v3977_v20 = vsel %vm3885_vm9, %v3798_v32, 0.0  ;;  %v4879_v32 = vunpack.c.h.bf16 %v7895_v63  ;;  %v5066_v63 = vunpack.c.l.bf16 %v7947_v61 }
 0x7b3   : > { %v3978_v6 = vadd.f32 %v3977_v20, %v3976_v15  ;;  %v3657_v57 = vpop.permute.xlu1 %3656  ;;  %v3905_v5 = vsel %vm3885_vm9, %v3767_v59, 0.0 }
 0x7b4   : > { %v3860_v17 = vmul.f32 %v5031_v58, %v3657_v57  ;;  %v3906_v18 = vadd.f32 %v3905_v5, %v3904_v9  ;;  %v3464_v15 = vpop.permute.xlu0 %3463  ;;  %812 = vrot.lane.b32.xlu1 %v8528_v62, %s5462_s21  ;;  %v5003_v57 = vunpack.c.h.bf16 %v7905_v45  ;;  %v4974_v45 = vunpack.c.l.bf16 %v7956_v11 }
 0x7b5   : > { %v3814_v24 = vmul.f32 %v4939_v44, %v3464_v15 }
 0x7b6   : > { %v4121_v31 = vsel %vm3885_vm9, %v3860_v17, 0.0 }
 0x7b7   : > { %v4122_v47 = vadd.f32 %v4121_v31, %v4120_v16  ;;  %v3334_v38 = vpop.permute.xlu1 %3333  ;;  %v4014_v50 = vsel %vm3885_vm9, %v3814_v24, 0.0 }
 0x7b8   : > { %v3783_v10 = vmul.f32 %v4878_v22, %v3334_v38  ;;  %v4015_v9 = vadd.f32 %v4014_v50, %v4013_v33  ;;  %v3724_v19 = vpop.permute.xlu0 %3723  ;;  %v7965_v38 = vld [vmem:[%s8459_s2 + $0x30] sm:$0xff]  }
 0x7b9   : > { %v3876_v52 = vmul.f32 %v5063_v41, %v3724_v19  ;;  %v7978_v50 = vld [vmem:[%s8459_s2 + $0x70] sm:$0xff]  }
 0x7ba   : > { %v3942_v2 = vsel %vm3885_vm9, %v3783_v10, 0.0 }
 0x7bb   : > { %v3943_v16 = vadd.f32 %v3942_v2, %v3941_v39  ;;  %v3594_v26 = vpop.permute.xlu1 %3593  ;;  %v4158_v27 = vsel %vm3885_vm9, %v3876_v52, 0.0  ;;  %v4850_v2 = vunpack.c.l.bf16 %v7965_v38 }
 0x7bc   : > { %v3845_v55 = vmul.f32 %v5002_v49, %v3594_v26  ;;  %v4159_v39 = vadd.f32 %v4158_v27, %v4157_v34  ;;  %v3531_v42 = vpop.permute.xlu0 %3530 }
 0x7bd   : > { %v3830_v8 = vmul.f32 %v4971_v48, %v3531_v42 }
 0x7be   : > { %v4086_v54 = vsel %vm3885_vm9, %v3845_v55, 0.0 }
 0x7bf   : > { %v4087_v28 = vadd.f32 %v4086_v54, %v4085_v40  ;;  %v3401_v33 = vpop.permute.xlu1 %3400  ;;  %v4051_v7 = vsel %vm3885_vm9, %v3830_v8, 0.0  ;;  %v4943_v54 = vunpack.c.h.bf16 %v7938_v37 }
 0x7c0   : > { %v3799_v1 = vmul.f32 %v4910_v60, %v3401_v33  ;;  %v4052_v35 = vadd.f32 %v4051_v7, %v4050_v46  ;;  %v3271_v34 = vpop.permute.xlu0 %3270 }
 0x7c1   : > { %v3768_v23 = vmul.f32 %v4847_v3, %v3271_v34 }
 0x7c2   : > { %v3979_v43 = vsel %vm3885_vm9, %v3799_v1, 0.0 }
 0x7c3   : > { %v3980_v4 = vadd.f32 %v3979_v43, %v3978_v6  ;;  %v3661_v40 = vpop.permute.xlu1 %3660  ;;  %v3907_v29 = vsel %vm3885_vm9, %v3768_v23, 0.0 }
 0x7c4   : > { %v3861_v21 = vmul.f32 %v5034_v14, %v3661_v40  ;;  %v3908_v12 = vadd.f32 %v3907_v29, %v3906_v18  ;;  %v3468_v13 = vpop.permute.xlu0 %3467  ;;  %v4911_v18 = vunpack.c.h.bf16 %v7920_v25  ;;  %v5035_v25 = vunpack.c.h.bf16 %v7929_v53 }
 0x7c5   : > { %v3815_v46 = vmul.f32 %v4942_v56, %v3468_v13  ;;  %v4882_v53 = vunpack.c.l.bf16 %v7978_v50 }
 0x7c6   : > { %v4123_v58 = vsel %vm3885_vm9, %v3861_v21, 0.0 }
 0x7c7   : > { %v4124_v20 = vadd.f32 %v4123_v58, %v4122_v47  ;;  %v3338_v0 = vpop.permute.xlu1 %3337  ;;  %v4016_v59 = vsel %vm3885_vm9, %v3815_v46, 0.0  ;;  %v8028_v46 = vld [vmem:[%s8459_s2 + $0xb0] sm:$0xff]  }
 0x7c8   : > { %v3784_v6 = vmul.f32 %v4879_v32, %v3338_v0  ;;  %v4017_v44 = vadd.f32 %v4016_v59, %v4015_v9  ;;  %v3728_v31 = vpop.permute.xlu0 %3727  ;;  %v8048_v59 = vld [vmem:[%s8459_s2 + $0x38] sm:$0xff]  }
 0x7c9   : > { %v3877_v47 = vmul.f32 %v5066_v63, %v3728_v31  ;;  %v8038_v63 = vld [vmem:[%s8459_s2 + $0xf0] sm:$0xff]   ;;  %v5067_v31 = vunpack.c.h.bf16 %v7947_v61  ;;  %v4883_v61 = vunpack.c.h.bf16 %v7978_v50 }
 0x7ca   : > { %v3944_v17 = vsel %vm3885_vm9, %v3784_v6, 0.0  ;;  %v8023_v6 = vld [vmem:[%s8459_s2 + $0x168] sm:$0xff]  }
 0x7cb   : > { %v3945_v22 = vadd.f32 %v3944_v17, %v3943_v16  ;;  %v3598_v51 = vpop.permute.xlu1 %3597  ;;  %v4160_v49 = vsel %vm3885_vm9, %v3877_v47, 0.0  ;;  %v8043_v17 = vld [vmem:[%s8459_s2 + $0x1e8] sm:$0xff]   ;;  %v4851_v47 = vunpack.c.h.bf16 %v7965_v38  ;;  %v8073_v38 = vld [vmem:[%s8459_s2 + $0x170] sm:$0xff]  }
 0x7cc   : > { %v3846_v5 = vmul.f32 %v5003_v57, %v3598_v51  ;;  %v7971_v10 = vadd.f32 %v4160_v49, %v4159_v39  ;;  %v3535_v41 = vpop.permute.xlu0 %3534  ;;  %v8033_v57 = vld [vmem:[%s8459_s2 + $0x1a8] sm:$0xff]   ;;  %v5006_v51 = vunpack.c.l.bf16 %v8023_v6 }
 0x7cd   : > { %v3831_v62 = vmul.f32 %v4974_v45, %v3535_v41  ;;  %v8064_v45 = vld [vmem:[%s8459_s2 + $0x78] sm:$0xff]   ;;  %v5038_v49 = vunpack.c.l.bf16 %v8033_v57 }
 0x7ce   : > { %v4088_v15 = vsel %vm3885_vm9, %v3846_v5, 0.0  ;;  %v4914_v5 = vunpack.c.l.bf16 %v8028_v46  ;;  %v8078_v41 = vld [vmem:[%s8459_s2 + $0xb8] sm:$0xff]  }
 0x7cf   : > { %v7969_v30 = vadd.f32 %v4088_v15, %v4087_v28  ;;  %v3405_v24 = vpop.permute.xlu1 %3404  ;;  %v4053_v9 = vsel %vm3885_vm9, %v3831_v62, 0.0  ;;  %v4975_v15 = vunpack.c.h.bf16 %v7956_v11  ;;  %v5070_v11 = vunpack.c.l.bf16 %v8043_v17 }
 0x7d0   : > { %v3800_v36 = vmul.f32 %v4911_v18, %v3405_v24  ;;  %v7984_v19 = vadd.f32 %v4053_v9, %v4052_v35  ;;  %v3275_v52 = vpop.permute.xlu0 %3274  ;;  %v8059_v18 = vld [vmem:[%s8459_s2 + $0x130] sm:$0xff]   ;;  %v5007_v24 = vunpack.c.h.bf16 %v8023_v6  ;;  %v4915_v62 = vunpack.c.h.bf16 %v8028_v46 }
 0x7d1   : > { %v3769_v48 = vmul.f32 %v4850_v2, %v3275_v52  ;;  %v8087_v2 = vld [vmem:[%s8459_s2 + $0x1b0] sm:$0xff]   ;;  %v4886_v9 = vunpack.c.l.bf16 %v8064_v45  ;;  %v8529_v46 = vunpack.c.l.bf16 %v8059_v18 }
 0x7d2   : > { %v3981_v16 = vsel %vm3885_vm9, %v3800_v36, 0.0  ;;  %v4946_v36 = vunpack.c.l.bf16 %v8038_v63 }
 0x7d3   : > { %v7982_v26 = vadd.f32 %v3981_v16, %v3980_v4  ;;  %v3665_v55 = vpop.permute.xlu1 %3664  ;;  %v3909_v28 = vsel %vm3885_vm9, %v3769_v48, 0.0  ;;  %v8100_v48 = vld [vmem:[%s8459_s2 + $0xf8] sm:$0xff]  }
 0x7d4   : > { %v3862_v60 = vmul.f32 %v5035_v25, %v3665_v55  ;;  %v7992_v33 = vadd.f32 %v3909_v28, %v3908_v12  ;;  %v3472_v1 = vpop.permute.xlu0 %3471  ;;  %v4854_v25 = vunpack.c.l.bf16 %v8048_v59 }
 0x7d5   : > { %v3816_v14 = vmul.f32 %v4943_v54, %v3472_v1 }
 0x7d6   : > { %v4125_v27 = vsel %vm3885_vm9, %v3862_v60, 0.0 }
 0x7d7   : > { %v7990_v39 = vadd.f32 %v4125_v27, %v4124_v20  ;;  %v3342_v42 = vpop.permute.xlu1 %3341  ;;  %v4018_v43 = vsel %vm3885_vm9, %v3816_v14, 0.0  ;;  %v4855_v14 = vunpack.c.h.bf16 %v8048_v59 }
 0x7d8   : > { %v3785_v8 = vmul.f32 %v4882_v53, %v3342_v42  ;;  %v7998_v4 = vadd.f32 %v4018_v43, %v4017_v44  ;;  %v3732_v35 = vpop.permute.xlu0 %3731  ;;  %v8108_v42 = vld [vmem:[%s8459_s2 + $0x1f0] sm:$0xff]   ;;  %v8117_v43 = vld [vmem:[%s8459_s2 + $0x138] sm:$0xff]  }
 0x7d9   : > { %v3878_v1 = vmul.f32 %v5067_v31, %v3732_v35 }
 0x7da   : > { %v3946_v3 = vsel %vm3885_vm9, %v3785_v8, 0.0  ;;  %v8125_v8 = vld [vmem:[%s8459_s2 + $0x178] sm:$0xff]  }
 0x7db   : > { %v7996_v7 = vadd.f32 %v3946_v3, %v3945_v22  ;;  %v3602_v37 = vpop.permute.xlu1 %3601  ;;  %v4887_v3 = vunpack.c.h.bf16 %v8064_v45 }
 0x7dc   : > { %v8002_v34 = vpop.permute.xlu0 %3538  ;;  %v3847_v59 = vmul.f32 %v5006_v51, %v3602_v37  ;;  %v4162_v51 = vsel %vm3885_vm9, %v3878_v1, 0.0 }
 0x7df   : > { %v8000_v40 = vpop.permute.xlu1 %3408 }
 0x7e0   : > { %v3279_v23 = vpop.permute.xlu0 %3278  ;;  %v3801_v31 = vmul.f32 %v4914_v5, %v8000_v40  ;;  %v4163_v5 = vadd.f32 %v4162_v51, %v7971_v10 }
 0x7e1   : > { %v3770_v53 = vmul.f32 %v4851_v47, %v3279_v23 }
 0x7e3   : > { %v8004_v21 = vpop.permute.xlu1 %3668  ;;  %v3911_v27 = vsel %vm3885_vm9, %v3770_v53, 0.0  ;;  %v4090_v53 = vsel %vm3885_vm9, %v3847_v59, 0.0 }
 0x7e4   : > { %v8008_v56 = vpop.permute.xlu0 %3475  ;;  %v4091_v40 = vadd.f32 %v4090_v53, %v7969_v30  ;;  %v3983_v30 = vsel %vm3885_vm9, %v3801_v31, 0.0 }
 0x7e5   : > { %v3817_v37 = vmul.f32 %v4946_v36, %v8008_v56  ;;  %v3984_v31 = vadd.f32 %v3983_v30, %v7982_v26  ;;  %v8535_v30 = vunpack.c.h.bf16 %v8043_v17 }
 0x7e7   : > { %v8006_v32 = vpop.permute.xlu1 %3345 }
 0x7e8   : > { %v8012_v29 = vpop.permute.xlu0 %3735  ;;  %v3786_v54 = vmul.f32 %v4883_v61, %v8006_v32  ;;  %v8149_v32 = vld [vmem:[%s8459_s2 + $0x1f8] sm:$0xff]  }
 0x7e9   : > { %v5078_v59 = vunpack.c.l.bf16 %v8149_v32  ;;  %v5079_v1 = vunpack.c.h.bf16 %v8149_v32  ;;  %v3879_v10 = vmul.f32 %v5070_v11, %v8012_v29 }
 0x7ea   : > { %v3948_v50 = vsel %vm3885_vm9, %v3786_v54, 0.0  ;;  %v4020_v54 = vsel %vm3885_vm9, %v3817_v37, 0.0 }
 0x7eb   : > { %v8010_v58 = vpop.permute.xlu1 %3605 }
 0x7ec   : > { %v8016_v12 = vpop.permute.xlu0 %3542 }
 0x7ef   : > { %v8014_v20 = vpop.permute.xlu1 %3412 }
 0x7f0   : > { %v3283_v13 = vpop.permute.xlu0 %3282  ;;  %v3802_v56 = vmul.f32 %v4915_v62, %v8014_v20  ;;  %v3833_v62 = vmul.f32 %v8529_v46, %v8016_v12 }
 0x7f1   : > { %v3771_v23 = vmul.f32 %v4854_v25, %v3283_v13  ;;  %v8134_v25 = vld [vmem:[%s8459_s2 + $0x1b8] sm:$0xff]   ;;  %v3912_v13 = vadd.f32 %v3911_v27, %v7992_v33  ;;  %v3848_v33 = vmul.f32 %v5007_v24, %v8010_v58  ;;  %v8530_v27 = vunpack.c.l.bf16 %v8078_v41 }
 0x7f3   : > { %v8018_v0 = vpop.permute.xlu1 %3672  ;;  %v3913_v55 = vsel %vm3885_vm9, %v3771_v23, 0.0  ;;  %v4092_v20 = vsel %vm3885_vm9, %v3848_v33, 0.0 }
 0x7f4   : > { %v8050_v44 = vpop.permute.xlu0 %3479  ;;  %v3914_v61 = vadd.f32 %v3913_v55, %v3912_v13  ;;  %v4093_v53 = vadd.f32 %v4092_v20, %v4091_v40 }
 0x7f7   : > { %v3350_v22 = vpop.permute.xlu1 %3349 }
 0x7f8   : > { %v8095_v60 = vpop.permute.xlu0 %3739  ;;  %v3787_v28 = vmul.f32 %v4886_v9, %v3350_v22  ;;  %v3832_v22 = vmul.f32 %v4975_v15, %v8002_v34  ;;  %v3863_v9 = vmul.f32 %v5038_v49, %v8004_v21  ;;  %v3949_v15 = vadd.f32 %v3948_v50, %v7996_v7 }
 0x7fa   : > { %v3950_v34 = vsel %vm3885_vm9, %v3787_v28, 0.0  ;;  %v4055_v6 = vsel %vm3885_vm9, %v3832_v22, 0.0  ;;  %v4127_v58 = vsel %vm3885_vm9, %v3863_v9, 0.0 }
 0x7fb   : > { %v8093_v52 = vpop.permute.xlu1 %3609  ;;  %v3951_v7 = vadd.f32 %v3950_v34, %v3949_v15  ;;  %v4128_v12 = vadd.f32 %v4127_v58, %v7990_v39  ;;  %v8537_v58 = vunpack.c.h.bf16 %v8078_v41 }
 0x7fc   : > { %v8127_v16 = vpop.permute.xlu0 %3546 }
 0x7ff   : > { %v3417_v45 = vpop.permute.xlu1 %3416 }
 0x800   : > { %v3287_v23 = vpop.permute.xlu0 %3286  ;;  %v3803_v28 = vmul.f32 %v8530_v27, %v3417_v45  ;;  %v4021_v45 = vadd.f32 %v4020_v54, %v7998_v4  ;;  %v8533_v4 = vunpack.c.l.bf16 %v8100_v48 }
 0x801   : > { %v3772_v47 = vmul.f32 %v4855_v14, %v3287_v23  ;;  %v4164_v23 = vsel %vm3885_vm9, %v3879_v10, 0.0 }
 0x802   : > { %v3987_v26 = vsel %vm3885_vm9, %v3803_v28, 0.0  ;;  %v4165_v20 = vadd.f32 %v4164_v23, %v4163_v5 }
 0x803   : > { %v3677_v35 = vpop.permute.xlu1 %3676  ;;  %v3915_v21 = vsel %vm3885_vm9, %v3772_v47, 0.0  ;;  %v8531_v47 = vunpack.c.h.bf16 %v8038_v63  ;;  %v4057_v63 = vsel %vm3885_vm9, %v3833_v62, 0.0 }
 0x804   : > { %v3916_v49 = vadd.f32 %v3915_v21, %v3914_v61  ;;  %v3484_v55 = vpop.permute.xlu0 %3483  ;;  %v4056_v61 = vadd.f32 %v4055_v6, %v7984_v19 }
 0x805   : > { %v3818_v13 = vmul.f32 %v8531_v47, %v8050_v44  ;;  %v8532_v44 = vunpack.c.h.bf16 %v8033_v57  ;;  %v3819_v40 = vmul.f32 %v8533_v4, %v3484_v55  ;;  %v3880_v57 = vmul.f32 %v8535_v30, %v8095_v60 }
 0x806   : > { %v3917_v50 = vrot.slane %v3916_v49, 4  ;;  %v8538_v55 = vunpack.c.l.bf16 %v8087_v2  ;;  %v4058_v46 = vadd.f32 %v4057_v63, %v4056_v61  ;;  %v8540_v61 = vunpack.c.h.bf16 %v8073_v38 }
 0x807   : > { %v3354_v36 = vpop.permute.xlu1 %3353  ;;  %v3864_v34 = vmul.f32 %v8532_v44, %v8018_v0  ;;  %v4022_v19 = vsel %vm3885_vm9, %v3818_v13, 0.0  ;;  %v8536_v0 = vunpack.c.h.bf16 %v8059_v18  ;;  %v4024_v18 = vsel %vm3885_vm9, %v3819_v40, 0.0 }
 0x808   : > { %v3788_v24 = vmul.f32 %v4887_v3, %v3354_v36  ;;  %v3985_v3 = vsel %vm3885_vm9, %v3802_v56, 0.0  ;;  %v3918_v29 = vadd.f32 %v3917_v50, %v3916_v49  ;;  %v3744_v51 = vpop.permute.xlu0 %3743  ;;  %v8534_v49 = vunpack.c.l.bf16 %v8073_v38 }
 0x809   : > { %v3986_v33 = vadd.f32 %v3985_v3, %v3984_v31  ;;  %v3834_v6 = vmul.f32 %v8536_v0, %v8127_v16  ;;  %v3865_v10 = vmul.f32 %v8538_v55, %v3677_v35  ;;  %v4023_v28 = vadd.f32 %v4022_v19, %v4021_v45 }
 0x80a   : > { %v3952_v14 = vsel %vm3885_vm9, %v3788_v24, 0.0  ;;  %v3919_v22 = vrot.slane %v3918_v29, 2  ;;  %v3849_v36 = vmul.f32 %v8534_v49, %v8093_v52  ;;  %v4129_v52 = vsel %vm3885_vm9, %v3864_v34, 0.0 }
 0x80b   : > { %v3953_v11 = vadd.f32 %v3952_v14, %v3951_v7  ;;  %v3614_v37 = vpop.permute.xlu1 %3613  ;;  %v3988_v54 = vadd.f32 %v3987_v26, %v3986_v33  ;;  %v4166_v35 = vsel %vm3885_vm9, %v3880_v57, 0.0  ;;  %v8539_v3 = vunpack.c.h.bf16 %v8100_v48 }
 0x80c   : > { %v3920_v21 = vadd.f32 %v3919_v22, %v3918_v29  ;;  %v3551_v56 = vpop.permute.xlu0 %3550  ;;  %v4094_v14 = vsel %vm3885_vm9, %v3849_v36, 0.0  ;;  %v4059_v47 = vsel %vm3885_vm9, %v3834_v6, 0.0  ;;  %v4131_v13 = vsel %vm3885_vm9, %v3865_v10, 0.0 }
 0x80d   : > { %v3954_v9 = vrot.slane %v3953_v11, 4  ;;  %v4025_v31 = vadd.f32 %v4024_v18, %v4023_v28  ;;  %v3850_v23 = vmul.f32 %v8540_v61, %v3614_v37  ;;  %v8541_v22 = vunpack.c.l.bf16 %v8117_v43 }
 0x80e   : > { %v3921_v7 = vrot.slane %v3920_v21, 1  ;;  %v4130_v33 = vadd.f32 %v4129_v52, %v4128_v12  ;;  %v4095_v19 = vadd.f32 %v4094_v14, %v4093_v53  ;;  %v8543_v30 = vunpack.c.l.bf16 %v8125_v8 }
 0x80f   : > { %v3955_v39 = vadd.f32 %v3954_v9, %v3953_v11  ;;  %v3421_v15 = vpop.permute.xlu1 %3420  ;;  %v3835_v45 = vmul.f32 %v8541_v22, %v3551_v56  ;;  %v4096_v56 = vsel %vm3885_vm9, %v3850_v23, 0.0 }
 0x810   : > { %v3804_v24 = vmul.f32 %v8537_v58, %v3421_v15  ;;  %v3922_v60 = vadd.f32 %v3921_v7, %v3920_v21  ;;  %v3488_v41 = vpop.permute.xlu0 %3487  ;;  %v4167_v21 = vadd.f32 %v4166_v35, %v4165_v20  ;;  %v4060_v15 = vadd.f32 %v4059_v47, %v4058_v46 }
 0x811   : > { %v3956_v50 = vrot.slane %v3955_v39, 2  ;;  %v3820_v5 = vmul.f32 %v8539_v3, %v3488_v41  ;;  %v4132_v38 = vadd.f32 %v4131_v13, %v4130_v33  ;;  %v4061_v36 = vsel %vm3885_vm9, %v3835_v45, 0.0 }
 0x812   : > { %v3989_v17 = vsel %vm3885_vm9, %v3804_v24, 0.0  ;;  %v4186_v63 = vpack.c.bf16 %v3922_v60, %v3922_v60  ;;  %v8544_v58 = vunpack.c.h.bf16 %v8087_v2  ;;  %v8545_v7 = vunpack.c.h.bf16 %v8108_v42 }
 0x813   : > { %v3957_v62 = vadd.f32 %v3956_v50, %v3955_v39  ;;  %v3990_v16 = vadd.f32 %v3989_v17, %v3988_v54  ;;  %v3681_v27 = vpop.permute.xlu1 %3680  ;;  %v4026_v9 = vsel %vm3885_vm9, %v3820_v5, 0.0  ;;  %v8542_v39 = vunpack.c.l.bf16 %v8108_v42 }
 0x814   : > { %v3748_v26 = vpop.permute.xlu0 %3747  ;;  %v4027_v40 = vadd.f32 %v4026_v9, %v4025_v31  ;;  %v4203_v0 = vunpack.c.l.b16 %v4186_v63  ;;  %v3866_v24 = vmul.f32 %v8544_v58, %v3681_v27  ;;  %v8546_v20 = vunpack.c.h.bf16 %v8117_v43 }
 0x815   : > { %v3958_v29 = vrot.slane %v3957_v62, 1  ;;  %v3991_v11 = vrot.slane %v3990_v16, 4  ;;  %v3881_v4 = vmul.f32 %v8542_v39, %v3744_v51  ;;  %v3882_v50 = vmul.f32 %v8545_v7, %v3748_v26 }
 0x816   : > { %v4028_v12 = vrot.slane %v4027_v40, 4  ;;  %v4062_v60 = vadd.f32 %v4061_v36, %v4060_v15  ;;  %v4097_v2 = vadd.f32 %v4096_v56, %v4095_v19  ;;  %v4133_v42 = vsel %vm3885_vm9, %v3866_v24, 0.0 }
 0x817   : > { %v3959_v44 = vadd.f32 %v3958_v29, %v3957_v62  ;;  %v3992_v48 = vadd.f32 %v3991_v11, %v3990_v16  ;;  %v3618_v34 = vpop.permute.xlu1 %3617  ;;  %v4168_v55 = vsel %vm3885_vm9, %v3881_v4, 0.0  ;;  %v8548_v62 = vunpack.c.l.bf16 %v8134_v25 }
 0x818   : > { %v3851_v57 = vmul.f32 %v8543_v30, %v3618_v34  ;;  %v3685_v54 = vpop.permute.xlu0 %3684  ;;  %v4029_v10 = vadd.f32 %v4028_v12, %v4027_v40  ;;  %v4169_v28 = vadd.f32 %v4168_v55, %v4167_v21  ;;  %v4170_v47 = vsel %vm3885_vm9, %v3882_v50, 0.0 }
 0x819   : > { %v4187_v37 = vpack.c.bf16 %v3959_v44, %v3959_v44  ;;  %v3993_v49 = vrot.slane %v3992_v48, 2  ;;  %v3867_v18 = vmul.f32 %v8548_v62, %v3685_v54  ;;  %v8549_v13 = vunpack.c.h.bf16 %v8125_v8 }
 0x81a   : > { %v4030_v16 = vrot.slane %v4029_v10, 2  ;;  %v4098_v27 = vsel %vm3885_vm9, %v3851_v57, 0.0  ;;  %v4134_v45 = vadd.f32 %v4133_v42, %v4132_v38 }
 0x81b   : > { %v4204_v6 = vunpack.c.l.b16 %v4187_v37  ;;  %v3994_v53 = vadd.f32 %v3993_v49, %v3992_v48  ;;  %v3555_v51 = vpop.permute.xlu1 %3554  ;;  %v4099_v61 = vadd.f32 %v4098_v27, %v4097_v2  ;;  %v4135_v22 = vsel %vm3885_vm9, %v3867_v18, 0.0 }
 0x81c   : > { %v3836_v46 = vmul.f32 %v8546_v20, %v3555_v51  ;;  %v3752_v3 = vpop.permute.xlu0 %3751  ;;  %v4031_v5 = vadd.f32 %v4030_v16, %v4029_v10  ;;  %v4171_v48 = vadd.f32 %v4170_v47, %v4169_v28  ;;  %v4136_v39 = vadd.f32 %v4135_v22, %v4134_v45 }
 0x81d   : > { %v4211_v52 = vsel %vm8547_vm12, %v4204_v6, %v4203_v0  ;;  %v3995_v17 = vrot.slane %v3994_v53, 1  ;;  %v3883_v11 = vmul.f32 %v5078_v59, %v3752_v3  ;;  %v8550_v59 = vunpack.c.h.bf16 %v8134_v25 }
 0x81e   : > { %v4063_v41 = vsel %vm3885_vm9, %v3836_v46, 0.0  ;;  %v4032_v9 = vrot.slane %v4031_v5, 1 }
 0x81f   : > { %v3996_v14 = vadd.f32 %v3995_v17, %v3994_v53  ;;  %v4064_v35 = vadd.f32 %v4063_v41, %v4062_v60  ;;  %v3622_v43 = vpop.permute.xlu1 %3621  ;;  %v4172_v63 = vsel %vm3885_vm9, %v3883_v11, 0.0 }
 0x820   : > { %v3852_v29 = vmul.f32 %v8549_v13, %v3622_v43  ;;  %v3756_v19 = vpop.permute.xlu0 %3755  ;;  %v4033_v21 = vadd.f32 %v4032_v9, %v4031_v5  ;;  %v4173_v49 = vadd.f32 %v4172_v63, %v4171_v48  ;;  %v8555_v43 = vld [vmem:[#allocation24_spill] sm:$0xff]  ;;  %v4560_v9 = vld [vmem:[%s8361_s14] ss:$0 sm:$0xff] }
 0x821   : > { %v4188_v31 = vpack.c.bf16 %v3996_v14, %v3996_v14  ;;  %v4065_v23 = vrot.slane %v4064_v35, 4  ;;  %v3884_v40 = vmul.f32 %v5079_v1, %v3756_v19 }
 0x822   : > { %v4100_v33 = vsel %vm3885_vm9, %v3852_v29, 0.0  ;;  %v4189_v56 = vpack.c.bf16 %v4033_v21, %v4033_v21 }
 0x823   : > { %v4205_v44 = vunpack.c.l.b16 %v4188_v31  ;;  %v4066_v34 = vadd.f32 %v4065_v23, %v4064_v35  ;;  %v4101_v26 = vadd.f32 %v4100_v33, %v4099_v61  ;;  %v3689_v8 = vpop.permute.xlu1 %3688  ;;  %v4174_v12 = vsel %vm3885_vm9, %v3884_v40, 0.0  ;;  %v8557_v33 = vld [vmem:[#allocation22_spill] sm:$0xff] }
 0x824   : > { %v3868_v4 = vmul.f32 %v8550_v59, %v3689_v8  ;;  %v4175_v6 = vadd.f32 %v4174_v12, %v4173_v49  ;;  %v808_v53 = vpop.permute.xlu0 %807  ;;  %v4206_v25 = vunpack.c.l.b16 %v4189_v56 }
 0x825   : > { %v4212_v15 = vsel %vm8551_vm13, %v4205_v44, %v4211_v52  ;;  %v4067_v38 = vrot.slane %v4066_v34, 2  ;;  %v4102_v37 = vrot.slane %v4101_v26, 4  ;;  %810 = vst.msk [vmem:[#allocation2] sm:$0xff] %vm8552_vm14, %v808_v53 }
 0x826   : > { %v4137_v36 = vsel %vm3885_vm9, %v3868_v4, 0.0  ;;  %v4176_v24 = vrot.slane %v4175_v6, 4  ;;  %v4213_v51 = vsel %vm8553_vm15, %v4206_v25, %v4212_v15 }
 0x827   : > { %v4068_v30 = vadd.f32 %v4067_v38, %v4066_v34  ;;  %v4103_v57 = vadd.f32 %v4102_v37, %v4101_v26  ;;  %v4138_v0 = vadd.f32 %v4137_v36, %v4136_v39 }
 0x828   : > { %v4177_v7 = vadd.f32 %v4176_v24, %v4175_v6 }
 0x829   : > { %v4069_v32 = vrot.slane %v4068_v30, 1  ;;  %v4104_v1 = vrot.slane %v4103_v57, 2  ;;  %v4139_v58 = vrot.slane %v4138_v0, 4 }
 0x82a   : > { %v4178_v52 = vrot.slane %v4177_v7, 2 }
 0x82b   : > { %v4070_v54 = vadd.f32 %v4069_v32, %v4068_v30  ;;  %v4105_v55 = vadd.f32 %v4104_v1, %v4103_v57  ;;  %v4140_v10 = vadd.f32 %v4139_v58, %v4138_v0  ;;  %v4332_v2 = vpop.permute.xlu1 %4331 }
 0x82c   : > { %v4179_v18 = vadd.f32 %v4178_v52, %v4177_v7  ;;  %vm4333_vm1 = vcmp.eq.s32.totalorder %v4332_v2, 1 }
 0x82d   : > { %v4190_v50 = vpack.c.bf16 %v4070_v54, %v4070_v54  ;;  %v4106_v20 = vrot.slane %v4105_v55, 1  ;;  %v4141_v46 = vrot.slane %v4140_v10, 2  ;;  %v4336_v3 = vsel %vm4333_vm1, %v8555_v43, 0.0 }
 0x82e   : > { %v4180_v28 = vrot.slane %v4179_v18, 1  ;;  %4337 = vst [vmem:[%s5623_s22] sm:$0xff] %v4336_v3 }
 0x82f   : > { %v4207_v17 = vunpack.c.l.b16 %v4190_v50  ;;  %v4107_v60 = vadd.f32 %v4106_v20, %v4105_v55  ;;  %v4142_v62 = vadd.f32 %v4141_v46, %v4140_v10  ;;  %v813_v5 = vpop.permute.xlu1 %812 }
 0x830   : > { %v4181_v35 = vadd.f32 %v4180_v28, %v4179_v18  ;;  %815 = vst.msk [vmem:[#allocation3] sm:$0xff] %vm8556_vm2, %v813_v5 }
 0x831   : > { %v4214_v16 = vsel %vm8554_vm0, %v4207_v17, %v4213_v51  ;;  %v4191_v27 = vpack.c.bf16 %v4107_v60, %v4107_v60  ;;  %v4143_v41 = vrot.slane %v4142_v62, 1 }
 0x832   : > { %v4193_v29 = vpack.c.bf16 %v4181_v35, %v4181_v35 }
 0x833   : > { %v4208_v14 = vunpack.c.l.b16 %v4191_v27  ;;  %v4144_v42 = vadd.f32 %v4143_v41, %v4142_v62 }
 0x834   : > { %v4210_v31 = vunpack.c.l.b16 %v4193_v29 }
 0x835   : > { %v4215_v47 = vsel %vm2948_vm5, %v4208_v14, %v4214_v16  ;;  %v4192_v13 = vpack.c.bf16 %v4144_v42, %v4144_v42 }
 0x837   : > { %v4209_v11 = vunpack.c.l.b16 %v4192_v13 }
 0x839   : > { %v4216_v61 = vsel %vm2950_vm6, %v4209_v11, %v4215_v47 }
 0x83a   : > { %v4217_v23 = vsel %vm2952_vm7, %v4210_v31, %v4216_v61 }
 0x83b   : > { %v4218_v22 = vpack.c.b16 %v4217_v23, %v4217_v23 }
 0x83d   : > { %5244 = vmatmul.mubr.msk.bf16.vlgmr.msra.gmra.mxu0 %vm3885_vm9, %v4218_v22 }
 0x8fd   : > { %v4260_v45 = vpop.f32.mrf.mxu0 }
 0x8fe   : > { %v4313_v63 = vadd.f32 %v8557_v33, %v4260_v45 }
 0x8ff   : > { %v5245_v44 = vpop.f32.mrf.mxu0 }
 0x900   : > { %v4325_v48 = vadd.f32 %v4560_v9, %v4313_v63 }
 0x901   : > { %v4263_v34 = vpop.f32.mrf.mxu0 }
 0x902   : > { %v4334_v26 = vsel %vm4333_vm1, %v4325_v48, 0.0 }
 0x903   : > { %4335 = vst [vmem:[%s5621_s28] sm:$0xff] %v4334_v26  ;;  %v5246_v8 = vpop.f32.mrf.mxu0 }
 0x904 PF: > { %p4561_p2 = scmp.lt.s32.totalorder %s5445_s29, %s5626_s25 }
 0x906   : > { %4341 = sbr.rel (%p4561_p2) target bundleno = 2317 (0x90d), region = 88 }
 0x90b   : > { %v5463_v19 = vmov 0.0  }
 0x90c   : > { %4342 = vst [vmem:[%s5621_s28] sm:$0xff] %v5463_v19  ;;  %4343 = vst [vmem:[%s5623_s22] sm:$0xff] %v5463_v19 }
 0x90d PF: > { %s8395_s3 = sshll.u32 %s5445_s29, 7  ;;  %s4364_s23 = sshll.u32 %s5621_s28, 4  ;;  %s4365_s23 = int_to_ptr.vmem [resolvable:$true] %s4364_s23 }
 0x90e   : > { %s4362_s11 = scalar_lea.hbm %s8362_s15, %s8395_s3  ;;  %s4345_s25 = scalar_lea.sflag [#allocation8], %s5613_s24 }
 0x90f   : > { %s5347_s30 = scalar_lea.vmem %s4365_s23, 128  ;;  %s5464_s17 = smov [#allocation7]  }
 0x910   : > { %p5348_p3 = scmp.ne.s32.totalorder %s4365_s23, %s5347_s30  ;;  %s5351_s18 = sshll.u32 %s5464_s17, 4  ;;  %s5352_s18 = int_to_ptr.vmem [resolvable:$false] %s5351_s18 }
 0x911   : > { %s5353_s1 = scalar_lea.vmem %s5352_s18, 256  ;;  %p5354_p7 = scmp.lt.s32.totalorder %s4365_s23, %s5352_s18 }
 0x912   : > { %p5349_p5 = pnand %p5348_p3, %p5597_p4  ;;  %p5355_p9 = scmp.lt.s32.totalorder %s5353_s1, %s5347_s30 }
 0x914   : > { %p5350_p6 = pneg %p5349_p5  ;;  %p5356_p10 = por %p5355_p9, %p5354_p7 }
 0x916   : > { %p5357_p11 = pnand %p5356_p10, %p5350_p6 }
 0x918   : > { %5360 = shalt.err (!%p5357_p11)
}
 0x919   : > { %s5361_s21 = scalar_lea.hbm %s4362_s11, 128  ;;  %s5365_s19 = scalar_lea.hbm %s8362_s15, 896 }
 0x91a   : > { %p5362_p12 = scmp.ne.s32.totalorder %s4362_s11, %s5361_s21  ;;  %p5366_p1 = scmp.lt.s32.totalorder %s4362_s11, %s8362_s15 }
 0x91b   : > { %p5367_p2 = scmp.lt.s32.totalorder %s5365_s19, %s5361_s21 }
 0x91c   : > { %p5363_p13 = pnand %p5362_p12, %p5597_p4 }
 0x91d   : > { %p5368_p3 = por %p5367_p2, %p5366_p1 }
 0x91e   : > { %p5364_p0 = pneg %p5363_p13 }
 0x920   : > { %p5369_p5 = pnand %p5368_p3, %p5364_p0 }
 0x922   : > { %5372 = shalt.err (!%p5369_p5)
}
 0x923   : > { %5255 = dma.vmem_to_hbm [thread:$0]  (%p5597_p4), %s4365_s23, 128, %s4362_s11, %s4345_s25  }
 0x924   : > { %s8558_s30 = sshll.u32 %s5445_s29, 7  ;;  %s4378_s28 = sshll.u32 %s5623_s22, 4  ;;  %s4379_s28 = int_to_ptr.vmem [resolvable:$true] %s4378_s28 }
 0x925   : > { %s4376_s1 = scalar_lea.hbm %s8363_s16, %s8558_s30  ;;  %s4350_s2 = scalar_lea.sflag [#allocation10], %s5613_s24 }
 0x926   : > { %s5373_s3 = scalar_lea.vmem %s4379_s28, 128  ;;  %s5465_s21 = smov [#allocation9]  }
 0x927   : > { %p5374_p6 = scmp.ne.s32.totalorder %s4379_s28, %s5373_s3  ;;  %s5377_s5 = sshll.u32 %s5465_s21, 4  ;;  %s5378_s5 = int_to_ptr.vmem [resolvable:$false] %s5377_s5 }
 0x928   : > { %s5379_s19 = scalar_lea.vmem %s5378_s5, 256  ;;  %p5380_p10 = scmp.lt.s32.totalorder %s4379_s28, %s5378_s5 }
 0x929   : > { %p5375_p7 = pnand %p5374_p6, %p5597_p4  ;;  %p5381_p11 = scmp.lt.s32.totalorder %s5379_s19, %s5373_s3 }
 0x92b   : > { %p5376_p9 = pneg %p5375_p7  ;;  %p5382_p12 = por %p5381_p11, %p5380_p10 }
 0x92d   : > { %p5383_p13 = pnand %p5382_p12, %p5376_p9 }
 0x92f   : > { %5386 = shalt.err (!%p5383_p13)
}
 0x930   : > { %s5387_s29 = scalar_lea.hbm %s4376_s1, 128  ;;  %s5391_s11 = scalar_lea.hbm %s8363_s16, 896 }
 0x931   : > { %p5388_p0 = scmp.ne.s32.totalorder %s4376_s1, %s5387_s29  ;;  %p5392_p3 = scmp.lt.s32.totalorder %s4376_s1, %s8363_s16 }
 0x932   : > { %p5393_p5 = scmp.lt.s32.totalorder %s5391_s11, %s5387_s29 }
 0x933   : > { %p5389_p1 = pnand %p5388_p0, %p5597_p4 }
 0x934   : > { %p5394_p6 = por %p5393_p5, %p5392_p3 }
 0x935   : > { %p5390_p2 = pneg %p5389_p1 }
 0x937   : > { %p5395_p7 = pnand %p5394_p6, %p5390_p2 }
 0x939   : > { %5398 = shalt.err (!%p5395_p7)
}
 0x93a   : > { %5256 = dma.vmem_to_hbm [thread:$0]  (%p5597_p4), %s4379_s28, 128, %s4376_s1, %s4350_s2  }
 0x93b PF: > { %p5266_p9 = scmp.ge.s32.totalorder %s5453_s0, 2  ;;  %s4390_s17 = sand.u32 1, %s5433_s26  }
 0x93c   : > { %s4391_s18 = scalar_lea.sflag [#allocation8], %s4390_s17 }
 0x93d   : > { %p5260_p10 = pnand %p5266_p9, %p5604_p8 }
 0x93f   : > { %p5261_p11 = pneg %p5260_p10 }
 0x941   : > { %5424 = dma.done.wait (%p5261_p11), %s4391_s18, 128  }
 0x942   : > { %5426 = vsyncadd (%p5261_p11), %s4391_s18, 4294967168  ;;  %s4400_s3 = scalar_lea.sflag [#allocation10], %s4390_s17 }
 0x943   : > { %5428 = dma.done.wait (%p5261_p11), %s4400_s3, 128  }
 0x944   : > { %5430 = vsyncadd (%p5261_p11), %s4400_s3, 4294967168  ;;  %s36_s0 = sadd.s32 1, %s5453_s0   ;;  %s8560_s20 = sld [smem:[#allocation13_spill]] }
 0x945   : > { %p33_p12 = scmp.ge.s32.totalorder %s36_s0, 9   ;;  %s8561_s28 = sld [smem:[#allocation17_spill]] }
 0x946   : > { %s8562_s29 = sld [smem:[#allocation14_spill]]  ;;  %s8564_s26 = smov %s5437_s27 }
 0x947   : > { %s8563_s30 = sld [smem:[#allocation15_spill]]  ;;  %35 = sbr.rel (!%p33_p12) target bundleno = 19 (0x13), region = 149 }
 0x94a   : > { %s8565_s27 = smov %s8560_s20 }
 0x94c   :  { %4405 = vsyncpa [#allocation8], 1 }
 0x94d   :  { %4407 = vsyncpa [#allocation8 + $0x1], 1 }
 0x94e   :  { %4408 = vsyncpa [#allocation10], 1 }
 0x94f   :  { %4410 = vsyncpa [#allocation10 + $0x1], 1 }

</bundles_post_ra>
